<compile_context>
chip_gen: v6e
topology: v6e:2x2x1
jax: 0.10.0
libtpu: 0.0.40
codegen_flags: <defaults>
</compile_context>

<pallas_src>
import functools
import math

import jax
import jax.numpy as jnp
from jax.experimental import pallas as pl
from jax.experimental.pallas import tpu as pltpu

KERNEL_SET = (2, 3, 5, 7)
KERNEL_SIZE = max(KERNEL_SET)
ALPHA = 0.05          # mixprop alpha
GDEP = 2              # mixprop depth (refolded analytically below; must stay 2)
BN_EPS = 1e-5
LANES = 128


# ------------------------------ configuration -------------------------------
def _rf(n_layers, q):
    if q > 1:
        return int(1 + (KERNEL_SIZE - 1) * (q ** n_layers - 1) / (q - 1))
    return n_layers * (KERNEL_SIZE - 1) + 1


def build_config(feature_dim, seq_length, n_layers, hidden_dim, dilation_exp=2):
    receptive_field = _rf(n_layers, dilation_exp)
    while receptive_field > seq_length:
        n_layers -= 1
        receptive_field = _rf(n_layers, dilation_exp)
    assert receptive_field <= seq_length
    t_lens = [seq_length - _rf(i, dilation_exp) + 1 for i in range(1, n_layers + 1)]
    dils = [dilation_exp ** (i - 1) for i in range(1, n_layers + 1)]
    return dict(feature_dim=feature_dim, seq_length=seq_length, n_layers=n_layers,
                hidden_dim=hidden_dim, dilation_exp=dilation_exp,
                receptive_field=receptive_field, total_t_len=seq_length,
                t_lens=t_lens, dilations=dils)


def init_params(cfg, key):
    H = cfg['hidden_dim']
    T = cfg['total_t_len']
    assert H % len(KERNEL_SET) == 0
    keys = iter(jax.random.split(key, 16 + 24 * max(cfg['n_layers'], 1)))

    def p(shape, scale=0.1):
        return scale * jax.random.normal(next(keys), shape, jnp.float32)

    params = dict(
        start_w=p((H, 1)), start_b=p((H,)),
        skip0_w=p((H, H, T)), skip0_b=p((H,)),
        skipE_w=p((H, H, T - cfg['receptive_field'] + 1)), skipE_b=p((H,)),
        layers=[])
    for i in range(cfg['n_layers']):
        t_len = cfg['t_lens'][i]
        params['layers'].append(dict(
            tconv=[dict(w=p((H // len(KERNEL_SET), H, k)), b=p((H // len(KERNEL_SET),)))
                   for k in KERNEL_SET],
            skip_w=p((H, H, t_len)), skip_b=p((H,)),
            gc_w=p((H, 3 * H, 1)), gc_b=p((H,)),
            bn_gamma=1.0 + p((H,)), bn_beta=p((H,)),
            bn_mean=p((H,)), bn_var=1.0 + jnp.abs(p((H,)))))
    return params


# --------------------- one-time weight preprocessing (hoisted) ---------------------
def prepare_params(params, cfg, mxu_dtype=jnp.bfloat16):
    """Fold / pack / pre-cast all weights once, outside the hot forward."""
    H = cfg['hidden_dim']
    cb = H // len(KERNEL_SET)

    # skip0 folded through the linear 1x1 start conv (Cin=1).
    sw = params['start_w'][:, 0]
    w0 = jnp.einsum('oct,c->ot', params['skip0_w'], sw)
    b0 = jnp.einsum('oct,c->o', params['skip0_w'], params['start_b']) + params['skip0_b']

    prepped = dict(
        start_w=params['start_w'].astype(jnp.float32),
        start_b=params['start_b'].reshape(H, 1).astype(jnp.float32),
        w0=w0.astype(mxu_dtype),
        b0=b0.reshape(H, 1).astype(jnp.float32),
        layers=[])

    for i in range(cfg['n_layers']):
        layer = params['layers'][i]
        # pack the 4 dilated-inception branches tap-major into (7, H, H); taps of the
        # shorter kernels occupy the trailing positions (crop-and-concat semantics).
        wp = jnp.zeros((KERNEL_SIZE, H, H), jnp.float32)
        biases = []
        for bi, (k, pw) in enumerate(zip(KERNEL_SET, layer['tconv'])):
            w = jnp.transpose(pw['w'], (2, 0, 1))                    # (k, cb, H)
            wp = wp.at[KERNEL_SIZE - k:, bi * cb:(bi + 1) * cb, :].set(w)
            biases.append(pw['b'])
        bp = jnp.concatenate(biases)

        # per-output-time-step skip conv weights: (t_len, H, H).
        skw = jnp.transpose(layer['skip_w'], (2, 0, 1))

        # eval-BN fold + mix-hop/mlp refold:  z = W0' y + P(W1' y + P(W2' y)).
        scale = layer['bn_gamma'] / jnp.sqrt(layer['bn_var'] + BN_EPS)
        shift = layer['bn_beta'] - layer['bn_mean'] * scale
        wm = scale[:, None] * layer['gc_w'][:, :, 0]                 # (H, 3H)
        bm = scale * layer['gc_b'] + shift
        wx, wh1, wh2 = wm[:, :H], wm[:, H:2 * H], wm[:, 2 * H:]
        wm0 = wx + ALPHA * (wh1 + wh2)
        wm1 = (1.0 - ALPHA) * (wh1 + ALPHA * wh2)
        wm2 = (1.0 - ALPHA) ** 2 * wh2

        prepped['layers'].append(dict(
            wp=wp.astype(mxu_dtype), bp=bp.reshape(H, 1).astype(jnp.float32),
            skw=skw.astype(mxu_dtype),
            skb=layer['skip_b'].reshape(H, 1).astype(jnp.float32),
            wm0=wm0.astype(mxu_dtype), wm1=wm1.astype(mxu_dtype),
            wm2=wm2.astype(mxu_dtype),
            bm=bm.reshape(H, 1).astype(jnp.float32)))

    prepped['wE'] = jnp.transpose(params['skipE_w'], (2, 0, 1)).astype(mxu_dtype)
    prepped['bE'] = params['skipE_b'].reshape(H, 1).astype(jnp.float32)
    return prepped


# ------------------------------ fused Pallas kernel ------------------------------
def _make_fused_kernel(cfg, bn_cols, mxu):
    H = cfg['hidden_dim']
    T = cfg['total_t_len']
    n_layers = cfg['n_layers']
    t_lens = cfg['t_lens']
    dils = cfg['dilations']
    BN = bn_cols                                   # lane-dense (multiple of 128)

    def kernel(xrow_ref, xtb_ref, abig_ref, sw_ref, sb_ref, w0_ref, b0_ref, *rest):
        layer_refs = rest[:8 * n_layers]
        we_ref, be_ref, out_ref, zbuf_ref = rest[8 * n_layers:]

        a_big = abig_ref[...]                                       # (BN, BN), mxu dtype

        # start_conv (Cin=1, 1x1): pure VPU broadcast.  h: (H, T*BN), columns (t, b, n).
        h = sw_ref[...] * xrow_ref[...] + sb_ref[...]
        # skip0 folded through the start conv: one (H, T) @ (T, BN) matmul.
        skip = jnp.dot(w0_ref[...], xtb_ref[...].astype(mxu),
                       preferred_element_type=jnp.float32) + b0_ref[...]

        t_cur = T
        for i in range(n_layers):
            (wp_ref, bp_ref, skw_ref, skb_ref,
             wm0_ref, wm1_ref, wm2_ref, bm_ref) = layer_refs[8 * i: 8 * i + 8]
            d = dils[i]
            t_out = t_lens[i]
            m_out = t_out * BN
            residual = h
            hm = h.astype(mxu)

            # dilated inception: 7 shifted, 128-aligned lane windows of h accumulated
            # as 7 matmuls into one f32 accumulator (in-kernel im2col, no 7x slab).
            y = jnp.dot(wp_ref[0], hm[:, 0:m_out],
                        preferred_element_type=jnp.float32)
            for j in range(1, KERNEL_SIZE):
                off = j * d * BN
                y = y + jnp.dot(wp_ref[j], hm[:, off:off + m_out],
                                preferred_element_type=jnp.float32)
            y = y + bp_ref[...]
            ym = y.astype(mxu)

            # skip conv (full time width -> length 1) + running-skip accumulation.
            for t in range(t_out):
                skip = skip + jnp.dot(skw_ref[t], ym[:, t * BN:(t + 1) * BN],
                                      preferred_element_type=jnp.float32)
            skip = skip + skb_ref[...]

            # mix-hop propagation (gdep=2) + 1x1 mlp + eval-BN, refolded as
            #   z = W0' y + P(W1' y + P(W2' y)),  P = right-mult by kron(I_B, A_hat^T),
            # applied per 128-lane (t, b)-block so everything stays lane-dense.
            u0 = jnp.dot(wm0_ref[...], ym, preferred_element_type=jnp.float32)
            u1 = jnp.dot(wm1_ref[...], ym, preferred_element_type=jnp.float32)
            u2 = jnp.dot(wm2_ref[...], ym, preferred_element_type=jnp.float32)
            for t in range(t_out):
                c = slice(t * BN, (t + 1) * BN)
                v = u1[:, c] + jnp.dot(u2[:, c].astype(mxu), a_big,
                                       preferred_element_type=jnp.float32)
                zbuf_ref[:, c] = u0[:, c] + jnp.dot(v.astype(mxu), a_big,
                                                    preferred_element_type=jnp.float32)
            z = zbuf_ref[:, 0:m_out] + bm_ref[...]
            # ReLU + residual (last t_out time steps of the layer input), fused.
            h = jnp.maximum(z, 0.0) + residual[:, (t_cur - t_out) * BN:]
            t_cur = t_out

        # skipE + final skip accumulation.
        hm = h.astype(mxu)
        for t in range(t_cur):
            skip = skip + jnp.dot(we_ref[t], hm[:, t * BN:(t + 1) * BN],
                                  preferred_element_type=jnp.float32)
        out_ref[...] = skip + be_ref[...]

    return kernel


# ------------------------------ Pallas forward -------------------------------
def st_encoder_forward(x, adj, prepped, cfg, mxu_dtype=jnp.bfloat16):
    """x: (B, seq_length, feature_dim), adj: (N, N)  ->  (B, feature_dim, hidden_dim)."""
    B, T, N = x.shape
    H = cfg['hidden_dim']
    assert T == cfg['total_t_len'] and cfg['receptive_field'] <= T   # is_pad unreachable

    # lane density: pad the batch so B_pad*N is a multiple of 128.  Padded columns
    # never mix with real ones (every op is per-column or block-diagonal over (t, b)).
    b_unit = LANES // math.gcd(N, LANES)
    B_pad = -(-B // b_unit) * b_unit
    BN = B_pad * N
    xp = jnp.pad(x, ((0, B_pad - B), (0, 0), (0, 0)))
    x_tb = jnp.transpose(xp, (1, 0, 2)).reshape(T, BN)       # columns ordered (b, n)
    x_row = x_tb.reshape(1, T * BN)

    # A_hat built once per forward; block-diagonal over the padded batch, transposed
    # for right-multiplication on the (t, b, n) lane axis.
    a = adj + jnp.eye(N, dtype=adj.dtype)
    a_hat_t = (a / jnp.sum(a, axis=1, keepdims=True)).T
    a_big = jnp.kron(jnp.eye(B_pad, dtype=a_hat_t.dtype), a_hat_t).astype(mxu_dtype)
    # TODO(synk): kron(I_B, A_hat^T) is (B*N)^2 -- for production N/B apply the node mix
    #             per batch block (or grid over batch) instead of materialising it.

    inputs = [x_row, x_tb, a_big,
              prepped['start_w'], prepped['start_b'], prepped['w0'], prepped['b0']]
    for lp in prepped['layers']:
        inputs += [lp['wp'], lp['bp'], lp['skw'], lp['skb'],
                   lp['wm0'], lp['wm1'], lp['wm2'], lp['bm']]
    inputs += [prepped['wE'], prepped['bE']]

    vmem = pl.BlockSpec(memory_space=pltpu.MemorySpace.VMEM)
    kernel = _make_fused_kernel(cfg, BN, mxu_dtype)
    skip = pl.pallas_call(
        kernel,
        out_shape=jax.ShapeDtypeStruct((H, BN), jnp.float32),
        in_specs=[vmem] * len(inputs),
        out_specs=vmem,
        scratch_shapes=[pltpu.VMEM((H, cfg['t_lens'][0] * BN), jnp.float32)],
    )(*inputs)
    # TODO(synk): for production sizes (N~200+, large B*T) add a >=512-wide parallel grid
    #             over the (b, n) lane axis (dimension_semantics=("parallel",)) so v7x's
    #             second TensorCore is used and its 64 MiB VMEM is tiled explicitly.
    skip = skip[:, :B * N]
    return jnp.transpose(skip.reshape(H, B, N), (1, 2, 0))    # (B, N, H)


# -------------------------- pure-jnp reference path --------------------------
def _ref_full_conv(x, w, b):
    # Conv2d with kernel (1, T) where T == x.shape[3] -> time output length 1.
    return jnp.einsum('oct,bcnt->bon', w, x)[..., None] + b[None, :, None, None]


def _ref_dilated_branch(x, w, b, d, t_out):
    k = w.shape[2]
    start = d * (KERNEL_SIZE - k)
    acc = b[None, :, None, None]
    for j in range(k):
        acc = acc + jnp.einsum('oc,bcnt->bont', w[:, :, j],
                               x[..., start + j * d: start + j * d + t_out])
    return acc


def reference_forward(x, adj, params, cfg):
    """Unfused pure-jnp reference mirroring the PyTorch module structure (eval mode)."""
    B, T, N = x.shape
    h = jnp.transpose(x, (0, 2, 1))[:, None, :, :]                    # (B, 1, N, T)
    h = (jnp.einsum('oc,bcnt->bont', params['start_w'], h)
         + params['start_b'][None, :, None, None])
    skip = _ref_full_conv(h, params['skip0_w'], params['skip0_b'])
    for i in range(cfg['n_layers']):
        layer = params['layers'][i]
        d = cfg['dilations'][i]
        residual = h
        t_last = h.shape[3] - d * (KERNEL_SIZE - 1)
        h = jnp.concatenate(
            [_ref_dilated_branch(h, pw['w'], pw['b'], d, t_last)
             for pw in layer['tconv']], axis=1)
        skip = skip + _ref_full_conv(h, layer['skip_w'], layer['skip_b'])
        a = adj + jnp.eye(N, dtype=adj.dtype)
        a_hat = a / jnp.sum(a, axis=1, keepdims=True)
        hh, hops = h, [h]
        for _ in range(GDEP):
            hh = ALPHA * h + (1.0 - ALPHA) * jnp.einsum('nm,bcmt->bcnt', a_hat, hh)
            hops.append(hh)
        ho = jnp.concatenate(hops, axis=1)
        h = (jnp.einsum('oc,bcnt->bont', layer['gc_w'][:, :, 0], ho)
             + layer['gc_b'][None, :, None, None])
        scale = layer['bn_gamma'] / jnp.sqrt(layer['bn_var'] + BN_EPS)
        shift = layer['bn_beta'] - layer['bn_mean'] * scale
        h = h * scale[None, :, None, None] + shift[None, :, None, None]
        h = jnp.maximum(h, 0.0)
        h = h + residual[..., -h.shape[3]:]
    skip = _ref_full_conv(h, params['skipE_w'], params['skipE_b']) + skip
    return jnp.transpose(skip[..., 0], (0, 2, 1))


# ----------------------------------- main ------------------------------------
if __name__ == "__main__":
    B, N, T, H, L = 2, 16, 20, 32, 2   # batch, nodes(feature_dim), seq, hidden, layers
    cfg = build_config(feature_dim=N, seq_length=T, n_layers=L, hidden_dim=H)

    key = jax.random.PRNGKey(0)
    kp, kx, ka = jax.random.split(key, 3)
    params = init_params(cfg, kp)
    x = jax.random.normal(kx, (B, T, N), jnp.float32)
    adj = jnp.abs(jax.random.normal(ka, (N, N), jnp.float32))

    # f32 MXU operands: strict structural check against the unfused jnp reference.
    prepped_f32 = prepare_params(params, cfg, mxu_dtype=jnp.float32)
    run_f32 = jax.jit(functools.partial(st_encoder_forward, cfg=cfg, mxu_dtype=jnp.float32))
    out_f32 = jax.block_until_ready(run_f32(x, adj, prepped_f32))
    assert out_f32.shape == (B, N, H), out_f32.shape

    ref = jax.block_until_ready(jax.jit(functools.partial(reference_forward, cfg=cfg))(x, adj, params))
    err = float(jnp.max(jnp.abs(out_f32 - ref)))
    assert err < 2e-3, f"Pallas(f32) vs reference mismatch: {err}"

    # default path: bf16 MXU operands with f32 accumulation (all generations).
    # Gate tightened from 8e-2 to 2e-2 per review.
    prepped_bf16 = prepare_params(params, cfg, mxu_dtype=jnp.bfloat16)
    run_bf16 = jax.jit(functools.partial(st_encoder_forward, cfg=cfg, mxu_dtype=jnp.bfloat16))
    out_bf16 = jax.block_until_ready(run_bf16(x, adj, prepped_bf16))
    rel = (float(jnp.max(jnp.abs(out_bf16 - out_f32)))
           / max(1.0, float(jnp.max(jnp.abs(out_f32)))))
    assert rel < 2e-2, f"Pallas(bf16 MXU operands) deviates from f32 path: {rel}"

    print("KERNEL_OK")
</pallas_src>

<mosaic_0001>
module attributes {stable_mosaic.version = 11 : i64} {
  func.func @kernel(%arg0: memref<1x2560xf32, #tpu.memory_space<vmem>>, %arg1: memref<20x128xf32, #tpu.memory_space<vmem>>, %arg2: memref<128x128xf32, #tpu.memory_space<vmem>>, %arg3: memref<32x1xf32, #tpu.memory_space<vmem>>, %arg4: memref<32x1xf32, #tpu.memory_space<vmem>>, %arg5: memref<32x20xf32, #tpu.memory_space<vmem>>, %arg6: memref<32x1xf32, #tpu.memory_space<vmem>>, %arg7: memref<7x32x32xf32, #tpu.memory_space<vmem>>, %arg8: memref<32x1xf32, #tpu.memory_space<vmem>>, %arg9: memref<14x32x32xf32, #tpu.memory_space<vmem>>, %arg10: memref<32x1xf32, #tpu.memory_space<vmem>>, %arg11: memref<32x32xf32, #tpu.memory_space<vmem>>, %arg12: memref<32x32xf32, #tpu.memory_space<vmem>>, %arg13: memref<32x32xf32, #tpu.memory_space<vmem>>, %arg14: memref<32x1xf32, #tpu.memory_space<vmem>>, %arg15: memref<7x32x32xf32, #tpu.memory_space<vmem>>, %arg16: memref<32x1xf32, #tpu.memory_space<vmem>>, %arg17: memref<2x32x32xf32, #tpu.memory_space<vmem>>, %arg18: memref<32x1xf32, #tpu.memory_space<vmem>>, %arg19: memref<32x32xf32, #tpu.memory_space<vmem>>, %arg20: memref<32x32xf32, #tpu.memory_space<vmem>>, %arg21: memref<32x32xf32, #tpu.memory_space<vmem>>, %arg22: memref<32x1xf32, #tpu.memory_space<vmem>>, %arg23: memref<2x32x32xf32, #tpu.memory_space<vmem>>, %arg24: memref<32x1xf32, #tpu.memory_space<vmem>>, %arg25: memref<32x128xf32, #tpu.memory_space<vmem>>, %arg26: memref<32x1792xf32, #tpu.memory_space<vmem>>) attributes {dimension_semantics = [], scalar_prefetch = 0 : i64, scratch_operands = 1 : i64, tpu.core_type = #tpu.core_type<tc>} {
    %c0 = arith.constant 0 : index
    %c0_0 = arith.constant 0 : index
    %0 = vector.load %arg2[%c0, %c0_0] : memref<128x128xf32, #tpu.memory_space<vmem>>, vector<128x128xf32>
    %c0_1 = arith.constant 0 : index
    %c0_2 = arith.constant 0 : index
    %1 = vector.load %arg3[%c0_1, %c0_2] : memref<32x1xf32, #tpu.memory_space<vmem>>, vector<32x1xf32>
    %c0_3 = arith.constant 0 : index
    %c0_4 = arith.constant 0 : index
    %2 = vector.load %arg0[%c0_3, %c0_4] : memref<1x2560xf32, #tpu.memory_space<vmem>>, vector<1x2560xf32>
    %3 = vector.broadcast %1 : vector<32x1xf32> to vector<32x2560xf32>
    %4 = vector.broadcast %2 : vector<1x2560xf32> to vector<32x2560xf32>
    %5 = arith.mulf %3, %4 : vector<32x2560xf32>
    %c0_5 = arith.constant 0 : index
    %c0_6 = arith.constant 0 : index
    %6 = vector.load %arg4[%c0_5, %c0_6] : memref<32x1xf32, #tpu.memory_space<vmem>>, vector<32x1xf32>
    %7 = vector.broadcast %6 : vector<32x1xf32> to vector<32x2560xf32>
    %8 = arith.addf %5, %7 : vector<32x2560xf32>
    %c0_7 = arith.constant 0 : index
    %c0_8 = arith.constant 0 : index
    %9 = vector.load %arg5[%c0_7, %c0_8] : memref<32x20xf32, #tpu.memory_space<vmem>>, vector<32x20xf32>
    %c0_9 = arith.constant 0 : index
    %c0_10 = arith.constant 0 : index
    %10 = vector.load %arg1[%c0_9, %c0_10] : memref<20x128xf32, #tpu.memory_space<vmem>>, vector<20x128xf32>
    %cst = arith.constant dense<0.000000e+00> : vector<32x128xf32>
    %11 = tpu.matmul %9, %10, %cst {dimension_numbers = #tpu.dot_dimension_numbers<[1], [0], [0], [1], [0, 0, 1, 1], [], []>} : vector<32x20xf32>, vector<20x128xf32>, vector<32x128xf32> -> vector<32x128xf32>
    %c0_11 = arith.constant 0 : index
    %c0_12 = arith.constant 0 : index
    %12 = vector.load %arg6[%c0_11, %c0_12] : memref<32x1xf32, #tpu.memory_space<vmem>>, vector<32x1xf32>
    %13 = vector.broadcast %12 : vector<32x1xf32> to vector<32x128xf32>
    %14 = arith.addf %11, %13 : vector<32x128xf32>
    %c0_13 = arith.constant 0 : index
    %c0_14 = arith.constant 0 : index
    %c0_15 = arith.constant 0 : index
    %15 = vector.load %arg7[%c0_13, %c0_14, %c0_15] : memref<7x32x32xf32, #tpu.memory_space<vmem>>, vector<1x32x32xf32>
    %16 = vector.shape_cast %15 : vector<1x32x32xf32> to vector<32x32xf32>
    %17 = vector.extract_strided_slice %8 {offsets = [0, 0], sizes = [32, 1792], strides = [1, 1]} : vector<32x2560xf32> to vector<32x1792xf32>
    %cst_16 = arith.constant dense<0.000000e+00> : vector<32x1792xf32>
    %18 = tpu.matmul %16, %17, %cst_16 {dimension_numbers = #tpu.dot_dimension_numbers<[1], [0], [0], [1], [0, 0, 1, 1], [], []>} : vector<32x32xf32>, vector<32x1792xf32>, vector<32x1792xf32> -> vector<32x1792xf32>
    %c1 = arith.constant 1 : index
    %c0_17 = arith.constant 0 : index
    %c0_18 = arith.constant 0 : index
    %19 = vector.load %arg7[%c1, %c0_17, %c0_18] : memref<7x32x32xf32, #tpu.memory_space<vmem>>, vector<1x32x32xf32>
    %20 = vector.shape_cast %19 : vector<1x32x32xf32> to vector<32x32xf32>
    %21 = vector.extract_strided_slice %8 {offsets = [0, 128], sizes = [32, 1792], strides = [1, 1]} : vector<32x2560xf32> to vector<32x1792xf32>
    %cst_19 = arith.constant dense<0.000000e+00> : vector<32x1792xf32>
    %22 = tpu.matmul %20, %21, %cst_19 {dimension_numbers = #tpu.dot_dimension_numbers<[1], [0], [0], [1], [0, 0, 1, 1], [], []>} : vector<32x32xf32>, vector<32x1792xf32>, vector<32x1792xf32> -> vector<32x1792xf32>
    %23 = arith.addf %18, %22 : vector<32x1792xf32>
    %c2 = arith.constant 2 : index
    %c0_20 = arith.constant 0 : index
    %c0_21 = arith.constant 0 : index
    %24 = vector.load %arg7[%c2, %c0_20, %c0_21] : memref<7x32x32xf32, #tpu.memory_space<vmem>>, vector<1x32x32xf32>
    %25 = vector.shape_cast %24 : vector<1x32x32xf32> to vector<32x32xf32>
    %26 = vector.extract_strided_slice %8 {offsets = [0, 256], sizes = [32, 1792], strides = [1, 1]} : vector<32x2560xf32> to vector<32x1792xf32>
    %cst_22 = arith.constant dense<0.000000e+00> : vector<32x1792xf32>
    %27 = tpu.matmul %25, %26, %cst_22 {dimension_numbers = #tpu.dot_dimension_numbers<[1], [0], [0], [1], [0, 0, 1, 1], [], []>} : vector<32x32xf32>, vector<32x1792xf32>, vector<32x1792xf32> -> vector<32x1792xf32>
    %28 = arith.addf %23, %27 : vector<32x1792xf32>
    %c3 = arith.constant 3 : index
    %c0_23 = arith.constant 0 : index
    %c0_24 = arith.constant 0 : index
    %29 = vector.load %arg7[%c3, %c0_23, %c0_24] : memref<7x32x32xf32, #tpu.memory_space<vmem>>, vector<1x32x32xf32>
    %30 = vector.shape_cast %29 : vector<1x32x32xf32> to vector<32x32xf32>
    %31 = vector.extract_strided_slice %8 {offsets = [0, 384], sizes = [32, 1792], strides = [1, 1]} : vector<32x2560xf32> to vector<32x1792xf32>
    %cst_25 = arith.constant dense<0.000000e+00> : vector<32x1792xf32>
    %32 = tpu.matmul %30, %31, %cst_25 {dimension_numbers = #tpu.dot_dimension_numbers<[1], [0], [0], [1], [0, 0, 1, 1], [], []>} : vector<32x32xf32>, vector<32x1792xf32>, vector<32x1792xf32> -> vector<32x1792xf32>
    %33 = arith.addf %28, %32 : vector<32x1792xf32>
    %c4 = arith.constant 4 : index
    %c0_26 = arith.constant 0 : index
    %c0_27 = arith.constant 0 : index
    %34 = vector.load %arg7[%c4, %c0_26, %c0_27] : memref<7x32x32xf32, #tpu.memory_space<vmem>>, vector<1x32x32xf32>
    %35 = vector.shape_cast %34 : vector<1x32x32xf32> to vector<32x32xf32>
    %36 = vector.extract_strided_slice %8 {offsets = [0, 512], sizes = [32, 1792], strides = [1, 1]} : vector<32x2560xf32> to vector<32x1792xf32>
    %cst_28 = arith.constant dense<0.000000e+00> : vector<32x1792xf32>
    %37 = tpu.matmul %35, %36, %cst_28 {dimension_numbers = #tpu.dot_dimension_numbers<[1], [0], [0], [1], [0, 0, 1, 1], [], []>} : vector<32x32xf32>, vector<32x1792xf32>, vector<32x1792xf32> -> vector<32x1792xf32>
    %38 = arith.addf %33, %37 : vector<32x1792xf32>
    %c5 = arith.constant 5 : index
    %c0_29 = arith.constant 0 : index
    %c0_30 = arith.constant 0 : index
    %39 = vector.load %arg7[%c5, %c0_29, %c0_30] : memref<7x32x32xf32, #tpu.memory_space<vmem>>, vector<1x32x32xf32>
    %40 = vector.shape_cast %39 : vector<1x32x32xf32> to vector<32x32xf32>
    %41 = vector.extract_strided_slice %8 {offsets = [0, 640], sizes = [32, 1792], strides = [1, 1]} : vector<32x2560xf32> to vector<32x1792xf32>
    %cst_31 = arith.constant dense<0.000000e+00> : vector<32x1792xf32>
    %42 = tpu.matmul %40, %41, %cst_31 {dimension_numbers = #tpu.dot_dimension_numbers<[1], [0], [0], [1], [0, 0, 1, 1], [], []>} : vector<32x32xf32>, vector<32x1792xf32>, vector<32x1792xf32> -> vector<32x1792xf32>
    %43 = arith.addf %38, %42 : vector<32x1792xf32>
    %c6 = arith.constant 6 : index
    %c0_32 = arith.constant 0 : index
    %c0_33 = arith.constant 0 : index
    %44 = vector.load %arg7[%c6, %c0_32, %c0_33] : memref<7x32x32xf32, #tpu.memory_space<vmem>>, vector<1x32x32xf32>
    %45 = vector.shape_cast %44 : vector<1x32x32xf32> to vector<32x32xf32>
    %46 = vector.extract_strided_slice %8 {offsets = [0, 768], sizes = [32, 1792], strides = [1, 1]} : vector<32x2560xf32> to vector<32x1792xf32>
    %cst_34 = arith.constant dense<0.000000e+00> : vector<32x1792xf32>
    %47 = tpu.matmul %45, %46, %cst_34 {dimension_numbers = #tpu.dot_dimension_numbers<[1], [0], [0], [1], [0, 0, 1, 1], [], []>} : vector<32x32xf32>, vector<32x1792xf32>, vector<32x1792xf32> -> vector<32x1792xf32>
    %48 = arith.addf %43, %47 : vector<32x1792xf32>
    %c0_35 = arith.constant 0 : index
    %c0_36 = arith.constant 0 : index
    %49 = vector.load %arg8[%c0_35, %c0_36] : memref<32x1xf32, #tpu.memory_space<vmem>>, vector<32x1xf32>
    %50 = vector.broadcast %49 : vector<32x1xf32> to vector<32x1792xf32>
    %51 = arith.addf %48, %50 : vector<32x1792xf32>
    %c0_37 = arith.constant 0 : index
    %c0_38 = arith.constant 0 : index
    %c0_39 = arith.constant 0 : index
    %52 = vector.load %arg9[%c0_37, %c0_38, %c0_39] : memref<14x32x32xf32, #tpu.memory_space<vmem>>, vector<1x32x32xf32>
    %53 = vector.shape_cast %52 : vector<1x32x32xf32> to vector<32x32xf32>
    %54 = vector.extract_strided_slice %51 {offsets = [0, 0], sizes = [32, 128], strides = [1, 1]} : vector<32x1792xf32> to vector<32x128xf32>
    %cst_40 = arith.constant dense<0.000000e+00> : vector<32x128xf32>
    %55 = tpu.matmul %53, %54, %cst_40 {dimension_numbers = #tpu.dot_dimension_numbers<[1], [0], [0], [1], [0, 0, 1, 1], [], []>} : vector<32x32xf32>, vector<32x128xf32>, vector<32x128xf32> -> vector<32x128xf32>
    %56 = arith.addf %14, %55 : vector<32x128xf32>
    %c1_41 = arith.constant 1 : index
    %c0_42 = arith.constant 0 : index
    %c0_43 = arith.constant 0 : index
    %57 = vector.load %arg9[%c1_41, %c0_42, %c0_43] : memref<14x32x32xf32, #tpu.memory_space<vmem>>, vector<1x32x32xf32>
    %58 = vector.shape_cast %57 : vector<1x32x32xf32> to vector<32x32xf32>
    %59 = vector.extract_strided_slice %51 {offsets = [0, 128], sizes = [32, 128], strides = [1, 1]} : vector<32x1792xf32> to vector<32x128xf32>
    %cst_44 = arith.constant dense<0.000000e+00> : vector<32x128xf32>
    %60 = tpu.matmul %58, %59, %cst_44 {dimension_numbers = #tpu.dot_dimension_numbers<[1], [0], [0], [1], [0, 0, 1, 1], [], []>} : vector<32x32xf32>, vector<32x128xf32>, vector<32x128xf32> -> vector<32x128xf32>
    %61 = arith.addf %56, %60 : vector<32x128xf32>
    %c2_45 = arith.constant 2 : index
    %c0_46 = arith.constant 0 : index
    %c0_47 = arith.constant 0 : index
    %62 = vector.load %arg9[%c2_45, %c0_46, %c0_47] : memref<14x32x32xf32, #tpu.memory_space<vmem>>, vector<1x32x32xf32>
    %63 = vector.shape_cast %62 : vector<1x32x32xf32> to vector<32x32xf32>
    %64 = vector.extract_strided_slice %51 {offsets = [0, 256], sizes = [32, 128], strides = [1, 1]} : vector<32x1792xf32> to vector<32x128xf32>
    %cst_48 = arith.constant dense<0.000000e+00> : vector<32x128xf32>
    %65 = tpu.matmul %63, %64, %cst_48 {dimension_numbers = #tpu.dot_dimension_numbers<[1], [0], [0], [1], [0, 0, 1, 1], [], []>} : vector<32x32xf32>, vector<32x128xf32>, vector<32x128xf32> -> vector<32x128xf32>
    %66 = arith.addf %61, %65 : vector<32x128xf32>
    %c3_49 = arith.constant 3 : index
    %c0_50 = arith.constant 0 : index
    %c0_51 = arith.constant 0 : index
    %67 = vector.load %arg9[%c3_49, %c0_50, %c0_51] : memref<14x32x32xf32, #tpu.memory_space<vmem>>, vector<1x32x32xf32>
    %68 = vector.shape_cast %67 : vector<1x32x32xf32> to vector<32x32xf32>
    %69 = vector.extract_strided_slice %51 {offsets = [0, 384], sizes = [32, 128], strides = [1, 1]} : vector<32x1792xf32> to vector<32x128xf32>
    %cst_52 = arith.constant dense<0.000000e+00> : vector<32x128xf32>
    %70 = tpu.matmul %68, %69, %cst_52 {dimension_numbers = #tpu.dot_dimension_numbers<[1], [0], [0], [1], [0, 0, 1, 1], [], []>} : vector<32x32xf32>, vector<32x128xf32>, vector<32x128xf32> -> vector<32x128xf32>
    %71 = arith.addf %66, %70 : vector<32x128xf32>
    %c4_53 = arith.constant 4 : index
    %c0_54 = arith.constant 0 : index
    %c0_55 = arith.constant 0 : index
    %72 = vector.load %arg9[%c4_53, %c0_54, %c0_55] : memref<14x32x32xf32, #tpu.memory_space<vmem>>, vector<1x32x32xf32>
    %73 = vector.shape_cast %72 : vector<1x32x32xf32> to vector<32x32xf32>
    %74 = vector.extract_strided_slice %51 {offsets = [0, 512], sizes = [32, 128], strides = [1, 1]} : vector<32x1792xf32> to vector<32x128xf32>
    %cst_56 = arith.constant dense<0.000000e+00> : vector<32x128xf32>
    %75 = tpu.matmul %73, %74, %cst_56 {dimension_numbers = #tpu.dot_dimension_numbers<[1], [0], [0], [1], [0, 0, 1, 1], [], []>} : vector<32x32xf32>, vector<32x128xf32>, vector<32x128xf32> -> vector<32x128xf32>
    %76 = arith.addf %71, %75 : vector<32x128xf32>
    %c5_57 = arith.constant 5 : index
    %c0_58 = arith.constant 0 : index
    %c0_59 = arith.constant 0 : index
    %77 = vector.load %arg9[%c5_57, %c0_58, %c0_59] : memref<14x32x32xf32, #tpu.memory_space<vmem>>, vector<1x32x32xf32>
    %78 = vector.shape_cast %77 : vector<1x32x32xf32> to vector<32x32xf32>
    %79 = vector.extract_strided_slice %51 {offsets = [0, 640], sizes = [32, 128], strides = [1, 1]} : vector<32x1792xf32> to vector<32x128xf32>
    %cst_60 = arith.constant dense<0.000000e+00> : vector<32x128xf32>
    %80 = tpu.matmul %78, %79, %cst_60 {dimension_numbers = #tpu.dot_dimension_numbers<[1], [0], [0], [1], [0, 0, 1, 1], [], []>} : vector<32x32xf32>, vector<32x128xf32>, vector<32x128xf32> -> vector<32x128xf32>
    %81 = arith.addf %76, %80 : vector<32x128xf32>
    %c6_61 = arith.constant 6 : index
    %c0_62 = arith.constant 0 : index
    %c0_63 = arith.constant 0 : index
    %82 = vector.load %arg9[%c6_61, %c0_62, %c0_63] : memref<14x32x32xf32, #tpu.memory_space<vmem>>, vector<1x32x32xf32>
    %83 = vector.shape_cast %82 : vector<1x32x32xf32> to vector<32x32xf32>
    %84 = vector.extract_strided_slice %51 {offsets = [0, 768], sizes = [32, 128], strides = [1, 1]} : vector<32x1792xf32> to vector<32x128xf32>
    %cst_64 = arith.constant dense<0.000000e+00> : vector<32x128xf32>
    %85 = tpu.matmul %83, %84, %cst_64 {dimension_numbers = #tpu.dot_dimension_numbers<[1], [0], [0], [1], [0, 0, 1, 1], [], []>} : vector<32x32xf32>, vector<32x128xf32>, vector<32x128xf32> -> vector<32x128xf32>
    %86 = arith.addf %81, %85 : vector<32x128xf32>
    %c7 = arith.constant 7 : index
    %c0_65 = arith.constant 0 : index
    %c0_66 = arith.constant 0 : index
    %87 = vector.load %arg9[%c7, %c0_65, %c0_66] : memref<14x32x32xf32, #tpu.memory_space<vmem>>, vector<1x32x32xf32>
    %88 = vector.shape_cast %87 : vector<1x32x32xf32> to vector<32x32xf32>
    %89 = vector.extract_strided_slice %51 {offsets = [0, 896], sizes = [32, 128], strides = [1, 1]} : vector<32x1792xf32> to vector<32x128xf32>
    %cst_67 = arith.constant dense<0.000000e+00> : vector<32x128xf32>
    %90 = tpu.matmul %88, %89, %cst_67 {dimension_numbers = #tpu.dot_dimension_numbers<[1], [0], [0], [1], [0, 0, 1, 1], [], []>} : vector<32x32xf32>, vector<32x128xf32>, vector<32x128xf32> -> vector<32x128xf32>
    %91 = arith.addf %86, %90 : vector<32x128xf32>
    %c8 = arith.constant 8 : index
    %c0_68 = arith.constant 0 : index
    %c0_69 = arith.constant 0 : index
    %92 = vector.load %arg9[%c8, %c0_68, %c0_69] : memref<14x32x32xf32, #tpu.memory_space<vmem>>, vector<1x32x32xf32>
    %93 = vector.shape_cast %92 : vector<1x32x32xf32> to vector<32x32xf32>
    %94 = vector.extract_strided_slice %51 {offsets = [0, 1024], sizes = [32, 128], strides = [1, 1]} : vector<32x1792xf32> to vector<32x128xf32>
    %cst_70 = arith.constant dense<0.000000e+00> : vector<32x128xf32>
    %95 = tpu.matmul %93, %94, %cst_70 {dimension_numbers = #tpu.dot_dimension_numbers<[1], [0], [0], [1], [0, 0, 1, 1], [], []>} : vector<32x32xf32>, vector<32x128xf32>, vector<32x128xf32> -> vector<32x128xf32>
    %96 = arith.addf %91, %95 : vector<32x128xf32>
    %c9 = arith.constant 9 : index
    %c0_71 = arith.constant 0 : index
    %c0_72 = arith.constant 0 : index
    %97 = vector.load %arg9[%c9, %c0_71, %c0_72] : memref<14x32x32xf32, #tpu.memory_space<vmem>>, vector<1x32x32xf32>
    %98 = vector.shape_cast %97 : vector<1x32x32xf32> to vector<32x32xf32>
    %99 = vector.extract_strided_slice %51 {offsets = [0, 1152], sizes = [32, 128], strides = [1, 1]} : vector<32x1792xf32> to vector<32x128xf32>
    %cst_73 = arith.constant dense<0.000000e+00> : vector<32x128xf32>
    %100 = tpu.matmul %98, %99, %cst_73 {dimension_numbers = #tpu.dot_dimension_numbers<[1], [0], [0], [1], [0, 0, 1, 1], [], []>} : vector<32x32xf32>, vector<32x128xf32>, vector<32x128xf32> -> vector<32x128xf32>
    %101 = arith.addf %96, %100 : vector<32x128xf32>
    %c10 = arith.constant 10 : index
    %c0_74 = arith.constant 0 : index
    %c0_75 = arith.constant 0 : index
    %102 = vector.load %arg9[%c10, %c0_74, %c0_75] : memref<14x32x32xf32, #tpu.memory_space<vmem>>, vector<1x32x32xf32>
    %103 = vector.shape_cast %102 : vector<1x32x32xf32> to vector<32x32xf32>
    %104 = vector.extract_strided_slice %51 {offsets = [0, 1280], sizes = [32, 128], strides = [1, 1]} : vector<32x1792xf32> to vector<32x128xf32>
    %cst_76 = arith.constant dense<0.000000e+00> : vector<32x128xf32>
    %105 = tpu.matmul %103, %104, %cst_76 {dimension_numbers = #tpu.dot_dimension_numbers<[1], [0], [0], [1], [0, 0, 1, 1], [], []>} : vector<32x32xf32>, vector<32x128xf32>, vector<32x128xf32> -> vector<32x128xf32>
    %106 = arith.addf %101, %105 : vector<32x128xf32>
    %c11 = arith.constant 11 : index
    %c0_77 = arith.constant 0 : index
    %c0_78 = arith.constant 0 : index
    %107 = vector.load %arg9[%c11, %c0_77, %c0_78] : memref<14x32x32xf32, #tpu.memory_space<vmem>>, vector<1x32x32xf32>
    %108 = vector.shape_cast %107 : vector<1x32x32xf32> to vector<32x32xf32>
    %109 = vector.extract_strided_slice %51 {offsets = [0, 1408], sizes = [32, 128], strides = [1, 1]} : vector<32x1792xf32> to vector<32x128xf32>
    %cst_79 = arith.constant dense<0.000000e+00> : vector<32x128xf32>
    %110 = tpu.matmul %108, %109, %cst_79 {dimension_numbers = #tpu.dot_dimension_numbers<[1], [0], [0], [1], [0, 0, 1, 1], [], []>} : vector<32x32xf32>, vector<32x128xf32>, vector<32x128xf32> -> vector<32x128xf32>
    %111 = arith.addf %106, %110 : vector<32x128xf32>
    %c12 = arith.constant 12 : index
    %c0_80 = arith.constant 0 : index
    %c0_81 = arith.constant 0 : index
    %112 = vector.load %arg9[%c12, %c0_80, %c0_81] : memref<14x32x32xf32, #tpu.memory_space<vmem>>, vector<1x32x32xf32>
    %113 = vector.shape_cast %112 : vector<1x32x32xf32> to vector<32x32xf32>
    %114 = vector.extract_strided_slice %51 {offsets = [0, 1536], sizes = [32, 128], strides = [1, 1]} : vector<32x1792xf32> to vector<32x128xf32>
    %cst_82 = arith.constant dense<0.000000e+00> : vector<32x128xf32>
    %115 = tpu.matmul %113, %114, %cst_82 {dimension_numbers = #tpu.dot_dimension_numbers<[1], [0], [0], [1], [0, 0, 1, 1], [], []>} : vector<32x32xf32>, vector<32x128xf32>, vector<32x128xf32> -> vector<32x128xf32>
    %116 = arith.addf %111, %115 : vector<32x128xf32>
    %c13 = arith.constant 13 : index
    %c0_83 = arith.constant 0 : index
    %c0_84 = arith.constant 0 : index
    %117 = vector.load %arg9[%c13, %c0_83, %c0_84] : memref<14x32x32xf32, #tpu.memory_space<vmem>>, vector<1x32x32xf32>
    %118 = vector.shape_cast %117 : vector<1x32x32xf32> to vector<32x32xf32>
    %119 = vector.extract_strided_slice %51 {offsets = [0, 1664], sizes = [32, 128], strides = [1, 1]} : vector<32x1792xf32> to vector<32x128xf32>
    %cst_85 = arith.constant dense<0.000000e+00> : vector<32x128xf32>
    %120 = tpu.matmul %118, %119, %cst_85 {dimension_numbers = #tpu.dot_dimension_numbers<[1], [0], [0], [1], [0, 0, 1, 1], [], []>} : vector<32x32xf32>, vector<32x128xf32>, vector<32x128xf32> -> vector<32x128xf32>
    %121 = arith.addf %116, %120 : vector<32x128xf32>
    %c0_86 = arith.constant 0 : index
    %c0_87 = arith.constant 0 : index
    %122 = vector.load %arg10[%c0_86, %c0_87] : memref<32x1xf32, #tpu.memory_space<vmem>>, vector<32x1xf32>
    %123 = vector.broadcast %122 : vector<32x1xf32> to vector<32x128xf32>
    %124 = arith.addf %121, %123 : vector<32x128xf32>
    %c0_88 = arith.constant 0 : index
    %c0_89 = arith.constant 0 : index
    %125 = vector.load %arg11[%c0_88, %c0_89] : memref<32x32xf32, #tpu.memory_space<vmem>>, vector<32x32xf32>
    %cst_90 = arith.constant dense<0.000000e+00> : vector<32x1792xf32>
    %126 = tpu.matmul %125, %51, %cst_90 {dimension_numbers = #tpu.dot_dimension_numbers<[1], [0], [0], [1], [0, 0, 1, 1], [], []>} : vector<32x32xf32>, vector<32x1792xf32>, vector<32x1792xf32> -> vector<32x1792xf32>
    %c0_91 = arith.constant 0 : index
    %c0_92 = arith.constant 0 : index
    %127 = vector.load %arg12[%c0_91, %c0_92] : memref<32x32xf32, #tpu.memory_space<vmem>>, vector<32x32xf32>
    %cst_93 = arith.constant dense<0.000000e+00> : vector<32x1792xf32>
    %128 = tpu.matmul %127, %51, %cst_93 {dimension_numbers = #tpu.dot_dimension_numbers<[1], [0], [0], [1], [0, 0, 1, 1], [], []>} : vector<32x32xf32>, vector<32x1792xf32>, vector<32x1792xf32> -> vector<32x1792xf32>
    %c0_94 = arith.constant 0 : index
    %c0_95 = arith.constant 0 : index
    %129 = vector.load %arg13[%c0_94, %c0_95] : memref<32x32xf32, #tpu.memory_space<vmem>>, vector<32x32xf32>
    %cst_96 = arith.constant dense<0.000000e+00> : vector<32x1792xf32>
    %130 = tpu.matmul %129, %51, %cst_96 {dimension_numbers = #tpu.dot_dimension_numbers<[1], [0], [0], [1], [0, 0, 1, 1], [], []>} : vector<32x32xf32>, vector<32x1792xf32>, vector<32x1792xf32> -> vector<32x1792xf32>
    %131 = vector.extract_strided_slice %128 {offsets = [0, 0], sizes = [32, 128], strides = [1, 1]} : vector<32x1792xf32> to vector<32x128xf32>
    %132 = vector.extract_strided_slice %130 {offsets = [0, 0], sizes = [32, 128], strides = [1, 1]} : vector<32x1792xf32> to vector<32x128xf32>
    %cst_97 = arith.constant dense<0.000000e+00> : vector<32x128xf32>
    %133 = tpu.matmul %132, %0, %cst_97 {dimension_numbers = #tpu.dot_dimension_numbers<[1], [0], [0], [1], [0, 0, 1, 1], [], []>} : vector<32x128xf32>, vector<128x128xf32>, vector<32x128xf32> -> vector<32x128xf32>
    %134 = arith.addf %131, %133 : vector<32x128xf32>
    %135 = vector.extract_strided_slice %126 {offsets = [0, 0], sizes = [32, 128], strides = [1, 1]} : vector<32x1792xf32> to vector<32x128xf32>
    %cst_98 = arith.constant dense<0.000000e+00> : vector<32x128xf32>
    %136 = tpu.matmul %134, %0, %cst_98 {dimension_numbers = #tpu.dot_dimension_numbers<[1], [0], [0], [1], [0, 0, 1, 1], [], []>} : vector<32x128xf32>, vector<128x128xf32>, vector<32x128xf32> -> vector<32x128xf32>
    %137 = arith.addf %135, %136 : vector<32x128xf32>
    %c0_99 = arith.constant 0 : index
    %c0_100 = arith.constant 0 : index
    %138 = vector.load %arg26[%c0_99, %c0_100] : memref<32x1792xf32, #tpu.memory_space<vmem>>, vector<32x128xf32>
    tpu.vector_store %arg26[%c0_99, %c0_100], %137 {strides = array<i32>} : memref<32x1792xf32, #tpu.memory_space<vmem>>, vector<32x128xf32>,
    %139 = vector.extract_strided_slice %128 {offsets = [0, 128], sizes = [32, 128], strides = [1, 1]} : vector<32x1792xf32> to vector<32x128xf32>
    %140 = vector.extract_strided_slice %130 {offsets = [0, 128], sizes = [32, 128], strides = [1, 1]} : vector<32x1792xf32> to vector<32x128xf32>
    %cst_101 = arith.constant dense<0.000000e+00> : vector<32x128xf32>
    %141 = tpu.matmul %140, %0, %cst_101 {dimension_numbers = #tpu.dot_dimension_numbers<[1], [0], [0], [1], [0, 0, 1, 1], [], []>} : vector<32x128xf32>, vector<128x128xf32>, vector<32x128xf32> -> vector<32x128xf32>
    %142 = arith.addf %139, %141 : vector<32x128xf32>
    %143 = vector.extract_strided_slice %126 {offsets = [0, 128], sizes = [32, 128], strides = [1, 1]} : vector<32x1792xf32> to vector<32x128xf32>
    %cst_102 = arith.constant dense<0.000000e+00> : vector<32x128xf32>
    %144 = tpu.matmul %142, %0, %cst_102 {dimension_numbers = #tpu.dot_dimension_numbers<[1], [0], [0], [1], [0, 0, 1, 1], [], []>} : vector<32x128xf32>, vector<128x128xf32>, vector<32x128xf32> -> vector<32x128xf32>
    %145 = arith.addf %143, %144 : vector<32x128xf32>
    %c0_103 = arith.constant 0 : index
    %c128 = arith.constant 128 : index
    %146 = vector.load %arg26[%c0_103, %c128] : memref<32x1792xf32, #tpu.memory_space<vmem>>, vector<32x128xf32>
    tpu.vector_store %arg26[%c0_103, %c128], %145 {strides = array<i32>} : memref<32x1792xf32, #tpu.memory_space<vmem>>, vector<32x128xf32>,
    %147 = vector.extract_strided_slice %128 {offsets = [0, 256], sizes = [32, 128], strides = [1, 1]} : vector<32x1792xf32> to vector<32x128xf32>
    %148 = vector.extract_strided_slice %130 {offsets = [0, 256], sizes = [32, 128], strides = [1, 1]} : vector<32x1792xf32> to vector<32x128xf32>
    %cst_104 = arith.constant dense<0.000000e+00> : vector<32x128xf32>
    %149 = tpu.matmul %148, %0, %cst_104 {dimension_numbers = #tpu.dot_dimension_numbers<[1], [0], [0], [1], [0, 0, 1, 1], [], []>} : vector<32x128xf32>, vector<128x128xf32>, vector<32x128xf32> -> vector<32x128xf32>
    %150 = arith.addf %147, %149 : vector<32x128xf32>
    %151 = vector.extract_strided_slice %126 {offsets = [0, 256], sizes = [32, 128], strides = [1, 1]} : vector<32x1792xf32> to vector<32x128xf32>
    %cst_105 = arith.constant dense<0.000000e+00> : vector<32x128xf32>
    %152 = tpu.matmul %150, %0, %cst_105 {dimension_numbers = #tpu.dot_dimension_numbers<[1], [0], [0], [1], [0, 0, 1, 1], [], []>} : vector<32x128xf32>, vector<128x128xf32>, vector<32x128xf32> -> vector<32x128xf32>
    %153 = arith.addf %151, %152 : vector<32x128xf32>
    %c0_106 = arith.constant 0 : index
    %c256 = arith.constant 256 : index
    %154 = vector.load %arg26[%c0_106, %c256] : memref<32x1792xf32, #tpu.memory_space<vmem>>, vector<32x128xf32>
    tpu.vector_store %arg26[%c0_106, %c256], %153 {strides = array<i32>} : memref<32x1792xf32, #tpu.memory_space<vmem>>, vector<32x128xf32>,
    %155 = vector.extract_strided_slice %128 {offsets = [0, 384], sizes = [32, 128], strides = [1, 1]} : vector<32x1792xf32> to vector<32x128xf32>
    %156 = vector.extract_strided_slice %130 {offsets = [0, 384], sizes = [32, 128], strides = [1, 1]} : vector<32x1792xf32> to vector<32x128xf32>
    %cst_107 = arith.constant dense<0.000000e+00> : vector<32x128xf32>
    %157 = tpu.matmul %156, %0, %cst_107 {dimension_numbers = #tpu.dot_dimension_numbers<[1], [0], [0], [1], [0, 0, 1, 1], [], []>} : vector<32x128xf32>, vector<128x128xf32>, vector<32x128xf32> -> vector<32x128xf32>
    %158 = arith.addf %155, %157 : vector<32x128xf32>
    %159 = vector.extract_strided_slice %126 {offsets = [0, 384], sizes = [32, 128], strides = [1, 1]} : vector<32x1792xf32> to vector<32x128xf32>
    %cst_108 = arith.constant dense<0.000000e+00> : vector<32x128xf32>
    %160 = tpu.matmul %158, %0, %cst_108 {dimension_numbers = #tpu.dot_dimension_numbers<[1], [0], [0], [1], [0, 0, 1, 1], [], []>} : vector<32x128xf32>, vector<128x128xf32>, vector<32x128xf32> -> vector<32x128xf32>
    %161 = arith.addf %159, %160 : vector<32x128xf32>
    %c0_109 = arith.constant 0 : index
    %c384 = arith.constant 384 : index
    %162 = vector.load %arg26[%c0_109, %c384] : memref<32x1792xf32, #tpu.memory_space<vmem>>, vector<32x128xf32>
    tpu.vector_store %arg26[%c0_109, %c384], %161 {strides = array<i32>} : memref<32x1792xf32, #tpu.memory_space<vmem>>, vector<32x128xf32>,
    %163 = vector.extract_strided_slice %128 {offsets = [0, 512], sizes = [32, 128], strides = [1, 1]} : vector<32x1792xf32> to vector<32x128xf32>
    %164 = vector.extract_strided_slice %130 {offsets = [0, 512], sizes = [32, 128], strides = [1, 1]} : vector<32x1792xf32> to vector<32x128xf32>
    %cst_110 = arith.constant dense<0.000000e+00> : vector<32x128xf32>
    %165 = tpu.matmul %164, %0, %cst_110 {dimension_numbers = #tpu.dot_dimension_numbers<[1], [0], [0], [1], [0, 0, 1, 1], [], []>} : vector<32x128xf32>, vector<128x128xf32>, vector<32x128xf32> -> vector<32x128xf32>
    %166 = arith.addf %163, %165 : vector<32x128xf32>
    %167 = vector.extract_strided_slice %126 {offsets = [0, 512], sizes = [32, 128], strides = [1, 1]} : vector<32x1792xf32> to vector<32x128xf32>
    %cst_111 = arith.constant dense<0.000000e+00> : vector<32x128xf32>
    %168 = tpu.matmul %166, %0, %cst_111 {dimension_numbers = #tpu.dot_dimension_numbers<[1], [0], [0], [1], [0, 0, 1, 1], [], []>} : vector<32x128xf32>, vector<128x128xf32>, vector<32x128xf32> -> vector<32x128xf32>
    %169 = arith.addf %167, %168 : vector<32x128xf32>
    %c0_112 = arith.constant 0 : index
    %c512 = arith.constant 512 : index
    %170 = vector.load %arg26[%c0_112, %c512] : memref<32x1792xf32, #tpu.memory_space<vmem>>, vector<32x128xf32>
    tpu.vector_store %arg26[%c0_112, %c512], %169 {strides = array<i32>} : memref<32x1792xf32, #tpu.memory_space<vmem>>, vector<32x128xf32>,
    %171 = vector.extract_strided_slice %128 {offsets = [0, 640], sizes = [32, 128], strides = [1, 1]} : vector<32x1792xf32> to vector<32x128xf32>
    %172 = vector.extract_strided_slice %130 {offsets = [0, 640], sizes = [32, 128], strides = [1, 1]} : vector<32x1792xf32> to vector<32x128xf32>
    %cst_113 = arith.constant dense<0.000000e+00> : vector<32x128xf32>
    %173 = tpu.matmul %172, %0, %cst_113 {dimension_numbers = #tpu.dot_dimension_numbers<[1], [0], [0], [1], [0, 0, 1, 1], [], []>} : vector<32x128xf32>, vector<128x128xf32>, vector<32x128xf32> -> vector<32x128xf32>
    %174 = arith.addf %171, %173 : vector<32x128xf32>
    %175 = vector.extract_strided_slice %126 {offsets = [0, 640], sizes = [32, 128], strides = [1, 1]} : vector<32x1792xf32> to vector<32x128xf32>
    %cst_114 = arith.constant dense<0.000000e+00> : vector<32x128xf32>
    %176 = tpu.matmul %174, %0, %cst_114 {dimension_numbers = #tpu.dot_dimension_numbers<[1], [0], [0], [1], [0, 0, 1, 1], [], []>} : vector<32x128xf32>, vector<128x128xf32>, vector<32x128xf32> -> vector<32x128xf32>
    %177 = arith.addf %175, %176 : vector<32x128xf32>
    %c0_115 = arith.constant 0 : index
    %c640 = arith.constant 640 : index
    %178 = vector.load %arg26[%c0_115, %c640] : memref<32x1792xf32, #tpu.memory_space<vmem>>, vector<32x128xf32>
    tpu.vector_store %arg26[%c0_115, %c640], %177 {strides = array<i32>} : memref<32x1792xf32, #tpu.memory_space<vmem>>, vector<32x128xf32>,
    %179 = vector.extract_strided_slice %128 {offsets = [0, 768], sizes = [32, 128], strides = [1, 1]} : vector<32x1792xf32> to vector<32x128xf32>
    %180 = vector.extract_strided_slice %130 {offsets = [0, 768], sizes = [32, 128], strides = [1, 1]} : vector<32x1792xf32> to vector<32x128xf32>
    %cst_116 = arith.constant dense<0.000000e+00> : vector<32x128xf32>
    %181 = tpu.matmul %180, %0, %cst_116 {dimension_numbers = #tpu.dot_dimension_numbers<[1], [0], [0], [1], [0, 0, 1, 1], [], []>} : vector<32x128xf32>, vector<128x128xf32>, vector<32x128xf32> -> vector<32x128xf32>
    %182 = arith.addf %179, %181 : vector<32x128xf32>
    %183 = vector.extract_strided_slice %126 {offsets = [0, 768], sizes = [32, 128], strides = [1, 1]} : vector<32x1792xf32> to vector<32x128xf32>
    %cst_117 = arith.constant dense<0.000000e+00> : vector<32x128xf32>
    %184 = tpu.matmul %182, %0, %cst_117 {dimension_numbers = #tpu.dot_dimension_numbers<[1], [0], [0], [1], [0, 0, 1, 1], [], []>} : vector<32x128xf32>, vector<128x128xf32>, vector<32x128xf32> -> vector<32x128xf32>
    %185 = arith.addf %183, %184 : vector<32x128xf32>
    %c0_118 = arith.constant 0 : index
    %c768 = arith.constant 768 : index
    %186 = vector.load %arg26[%c0_118, %c768] : memref<32x1792xf32, #tpu.memory_space<vmem>>, vector<32x128xf32>
    tpu.vector_store %arg26[%c0_118, %c768], %185 {strides = array<i32>} : memref<32x1792xf32, #tpu.memory_space<vmem>>, vector<32x128xf32>,
    %187 = vector.extract_strided_slice %128 {offsets = [0, 896], sizes = [32, 128], strides = [1, 1]} : vector<32x1792xf32> to vector<32x128xf32>
    %188 = vector.extract_strided_slice %130 {offsets = [0, 896], sizes = [32, 128], strides = [1, 1]} : vector<32x1792xf32> to vector<32x128xf32>
    %cst_119 = arith.constant dense<0.000000e+00> : vector<32x128xf32>
    %189 = tpu.matmul %188, %0, %cst_119 {dimension_numbers = #tpu.dot_dimension_numbers<[1], [0], [0], [1], [0, 0, 1, 1], [], []>} : vector<32x128xf32>, vector<128x128xf32>, vector<32x128xf32> -> vector<32x128xf32>
    %190 = arith.addf %187, %189 : vector<32x128xf32>
    %191 = vector.extract_strided_slice %126 {offsets = [0, 896], sizes = [32, 128], strides = [1, 1]} : vector<32x1792xf32> to vector<32x128xf32>
    %cst_120 = arith.constant dense<0.000000e+00> : vector<32x128xf32>
    %192 = tpu.matmul %190, %0, %cst_120 {dimension_numbers = #tpu.dot_dimension_numbers<[1], [0], [0], [1], [0, 0, 1, 1], [], []>} : vector<32x128xf32>, vector<128x128xf32>, vector<32x128xf32> -> vector<32x128xf32>
    %193 = arith.addf %191, %192 : vector<32x128xf32>
    %c0_121 = arith.constant 0 : index
    %c896 = arith.constant 896 : index
    %194 = vector.load %arg26[%c0_121, %c896] : memref<32x1792xf32, #tpu.memory_space<vmem>>, vector<32x128xf32>
    tpu.vector_store %arg26[%c0_121, %c896], %193 {strides = array<i32>} : memref<32x1792xf32, #tpu.memory_space<vmem>>, vector<32x128xf32>,
    %195 = vector.extract_strided_slice %128 {offsets = [0, 1024], sizes = [32, 128], strides = [1, 1]} : vector<32x1792xf32> to vector<32x128xf32>
    %196 = vector.extract_strided_slice %130 {offsets = [0, 1024], sizes = [32, 128], strides = [1, 1]} : vector<32x1792xf32> to vector<32x128xf32>
    %cst_122 = arith.constant dense<0.000000e+00> : vector<32x128xf32>
    %197 = tpu.matmul %196, %0, %cst_122 {dimension_numbers = #tpu.dot_dimension_numbers<[1], [0], [0], [1], [0, 0, 1, 1], [], []>} : vector<32x128xf32>, vector<128x128xf32>, vector<32x128xf32> -> vector<32x128xf32>
    %198 = arith.addf %195, %197 : vector<32x128xf32>
    %199 = vector.extract_strided_slice %126 {offsets = [0, 1024], sizes = [32, 128], strides = [1, 1]} : vector<32x1792xf32> to vector<32x128xf32>
    %cst_123 = arith.constant dense<0.000000e+00> : vector<32x128xf32>
    %200 = tpu.matmul %198, %0, %cst_123 {dimension_numbers = #tpu.dot_dimension_numbers<[1], [0], [0], [1], [0, 0, 1, 1], [], []>} : vector<32x128xf32>, vector<128x128xf32>, vector<32x128xf32> -> vector<32x128xf32>
    %201 = arith.addf %199, %200 : vector<32x128xf32>
    %c0_124 = arith.constant 0 : index
    %c1024 = arith.constant 1024 : index
    %202 = vector.load %arg26[%c0_124, %c1024] : memref<32x1792xf32, #tpu.memory_space<vmem>>, vector<32x128xf32>
    tpu.vector_store %arg26[%c0_124, %c1024], %201 {strides = array<i32>} : memref<32x1792xf32, #tpu.memory_space<vmem>>, vector<32x128xf32>,
    %203 = vector.extract_strided_slice %128 {offsets = [0, 1152], sizes = [32, 128], strides = [1, 1]} : vector<32x1792xf32> to vector<32x128xf32>
    %204 = vector.extract_strided_slice %130 {offsets = [0, 1152], sizes = [32, 128], strides = [1, 1]} : vector<32x1792xf32> to vector<32x128xf32>
    %cst_125 = arith.constant dense<0.000000e+00> : vector<32x128xf32>
    %205 = tpu.matmul %204, %0, %cst_125 {dimension_numbers = #tpu.dot_dimension_numbers<[1], [0], [0], [1], [0, 0, 1, 1], [], []>} : vector<32x128xf32>, vector<128x128xf32>, vector<32x128xf32> -> vector<32x128xf32>
    %206 = arith.addf %203, %205 : vector<32x128xf32>
    %207 = vector.extract_strided_slice %126 {offsets = [0, 1152], sizes = [32, 128], strides = [1, 1]} : vector<32x1792xf32> to vector<32x128xf32>
    %cst_126 = arith.constant dense<0.000000e+00> : vector<32x128xf32>
    %208 = tpu.matmul %206, %0, %cst_126 {dimension_numbers = #tpu.dot_dimension_numbers<[1], [0], [0], [1], [0, 0, 1, 1], [], []>} : vector<32x128xf32>, vector<128x128xf32>, vector<32x128xf32> -> vector<32x128xf32>
    %209 = arith.addf %207, %208 : vector<32x128xf32>
    %c0_127 = arith.constant 0 : index
    %c1152 = arith.constant 1152 : index
    %210 = vector.load %arg26[%c0_127, %c1152] : memref<32x1792xf32, #tpu.memory_space<vmem>>, vector<32x128xf32>
    tpu.vector_store %arg26[%c0_127, %c1152], %209 {strides = array<i32>} : memref<32x1792xf32, #tpu.memory_space<vmem>>, vector<32x128xf32>,
    %211 = vector.extract_strided_slice %128 {offsets = [0, 1280], sizes = [32, 128], strides = [1, 1]} : vector<32x1792xf32> to vector<32x128xf32>
    %212 = vector.extract_strided_slice %130 {offsets = [0, 1280], sizes = [32, 128], strides = [1, 1]} : vector<32x1792xf32> to vector<32x128xf32>
    %cst_128 = arith.constant dense<0.000000e+00> : vector<32x128xf32>
    %213 = tpu.matmul %212, %0, %cst_128 {dimension_numbers = #tpu.dot_dimension_numbers<[1], [0], [0], [1], [0, 0, 1, 1], [], []>} : vector<32x128xf32>, vector<128x128xf32>, vector<32x128xf32> -> vector<32x128xf32>
    %214 = arith.addf %211, %213 : vector<32x128xf32>
    %215 = vector.extract_strided_slice %126 {offsets = [0, 1280], sizes = [32, 128], strides = [1, 1]} : vector<32x1792xf32> to vector<32x128xf32>
    %cst_129 = arith.constant dense<0.000000e+00> : vector<32x128xf32>
    %216 = tpu.matmul %214, %0, %cst_129 {dimension_numbers = #tpu.dot_dimension_numbers<[1], [0], [0], [1], [0, 0, 1, 1], [], []>} : vector<32x128xf32>, vector<128x128xf32>, vector<32x128xf32> -> vector<32x128xf32>
    %217 = arith.addf %215, %216 : vector<32x128xf32>
    %c0_130 = arith.constant 0 : index
    %c1280 = arith.constant 1280 : index
    %218 = vector.load %arg26[%c0_130, %c1280] : memref<32x1792xf32, #tpu.memory_space<vmem>>, vector<32x128xf32>
    tpu.vector_store %arg26[%c0_130, %c1280], %217 {strides = array<i32>} : memref<32x1792xf32, #tpu.memory_space<vmem>>, vector<32x128xf32>,
    %219 = vector.extract_strided_slice %128 {offsets = [0, 1408], sizes = [32, 128], strides = [1, 1]} : vector<32x1792xf32> to vector<32x128xf32>
    %220 = vector.extract_strided_slice %130 {offsets = [0, 1408], sizes = [32, 128], strides = [1, 1]} : vector<32x1792xf32> to vector<32x128xf32>
    %cst_131 = arith.constant dense<0.000000e+00> : vector<32x128xf32>
    %221 = tpu.matmul %220, %0, %cst_131 {dimension_numbers = #tpu.dot_dimension_numbers<[1], [0], [0], [1], [0, 0, 1, 1], [], []>} : vector<32x128xf32>, vector<128x128xf32>, vector<32x128xf32> -> vector<32x128xf32>
    %222 = arith.addf %219, %221 : vector<32x128xf32>
    %223 = vector.extract_strided_slice %126 {offsets = [0, 1408], sizes = [32, 128], strides = [1, 1]} : vector<32x1792xf32> to vector<32x128xf32>
    %cst_132 = arith.constant dense<0.000000e+00> : vector<32x128xf32>
    %224 = tpu.matmul %222, %0, %cst_132 {dimension_numbers = #tpu.dot_dimension_numbers<[1], [0], [0], [1], [0, 0, 1, 1], [], []>} : vector<32x128xf32>, vector<128x128xf32>, vector<32x128xf32> -> vector<32x128xf32>
    %225 = arith.addf %223, %224 : vector<32x128xf32>
    %c0_133 = arith.constant 0 : index
    %c1408 = arith.constant 1408 : index
    %226 = vector.load %arg26[%c0_133, %c1408] : memref<32x1792xf32, #tpu.memory_space<vmem>>, vector<32x128xf32>
    tpu.vector_store %arg26[%c0_133, %c1408], %225 {strides = array<i32>} : memref<32x1792xf32, #tpu.memory_space<vmem>>, vector<32x128xf32>,
    %227 = vector.extract_strided_slice %128 {offsets = [0, 1536], sizes = [32, 128], strides = [1, 1]} : vector<32x1792xf32> to vector<32x128xf32>
    %228 = vector.extract_strided_slice %130 {offsets = [0, 1536], sizes = [32, 128], strides = [1, 1]} : vector<32x1792xf32> to vector<32x128xf32>
    %cst_134 = arith.constant dense<0.000000e+00> : vector<32x128xf32>
    %229 = tpu.matmul %228, %0, %cst_134 {dimension_numbers = #tpu.dot_dimension_numbers<[1], [0], [0], [1], [0, 0, 1, 1], [], []>} : vector<32x128xf32>, vector<128x128xf32>, vector<32x128xf32> -> vector<32x128xf32>
    %230 = arith.addf %227, %229 : vector<32x128xf32>
    %231 = vector.extract_strided_slice %126 {offsets = [0, 1536], sizes = [32, 128], strides = [1, 1]} : vector<32x1792xf32> to vector<32x128xf32>
    %cst_135 = arith.constant dense<0.000000e+00> : vector<32x128xf32>
    %232 = tpu.matmul %230, %0, %cst_135 {dimension_numbers = #tpu.dot_dimension_numbers<[1], [0], [0], [1], [0, 0, 1, 1], [], []>} : vector<32x128xf32>, vector<128x128xf32>, vector<32x128xf32> -> vector<32x128xf32>
    %233 = arith.addf %231, %232 : vector<32x128xf32>
    %c0_136 = arith.constant 0 : index
    %c1536 = arith.constant 1536 : index
    %234 = vector.load %arg26[%c0_136, %c1536] : memref<32x1792xf32, #tpu.memory_space<vmem>>, vector<32x128xf32>
    tpu.vector_store %arg26[%c0_136, %c1536], %233 {strides = array<i32>} : memref<32x1792xf32, #tpu.memory_space<vmem>>, vector<32x128xf32>,
    %235 = vector.extract_strided_slice %128 {offsets = [0, 1664], sizes = [32, 128], strides = [1, 1]} : vector<32x1792xf32> to vector<32x128xf32>
    %236 = vector.extract_strided_slice %130 {offsets = [0, 1664], sizes = [32, 128], strides = [1, 1]} : vector<32x1792xf32> to vector<32x128xf32>
    %cst_137 = arith.constant dense<0.000000e+00> : vector<32x128xf32>
    %237 = tpu.matmul %236, %0, %cst_137 {dimension_numbers = #tpu.dot_dimension_numbers<[1], [0], [0], [1], [0, 0, 1, 1], [], []>} : vector<32x128xf32>, vector<128x128xf32>, vector<32x128xf32> -> vector<32x128xf32>
    %238 = arith.addf %235, %237 : vector<32x128xf32>
    %239 = vector.extract_strided_slice %126 {offsets = [0, 1664], sizes = [32, 128], strides = [1, 1]} : vector<32x1792xf32> to vector<32x128xf32>
    %cst_138 = arith.constant dense<0.000000e+00> : vector<32x128xf32>
    %240 = tpu.matmul %238, %0, %cst_138 {dimension_numbers = #tpu.dot_dimension_numbers<[1], [0], [0], [1], [0, 0, 1, 1], [], []>} : vector<32x128xf32>, vector<128x128xf32>, vector<32x128xf32> -> vector<32x128xf32>
    %241 = arith.addf %239, %240 : vector<32x128xf32>
    %c0_139 = arith.constant 0 : index
    %c1664 = arith.constant 1664 : index
    %242 = vector.load %arg26[%c0_139, %c1664] : memref<32x1792xf32, #tpu.memory_space<vmem>>, vector<32x128xf32>
    tpu.vector_store %arg26[%c0_139, %c1664], %241 {strides = array<i32>} : memref<32x1792xf32, #tpu.memory_space<vmem>>, vector<32x128xf32>,
    %c0_140 = arith.constant 0 : index
    %c0_141 = arith.constant 0 : index
    %243 = vector.load %arg26[%c0_140, %c0_141] : memref<32x1792xf32, #tpu.memory_space<vmem>>, vector<32x1792xf32>
    %c0_142 = arith.constant 0 : index
    %c0_143 = arith.constant 0 : index
    %244 = vector.load %arg14[%c0_142, %c0_143] : memref<32x1xf32, #tpu.memory_space<vmem>>, vector<32x1xf32>
    %245 = vector.broadcast %244 : vector<32x1xf32> to vector<32x1792xf32>
    %246 = arith.addf %243, %245 : vector<32x1792xf32>
    %cst_144 = arith.constant 0.000000e+00 : f32
    %247 = vector.broadcast %cst_144 : f32 to vector<32x1792xf32>
    %248 = arith.maximumf %246, %247 : vector<32x1792xf32>
    %249 = vector.extract_strided_slice %8 {offsets = [0, 768], sizes = [32, 1792], strides = [1, 1]} : vector<32x2560xf32> to vector<32x1792xf32>
    %250 = arith.addf %248, %249 : vector<32x1792xf32>
    %c0_145 = arith.constant 0 : index
    %c0_146 = arith.constant 0 : index
    %c0_147 = arith.constant 0 : index
    %251 = vector.load %arg15[%c0_145, %c0_146, %c0_147] : memref<7x32x32xf32, #tpu.memory_space<vmem>>, vector<1x32x32xf32>
    %252 = vector.shape_cast %251 : vector<1x32x32xf32> to vector<32x32xf32>
    %253 = vector.extract_strided_slice %250 {offsets = [0, 0], sizes = [32, 256], strides = [1, 1]} : vector<32x1792xf32> to vector<32x256xf32>
    %cst_148 = arith.constant dense<0.000000e+00> : vector<32x256xf32>
    %254 = tpu.matmul %252, %253, %cst_148 {dimension_numbers = #tpu.dot_dimension_numbers<[1], [0], [0], [1], [0, 0, 1, 1], [], []>} : vector<32x32xf32>, vector<32x256xf32>, vector<32x256xf32> -> vector<32x256xf32>
    %c1_149 = arith.constant 1 : index
    %c0_150 = arith.constant 0 : index
    %c0_151 = arith.constant 0 : index
    %255 = vector.load %arg15[%c1_149, %c0_150, %c0_151] : memref<7x32x32xf32, #tpu.memory_space<vmem>>, vector<1x32x32xf32>
    %256 = vector.shape_cast %255 : vector<1x32x32xf32> to vector<32x32xf32>
    %257 = vector.extract_strided_slice %250 {offsets = [0, 256], sizes = [32, 256], strides = [1, 1]} : vector<32x1792xf32> to vector<32x256xf32>
    %cst_152 = arith.constant dense<0.000000e+00> : vector<32x256xf32>
    %258 = tpu.matmul %256, %257, %cst_152 {dimension_numbers = #tpu.dot_dimension_numbers<[1], [0], [0], [1], [0, 0, 1, 1], [], []>} : vector<32x32xf32>, vector<32x256xf32>, vector<32x256xf32> -> vector<32x256xf32>
    %259 = arith.addf %254, %258 : vector<32x256xf32>
    %c2_153 = arith.constant 2 : index
    %c0_154 = arith.constant 0 : index
    %c0_155 = arith.constant 0 : index
    %260 = vector.load %arg15[%c2_153, %c0_154, %c0_155] : memref<7x32x32xf32, #tpu.memory_space<vmem>>, vector<1x32x32xf32>
    %261 = vector.shape_cast %260 : vector<1x32x32xf32> to vector<32x32xf32>
    %262 = vector.extract_strided_slice %250 {offsets = [0, 512], sizes = [32, 256], strides = [1, 1]} : vector<32x1792xf32> to vector<32x256xf32>
    %cst_156 = arith.constant dense<0.000000e+00> : vector<32x256xf32>
    %263 = tpu.matmul %261, %262, %cst_156 {dimension_numbers = #tpu.dot_dimension_numbers<[1], [0], [0], [1], [0, 0, 1, 1], [], []>} : vector<32x32xf32>, vector<32x256xf32>, vector<32x256xf32> -> vector<32x256xf32>
    %264 = arith.addf %259, %263 : vector<32x256xf32>
    %c3_157 = arith.constant 3 : index
    %c0_158 = arith.constant 0 : index
    %c0_159 = arith.constant 0 : index
    %265 = vector.load %arg15[%c3_157, %c0_158, %c0_159] : memref<7x32x32xf32, #tpu.memory_space<vmem>>, vector<1x32x32xf32>
    %266 = vector.shape_cast %265 : vector<1x32x32xf32> to vector<32x32xf32>
    %267 = vector.extract_strided_slice %250 {offsets = [0, 768], sizes = [32, 256], strides = [1, 1]} : vector<32x1792xf32> to vector<32x256xf32>
    %cst_160 = arith.constant dense<0.000000e+00> : vector<32x256xf32>
    %268 = tpu.matmul %266, %267, %cst_160 {dimension_numbers = #tpu.dot_dimension_numbers<[1], [0], [0], [1], [0, 0, 1, 1], [], []>} : vector<32x32xf32>, vector<32x256xf32>, vector<32x256xf32> -> vector<32x256xf32>
    %269 = arith.addf %264, %268 : vector<32x256xf32>
    %c4_161 = arith.constant 4 : index
    %c0_162 = arith.constant 0 : index
    %c0_163 = arith.constant 0 : index
    %270 = vector.load %arg15[%c4_161, %c0_162, %c0_163] : memref<7x32x32xf32, #tpu.memory_space<vmem>>, vector<1x32x32xf32>
    %271 = vector.shape_cast %270 : vector<1x32x32xf32> to vector<32x32xf32>
    %272 = vector.extract_strided_slice %250 {offsets = [0, 1024], sizes = [32, 256], strides = [1, 1]} : vector<32x1792xf32> to vector<32x256xf32>
    %cst_164 = arith.constant dense<0.000000e+00> : vector<32x256xf32>
    %273 = tpu.matmul %271, %272, %cst_164 {dimension_numbers = #tpu.dot_dimension_numbers<[1], [0], [0], [1], [0, 0, 1, 1], [], []>} : vector<32x32xf32>, vector<32x256xf32>, vector<32x256xf32> -> vector<32x256xf32>
    %274 = arith.addf %269, %273 : vector<32x256xf32>
    %c5_165 = arith.constant 5 : index
    %c0_166 = arith.constant 0 : index
    %c0_167 = arith.constant 0 : index
    %275 = vector.load %arg15[%c5_165, %c0_166, %c0_167] : memref<7x32x32xf32, #tpu.memory_space<vmem>>, vector<1x32x32xf32>
    %276 = vector.shape_cast %275 : vector<1x32x32xf32> to vector<32x32xf32>
    %277 = vector.extract_strided_slice %250 {offsets = [0, 1280], sizes = [32, 256], strides = [1, 1]} : vector<32x1792xf32> to vector<32x256xf32>
    %cst_168 = arith.constant dense<0.000000e+00> : vector<32x256xf32>
    %278 = tpu.matmul %276, %277, %cst_168 {dimension_numbers = #tpu.dot_dimension_numbers<[1], [0], [0], [1], [0, 0, 1, 1], [], []>} : vector<32x32xf32>, vector<32x256xf32>, vector<32x256xf32> -> vector<32x256xf32>
    %279 = arith.addf %274, %278 : vector<32x256xf32>
    %c6_169 = arith.constant 6 : index
    %c0_170 = arith.constant 0 : index
    %c0_171 = arith.constant 0 : index
    %280 = vector.load %arg15[%c6_169, %c0_170, %c0_171] : memref<7x32x32xf32, #tpu.memory_space<vmem>>, vector<1x32x32xf32>
    %281 = vector.shape_cast %280 : vector<1x32x32xf32> to vector<32x32xf32>
    %282 = vector.extract_strided_slice %250 {offsets = [0, 1536], sizes = [32, 256], strides = [1, 1]} : vector<32x1792xf32> to vector<32x256xf32>
    %cst_172 = arith.constant dense<0.000000e+00> : vector<32x256xf32>
    %283 = tpu.matmul %281, %282, %cst_172 {dimension_numbers = #tpu.dot_dimension_numbers<[1], [0], [0], [1], [0, 0, 1, 1], [], []>} : vector<32x32xf32>, vector<32x256xf32>, vector<32x256xf32> -> vector<32x256xf32>
    %284 = arith.addf %279, %283 : vector<32x256xf32>
    %c0_173 = arith.constant 0 : index
    %c0_174 = arith.constant 0 : index
    %285 = vector.load %arg16[%c0_173, %c0_174] : memref<32x1xf32, #tpu.memory_space<vmem>>, vector<32x1xf32>
    %286 = vector.broadcast %285 : vector<32x1xf32> to vector<32x256xf32>
    %287 = arith.addf %284, %286 : vector<32x256xf32>
    %c0_175 = arith.constant 0 : index
    %c0_176 = arith.constant 0 : index
    %c0_177 = arith.constant 0 : index
    %288 = vector.load %arg17[%c0_175, %c0_176, %c0_177] : memref<2x32x32xf32, #tpu.memory_space<vmem>>, vector<1x32x32xf32>
    %289 = vector.shape_cast %288 : vector<1x32x32xf32> to vector<32x32xf32>
    %290 = vector.extract_strided_slice %287 {offsets = [0, 0], sizes = [32, 128], strides = [1, 1]} : vector<32x256xf32> to vector<32x128xf32>
    %cst_178 = arith.constant dense<0.000000e+00> : vector<32x128xf32>
    %291 = tpu.matmul %289, %290, %cst_178 {dimension_numbers = #tpu.dot_dimension_numbers<[1], [0], [0], [1], [0, 0, 1, 1], [], []>} : vector<32x32xf32>, vector<32x128xf32>, vector<32x128xf32> -> vector<32x128xf32>
    %292 = arith.addf %124, %291 : vector<32x128xf32>
    %c1_179 = arith.constant 1 : index
    %c0_180 = arith.constant 0 : index
    %c0_181 = arith.constant 0 : index
    %293 = vector.load %arg17[%c1_179, %c0_180, %c0_181] : memref<2x32x32xf32, #tpu.memory_space<vmem>>, vector<1x32x32xf32>
    %294 = vector.shape_cast %293 : vector<1x32x32xf32> to vector<32x32xf32>
    %295 = vector.extract_strided_slice %287 {offsets = [0, 128], sizes = [32, 128], strides = [1, 1]} : vector<32x256xf32> to vector<32x128xf32>
    %cst_182 = arith.constant dense<0.000000e+00> : vector<32x128xf32>
    %296 = tpu.matmul %294, %295, %cst_182 {dimension_numbers = #tpu.dot_dimension_numbers<[1], [0], [0], [1], [0, 0, 1, 1], [], []>} : vector<32x32xf32>, vector<32x128xf32>, vector<32x128xf32> -> vector<32x128xf32>
    %297 = arith.addf %292, %296 : vector<32x128xf32>
    %c0_183 = arith.constant 0 : index
    %c0_184 = arith.constant 0 : index
    %298 = vector.load %arg18[%c0_183, %c0_184] : memref<32x1xf32, #tpu.memory_space<vmem>>, vector<32x1xf32>
    %299 = vector.broadcast %298 : vector<32x1xf32> to vector<32x128xf32>
    %300 = arith.addf %297, %299 : vector<32x128xf32>
    %c0_185 = arith.constant 0 : index
    %c0_186 = arith.constant 0 : index
    %301 = vector.load %arg19[%c0_185, %c0_186] : memref<32x32xf32, #tpu.memory_space<vmem>>, vector<32x32xf32>
    %cst_187 = arith.constant dense<0.000000e+00> : vector<32x256xf32>
    %302 = tpu.matmul %301, %287, %cst_187 {dimension_numbers = #tpu.dot_dimension_numbers<[1], [0], [0], [1], [0, 0, 1, 1], [], []>} : vector<32x32xf32>, vector<32x256xf32>, vector<32x256xf32> -> vector<32x256xf32>
    %c0_188 = arith.constant 0 : index
    %c0_189 = arith.constant 0 : index
    %303 = vector.load %arg20[%c0_188, %c0_189] : memref<32x32xf32, #tpu.memory_space<vmem>>, vector<32x32xf32>
    %cst_190 = arith.constant dense<0.000000e+00> : vector<32x256xf32>
    %304 = tpu.matmul %303, %287, %cst_190 {dimension_numbers = #tpu.dot_dimension_numbers<[1], [0], [0], [1], [0, 0, 1, 1], [], []>} : vector<32x32xf32>, vector<32x256xf32>, vector<32x256xf32> -> vector<32x256xf32>
    %c0_191 = arith.constant 0 : index
    %c0_192 = arith.constant 0 : index
    %305 = vector.load %arg21[%c0_191, %c0_192] : memref<32x32xf32, #tpu.memory_space<vmem>>, vector<32x32xf32>
    %cst_193 = arith.constant dense<0.000000e+00> : vector<32x256xf32>
    %306 = tpu.matmul %305, %287, %cst_193 {dimension_numbers = #tpu.dot_dimension_numbers<[1], [0], [0], [1], [0, 0, 1, 1], [], []>} : vector<32x32xf32>, vector<32x256xf32>, vector<32x256xf32> -> vector<32x256xf32>
    %307 = vector.extract_strided_slice %304 {offsets = [0, 0], sizes = [32, 128], strides = [1, 1]} : vector<32x256xf32> to vector<32x128xf32>
    %308 = vector.extract_strided_slice %306 {offsets = [0, 0], sizes = [32, 128], strides = [1, 1]} : vector<32x256xf32> to vector<32x128xf32>
    %cst_194 = arith.constant dense<0.000000e+00> : vector<32x128xf32>
    %309 = tpu.matmul %308, %0, %cst_194 {dimension_numbers = #tpu.dot_dimension_numbers<[1], [0], [0], [1], [0, 0, 1, 1], [], []>} : vector<32x128xf32>, vector<128x128xf32>, vector<32x128xf32> -> vector<32x128xf32>
    %310 = arith.addf %307, %309 : vector<32x128xf32>
    %311 = vector.extract_strided_slice %302 {offsets = [0, 0], sizes = [32, 128], strides = [1, 1]} : vector<32x256xf32> to vector<32x128xf32>
    %cst_195 = arith.constant dense<0.000000e+00> : vector<32x128xf32>
    %312 = tpu.matmul %310, %0, %cst_195 {dimension_numbers = #tpu.dot_dimension_numbers<[1], [0], [0], [1], [0, 0, 1, 1], [], []>} : vector<32x128xf32>, vector<128x128xf32>, vector<32x128xf32> -> vector<32x128xf32>
    %313 = arith.addf %311, %312 : vector<32x128xf32>
    %c0_196 = arith.constant 0 : index
    %c0_197 = arith.constant 0 : index
    %314 = vector.load %arg26[%c0_196, %c0_197] : memref<32x1792xf32, #tpu.memory_space<vmem>>, vector<32x128xf32>
    tpu.vector_store %arg26[%c0_196, %c0_197], %313 {strides = array<i32>} : memref<32x1792xf32, #tpu.memory_space<vmem>>, vector<32x128xf32>,
    %315 = vector.extract_strided_slice %304 {offsets = [0, 128], sizes = [32, 128], strides = [1, 1]} : vector<32x256xf32> to vector<32x128xf32>
    %316 = vector.extract_strided_slice %306 {offsets = [0, 128], sizes = [32, 128], strides = [1, 1]} : vector<32x256xf32> to vector<32x128xf32>
    %cst_198 = arith.constant dense<0.000000e+00> : vector<32x128xf32>
    %317 = tpu.matmul %316, %0, %cst_198 {dimension_numbers = #tpu.dot_dimension_numbers<[1], [0], [0], [1], [0, 0, 1, 1], [], []>} : vector<32x128xf32>, vector<128x128xf32>, vector<32x128xf32> -> vector<32x128xf32>
    %318 = arith.addf %315, %317 : vector<32x128xf32>
    %319 = vector.extract_strided_slice %302 {offsets = [0, 128], sizes = [32, 128], strides = [1, 1]} : vector<32x256xf32> to vector<32x128xf32>
    %cst_199 = arith.constant dense<0.000000e+00> : vector<32x128xf32>
    %320 = tpu.matmul %318, %0, %cst_199 {dimension_numbers = #tpu.dot_dimension_numbers<[1], [0], [0], [1], [0, 0, 1, 1], [], []>} : vector<32x128xf32>, vector<128x128xf32>, vector<32x128xf32> -> vector<32x128xf32>
    %321 = arith.addf %319, %320 : vector<32x128xf32>
    %c0_200 = arith.constant 0 : index
    %c128_201 = arith.constant 128 : index
    %322 = vector.load %arg26[%c0_200, %c128_201] : memref<32x1792xf32, #tpu.memory_space<vmem>>, vector<32x128xf32>
    tpu.vector_store %arg26[%c0_200, %c128_201], %321 {strides = array<i32>} : memref<32x1792xf32, #tpu.memory_space<vmem>>, vector<32x128xf32>,
    %c0_202 = arith.constant 0 : index
    %c0_203 = arith.constant 0 : index
    %323 = vector.load %arg26[%c0_202, %c0_203] : memref<32x1792xf32, #tpu.memory_space<vmem>>, vector<32x256xf32>
    %c0_204 = arith.constant 0 : index
    %c0_205 = arith.constant 0 : index
    %324 = vector.load %arg22[%c0_204, %c0_205] : memref<32x1xf32, #tpu.memory_space<vmem>>, vector<32x1xf32>
    %325 = vector.broadcast %324 : vector<32x1xf32> to vector<32x256xf32>
    %326 = arith.addf %323, %325 : vector<32x256xf32>
    %cst_206 = arith.constant 0.000000e+00 : f32
    %327 = vector.broadcast %cst_206 : f32 to vector<32x256xf32>
    %328 = arith.maximumf %326, %327 : vector<32x256xf32>
    %329 = vector.extract_strided_slice %250 {offsets = [0, 1536], sizes = [32, 256], strides = [1, 1]} : vector<32x1792xf32> to vector<32x256xf32>
    %330 = arith.addf %328, %329 : vector<32x256xf32>
    %c0_207 = arith.constant 0 : index
    %c0_208 = arith.constant 0 : index
    %c0_209 = arith.constant 0 : index
    %331 = vector.load %arg23[%c0_207, %c0_208, %c0_209] : memref<2x32x32xf32, #tpu.memory_space<vmem>>, vector<1x32x32xf32>
    %332 = vector.shape_cast %331 : vector<1x32x32xf32> to vector<32x32xf32>
    %333 = vector.extract_strided_slice %330 {offsets = [0, 0], sizes = [32, 128], strides = [1, 1]} : vector<32x256xf32> to vector<32x128xf32>
    %cst_210 = arith.constant dense<0.000000e+00> : vector<32x128xf32>
    %334 = tpu.matmul %332, %333, %cst_210 {dimension_numbers = #tpu.dot_dimension_numbers<[1], [0], [0], [1], [0, 0, 1, 1], [], []>} : vector<32x32xf32>, vector<32x128xf32>, vector<32x128xf32> -> vector<32x128xf32>
    %335 = arith.addf %300, %334 : vector<32x128xf32>
    %c1_211 = arith.constant 1 : index
    %c0_212 = arith.constant 0 : index
    %c0_213 = arith.constant 0 : index
    %336 = vector.load %arg23[%c1_211, %c0_212, %c0_213] : memref<2x32x32xf32, #tpu.memory_space<vmem>>, vector<1x32x32xf32>
    %337 = vector.shape_cast %336 : vector<1x32x32xf32> to vector<32x32xf32>
    %338 = vector.extract_strided_slice %330 {offsets = [0, 128], sizes = [32, 128], strides = [1, 1]} : vector<32x256xf32> to vector<32x128xf32>
    %cst_214 = arith.constant dense<0.000000e+00> : vector<32x128xf32>
    %339 = tpu.matmul %337, %338, %cst_214 {dimension_numbers = #tpu.dot_dimension_numbers<[1], [0], [0], [1], [0, 0, 1, 1], [], []>} : vector<32x32xf32>, vector<32x128xf32>, vector<32x128xf32> -> vector<32x128xf32>
    %340 = arith.addf %335, %339 : vector<32x128xf32>
    %c0_215 = arith.constant 0 : index
    %c0_216 = arith.constant 0 : index
    %341 = vector.load %arg24[%c0_215, %c0_216] : memref<32x1xf32, #tpu.memory_space<vmem>>, vector<32x1xf32>
    %342 = vector.broadcast %341 : vector<32x1xf32> to vector<32x128xf32>
    %343 = arith.addf %340, %342 : vector<32x128xf32>
    %c0_217 = arith.constant 0 : index
    %c0_218 = arith.constant 0 : index
    %344 = vector.load %arg25[%c0_217, %c0_218] : memref<32x128xf32, #tpu.memory_space<vmem>>, vector<32x128xf32>
    tpu.vector_store %arg25[%c0_217, %c0_218], %343 {strides = array<i32>} : memref<32x128xf32, #tpu.memory_space<vmem>>, vector<32x128xf32>,
    return
  }
}

</mosaic_0001>

<bundles_post_ra>
// kernel: st_encoder_forward.1
= control target key start
LH: loop header
LB: loop body
LE: loop exit
PB: predicated region body
PF: predicated region fallthrough
CT: control target
= control target key end

     0   :  { %vm454_vm0 = vcmask 1043456   ;;  %v16477_v0 = vmov 0   ;;  %vm441_vm1 = vcmask 162816   ;;  %v22883_v18 = vmov 0.0   ;;  %s22846_s4 = inlined_call_operand.vmem [shape: f32[32,1], index: 4, kind: input, shape index: {}]   ;;  %s22847_s3 = inlined_call_operand.vmem [shape: f32[32,1], index: 3, kind: input, shape index: {}]   ;;  %s22848_s1 = inlined_call_operand.vmem [shape: f32[20,128], index: 1, kind: input, shape index: {}]   ;;  %s22849_s5 = inlined_call_operand.vmem [shape: f32[32,20], index: 5, kind: input, shape index: {}]   ;;  %s22850_s8 = inlined_call_operand.vmem [shape: f32[32,1], index: 8, kind: input, shape index: {}]   ;;  %s22851_s14 = inlined_call_operand.vmem [shape: f32[32,1], index: 14, kind: input, shape index: {}]   ;;  %s22852_s0 = inlined_call_operand.vmem [shape: f32[1,2560], index: 0, kind: input, shape index: {}]   ;;  %s22853_s16 = inlined_call_operand.vmem [shape: f32[32,1], index: 16, kind: input, shape index: {}]   ;;  %s22854_s22 = inlined_call_operand.vmem [shape: f32[32,1], index: 22, kind: input, shape index: {}]   ;;  %s22855_s6 = inlined_call_operand.vmem [shape: f32[32,1], index: 6, kind: input, shape index: {}]   ;;  %s22856_s10 = inlined_call_operand.vmem [shape: f32[32,1], index: 10, kind: input, shape index: {}]   ;;  %s22857_s18 = inlined_call_operand.vmem [shape: f32[32,1], index: 18, kind: input, shape index: {}]   ;;  %s22858_s24 = inlined_call_operand.vmem [shape: f32[32,1], index: 24, kind: input, shape index: {}]   ;;  %s22859_s7 = inlined_call_operand.vmem [shape: f32[7,32,32], index: 7, kind: input, shape index: {}]   ;;  %s22860_s9 = inlined_call_operand.vmem [shape: f32[14,32,32], index: 9, kind: input, shape index: {}]   ;;  %s22861_s11 = inlined_call_operand.vmem [shape: f32[32,32], index: 11, kind: input, shape index: {}]   ;;  %s22862_s12 = inlined_call_operand.vmem [shape: f32[32,32], index: 12, kind: input, shape index: {}]   ;;  %s22863_s13 = inlined_call_operand.vmem [shape: f32[32,32], index: 13, kind: input, shape index: {}]   ;;  %s22864_s2 = inlined_call_operand.vmem [shape: f32[128,128], index: 2, kind: input, shape index: {}]   ;;  %s22865_s15 = inlined_call_operand.vmem [shape: f32[7,32,32], index: 15, kind: input, shape index: {}]   ;;  %s22866_s17 = inlined_call_operand.vmem [shape: f32[2,32,32], index: 17, kind: input, shape index: {}]   ;;  %s22867_s19 = inlined_call_operand.vmem [shape: f32[32,32], index: 19, kind: input, shape index: {}]   ;;  %s22868_s20 = inlined_call_operand.vmem [shape: f32[32,32], index: 20, kind: input, shape index: {}]   ;;  %s22869_s21 = inlined_call_operand.vmem [shape: f32[32,32], index: 21, kind: input, shape index: {}]   ;;  %s22870_s23 = inlined_call_operand.vmem [shape: f32[2,32,32], index: 23, kind: input, shape index: {}]   ;;  %s22871_s25 = inlined_call_operand.vmem [shape: f32[32,128], index: 25, kind: output, shape index: {}]  }
   0x1   :  { %23063 = sst [smem:[#allocation235_spill]] %s22846_s4  ;;  %16428 = vset.pattern.permute.xlu1 %v16477_v0  ;;  %16427 = vset.pattern.permute.xlu0 %v16477_v0  ;;  %v126_v20 = vlaneseq  ;;  %v6866_v45 = vld [vmem:[%s22856_s10] sm:$0xff]  ;;  %v6867_v47 = vld [vmem:[%s22856_s10 + $0x8] sm:$0xff]  ;;  %v6868_v48 = vld [vmem:[%s22856_s10 + $0x10] sm:$0xff]  ;;  %vm552_vm2 = vcmask 261120  }
   0x2   :  { %23064 = sst [smem:[#allocation236_spill]] %s22847_s3  ;;  %629 = vmatprep.mubr.f32.mxu1 %v22883_v18  ;;  %v6869_v50 = vld [vmem:[%s22856_s10 + $0x18] sm:$0xff]  ;;  %v12631_v51 = vld [vmem:[%s22857_s18] sm:$0xff]  ;;  %v12632_v52 = vld [vmem:[%s22857_s18 + $0x8] sm:$0xff] }
   0x3   :  { %23065 = sst [smem:[#allocation237_spill]] %s22848_s1  ;;  %v16675_v23 = vshrl.u32 %v126_v20, 7  ;;  %v12633_v53 = vld [vmem:[%s22857_s18 + $0x10] sm:$0xff]  ;;  %v12634_v54 = vld [vmem:[%s22857_s18 + $0x18] sm:$0xff]  ;;  %v13605_v56 = vld [vmem:[%s22858_s24] sm:$0xff] }
   0x4   :  { %23066 = sst [smem:[#allocation238_spill]] %s22849_s5  ;;  %v13606_v57 = vld [vmem:[%s22858_s24 + $0x8] sm:$0xff]  ;;  %v13607_v59 = vld [vmem:[%s22858_s24 + $0x10] sm:$0xff]  ;;  %v13608_v60 = vld [vmem:[%s22858_s24 + $0x18] sm:$0xff] }
   0x5   :  { %23067 = sst [smem:[#allocation239_spill]] %s22850_s8  ;;  %v156_v26 = vsub.s32 7, %v16675_v23  ;;  %v16716_v36 = vsub.s32 0, %v16675_v23  ;;  %v132_v46 = vsub.s32 1, %v16675_v23  ;;  %v136_v55 = vsub.s32 2, %v16675_v23 }
   0x6   :  { %23068 = sst [smem:[#allocation240_spill]] %s22851_s14  ;;  %v144_v61 = vsub.s32 4, %v16675_v23  ;;  %v16796_v63 = vsub.s32 3, %v16675_v23  ;;  %v22882_v20 = vsub.s32 5, %v16675_v23 }
   0x7   :  { %23069 = sst [smem:[#allocation241_spill]] %s22852_s0 }
   0x8   :  { %23070 = sst [smem:[#allocation242_spill]] %s22853_s16 }
   0x9   :  { %23071 = sst [smem:[#allocation243_spill]] %s22854_s22 }
   0xa   :  { %23072 = sst [smem:[#allocation244_spill]] %s22855_s6 }
   0xb   :  { %s23073_s4 = sld [smem:[#allocation235_spill]] }
   0xc   :  { %s23074_s5 = sld [smem:[#allocation236_spill]] }
   0xd   :  { %s23075_s22 = sld [smem:[#allocation237_spill]] }
   0xe   :  { %s23076_s0 = sld [smem:[#allocation238_spill]] }
   0xf   :  { %s23077_s8 = sld [smem:[#allocation239_spill]] }
  0x10   :  { %s23078_s16 = sld [smem:[#allocation240_spill]] }
  0x11   :  { %v309_v1 = vld [vmem:[%s23073_s4 + $0x18] sm:$0xff]  ;;  %v308_v10 = vld [vmem:[%s23073_s4 + $0x10] sm:$0xff]  ;;  %v307_v14 = vld [vmem:[%s23073_s4 + $0x8] sm:$0xff]  ;;  %s23080_s1 = sld [smem:[#allocation242_spill]] }
  0x12   :  { %v99_v2 = vld [vmem:[%s23074_s5 + $0x18] sm:$0xff]  ;;  %327 = vperm.xlu1 %16428, %v309_v1   ;;  %v98_v5 = vld [vmem:[%s23074_s5 + $0x10] sm:$0xff]  ;;  %v97_v7 = vld [vmem:[%s23074_s5 + $0x8] sm:$0xff]  ;;  %s23082_s27 = sld [smem:[#allocation244_spill]] }
  0x13   :  { %v416_v3 = vld [vmem:[%s23075_s22 + $0x10] sm:$0xf]  ;;  %120 = vperm.xlu0 %16427, %v99_v2   ;;  %v415_v4 = vld [vmem:[%s23075_s22 + $0x8] sm:$0xff]  ;;  %v414_v8 = vld [vmem:[%s23075_s22] sm:$0xff] }
  0x14   :  { %14937 = vmatprep.subr.msk.mxu0 %vm454_vm0, %v416_v3  ;;  %v410_v6 = vld [vmem:[%s23076_s0] sm:$0xff]  ;;  %v411_v9 = vld [vmem:[%s23076_s0 + $0x8] sm:$0xff]  ;;  %v412_v11 = vld [vmem:[%s23076_s0 + $0x10] sm:$0xff] }
  0x15   :  { %14938 = vmatpush3.msk.msra.mxu0 %vm454_vm0, %v416_v3  ;;  %14943 = vmatprep.mubr.msk.f32.mxu0 %vm441_vm1, %v410_v6  ;;  %v96_v12 = vld [vmem:[%s23074_s5] sm:$0xff]  ;;  %v413_v13 = vld [vmem:[%s23076_s0 + $0x18] sm:$0xff]  ;;  %v5305_v17 = vld [vmem:[%s23077_s8 + $0x10] sm:$0xff] }
  0x16   :  { %14939 = vmatprep.subr.mxu0 %v415_v4  ;;  %110 = vperm.xlu1 %16428, %v97_v7   ;;  %v306_v15 = vld [vmem:[%s23073_s4] sm:$0xff]  ;;  %v5306_v16 = vld [vmem:[%s23077_s8 + $0x18] sm:$0xff]  ;;  %v5304_v19 = vld [vmem:[%s23077_s8 + $0x8] sm:$0xff]  ;;  %s23079_s4 = sld [smem:[#allocation241_spill]] }
  0x17   :  { %14940 = vmatpush3.msra.mxu0 %v415_v4  ;;  %115 = vperm.xlu0 %16427, %v98_v5   ;;  %v5303_v21 = vld [vmem:[%s23077_s8] sm:$0xff]  ;;  %v11418_v22 = vld [vmem:[%s23078_s16 + $0x18] sm:$0xff]  ;;  %v11417_v24 = vld [vmem:[%s23078_s16 + $0x10] sm:$0xff]  ;;  %s23081_s8 = sld [smem:[#allocation243_spill]] }
  0x18   :  { %14941 = vmatprep.subr.mxu0 %v414_v8  ;;  %v11416_v25 = vld [vmem:[%s23078_s16 + $0x8] sm:$0xff]  ;;  %v11415_v27 = vld [vmem:[%s23078_s16] sm:$0xff]  ;;  %v12391_v29 = vld [vmem:[%s23080_s1 + $0x18] sm:$0xff] }
  0x19   :  { %14942 = vmatpush3.msra.mxu0 %v414_v8  ;;  %v12390_v31 = vld [vmem:[%s23080_s1 + $0x10] sm:$0xff]  ;;  %v12389_v32 = vld [vmem:[%s23080_s1 + $0x8] sm:$0xff]  ;;  %v12388_v33 = vld [vmem:[%s23080_s1] sm:$0xff] }
  0x1a   :  { %14944 = vmatmul.mubr.msk.f32.vlgmr.msra.gmra.mxu0 %vm441_vm1, %v411_v9  ;;  %105 = vperm.xlu1 %16428, %v96_v12   ;;  %v417_v41 = vld [vmem:[%s23082_s27] sm:$0xff]  ;;  %v418_v42 = vld [vmem:[%s23082_s27 + $0x8] sm:$0xff]  ;;  %v419_v43 = vld [vmem:[%s23082_s27 + $0x10] sm:$0xff] }
  0x1b   :  { %322 = vperm.xlu0 %16427, %v308_v10   ;;  %14946 = vmatprep.mubr.msk.f32.mxu0 %vm441_vm1, %v412_v11  ;;  %v420_v44 = vld [vmem:[%s23082_s27 + $0x18] sm:$0xff]  ;;  %v152_v10 = vsub.s32 6, %v16675_v23 }
  0x1c   :  { %v16690_v28 = vld [vmem:[%s23079_s4 + $0x8] sm:$0xff]  ;;  %v16724_v38 = vld [vmem:[%s23079_s4 + $0x10] sm:$0xf]  ;;  %v16793_v62 = vld [vmem:[%s23079_s4] sm:$0xff] }
  0x1d   :  { %v16698_v30 = vrot.slane %v16690_v28, %v156_v26  ;;  %v13349_v34 = vld [vmem:[%s23081_s8 + $0x18] sm:$0xff]  ;;  %v13348_v35 = vld [vmem:[%s23081_s8 + $0x10] sm:$0xff]  ;;  %v13347_v37 = vld [vmem:[%s23081_s8 + $0x8] sm:$0xff]  ;;  %v16731_v40 = vrot.slane %v16724_v38, %v16716_v36  ;;  %v16756_v49 = vrot.slane %v16724_v38, %v132_v46  ;;  %v16781_v58 = vrot.slane %v16724_v38, %v136_v55 }
  0x1e   :  { %14947 = vmatmul.mubr.msk.f32.gmra.mxu0 %vm441_vm1, %v413_v13  ;;  %312 = vperm.xlu1 %16428, %v306_v15   ;;  %v13346_v39 = vld [vmem:[%s23081_s8] sm:$0xff]  ;;  %v137_v0 = vrot.slane %v16793_v62, %v136_v55  ;;  %v145_v1 = vrot.slane %v16793_v62, %v144_v61  ;;  %v133_v2 = vrot.slane %v16793_v62, %v132_v46 }
  0x1f   :  { %317 = vperm.xlu0 %16427, %v307_v14   ;;  %718 = vmatprep.mubr.f32.mxu0 %v22883_v18  ;;  %v141_v3 = vrot.slane %v16793_v62, %v16796_v63 }
  0x22   :  { %5319 = vperm.xlu1 %16428, %v5305_v17   ;;  %v16831_v17 = vrot.slane %v16690_v28, %v136_v55 }
  0x23   :  { %5324 = vperm.xlu0 %16427, %v5306_v16  }
  0x26   :  { %5309 = vperm.xlu1 %16428, %v5303_v21  }
  0x27   :  { %5314 = vperm.xlu0 %16427, %v5304_v19   ;;  %v16836_v19 = vrot.slane %v16793_v62, %v152_v10 }
  0x2a   :  { %11431 = vperm.xlu1 %16428, %v11417_v24  }
  0x2b   :  { %11436 = vperm.xlu0 %16427, %v11418_v22  }
  0x2e   :  { %11421 = vperm.xlu1 %16428, %v11415_v27   ;;  %v16844_v27 = vrot.slane %v16690_v28, %v144_v61 }
  0x2f   :  { %11426 = vperm.xlu0 %16427, %v11416_v25  }
  0x32   :  { %12404 = vperm.xlu1 %16428, %v12390_v31   ;;  %v16851_v31 = vrot.slane %v16690_v28, %v16796_v63 }
  0x33   :  { %12409 = vperm.xlu0 %16427, %v12391_v29   ;;  %v16847_v29 = vrot.slane %v16690_v28, %v132_v46 }
  0x36   :  { %12394 = vperm.xlu1 %16428, %v12388_v33   ;;  %v16857_v33 = vrot.slane %v16690_v28, %v16716_v36 }
  0x37   :  { %12399 = vperm.xlu0 %16427, %v12389_v32  }
  0x3a   :  { %13362 = vperm.xlu1 %16428, %v13348_v35  }
  0x3b   :  { %13367 = vperm.xlu0 %16427, %v13349_v34  }
  0x3e   :  { %13352 = vperm.xlu1 %16428, %v13346_v39  }
  0x3f   :  { %13357 = vperm.xlu0 %16427, %v13347_v37  }
  0x42   :  { %428 = vperm.xlu1 %16428, %v418_v42  }
  0x43   :  { %423 = vperm.xlu0 %16427, %v417_v41  }
  0x46   :  { %438 = vperm.xlu1 %16428, %v420_v44   ;;  %v16879_v44 = vrot.slane %v16793_v62, %v22882_v20 }
  0x47   :  { %433 = vperm.xlu0 %16427, %v419_v43  }
  0x4a   :  { %6877 = vperm.xlu1 %16428, %v6867_v47  }
  0x4b   :  { %6872 = vperm.xlu0 %16427, %v6866_v45   ;;  %v16884_v45 = vrot.slane %v16793_v62, %v156_v26 }
  0x4e   :  { %6887 = vperm.xlu1 %16428, %v6869_v50  }
  0x4f   :  { %6882 = vperm.xlu0 %16427, %v6868_v48  }
  0x52   :  { %12642 = vperm.xlu1 %16428, %v12632_v52  }
  0x53   :  { %12637 = vperm.xlu0 %16427, %v12631_v51  }
  0x56   :  { %12652 = vperm.xlu1 %16428, %v12634_v54  }
  0x57   :  { %12647 = vperm.xlu0 %16427, %v12633_v53  }
  0x5a   :  { %13616 = vperm.xlu1 %16428, %v13606_v57  }
  0x5b   :  { %13611 = vperm.xlu0 %16427, %v13605_v56  }
  0x5e   :  { %13626 = vperm.xlu1 %16428, %v13608_v60  }
  0x5f   :  { %13621 = vperm.xlu0 %16427, %v13607_v59  }
  0x8d   :  { %v16803_v4 = vpop.permute.xlu1 %327 }
  0x8e   :  { %v16805_v5 = vpop.permute.xlu0 %120 }
  0x8f   :  { %v288_v6 = vmul.f32 %v137_v0, %v16805_v5  ;;  %v290_v7 = vmul.f32 %v145_v1, %v16805_v5  ;;  %v287_v8 = vmul.f32 %v133_v2, %v16805_v5  ;;  %v289_v9 = vmul.f32 %v141_v3, %v16805_v5 }
  0x90   :  { %v292_v43 = vmul.f32 %v16836_v19, %v16805_v5  ;;  %v294_v52 = vmul.f32 %v16857_v33, %v16805_v5  ;;  %v291_v61 = vmul.f32 %v16879_v44, %v16805_v5 }
  0x91   :  { %v16813_v11 = vadd.f32 %v16803_v4, %v288_v6  ;;  %v16816_v12 = vadd.f32 %v16803_v4, %v290_v7  ;;  %v16819_v13 = vadd.f32 %v16803_v4, %v287_v8  ;;  %v16824_v15 = vadd.f32 %v16803_v4, %v289_v9  ;;  %v16826_v16 = vpop.permute.xlu1 %110  ;;  %v16941_v8 = vld [vmem:[%s22859_s7 + $0x20] sm:$0xff] }
  0x92   :  { %v16821_v14 = vpop.permute.xlu0 %115  ;;  %v248_v42 = vmul.f32 %v137_v0, %v16826_v16  ;;  %v250_v46 = vmul.f32 %v145_v1, %v16826_v16  ;;  %v247_v47 = vmul.f32 %v133_v2, %v16826_v16  ;;  %v249_v48 = vmul.f32 %v141_v3, %v16826_v16 }
  0x93   :  { %589 = vmatprep.subr.mxu1 %v16813_v11  ;;  %678 = vmatprep.subr.mxu0 %v16816_v12  ;;  %v268_v21 = vmul.f32 %v137_v0, %v16821_v14  ;;  %v270_v22 = vmul.f32 %v145_v1, %v16821_v14  ;;  %v267_v24 = vmul.f32 %v133_v2, %v16821_v14 }
  0x94   :  { %590 = vmatpush1.msra.mxu1 %v16819_v13  ;;  %679 = vmatpush1.msra.mxu0 %v16824_v15  ;;  %v269_v25 = vmul.f32 %v141_v3, %v16821_v14  ;;  %v16945_v9 = vrot.slane %v16724_v38, %v16796_v63  ;;  %v16962_v38 = vadd.f32 %v16803_v4, %v291_v61 }
  0x95   :  { %v16859_v34 = vpop.permute.xlu1 %105  ;;  %v272_v63 = vmul.f32 %v16836_v19, %v16821_v14  ;;  %v254_v61 = vmul.f32 %v16857_v33, %v16826_v16 }
  0x96   :  { %v16853_v32 = vpop.permute.xlu0 %322  ;;  %v228_v51 = vmul.f32 %v137_v0, %v16859_v34  ;;  %v230_v26 = vmul.f32 %v145_v1, %v16859_v34  ;;  %v227_v59 = vmul.f32 %v133_v2, %v16859_v34  ;;  %v229_v60 = vmul.f32 %v141_v3, %v16859_v34  ;;  %23090 = vst [vmem:[#allocation10_spill] sm:$0xff] %v16962_v38 }
  0x97   :  { %v16862_v35 = vadd.f32 %v16853_v32, %v268_v21  ;;  %v16865_v37 = vadd.f32 %v16853_v32, %v270_v22  ;;  %v16868_v39 = vadd.f32 %v16853_v32, %v267_v24  ;;  %v16871_v41 = vadd.f32 %v16853_v32, %v269_v25 }
  0x98   :  { %v16918_v0 = vrot.slane %v16690_v28, %v152_v10  ;;  %v293_v2 = vmul.f32 %v16884_v45, %v16805_v5  ;;  %v16949_v10 = vmul.f32 %v16831_v17, %v16805_v5  ;;  %v16954_v21 = vadd.f32 %v16803_v4, %v292_v43 }
  0x99   :  { %591 = vmatprep.subr.mxu1 %v16862_v35  ;;  %680 = vmatprep.subr.mxu0 %v16865_v37  ;;  %v16899_v53 = vpop.permute.xlu1 %312  ;;  %v16957_v22 = vadd.f32 %v16803_v4, %v294_v52  ;;  %v274_v24 = vmul.f32 %v16857_v33, %v16821_v14  ;;  %v273_v43 = vmul.f32 %v16884_v45, %v16821_v14 }
  0x9a   :  { %v16891_v50 = vpop.permute.xlu0 %317  ;;  %592 = vmatpush1.msra.mxu1 %v16868_v39  ;;  %681 = vmatpush1.msra.mxu0 %v16871_v41  ;;  %v16923_v1 = vadd.f32 %v16899_v53, %v228_v51  ;;  %v16926_v6 = vadd.f32 %v16899_v53, %v230_v26  ;;  %v16933_v3 = vadd.f32 %v16899_v53, %v227_v59  ;;  %v17004_v59 = vld [vmem:[%s22859_s7 + $0x28] sm:$0xff] }
  0x9b   :  { %v16902_v54 = vadd.f32 %v16891_v50, %v248_v42  ;;  %v16905_v55 = vadd.f32 %v16891_v50, %v250_v46  ;;  %v16908_v56 = vadd.f32 %v16891_v50, %v247_v47  ;;  %v16911_v57 = vadd.f32 %v16891_v50, %v249_v48  ;;  %23088 = vst [vmem:[#allocation8_spill] sm:$0xff] %v16954_v21 }
  0x9c   :  { %23085 = vst [vmem:[#allocation5_spill] sm:$0xff] %v16923_v1  ;;  %23086 = vst [vmem:[#allocation6_spill] sm:$0xff] %v16926_v6  ;;  %v16936_v7 = vadd.f32 %v16899_v53, %v229_v60  ;;  %v16973_v25 = vadd.f32 %v16803_v4, %v293_v2  ;;  %v271_v42 = vmul.f32 %v16879_v44, %v16821_v14 }
  0x9d   :  { %23083 = vst [vmem:[#allocation3_spill] sm:$0xff] %v16902_v54  ;;  %23084 = vst [vmem:[#allocation4_spill] sm:$0xff] %v16905_v55  ;;  %593 = vmatprep.subr.mxu1 %v16902_v54  ;;  %682 = vmatprep.subr.mxu0 %v16905_v55  ;;  %v16982_v46 = vadd.f32 %v16853_v32, %v272_v63  ;;  %v16985_v47 = vadd.f32 %v16853_v32, %v274_v24 }
  0x9e   :  { %594 = vmatpush1.msra.mxu1 %v16908_v56  ;;  %683 = vmatpush1.msra.mxu0 %v16911_v57  ;;  %23087 = vst [vmem:[#allocation7_spill] sm:$0xff] %v16936_v7  ;;  %23089 = vst [vmem:[#allocation9_spill] sm:$0xff] %v16957_v22  ;;  %v252_v48 = vmul.f32 %v16836_v19, %v16826_v16  ;;  %v295_v51 = vmul.f32 %v16847_v29, %v16805_v5 }
  0x9f   :  { %595 = vmatprep.subr.mxu1 %v16923_v1  ;;  %684 = vmatprep.subr.mxu0 %v16926_v6  ;;  %23091 = vst [vmem:[#allocation11_spill] sm:$0xff] %v16973_v25  ;;  %23092 = vst [vmem:[#allocation12_spill] sm:$0xff] %v16982_v46  ;;  %v16994_v26 = vadd.f32 %v16853_v32, %v271_v42  ;;  %v16997_v52 = vadd.f32 %v16853_v32, %v273_v43 }
  0xa0   :  { %596 = vmatpush1.msra.mxu1 %v16933_v3  ;;  %685 = vmatpush1.msra.mxu0 %v16936_v7  ;;  %23093 = vst [vmem:[#allocation13_spill] sm:$0xff] %v16985_v47  ;;  %v17007_v60 = vadd.f32 %v16891_v50, %v252_v48  ;;  %v251_v2 = vmul.f32 %v16879_v44, %v16826_v16 }
  0xa1   :  { %13650 = vmatmul.mubr.msk.f32.vlgmr.msra.gmra.mxu1 %vm552_vm2, %v16941_v8  ;;  %13654 = vmatmul.mubr.msk.f32.vlgmr.msra.gmra.mxu0 %vm552_vm2, %v16941_v8  ;;  %23094 = vst [vmem:[#allocation14_spill] sm:$0xff] %v16997_v52  ;;  %v253_v63 = vmul.f32 %v16884_v45, %v16826_v16  ;;  %v232_v24 = vmul.f32 %v16836_v19, %v16859_v34 }
  0xa2   :  { %767 = vmatprep.subr.mxu1 %v16954_v21  ;;  %856 = vmatprep.subr.mxu0 %v16957_v22  ;;  %23095 = vst [vmem:[#allocation15_spill] sm:$0xff] %v17007_v60  ;;  %v234_v42 = vmul.f32 %v16857_v33, %v16859_v34  ;;  %v17024_v43 = vadd.f32 %v16891_v50, %v254_v61 }
  0xa3   :  { %768 = vmatpush1.msra.mxu1 %v16962_v38  ;;  %857 = vmatpush1.msra.mxu0 %v16973_v25  ;;  %v17027_v48 = vadd.f32 %v16891_v50, %v251_v2  ;;  %v231_v20 = vmul.f32 %v16879_v44, %v16859_v34  ;;  %v17036_v19 = vadd.f32 %v16891_v50, %v253_v63 }
  0xa4   :  { %769 = vmatprep.subr.mxu1 %v16982_v46  ;;  %858 = vmatprep.subr.mxu0 %v16985_v47  ;;  %23096 = vst [vmem:[#allocation16_spill] sm:$0xff] %v17024_v43  ;;  %v17039_v33 = vadd.f32 %v16899_v53, %v232_v24  ;;  %v17042_v61 = vadd.f32 %v16899_v53, %v234_v42  ;;  %v23103_v47 = vmov 0.0  }
  0xa5   :  { %635 = vmatprep.mubr.f32.mxu1 %v22883_v18  ;;  %724 = vmatprep.mubr.f32.mxu0 %v22883_v18  ;;  %23097 = vst [vmem:[#allocation17_spill] sm:$0xff] %v17036_v19  ;;  %v233_v44 = vmul.f32 %v16884_v45, %v16859_v34  ;;  %v298_v2 = vmul.f32 %v16844_v27, %v16805_v5 }
  0xa6   :  { %770 = vmatpush1.msra.mxu1 %v16994_v26  ;;  %859 = vmatpush1.msra.mxu0 %v16997_v52  ;;  %23098 = vst [vmem:[#allocation18_spill] sm:$0xff] %v17039_v33  ;;  %23099 = vst [vmem:[#allocation19_spill] sm:$0xff] %v17042_v61  ;;  %v297_v63 = vmul.f32 %v16851_v31, %v16805_v5  ;;  %v276_v24 = vmul.f32 %v16831_v17, %v16821_v14 }
  0xa7   :  { %13651 = vmatmul.mubr.msk.f32.gmra.mxu1 %vm552_vm2, %v17004_v59  ;;  %13655 = vmatmul.mubr.msk.f32.gmra.mxu0 %vm552_vm2, %v17004_v59  ;;  %v275_v42 = vmul.f32 %v16847_v29, %v16821_v14  ;;  %v17057_v18 = vadd.f32 %v16803_v4, %v295_v51  ;;  %v256_v45 = vmul.f32 %v16831_v17, %v16826_v16  ;;  %v17074_v51 = vld [vmem:[%s22859_s7 + $0x30] sm:$0xff] }
  0xa8   :  { %771 = vmatprep.subr.mxu1 %v17007_v60  ;;  %860 = vmatprep.subr.mxu0 %v17024_v43  ;;  %v17066_v43 = vadd.f32 %v16899_v53, %v231_v20  ;;  %v17069_v60 = vadd.f32 %v16899_v53, %v233_v44  ;;  %v278_v20 = vmul.f32 %v16844_v27, %v16821_v14 }
  0xa9   :  { %23100 = vst [vmem:[#allocation20_spill] sm:$0xff] %v17057_v18  ;;  %772 = vmatpush1.msra.mxu1 %v17027_v48  ;;  %861 = vmatpush1.msra.mxu0 %v17036_v19  ;;  %v255_v19 = vmul.f32 %v16847_v29, %v16826_v16  ;;  %v17089_v44 = vadd.f32 %v16803_v4, %v298_v2 }
  0xaa   :  { %773 = vmatprep.subr.mxu1 %v17039_v33  ;;  %862 = vmatprep.subr.mxu0 %v17042_v61  ;;  %23101 = vst [vmem:[#allocation21_spill] sm:$0xff] %v17066_v43  ;;  %23102 = vst [vmem:[#allocation22_spill] sm:$0xff] %v17069_v60  ;;  %v17082_v61 = vadd.f32 %v16803_v4, %v16949_v10  ;;  %v17092_v33 = vadd.f32 %v16803_v4, %v297_v63  ;;  %v17114_v63 = vld [vmem:[%s22859_s7 + $0x38] sm:$0xff] }
  0xab   :  { %641 = vmatprep.mubr.f32.mxu1 %v23103_v47  ;;  %730 = vmatprep.mubr.f32.mxu0 %v23103_v47  ;;  %23105 = vst [vmem:[#allocation24_spill] sm:$0xff] %v17089_v44  ;;  %v17095_v46 = vadd.f32 %v16853_v32, %v276_v24  ;;  %v17102_v10 = vadd.f32 %v16853_v32, %v278_v20 }
  0xac   :  { %23104 = vst [vmem:[#allocation23_spill] sm:$0xff] %v17082_v61  ;;  %774 = vmatpush1.msra.mxu1 %v17066_v43  ;;  %863 = vmatpush1.msra.mxu0 %v17069_v60  ;;  %23106 = vst [vmem:[#allocation25_spill] sm:$0xff] %v17092_v33  ;;  %v17105_v60 = vadd.f32 %v16853_v32, %v275_v42  ;;  %v277_v2 = vmul.f32 %v16851_v31, %v16821_v14 }
  0xad   :  { %23107 = vst [vmem:[#allocation26_spill] sm:$0xff] %v17095_v46  ;;  %13652 = vmatmul.mubr.msk.f32.gmra.mxu1 %vm552_vm2, %v17074_v51  ;;  %13656 = vmatmul.mubr.msk.f32.gmra.mxu0 %vm552_vm2, %v17074_v51  ;;  %23108 = vst [vmem:[#allocation27_spill] sm:$0xff] %v17102_v10  ;;  %v17117_v24 = vadd.f32 %v16891_v50, %v256_v45  ;;  %v258_v20 = vmul.f32 %v16844_v27, %v16826_v16 }
  0xae   :  { %23109 = vst [vmem:[#allocation28_spill] sm:$0xff] %v17105_v60  ;;  %945 = vmatprep.subr.mxu1 %v17082_v61  ;;  %1034 = vmatprep.subr.mxu0 %v17089_v44  ;;  %v17122_v42 = vadd.f32 %v16891_v50, %v255_v19  ;;  %v257_v44 = vmul.f32 %v16851_v31, %v16826_v16 }
  0xaf   :  { %23110 = vst [vmem:[#allocation29_spill] sm:$0xff] %v17117_v24  ;;  %647 = vmatprep.mubr.f32.mxu1 %v23103_v47  ;;  %736 = vmatprep.mubr.f32.mxu0 %v23103_v47  ;;  %v236_v61 = vmul.f32 %v16831_v17, %v16859_v34  ;;  %v300_v45 = vmul.f32 %v16918_v0, %v16805_v5 }
  0xb0   :  { %23111 = vst [vmem:[#allocation30_spill] sm:$0xff] %v17122_v42  ;;  %v17133_v52 = vadd.f32 %v16853_v32, %v277_v2  ;;  %v238_v19 = vmul.f32 %v16844_v27, %v16859_v34  ;;  %v235_v22 = vmul.f32 %v16847_v29, %v16859_v34  ;;  %v237_v21 = vmul.f32 %v16851_v31, %v16859_v34 }
  0xb1   :  { %13653 = vmatmul.mubr.msk.f32.gmra.mxu1 %vm552_vm2, %v17114_v63  ;;  %13657 = vmatmul.mubr.msk.f32.gmra.mxu0 %vm552_vm2, %v17114_v63  ;;  %v17146_v17 = vadd.f32 %v16891_v50, %v258_v20  ;;  %v17149_v2 = vadd.f32 %v16891_v50, %v257_v44  ;;  %v17152_v27 = vadd.f32 %v16899_v53, %v236_v61 }
  0xb2   :  { %23112 = vst [vmem:[#allocation31_spill] sm:$0xff] %v17133_v52  ;;  %807 = vmatprep.mubr.f32.mxu1 %v23103_v47  ;;  %896 = vmatprep.mubr.f32.mxu0 %v23103_v47  ;;  %v17157_v29 = vadd.f32 %v16899_v53, %v238_v19  ;;  %v17160_v31 = vadd.f32 %v16899_v53, %v235_v22 }
  0xb3   :  { %23113 = vst [vmem:[#allocation32_spill] sm:$0xff] %v17146_v17  ;;  %23114 = vst [vmem:[#allocation33_spill] sm:$0xff] %v17149_v2  ;;  %v17163_v25 = vadd.f32 %v16899_v53, %v237_v21  ;;  %v17166_v20 = vadd.f32 %v16803_v4, %v300_v45  ;;  %v301_v61 = vmul.f32 %v16698_v30, %v16805_v5 }
  0xb4   :  { %23115 = vst [vmem:[#allocation34_spill] sm:$0xff] %v17152_v27  ;;  %23116 = vst [vmem:[#allocation35_spill] sm:$0xff] %v17157_v29  ;;  %v281_v44 = vmul.f32 %v16698_v30, %v16821_v14  ;;  %v261_v6 = vmul.f32 %v16698_v30, %v16826_v16  ;;  %v241_v19 = vmul.f32 %v16698_v30, %v16859_v34 }
  0xb5   :  { %23117 = vst [vmem:[#allocation36_spill] sm:$0xff] %v17160_v31  ;;  %23118 = vst [vmem:[#allocation37_spill] sm:$0xff] %v17163_v25  ;;  %v302_v22 = vmul.f32 %v16731_v40, %v16805_v5  ;;  %v282_v21 = vmul.f32 %v16731_v40, %v16821_v14  ;;  %v262_v45 = vmul.f32 %v16731_v40, %v16826_v16  ;;  %13658 = vmatmul.mubr.msk.f32.vlgmr.msra.gmra.mxu1 %vm552_vm2, %v16941_v8 }
  0xb6   :  { %23119 = vst [vmem:[#allocation38_spill] sm:$0xff] %v17166_v20  ;;  %13662 = vmatmul.mubr.msk.f32.vlgmr.msra.gmra.mxu0 %vm552_vm2, %v16941_v8  ;;  %v17187_v1 = vadd.f32 %v16803_v4, %v301_v61  ;;  %v17190_v30 = vadd.f32 %v16853_v32, %v281_v44  ;;  %v17193_v43 = vadd.f32 %v16891_v50, %v261_v6 }
  0xb7   :  { %946 = vmatpush1.msra.mxu1 %v17057_v18  ;;  %1035 = vmatpush1.msra.mxu0 %v17092_v33  ;;  %v17198_v7 = vadd.f32 %v16899_v53, %v241_v19  ;;  %v17201_v55 = vadd.f32 %v16803_v4, %v302_v22  ;;  %v17204_v54 = vadd.f32 %v16853_v32, %v282_v21 }
  0xb8   :  { %23120 = vst [vmem:[#allocation39_spill] sm:$0xff] %v17187_v1  ;;  %23121 = vst [vmem:[#allocation40_spill] sm:$0xff] %v17190_v30  ;;  %947 = vmatprep.subr.mxu1 %v17095_v46  ;;  %1036 = vmatprep.subr.mxu0 %v17102_v10  ;;  %v17209_v6 = vadd.f32 %v16891_v50, %v262_v45  ;;  %v242_v61 = vmul.f32 %v16731_v40, %v16859_v34 }
  0xb9   :  { %23122 = vst [vmem:[#allocation41_spill] sm:$0xff] %v17193_v43  ;;  %23123 = vst [vmem:[#allocation42_spill] sm:$0xff] %v17198_v7  ;;  %v303_v44 = vmul.f32 %v16756_v49, %v16805_v5  ;;  %948 = vmatpush1.msra.mxu1 %v17105_v60  ;;  %1037 = vmatpush1.msra.mxu0 %v17133_v52  ;;  %v283_v19 = vmul.f32 %v16756_v49, %v16821_v14 }
  0xba   :  { %23124 = vst [vmem:[#allocation43_spill] sm:$0xff] %v17201_v55  ;;  %23125 = vst [vmem:[#allocation44_spill] sm:$0xff] %v17204_v54  ;;  %v263_v22 = vmul.f32 %v16756_v49, %v16826_v16  ;;  %v243_v21 = vmul.f32 %v16756_v49, %v16859_v34  ;;  %813 = vmatprep.mubr.f32.mxu1 %v23103_v47  ;;  %902 = vmatprep.mubr.f32.mxu0 %v23103_v47 }
  0xbb   :  { %23126 = vst [vmem:[#allocation45_spill] sm:$0xff] %v17209_v6  ;;  %v17226_v40 = vadd.f32 %v16899_v53, %v242_v61  ;;  %v17229_v45 = vadd.f32 %v16803_v4, %v303_v44  ;;  %v304_v6 = vmul.f32 %v16781_v58, %v16805_v5  ;;  %949 = vmatprep.subr.mxu1 %v17117_v24 }
  0xbc   :  { %1038 = vmatprep.subr.mxu0 %v17146_v17  ;;  %v17236_v54 = vadd.f32 %v16853_v32, %v283_v19  ;;  %v17239_v49 = vadd.f32 %v16891_v50, %v263_v22  ;;  %v17242_v55 = vadd.f32 %v16899_v53, %v243_v21  ;;  %13659 = vmatmul.mubr.msk.f32.gmra.mxu1 %vm552_vm2, %v17004_v59 }
  0xbd   :  { %23127 = vst [vmem:[#allocation46_spill] sm:$0xff] %v17226_v40  ;;  %23128 = vst [vmem:[#allocation47_spill] sm:$0xff] %v17229_v45  ;;  %13663 = vmatmul.mubr.msk.f32.gmra.mxu0 %vm552_vm2, %v17004_v59  ;;  %v17249_v61 = vadd.f32 %v16803_v4, %v304_v6  ;;  %v284_v44 = vmul.f32 %v16781_v58, %v16821_v14  ;;  %v264_v19 = vmul.f32 %v16781_v58, %v16826_v16 }
  0xbe   :  { %23129 = vst [vmem:[#allocation48_spill] sm:$0xff] %v17236_v54  ;;  %23130 = vst [vmem:[#allocation49_spill] sm:$0xff] %v17239_v49  ;;  %950 = vmatpush1.msra.mxu1 %v17122_v42  ;;  %1039 = vmatpush1.msra.mxu0 %v17149_v2  ;;  %v244_v22 = vmul.f32 %v16781_v58, %v16859_v34  ;;  %v305_v21 = vmul.f32 %v16945_v9, %v16805_v5 }
  0xbf   :  { %23131 = vst [vmem:[#allocation50_spill] sm:$0xff] %v17242_v55  ;;  %23132 = vst [vmem:[#allocation51_spill] sm:$0xff] %v17249_v61  ;;  %v285_v6 = vmul.f32 %v16945_v9, %v16821_v14  ;;  %951 = vmatprep.subr.mxu1 %v17152_v27  ;;  %1040 = vmatprep.subr.mxu0 %v17157_v29  ;;  %v17266_v61 = vadd.f32 %v16853_v32, %v284_v44 }
  0xc0   :  { %v17269_v55 = vadd.f32 %v16891_v50, %v264_v19  ;;  %v265_v49 = vmul.f32 %v16945_v9, %v16826_v16  ;;  %952 = vmatpush1.msra.mxu1 %v17160_v31  ;;  %1041 = vmatpush1.msra.mxu0 %v17163_v25  ;;  %v17276_v58 = vadd.f32 %v16899_v53, %v244_v22 }
  0xc1   :  { %23133 = vst [vmem:[#allocation52_spill] sm:$0xff] %v17266_v61  ;;  %v17279_v54 = vadd.f32 %v16803_v4, %v305_v21  ;;  %v17282_v45 = vadd.f32 %v16853_v32, %v285_v6  ;;  %819 = vmatprep.mubr.f32.mxu1 %v23103_v47  ;;  %908 = vmatprep.mubr.f32.mxu0 %v23103_v47 }
  0xc2   :  { %23134 = vst [vmem:[#allocation53_spill] sm:$0xff] %v17269_v55  ;;  %23135 = vst [vmem:[#allocation54_spill] sm:$0xff] %v17276_v58  ;;  %v17287_v44 = vadd.f32 %v16891_v50, %v265_v49  ;;  %v245_v19 = vmul.f32 %v16945_v9, %v16859_v34  ;;  %v23139_v55 = vsub.s32 5, %v16675_v23  ;;  %1123 = vmatprep.subr.mxu1 %v17166_v20  ;;  %1224 = vmatprep.subr.mxu0 %v16819_v13 }
  0xc3   :  { %23136 = vst [vmem:[#allocation55_spill] sm:$0xff] %v17279_v54  ;;  %23137 = vst [vmem:[#allocation56_spill] sm:$0xff] %v17282_v45  ;;  %v129_v21 = vrot.slane %v16793_v62, %v16716_v36  ;;  %13660 = vmatmul.mubr.msk.f32.gmra.mxu1 %vm552_vm2, %v17074_v51  ;;  %13664 = vmatmul.mubr.msk.f32.gmra.mxu0 %vm552_vm2, %v17074_v51  ;;  %v280_v36 = vmul.f32 %v16918_v0, %v16821_v14  ;;  %v23166_v45 = vld [vmem:[#allocation23_spill] sm:$0xff]  ;;  %v23167_v54 = vld [vmem:[#allocation24_spill] sm:$0xff] }
  0xc4   :  { %23138 = vst [vmem:[#allocation57_spill] sm:$0xff] %v17287_v44  ;;  %v181_v22 = vrot.slane %v16690_v28, %v23139_v55  ;;  %v17303_v49 = vadd.f32 %v16899_v53, %v245_v19  ;;  %825 = vmatprep.mubr.f32.mxu1 %v23103_v47  ;;  %914 = vmatprep.mubr.f32.mxu0 %v23103_v47  ;;  %v23165_v44 = vld [vmem:[#allocation19_spill] sm:$0xff] }
  0xc5   :  { %v286_v28 = vmul.f32 %v129_v21, %v16805_v5  ;;  %v266_v55 = vmul.f32 %v129_v21, %v16821_v14  ;;  %v17328_v9 = vadd.f32 %v16853_v32, %v280_v36 }
  0xc6   :  { %23140 = vst [vmem:[#allocation58_spill] sm:$0xff] %v17303_v49  ;;  %v299_v23 = vmul.f32 %v181_v22, %v16805_v5  ;;  %v279_v5 = vmul.f32 %v181_v22, %v16821_v14  ;;  %v260_v14 = vmul.f32 %v16918_v0, %v16826_v16  ;;  %v239_v36 = vmul.f32 %v181_v22, %v16859_v34  ;;  %v23164_v49 = vld [vmem:[#allocation18_spill] sm:$0xff] }
  0xc7   :  { %13661 = vmatmul.mubr.msk.f32.gmra.mxu1 %vm552_vm2, %v17114_v63  ;;  %13665 = vmatmul.mubr.msk.f32.gmra.mxu0 %vm552_vm2, %v17114_v63  ;;  %v390_v13 = vadd.f32 %v16803_v4, %v286_v28  ;;  %23142 = vst [vmem:[#allocation60_spill] sm:$0xff] %v17328_v9  ;;  %v246_v28 = vmul.f32 %v129_v21, %v16826_v16 }
  0xc8   :  { %985 = vmatprep.mubr.f32.mxu1 %v23103_v47  ;;  %1074 = vmatprep.mubr.f32.mxu0 %v23103_v47  ;;  %v17318_v62 = vadd.f32 %v16803_v4, %v299_v23  ;;  %v17332_v6 = vadd.f32 %v16853_v32, %v279_v5  ;;  %v370_v4 = vadd.f32 %v16853_v32, %v266_v55  ;;  %v23152_v5 = vld [vmem:[#allocation5_spill] sm:$0xff]  ;;  %v23153_v55 = vld [vmem:[#allocation6_spill] sm:$0xff] }
  0xc9   :  { %v17341_v19 = vadd.f32 %v16891_v50, %v260_v14  ;;  %v259_v23 = vmul.f32 %v181_v22, %v16826_v16  ;;  %v240_v32 = vmul.f32 %v16918_v0, %v16859_v34  ;;  %v226_v16 = vmul.f32 %v129_v21, %v16859_v34  ;;  %v17391_v34 = vld [vmem:[%s22859_s7] sm:$0xff]  ;;  %v23151_v21 = vld [vmem:[#allocation21_spill] sm:$0xff]  ;;  %v17440_v14 = vld [vmem:[%s22859_s7 + $0x18] sm:$0xff] }
  0xca   :  { %23141 = vst [vmem:[#allocation59_spill] sm:$0xff] %v17318_v62  ;;  %23143 = vst [vmem:[#allocation61_spill] sm:$0xff] %v17332_v6 }
  0xcb   :  { %13666 = vmatmul.mubr.msk.f32.vlgmr.msra.gmra.mxu1 %vm552_vm2, %v16941_v8  ;;  %13670 = vmatmul.mubr.msk.f32.vlgmr.msra.gmra.mxu0 %vm552_vm2, %v16941_v8  ;;  %23144 = vst [vmem:[#allocation62_spill] sm:$0xff] %v17341_v19  ;;  %v17362_v0 = vadd.f32 %v16899_v53, %v240_v32  ;;  %v330_v22 = vadd.f32 %v16899_v53, %v226_v16  ;;  %v23159_v32 = vld [vmem:[#allocation13_spill] sm:$0xff]  ;;  %v23162_v16 = vld [vmem:[#allocation16_spill] sm:$0xff] }
  0xcc   :  { %1124 = vmatpush1.msra.mxu1 %v17318_v62  ;;  %1225 = vmatpush1.msra.mxu0 %v390_v13  ;;  %v350_v13 = vadd.f32 %v16891_v50, %v246_v28  ;;  %v23157_v28 = vld [vmem:[#allocation14_spill] sm:$0xff] }
  0xcd   :  { %1125 = vmatprep.subr.mxu1 %v17328_v9  ;;  %1226 = vmatprep.subr.mxu0 %v16868_v39  ;;  %v17353_v39 = vadd.f32 %v16891_v50, %v259_v23  ;;  %23146 = vst [vmem:[#allocation64_spill] sm:$0xff] %v17362_v0  ;;  %v17406_v50 = vld [vmem:[%s22859_s7 + $0x8] sm:$0xff]  ;;  %v23156_v23 = vld [vmem:[#allocation9_spill] sm:$0xff] }
  0xce   :  { %1126 = vmatpush1.msra.mxu1 %v17332_v6  ;;  %1227 = vmatpush1.msra.mxu0 %v370_v4  ;;  %v17425_v4 = vld [vmem:[%s22859_s7 + $0x10] sm:$0xff] }
  0xcf   :  { %991 = vmatprep.mubr.f32.mxu1 %v23103_v47  ;;  %1080 = vmatprep.mubr.f32.mxu0 %v23103_v47  ;;  %23145 = vst [vmem:[#allocation63_spill] sm:$0xff] %v17353_v39 }
  0xd0   :  { %1127 = vmatprep.subr.mxu1 %v17341_v19  ;;  %1228 = vmatprep.subr.mxu0 %v16908_v56  ;;  %v17366_v56 = vadd.f32 %v16899_v53, %v239_v36  ;;  %v23148_v53 = vld [vmem:[#allocation3_spill] sm:$0xff]  ;;  %v23160_v36 = vld [vmem:[#allocation17_spill] sm:$0xff] }
  0xd1   :  { %13667 = vmatmul.mubr.msk.f32.gmra.mxu1 %vm552_vm2, %v17004_v59  ;;  %13671 = vmatmul.mubr.msk.f32.gmra.mxu0 %vm552_vm2, %v17004_v59 }
  0xd2   :  { %1128 = vmatpush1.msra.mxu1 %v17353_v39  ;;  %1229 = vmatpush1.msra.mxu0 %v350_v13  ;;  %23147 = vst [vmem:[#allocation65_spill] sm:$0xff] %v17366_v56  ;;  %v23161_v13 = vld [vmem:[#allocation15_spill] sm:$0xff] }
  0xd3   :  { %1129 = vmatprep.subr.mxu1 %v17362_v0  ;;  %1230 = vmatprep.subr.mxu0 %v16933_v3  ;;  %v23149_v3 = vld [vmem:[#allocation4_spill] sm:$0xff] }
  0xd4   :  { %1130 = vmatpush1.msra.mxu1 %v17366_v56  ;;  %1231 = vmatpush1.msra.mxu0 %v330_v22  ;;  %v23163_v22 = vld [vmem:[#allocation22_spill] sm:$0xff] }
  0xd5   :  { %997 = vmatprep.mubr.f32.mxu1 %v23103_v47  ;;  %1086 = vmatprep.mubr.f32.mxu0 %v23103_v47 }
  0xd6   :  { %1313 = vmatprep.subr.mxu1 %v16824_v15  ;;  %1402 = vmatprep.subr.mxu0 %v16962_v38 }
  0xd7   :  { %13668 = vmatmul.mubr.msk.f32.gmra.mxu1 %vm552_vm2, %v17074_v51  ;;  %13672 = vmatmul.mubr.msk.f32.gmra.mxu0 %vm552_vm2, %v17074_v51 }
  0xd8   :  { %1003 = vmatprep.mubr.f32.mxu1 %v23103_v47  ;;  %1092 = vmatprep.mubr.f32.mxu0 %v23103_v47 }
  0xdb   :  { %13669 = vmatmul.mubr.msk.f32.gmra.mxu1 %vm552_vm2, %v17114_v63  ;;  %13673 = vmatmul.mubr.msk.f32.gmra.mxu0 %vm552_vm2, %v17114_v63 }
  0xdc   :  { %1163 = vmatprep.mubr.f32.mxu1 %v23103_v47  ;;  %1264 = vmatprep.mubr.f32.mxu0 %v23103_v47 }
  0xdf   :  { %13674 = vmatmul.mubr.msk.f32.vlgmr.msra.gmra.mxu1 %vm552_vm2, %v16941_v8  ;;  %13678 = vmatmul.mubr.msk.f32.vlgmr.msra.gmra.mxu0 %vm552_vm2, %v17391_v34  ;;  %v23150_v8 = vld [vmem:[#allocation7_spill] sm:$0xff] }
  0xe0   :  { %1314 = vmatpush1.msra.mxu1 %v16813_v11  ;;  %1403 = vmatpush1.msra.mxu0 %v16816_v12 }
  0xe1   :  { %1315 = vmatprep.subr.mxu1 %v16871_v41  ;;  %1404 = vmatprep.subr.mxu0 %v16994_v26 }
  0xe2   :  { %1316 = vmatpush1.msra.mxu1 %v16862_v35  ;;  %1405 = vmatpush1.msra.mxu0 %v16865_v37 }
  0xe3   :  { %1169 = vmatprep.mubr.f32.mxu1 %v23103_v47  ;;  %1270 = vmatprep.mubr.f32.mxu0 %v23103_v47 }
  0xe4   :  { %1317 = vmatprep.subr.mxu1 %v16911_v57  ;;  %1406 = vmatprep.subr.mxu0 %v17027_v48 }
  0xe5   :  { %13675 = vmatmul.mubr.msk.f32.gmra.mxu1 %vm552_vm2, %v17004_v59  ;;  %13679 = vmatmul.mubr.msk.f32.gmra.mxu0 %vm552_vm2, %v17406_v50  ;;  %v23154_v59 = vld [vmem:[#allocation11_spill] sm:$0xff] }
  0xe6   :  { %1318 = vmatpush1.msra.mxu1 %v23148_v53  ;;  %1407 = vmatpush1.msra.mxu0 %v23149_v3 }
  0xe7   :  { %1319 = vmatprep.subr.mxu1 %v23150_v8  ;;  %1408 = vmatprep.subr.mxu0 %v23151_v21 }
  0xe8   :  { %1320 = vmatpush1.msra.mxu1 %v23152_v5  ;;  %1409 = vmatpush1.msra.mxu0 %v23153_v55 }
  0xe9   :  { %1175 = vmatprep.mubr.f32.mxu1 %v23103_v47  ;;  %1276 = vmatprep.mubr.f32.mxu0 %v23103_v47 }
  0xea   :  { %1491 = vmatprep.subr.mxu1 %v23154_v59  ;;  %1580 = vmatprep.subr.mxu0 %v17057_v18 }
  0xeb   :  { %13676 = vmatmul.mubr.msk.f32.gmra.mxu1 %vm552_vm2, %v17074_v51  ;;  %13680 = vmatmul.mubr.msk.f32.gmra.mxu0 %vm552_vm2, %v17425_v4  ;;  %v23155_v51 = vld [vmem:[#allocation8_spill] sm:$0xff] }
  0xec   :  { %1181 = vmatprep.mubr.f32.mxu1 %v23103_v47  ;;  %1282 = vmatprep.mubr.f32.mxu0 %v23103_v47 }
  0xef   :  { %13677 = vmatmul.mubr.msk.f32.gmra.mxu1 %vm552_vm2, %v17114_v63  ;;  %13681 = vmatmul.mubr.msk.f32.gmra.mxu0 %vm552_vm2, %v17440_v14  ;;  %v23158_v63 = vld [vmem:[#allocation12_spill] sm:$0xff] }
  0xf0   :  { %1353 = vmatprep.mubr.f32.mxu1 %v23103_v47  ;;  %1442 = vmatprep.mubr.f32.mxu0 %v23103_v47 }
  0xf3   :  { %13682 = vmatmul.mubr.msk.f32.vlgmr.msra.gmra.mxu1 %vm552_vm2, %v17391_v34  ;;  %13686 = vmatmul.mubr.msk.f32.vlgmr.msra.gmra.mxu0 %vm552_vm2, %v17391_v34 }
  0xf4   :  { %1492 = vmatpush1.msra.mxu1 %v23155_v51  ;;  %1581 = vmatpush1.msra.mxu0 %v23156_v23 }
  0xf5   :  { %1493 = vmatprep.subr.mxu1 %v23157_v28  ;;  %1582 = vmatprep.subr.mxu0 %v17105_v60 }
  0xf6   :  { %1494 = vmatpush1.msra.mxu1 %v23158_v63  ;;  %1583 = vmatpush1.msra.mxu0 %v23159_v32 }
  0xf7   :  { %1359 = vmatprep.mubr.f32.mxu1 %v23103_v47  ;;  %1448 = vmatprep.mubr.f32.mxu0 %v23103_v47 }
  0xf8   :  { %1495 = vmatprep.subr.mxu1 %v23160_v36  ;;  %1584 = vmatprep.subr.mxu0 %v17122_v42 }
  0xf9   :  { %13683 = vmatmul.mubr.msk.f32.gmra.mxu1 %vm552_vm2, %v17406_v50  ;;  %13687 = vmatmul.mubr.msk.f32.gmra.mxu0 %vm552_vm2, %v17406_v50 }
  0xfa   :  { %1496 = vmatpush1.msra.mxu1 %v23161_v13  ;;  %1585 = vmatpush1.msra.mxu0 %v23162_v16 }
  0xfb   :  { %1497 = vmatprep.subr.mxu1 %v23163_v22  ;;  %1586 = vmatprep.subr.mxu0 %v17160_v31 }
  0xfc   :  { %1498 = vmatpush1.msra.mxu1 %v23164_v49  ;;  %1587 = vmatpush1.msra.mxu0 %v23165_v44 }
  0xfd   :  { %1365 = vmatprep.mubr.f32.mxu1 %v23103_v47  ;;  %1454 = vmatprep.mubr.f32.mxu0 %v23103_v47 }
  0xfe   :  { %1669 = vmatprep.subr.mxu1 %v17092_v33  ;;  %1758 = vmatprep.subr.mxu0 %v17318_v62 }
  0xff   :  { %13684 = vmatmul.mubr.msk.f32.gmra.mxu1 %vm552_vm2, %v17425_v4  ;;  %13688 = vmatmul.mubr.msk.f32.gmra.mxu0 %vm552_vm2, %v17425_v4 }
 0x100   :  { %1371 = vmatprep.mubr.f32.mxu1 %v23103_v47  ;;  %1460 = vmatprep.mubr.f32.mxu0 %v23103_v47 }
 0x103   :  { %13685 = vmatmul.mubr.msk.f32.gmra.mxu1 %vm552_vm2, %v17440_v14  ;;  %13689 = vmatmul.mubr.msk.f32.gmra.mxu0 %vm552_vm2, %v17440_v14 }
 0x104   :  { %1531 = vmatprep.mubr.f32.mxu1 %v23103_v47  ;;  %1620 = vmatprep.mubr.f32.mxu0 %v23103_v47 }
 0x107   :  { %13690 = vmatmul.mubr.msk.f32.vlgmr.msra.gmra.mxu1 %vm552_vm2, %v17391_v34  ;;  %13694 = vmatmul.mubr.msk.f32.vlgmr.msra.gmra.mxu0 %vm552_vm2, %v17391_v34 }
 0x108   :  { %1670 = vmatpush1.msra.mxu1 %v23166_v45  ;;  %1759 = vmatpush1.msra.mxu0 %v23167_v54 }
 0x109   :  { %1671 = vmatprep.subr.mxu1 %v17133_v52  ;;  %1760 = vmatprep.subr.mxu0 %v17332_v6 }
 0x10a   :  { %1672 = vmatpush1.msra.mxu1 %v17095_v46  ;;  %1761 = vmatpush1.msra.mxu0 %v17102_v10 }
 0x10b   :  { %1537 = vmatprep.mubr.f32.mxu1 %v23103_v47  ;;  %1626 = vmatprep.mubr.f32.mxu0 %v23103_v47 }
 0x10c   :  { %1673 = vmatprep.subr.mxu1 %v17149_v2  ;;  %1762 = vmatprep.subr.mxu0 %v17353_v39 }
 0x10d   :  { %13691 = vmatmul.mubr.msk.f32.gmra.mxu1 %vm552_vm2, %v17406_v50  ;;  %13695 = vmatmul.mubr.msk.f32.gmra.mxu0 %vm552_vm2, %v17406_v50 }
 0x10e   :  { %1674 = vmatpush1.msra.mxu1 %v17117_v24  ;;  %1763 = vmatpush1.msra.mxu0 %v17146_v17 }
 0x10f   :  { %1675 = vmatprep.subr.mxu1 %v17163_v25  ;;  %1764 = vmatprep.subr.mxu0 %v17366_v56 }
 0x110   :  { %1676 = vmatpush1.msra.mxu1 %v17152_v27  ;;  %1765 = vmatpush1.msra.mxu0 %v17157_v29 }
 0x111   :  { %1543 = vmatprep.mubr.f32.mxu1 %v23103_v47  ;;  %1632 = vmatprep.mubr.f32.mxu0 %v23103_v47 }
 0x112   :  { %1864 = vmatprep.subr.mxu1 %v16824_v15  ;;  %1953 = vmatprep.subr.mxu0 %v16962_v38 }
 0x113   :  { %13692 = vmatmul.mubr.msk.f32.gmra.mxu1 %vm552_vm2, %v17425_v4  ;;  %13696 = vmatmul.mubr.msk.f32.gmra.mxu0 %vm552_vm2, %v17425_v4 }
 0x114   :  { %1549 = vmatprep.mubr.f32.mxu1 %v23103_v47  ;;  %1638 = vmatprep.mubr.f32.mxu0 %v23103_v47 }
 0x117   :  { %13693 = vmatmul.mubr.msk.f32.gmra.mxu1 %vm552_vm2, %v17440_v14  ;;  %13697 = vmatmul.mubr.msk.f32.gmra.mxu0 %vm552_vm2, %v17440_v14 }
 0x118   :  { %1709 = vmatprep.mubr.f32.mxu1 %v23103_v47  ;;  %1798 = vmatprep.mubr.f32.mxu0 %v23103_v47 }
 0x11b   :  { %13698 = vmatmul.mubr.msk.f32.vlgmr.msra.gmra.mxu1 %vm552_vm2, %v17391_v34  ;;  %13702 = vmatmul.mubr.msk.f32.vlgmr.msra.gmra.mxu0 %vm552_vm2, %v17391_v34  ;;  %v17605_v34 = vld [vmem:[%s22859_s7 + $0x50] sm:$0xff] }
 0x11c   :  { %1865 = vmatpush1.msra.mxu1 %v16813_v11  ;;  %1954 = vmatpush1.msra.mxu0 %v16816_v12  ;;  %v17571_v11 = vld [vmem:[%s22859_s7 + $0x40] sm:$0xff] }
 0x11d   :  { %1866 = vmatprep.subr.mxu1 %v16871_v41  ;;  %1955 = vmatprep.subr.mxu0 %v16994_v26 }
 0x11e   :  { %1867 = vmatpush1.msra.mxu1 %v16862_v35  ;;  %1956 = vmatpush1.msra.mxu0 %v16865_v37  ;;  %v17586_v35 = vld [vmem:[%s22859_s7 + $0x48] sm:$0xff] }
 0x11f   :  { %1715 = vmatprep.mubr.f32.mxu1 %v23103_v47  ;;  %1804 = vmatprep.mubr.f32.mxu0 %v23103_v47 }
 0x120   :  { %1868 = vmatprep.subr.mxu1 %v16911_v57  ;;  %1957 = vmatprep.subr.mxu0 %v17027_v48 }
 0x121   :  { %13699 = vmatmul.mubr.msk.f32.gmra.mxu1 %vm552_vm2, %v17406_v50  ;;  %13703 = vmatmul.mubr.msk.f32.gmra.mxu0 %vm552_vm2, %v17406_v50  ;;  %v17620_v50 = vld [vmem:[%s22859_s7 + $0x58] sm:$0xff] }
 0x122   :  { %1869 = vmatpush1.msra.mxu1 %v23148_v53  ;;  %1958 = vmatpush1.msra.mxu0 %v23149_v3  ;;  %v17668_v53 = vpop.f32.mrf.mxu0 }
 0x123   :  { %1870 = vmatprep.subr.mxu1 %v23150_v8  ;;  %1959 = vmatprep.subr.mxu0 %v23151_v21  ;;  %23168 = vst [vmem:[#allocation3_spill] sm:$0xff] %v17668_v53 }
 0x124   :  { %1871 = vmatpush1.msra.mxu1 %v23152_v5  ;;  %1960 = vmatpush1.msra.mxu0 %v23153_v55  ;;  %v17676_v5 = vpop.f32.mrf.mxu0 }
 0x125   :  { %1721 = vmatprep.mubr.f32.mxu1 %v23103_v47  ;;  %1810 = vmatprep.mubr.f32.mxu0 %v23103_v47  ;;  %23169 = vst [vmem:[#allocation4_spill] sm:$0xff] %v17676_v5 }
 0x126   :  { %2042 = vmatprep.subr.mxu1 %v23154_v59  ;;  %2131 = vmatprep.subr.mxu0 %v17057_v18 }
 0x127   :  { %13700 = vmatmul.mubr.msk.f32.gmra.mxu1 %vm552_vm2, %v17425_v4  ;;  %13704 = vmatmul.mubr.msk.f32.gmra.mxu0 %vm552_vm2, %v17425_v4  ;;  %v17686_v4 = vpop.f32.mrf.mxu0 }
 0x128   :  { %1727 = vmatprep.mubr.f32.mxu1 %v23103_v47  ;;  %1816 = vmatprep.mubr.f32.mxu0 %v23103_v47  ;;  %23170 = vst [vmem:[#allocation7_spill] sm:$0xff] %v17686_v4 }
 0x12b   :  { %13701 = vmatmul.mubr.msk.f32.gmra.mxu1 %vm552_vm2, %v17440_v14  ;;  %13705 = vmatmul.mubr.msk.f32.gmra.mxu0 %vm552_vm2, %v17440_v14 }
 0x12c   :  { %1904 = vmatprep.mubr.f32.mxu1 %v23103_v47  ;;  %1993 = vmatprep.mubr.f32.mxu0 %v23103_v47 }
 0x12f   :  { %13710 = vmatmul.mubr.msk.f32.vlgmr.msra.gmra.mxu1 %vm552_vm2, %v17571_v11  ;;  %13714 = vmatmul.mubr.msk.f32.vlgmr.msra.gmra.mxu0 %vm552_vm2, %v17571_v11 }
 0x130   :  { %2043 = vmatpush1.msra.mxu1 %v23155_v51  ;;  %2132 = vmatpush1.msra.mxu0 %v23156_v23 }
 0x131   :  { %2044 = vmatprep.subr.mxu1 %v23157_v28  ;;  %2133 = vmatprep.subr.mxu0 %v17105_v60 }
 0x132   :  { %2045 = vmatpush1.msra.mxu1 %v23158_v63  ;;  %2134 = vmatpush1.msra.mxu0 %v23159_v32 }
 0x133   :  { %1910 = vmatprep.mubr.f32.mxu1 %v23103_v47  ;;  %1999 = vmatprep.mubr.f32.mxu0 %v23103_v47 }
 0x134   :  { %2046 = vmatprep.subr.mxu1 %v23160_v36  ;;  %2135 = vmatprep.subr.mxu0 %v17122_v42 }
 0x135   :  { %13711 = vmatmul.mubr.msk.f32.gmra.mxu1 %vm552_vm2, %v17586_v35  ;;  %13715 = vmatmul.mubr.msk.f32.gmra.mxu0 %vm552_vm2, %v17586_v35 }
 0x136   :  { %2047 = vmatpush1.msra.mxu1 %v23161_v13  ;;  %2136 = vmatpush1.msra.mxu0 %v23162_v16 }
 0x137   :  { %2048 = vmatprep.subr.mxu1 %v23163_v22  ;;  %2137 = vmatprep.subr.mxu0 %v17160_v31 }
 0x138   :  { %2049 = vmatpush1.msra.mxu1 %v23164_v49  ;;  %2138 = vmatpush1.msra.mxu0 %v23165_v44 }
 0x139   :  { %1916 = vmatprep.mubr.f32.mxu1 %v23103_v47  ;;  %2005 = vmatprep.mubr.f32.mxu0 %v23103_v47 }
 0x13a   :  { %2220 = vmatprep.subr.mxu1 %v17092_v33  ;;  %2309 = vmatprep.subr.mxu0 %v17318_v62 }
 0x13b   :  { %13712 = vmatmul.mubr.msk.f32.gmra.mxu1 %vm552_vm2, %v17605_v34  ;;  %13716 = vmatmul.mubr.msk.f32.gmra.mxu0 %vm552_vm2, %v17605_v34 }
 0x13c   :  { %1922 = vmatprep.mubr.f32.mxu1 %v23103_v47  ;;  %2011 = vmatprep.mubr.f32.mxu0 %v23103_v47 }
 0x13f   :  { %13713 = vmatmul.mubr.msk.f32.gmra.mxu1 %vm552_vm2, %v17620_v50  ;;  %13717 = vmatmul.mubr.msk.f32.gmra.mxu0 %vm552_vm2, %v17620_v50 }
 0x140   :  { %2082 = vmatprep.mubr.f32.mxu1 %v23103_v47  ;;  %2171 = vmatprep.mubr.f32.mxu0 %v23103_v47 }
 0x143   :  { %13718 = vmatmul.mubr.msk.f32.vlgmr.msra.gmra.mxu1 %vm552_vm2, %v17571_v11  ;;  %13722 = vmatmul.mubr.msk.f32.vlgmr.msra.gmra.mxu0 %vm552_vm2, %v17571_v11 }
 0x144   :  { %2221 = vmatpush1.msra.mxu1 %v23166_v45  ;;  %2310 = vmatpush1.msra.mxu0 %v23167_v54 }
 0x145   :  { %2222 = vmatprep.subr.mxu1 %v17133_v52  ;;  %2311 = vmatprep.subr.mxu0 %v17332_v6 }
 0x146   :  { %2223 = vmatpush1.msra.mxu1 %v17095_v46  ;;  %2312 = vmatpush1.msra.mxu0 %v17102_v10 }
 0x147   :  { %2088 = vmatprep.mubr.f32.mxu1 %v23103_v47  ;;  %2177 = vmatprep.mubr.f32.mxu0 %v23103_v47 }
 0x148   :  { %2224 = vmatprep.subr.mxu1 %v17149_v2  ;;  %2313 = vmatprep.subr.mxu0 %v17353_v39 }
 0x149   :  { %13719 = vmatmul.mubr.msk.f32.gmra.mxu1 %vm552_vm2, %v17586_v35  ;;  %13723 = vmatmul.mubr.msk.f32.gmra.mxu0 %vm552_vm2, %v17586_v35 }
 0x14a   :  { %2225 = vmatpush1.msra.mxu1 %v17117_v24  ;;  %2314 = vmatpush1.msra.mxu0 %v17146_v17 }
 0x14b   :  { %2226 = vmatprep.subr.mxu1 %v17163_v25  ;;  %2315 = vmatprep.subr.mxu0 %v17366_v56 }
 0x14c   :  { %2227 = vmatpush1.msra.mxu1 %v17152_v27  ;;  %2316 = vmatpush1.msra.mxu0 %v17157_v29 }
 0x14d   :  { %2094 = vmatprep.mubr.f32.mxu1 %v23103_v47  ;;  %2183 = vmatprep.mubr.f32.mxu0 %v23103_v47 }
 0x14e   :  { %2398 = vmatprep.subr.mxu1 %v17187_v1  ;;  %2560 = vmatprep.subr.mxu0 %v16816_v12 }
 0x14f   :  { %13720 = vmatmul.mubr.msk.f32.gmra.mxu1 %vm552_vm2, %v17605_v34  ;;  %13724 = vmatmul.mubr.msk.f32.gmra.mxu0 %vm552_vm2, %v17605_v34 }
 0x150   :  { %2100 = vmatprep.mubr.f32.mxu1 %v23103_v47  ;;  %2189 = vmatprep.mubr.f32.mxu0 %v23103_v47 }
 0x153   :  { %13721 = vmatmul.mubr.msk.f32.gmra.mxu1 %vm552_vm2, %v17620_v50  ;;  %13725 = vmatmul.mubr.msk.f32.gmra.mxu0 %vm552_vm2, %v17620_v50 }
 0x154   :  { %2260 = vmatprep.mubr.f32.mxu1 %v23103_v47  ;;  %2349 = vmatprep.mubr.f32.mxu0 %v23103_v47 }
 0x157   :  { %13726 = vmatmul.mubr.msk.f32.vlgmr.msra.gmra.mxu1 %vm552_vm2, %v17571_v11  ;;  %13730 = vmatmul.mubr.msk.f32.vlgmr.msra.gmra.mxu0 %vm552_vm2, %v17571_v11 }
 0x158   :  { %2399 = vmatpush1.msra.mxu1 %v17166_v20  ;;  %2561 = vmatpush1.msra.mxu0 %v16824_v15  ;;  %v17698_v15 = vpop.f32.mrf.mxu0 }
 0x159   :  { %2400 = vmatprep.subr.mxu1 %v17190_v30  ;;  %2562 = vmatprep.subr.mxu0 %v16865_v37  ;;  %23171 = vst [vmem:[#allocation21_spill] sm:$0xff] %v17698_v15  ;;  %v17727_v15 = vld [vmem:[%s22859_s7 + $0x60] sm:$0xff] }
 0x15a   :  { %2401 = vmatpush1.msra.mxu1 %v17328_v9  ;;  %2563 = vmatpush1.msra.mxu0 %v16871_v41 }
 0x15b   :  { %2266 = vmatprep.mubr.f32.mxu1 %v23103_v47  ;;  %2355 = vmatprep.mubr.f32.mxu0 %v23103_v47 }
 0x15c   :  { %2402 = vmatprep.subr.mxu1 %v17193_v43  ;;  %2564 = vmatprep.subr.mxu0 %v23149_v3 }
 0x15d   :  { %13727 = vmatmul.mubr.msk.f32.gmra.mxu1 %vm552_vm2, %v17586_v35  ;;  %13731 = vmatmul.mubr.msk.f32.gmra.mxu0 %vm552_vm2, %v17586_v35 }
 0x15e   :  { %2403 = vmatpush1.msra.mxu1 %v17341_v19  ;;  %2565 = vmatpush1.msra.mxu0 %v16911_v57 }
 0x15f   :  { %2404 = vmatprep.subr.mxu1 %v17198_v7  ;;  %2566 = vmatprep.subr.mxu0 %v23153_v55 }
 0x160   :  { %2405 = vmatpush1.msra.mxu1 %v17362_v0  ;;  %2567 = vmatpush1.msra.mxu0 %v23150_v8 }
 0x161   :  { %2272 = vmatprep.mubr.f32.mxu1 %v23103_v47  ;;  %2361 = vmatprep.mubr.f32.mxu0 %v23103_v47  ;;  %v17708_v41 = vpop.f32.mrf.mxu1  ;;  %v17710_v57 = vpop.f32.mrf.mxu0 }
 0x162   :  { %2649 = vmatprep.subr.mxu1 %v23155_v51  ;;  %2738 = vmatprep.subr.mxu0 %v23156_v23  ;;  %23172 = vst [vmem:[#allocation5_spill] sm:$0xff] %v17710_v57 }
 0x163   :  { %13728 = vmatmul.mubr.msk.f32.gmra.mxu1 %vm552_vm2, %v17605_v34  ;;  %13732 = vmatmul.mubr.msk.f32.gmra.mxu0 %vm552_vm2, %v17605_v34  ;;  %v17714_v8 = vpop.f32.mrf.mxu1  ;;  %v17716_v14 = vpop.f32.mrf.mxu0 }
 0x164   :  { %2278 = vmatprep.mubr.f32.mxu1 %v23103_v47  ;;  %2367 = vmatprep.mubr.f32.mxu0 %v23103_v47  ;;  %23173 = vst [vmem:[#allocation6_spill] sm:$0xff] %v17714_v8  ;;  %23174 = vst [vmem:[#allocation66_spill] sm:$0xff] %v17716_v14 }
 0x167   :  { %13729 = vmatmul.mubr.msk.f32.gmra.mxu1 %vm552_vm2, %v17620_v50  ;;  %13733 = vmatmul.mubr.msk.f32.gmra.mxu0 %vm552_vm2, %v17620_v50  ;;  %v17729_v5 = vpop.f32.mrf.mxu1  ;;  %v17731_v4 = vpop.f32.mrf.mxu0 }
 0x168   :  { %2438 = vmatprep.mubr.f32.mxu1 %v23103_v47  ;;  %2600 = vmatprep.mubr.f32.mxu0 %v23103_v47  ;;  %23175 = vst [vmem:[#allocation67_spill] sm:$0xff] %v17731_v4 }
 0x169   :  { %v17737_v53 = vpop.f32.mrf.mxu1  ;;  %v17739_v14 = vpop.f32.mrf.mxu0 }
 0x16a   :  { %23176 = vst [vmem:[#allocation68_spill] sm:$0xff] %v17737_v53  ;;  %23177 = vst [vmem:[#allocation69_spill] sm:$0xff] %v17739_v14 }
 0x16b   :  { %13734 = vmatmul.mubr.msk.f32.vlgmr.msra.gmra.mxu1 %vm552_vm2, %v17571_v11  ;;  %13742 = vmatmul.mubr.msk.f32.vlgmr.msra.gmra.mxu0 %vm552_vm2, %v17727_v15  ;;  %v17750_v11 = vld [vmem:[%s22859_s7 + $0x68] sm:$0xff] }
 0x16c   :  { %2650 = vmatpush1.msra.mxu1 %v16962_v38  ;;  %2739 = vmatpush1.msra.mxu0 %v23154_v59 }
 0x16d   :  { %2651 = vmatprep.subr.mxu1 %v23158_v63  ;;  %2740 = vmatprep.subr.mxu0 %v23159_v32  ;;  %v17754_v14 = vpop.f32.mrf.mxu1  ;;  %v17756_v53 = vpop.f32.mrf.mxu0 }
 0x16e   :  { %2652 = vmatpush1.msra.mxu1 %v16994_v26  ;;  %2741 = vmatpush1.msra.mxu0 %v23157_v28  ;;  %23178 = vst [vmem:[#allocation70_spill] sm:$0xff] %v17756_v53 }
 0x16f   :  { %2444 = vmatprep.mubr.f32.mxu1 %v23103_v47  ;;  %2606 = vmatprep.mubr.f32.mxu0 %v23103_v47  ;;  %v17764_v8 = vpop.f32.mrf.mxu1  ;;  %v17766_v58 = vpop.f32.mrf.mxu0 }
 0x170   :  { %2653 = vmatprep.subr.mxu1 %v23161_v13  ;;  %2742 = vmatprep.subr.mxu0 %v23162_v16  ;;  %23179 = vst [vmem:[#allocation71_spill] sm:$0xff] %v17764_v8  ;;  %23180 = vst [vmem:[#allocation72_spill] sm:$0xff] %v17766_v58 }
 0x171   :  { %13735 = vmatmul.mubr.msk.f32.gmra.mxu1 %vm552_vm2, %v17586_v35  ;;  %13743 = vmatmul.mubr.msk.f32.gmra.mxu0 %vm552_vm2, %v17750_v11  ;;  %v17772_v61 = vpop.f32.mrf.mxu1  ;;  %v17774_v53 = vpop.f32.mrf.mxu0  ;;  %v17781_v35 = vld [vmem:[%s22859_s7 + $0x70] sm:$0xff] }
 0x172   :  { %2654 = vmatpush1.msra.mxu1 %v17027_v48  ;;  %2743 = vmatpush1.msra.mxu0 %v23160_v36  ;;  %23181 = vst [vmem:[#allocation73_spill] sm:$0xff] %v17774_v53 }
 0x173   :  { %2655 = vmatprep.subr.mxu1 %v23164_v49  ;;  %2744 = vmatprep.subr.mxu0 %v23165_v44  ;;  %v17785_v58 = vpop.f32.mrf.mxu1  ;;  %v17787_v8 = vpop.f32.mrf.mxu0 }
 0x174   :  { %2656 = vmatpush1.msra.mxu1 %v23151_v21  ;;  %2745 = vmatpush1.msra.mxu0 %v23163_v22  ;;  %23182 = vst [vmem:[#allocation74_spill] sm:$0xff] %v17785_v58  ;;  %23183 = vst [vmem:[#allocation75_spill] sm:$0xff] %v17787_v8  ;;  %v17804_v8 = vld [vmem:[%s22859_s7 + $0x78] sm:$0xff] }
 0x175   :  { %2450 = vmatprep.mubr.f32.mxu1 %v23103_v47  ;;  %2612 = vmatprep.mubr.f32.mxu0 %v23103_v47  ;;  %v17795_v53 = vpop.f32.mrf.mxu1 }
 0x176   :  { %2827 = vmatprep.subr.mxu1 %v23166_v45  ;;  %2916 = vmatprep.subr.mxu0 %v23167_v54  ;;  %v17797_v4 = vpop.f32.mrf.mxu0 }
 0x177   :  { %13736 = vmatmul.mubr.msk.f32.gmra.mxu1 %vm552_vm2, %v17605_v34  ;;  %13744 = vmatmul.mubr.msk.f32.gmra.mxu0 %vm552_vm2, %v17781_v35  ;;  %23184 = vst [vmem:[#allocation76_spill] sm:$0xff] %v17797_v4  ;;  %v17806_v58 = vpop.f32.mrf.mxu1 }
 0x178   :  { %2456 = vmatprep.mubr.f32.mxu1 %v23103_v47  ;;  %2618 = vmatprep.mubr.f32.mxu0 %v23103_v47  ;;  %23185 = vst [vmem:[#allocation77_spill] sm:$0xff] %v17806_v58  ;;  %v17808_v57 = vpop.f32.mrf.mxu0 }
 0x179   :  { %23186 = vst [vmem:[#allocation78_spill] sm:$0xff] %v17808_v57 }
 0x17b   :  { %13737 = vmatmul.mubr.msk.f32.gmra.mxu1 %vm552_vm2, %v17620_v50  ;;  %13745 = vmatmul.mubr.msk.f32.gmra.mxu0 %vm552_vm2, %v17804_v8 }
 0x17c   :  { %2689 = vmatprep.mubr.f32.mxu1 %v23103_v47  ;;  %2778 = vmatprep.mubr.f32.mxu0 %v23103_v47  ;;  %v17816_v34 = vpop.f32.mrf.mxu1 }
 0x17d   :  { %v17818_v4 = vpop.f32.mrf.mxu0 }
 0x17e   :  { %23187 = vst [vmem:[#allocation79_spill] sm:$0xff] %v17818_v4  ;;  %v17824_v57 = vpop.f32.mrf.mxu1 }
 0x17f   :  { %13746 = vmatmul.mubr.msk.f32.vlgmr.msra.gmra.mxu1 %vm552_vm2, %v17727_v15  ;;  %13750 = vmatmul.mubr.msk.f32.vlgmr.msra.gmra.mxu0 %vm552_vm2, %v17727_v15  ;;  %23188 = vst [vmem:[#allocation80_spill] sm:$0xff] %v17824_v57  ;;  %v17826_v50 = vpop.f32.mrf.mxu0 }
 0x180   :  { %23189 = vst [vmem:[#allocation81_spill] sm:$0xff] %v17826_v50  ;;  %2828 = vmatpush1.msra.mxu1 %v17057_v18  ;;  %2917 = vmatpush1.msra.mxu0 %v17092_v33 }
 0x181   :  { %2829 = vmatprep.subr.mxu1 %v17095_v46  ;;  %2918 = vmatprep.subr.mxu0 %v17102_v10  ;;  %v23196_v10 = vld [vmem:[#allocation43_spill] sm:$0xff] }
 0x182   :  { %2830 = vmatpush1.msra.mxu1 %v17105_v60  ;;  %2919 = vmatpush1.msra.mxu0 %v17133_v52 }
 0x183   :  { %2695 = vmatprep.mubr.f32.mxu1 %v23103_v47  ;;  %2784 = vmatprep.mubr.f32.mxu0 %v23103_v47  ;;  %v17836_v58 = vpop.f32.mrf.mxu1  ;;  %v17838_v57 = vpop.f32.mrf.mxu0 }
 0x184   :  { %23190 = vst [vmem:[#allocation82_spill] sm:$0xff] %v17838_v57  ;;  %2831 = vmatprep.subr.mxu1 %v17117_v24  ;;  %2920 = vmatprep.subr.mxu0 %v17146_v17 }
 0x185   :  { %13747 = vmatmul.mubr.msk.f32.gmra.mxu1 %vm552_vm2, %v17750_v11  ;;  %13751 = vmatmul.mubr.msk.f32.gmra.mxu0 %vm552_vm2, %v17750_v11  ;;  %v17846_v50 = vpop.f32.mrf.mxu1  ;;  %v17848_v4 = vpop.f32.mrf.mxu0 }
 0x186   :  { %23191 = vst [vmem:[#allocation83_spill] sm:$0xff] %v17846_v50  ;;  %23192 = vst [vmem:[#allocation84_spill] sm:$0xff] %v17848_v4  ;;  %2832 = vmatpush1.msra.mxu1 %v17122_v42  ;;  %2921 = vmatpush1.msra.mxu0 %v17149_v2 }
 0x187   :  { %2833 = vmatprep.subr.mxu1 %v17152_v27  ;;  %2922 = vmatprep.subr.mxu0 %v17157_v29  ;;  %v17854_v57 = vpop.f32.mrf.mxu1  ;;  %v17856_v17 = vpop.f32.mrf.mxu0 }
 0x188   :  { %23193 = vst [vmem:[#allocation85_spill] sm:$0xff] %v17856_v17  ;;  %2834 = vmatpush1.msra.mxu1 %v17160_v31  ;;  %2923 = vmatpush1.msra.mxu0 %v17163_v25 }
 0x189   :  { %2701 = vmatprep.mubr.f32.mxu1 %v23103_v47  ;;  %2790 = vmatprep.mubr.f32.mxu0 %v23103_v47  ;;  %v17862_v4 = vpop.f32.mrf.mxu1  ;;  %v17864_v50 = vpop.f32.mrf.mxu0 }
 0x18a   :  { %23194 = vst [vmem:[#allocation86_spill] sm:$0xff] %v17862_v4  ;;  %23195 = vst [vmem:[#allocation87_spill] sm:$0xff] %v17864_v50  ;;  %3005 = vmatprep.subr.mxu1 %v17166_v20  ;;  %3094 = vmatprep.subr.mxu0 %v23196_v10  ;;  %v23203_v20 = vld [vmem:[#allocation44_spill] sm:$0xff] }
 0x18b   :  { %13748 = vmatmul.mubr.msk.f32.gmra.mxu1 %vm552_vm2, %v17781_v35  ;;  %13752 = vmatmul.mubr.msk.f32.gmra.mxu0 %vm552_vm2, %v17781_v35  ;;  %v17872_v17 = vpop.f32.mrf.mxu1  ;;  %v17874_v29 = vpop.f32.mrf.mxu0 }
 0x18c   :  { %23197 = vst [vmem:[#allocation88_spill] sm:$0xff] %v17874_v29  ;;  %2707 = vmatprep.mubr.f32.mxu1 %v23103_v47  ;;  %2796 = vmatprep.mubr.f32.mxu0 %v23103_v47 }
 0x18d   :  { %v17878_v4 = vpop.f32.mrf.mxu1  ;;  %v17880_v50 = vpop.f32.mrf.mxu0 }
 0x18e   :  { %23198 = vst [vmem:[#allocation89_spill] sm:$0xff] %v17878_v4  ;;  %23199 = vst [vmem:[#allocation90_spill] sm:$0xff] %v17880_v50 }
 0x18f   :  { %13749 = vmatmul.mubr.msk.f32.gmra.mxu1 %vm552_vm2, %v17804_v8  ;;  %13753 = vmatmul.mubr.msk.f32.gmra.mxu0 %vm552_vm2, %v17804_v8 }
 0x190   :  { %2867 = vmatprep.mubr.f32.mxu1 %v23103_v47  ;;  %2956 = vmatprep.mubr.f32.mxu0 %v23103_v47 }
 0x191   :  { %v17888_v10 = vpop.f32.mrf.mxu1  ;;  %v17890_v29 = vpop.f32.mrf.mxu0 }
 0x192   :  { %23200 = vst [vmem:[#allocation91_spill] sm:$0xff] %v17890_v29 }
 0x193   :  { %13754 = vmatmul.mubr.msk.f32.vlgmr.msra.gmra.mxu1 %vm552_vm2, %v17727_v15  ;;  %13758 = vmatmul.mubr.msk.f32.vlgmr.msra.gmra.mxu0 %vm552_vm2, %v17727_v15  ;;  %v17896_v50 = vpop.f32.mrf.mxu1  ;;  %v17898_v4 = vpop.f32.mrf.mxu0 }
 0x194   :  { %23201 = vst [vmem:[#allocation92_spill] sm:$0xff] %v17896_v50  ;;  %23202 = vst [vmem:[#allocation93_spill] sm:$0xff] %v17898_v4  ;;  %3006 = vmatpush1.msra.mxu1 %v17318_v62  ;;  %3095 = vmatpush1.msra.mxu0 %v17187_v1  ;;  %v23205_v4 = vld [vmem:[#allocation45_spill] sm:$0xff] }
 0x195   :  { %3007 = vmatprep.subr.mxu1 %v17328_v9  ;;  %3096 = vmatprep.subr.mxu0 %v23203_v20 }
 0x196   :  { %3008 = vmatpush1.msra.mxu1 %v17332_v6  ;;  %3097 = vmatpush1.msra.mxu0 %v17190_v30 }
 0x197   :  { %2873 = vmatprep.mubr.f32.mxu1 %v23103_v47  ;;  %2962 = vmatprep.mubr.f32.mxu0 %v23103_v47  ;;  %v17908_v29 = vpop.f32.mrf.mxu1  ;;  %v17910_v50 = vpop.f32.mrf.mxu0 }
 0x198   :  { %23204 = vst [vmem:[#allocation94_spill] sm:$0xff] %v17910_v50  ;;  %3009 = vmatprep.subr.mxu1 %v17341_v19  ;;  %3098 = vmatprep.subr.mxu0 %v23205_v4 }
 0x199   :  { %13755 = vmatmul.mubr.msk.f32.gmra.mxu1 %vm552_vm2, %v17750_v11  ;;  %13759 = vmatmul.mubr.msk.f32.gmra.mxu0 %vm552_vm2, %v17750_v11  ;;  %v17918_v20 = vpop.f32.mrf.mxu1  ;;  %v17920_v9 = vpop.f32.mrf.mxu0 }
 0x19a   :  { %23206 = vst [vmem:[#allocation95_spill] sm:$0xff] %v17918_v20  ;;  %23207 = vst [vmem:[#allocation96_spill] sm:$0xff] %v17920_v9  ;;  %3010 = vmatpush1.msra.mxu1 %v17353_v39  ;;  %3099 = vmatpush1.msra.mxu0 %v17193_v43 }
 0x19b   :  { %3011 = vmatprep.subr.mxu1 %v17362_v0  ;;  %3100 = vmatprep.subr.mxu0 %v17226_v40  ;;  %v17926_v50 = vpop.f32.mrf.mxu1  ;;  %v17928_v4 = vpop.f32.mrf.mxu0 }
 0x19c   :  { %23208 = vst [vmem:[#allocation97_spill] sm:$0xff] %v17928_v4  ;;  %3012 = vmatpush1.msra.mxu1 %v17366_v56  ;;  %3101 = vmatpush1.msra.mxu0 %v17198_v7 }
 0x19d   :  { %2879 = vmatprep.mubr.f32.mxu1 %v23103_v47  ;;  %2968 = vmatprep.mubr.f32.mxu0 %v23103_v47  ;;  %v17934_v9 = vpop.f32.mrf.mxu1  ;;  %v17936_v20 = vpop.f32.mrf.mxu0 }
 0x19e   :  { %23209 = vst [vmem:[#allocation98_spill] sm:$0xff] %v17934_v9  ;;  %23210 = vst [vmem:[#allocation99_spill] sm:$0xff] %v17936_v20  ;;  %3256 = vmatprep.subr.mxu1 %v16962_v38  ;;  %3345 = vmatprep.subr.mxu0 %v23154_v59 }
 0x19f   :  { %13756 = vmatmul.mubr.msk.f32.gmra.mxu1 %vm552_vm2, %v17781_v35  ;;  %13760 = vmatmul.mubr.msk.f32.gmra.mxu0 %vm552_vm2, %v17781_v35  ;;  %v17944_v4 = vpop.f32.mrf.mxu1  ;;  %v1266_v40 = vpop.f32.mrf.mxu0 }
 0x1a0   :  { %23211 = vst [vmem:[#allocation100_spill] sm:$0xff] %v17944_v4  ;;  %2885 = vmatprep.mubr.f32.mxu1 %v23103_v47  ;;  %2974 = vmatprep.mubr.f32.mxu0 %v23103_v47  ;;  %v17949_v9 = vadd.f32 %v1266_v40, %v17708_v41 }
 0x1a1   :  { %v17951_v20 = vpop.f32.mrf.mxu1  ;;  %v17953_v38 = vpop.f32.mrf.mxu0 }
 0x1a2   :  { %23212 = vst [vmem:[#allocation101_spill] sm:$0xff] %v17951_v20  ;;  %23213 = vst [vmem:[#allocation102_spill] sm:$0xff] %v17953_v38 }
 0x1a3   :  { %13757 = vmatmul.mubr.msk.f32.gmra.mxu1 %vm552_vm2, %v17804_v8  ;;  %13761 = vmatmul.mubr.msk.f32.gmra.mxu0 %vm552_vm2, %v17804_v8 }
 0x1a4   :  { %3045 = vmatprep.mubr.f32.mxu1 %v23103_v47  ;;  %3134 = vmatprep.mubr.f32.mxu0 %v23103_v47 }
 0x1a5   :  { %v17961_v59 = vpop.f32.mrf.mxu1  ;;  %v1272_v4 = vpop.f32.mrf.mxu0 }
 0x1a6   :  { %v17964_v40 = vadd.f32 %v1272_v4, %v17729_v5 }
 0x1a7   :  { %13762 = vmatmul.mubr.msk.f32.vlgmr.msra.gmra.mxu1 %vm552_vm2, %v17727_v15  ;;  %13766 = vmatmul.mubr.msk.f32.vlgmr.msra.gmra.mxu0 %vm552_vm2, %v17727_v15  ;;  %v17970_v41 = vpop.f32.mrf.mxu1  ;;  %v17972_v20 = vpop.f32.mrf.mxu0 }
 0x1a8   :  { %23214 = vst [vmem:[#allocation103_spill] sm:$0xff] %v17970_v41  ;;  %23215 = vst [vmem:[#allocation104_spill] sm:$0xff] %v17972_v20  ;;  %3257 = vmatpush1.msra.mxu1 %v16816_v12  ;;  %3346 = vmatpush1.msra.mxu0 %v23155_v51 }
 0x1a9   :  { %3258 = vmatprep.subr.mxu1 %v16994_v26  ;;  %3347 = vmatprep.subr.mxu0 %v23157_v28 }
 0x1aa   :  { %3259 = vmatpush1.msra.mxu1 %v16865_v37  ;;  %3348 = vmatpush1.msra.mxu0 %v23158_v63 }
 0x1ab   :  { %3051 = vmatprep.mubr.f32.mxu1 %v23103_v47  ;;  %3140 = vmatprep.mubr.f32.mxu0 %v23103_v47  ;;  %v17982_v5 = vpop.f32.mrf.mxu1  ;;  %v1278_v4 = vpop.f32.mrf.mxu0 }
 0x1ac   :  { %3260 = vmatprep.subr.mxu1 %v17027_v48  ;;  %3349 = vmatprep.subr.mxu0 %v23160_v36  ;;  %v17987_v12 = vadd.f32 %v1278_v4, %v17754_v14 }
 0x1ad   :  { %13763 = vmatmul.mubr.msk.f32.gmra.mxu1 %vm552_vm2, %v17750_v11  ;;  %13767 = vmatmul.mubr.msk.f32.gmra.mxu0 %vm552_vm2, %v17750_v11  ;;  %v17993_v37 = vpop.f32.mrf.mxu1  ;;  %v17995_v15 = vpop.f32.mrf.mxu0 }
 0x1ae   :  { %23216 = vst [vmem:[#allocation105_spill] sm:$0xff] %v17993_v37  ;;  %23217 = vst [vmem:[#allocation106_spill] sm:$0xff] %v17995_v15  ;;  %3261 = vmatpush1.msra.mxu1 %v23149_v3  ;;  %3350 = vmatpush1.msra.mxu0 %v23161_v13 }
 0x1af   :  { %3262 = vmatprep.subr.mxu1 %v23151_v21  ;;  %3351 = vmatprep.subr.mxu0 %v23163_v22  ;;  %v18001_v14 = vpop.f32.mrf.mxu1  ;;  %v1284_v4 = vpop.f32.mrf.mxu0 }
 0x1b0   :  { %3263 = vmatpush1.msra.mxu1 %v23153_v55  ;;  %3352 = vmatpush1.msra.mxu0 %v23164_v49  ;;  %v18006_v11 = vadd.f32 %v1284_v4, %v17772_v61 }
 0x1b1   :  { %3057 = vmatprep.mubr.f32.mxu1 %v23103_v47  ;;  %3146 = vmatprep.mubr.f32.mxu0 %v23103_v47  ;;  %v18010_v3 = vpop.f32.mrf.mxu1  ;;  %v18012_v41 = vpop.f32.mrf.mxu0 }
 0x1b2   :  { %23218 = vst [vmem:[#allocation107_spill] sm:$0xff] %v18010_v3  ;;  %23219 = vst [vmem:[#allocation108_spill] sm:$0xff] %v18012_v41  ;;  %3434 = vmatprep.subr.mxu1 %v17057_v18  ;;  %3523 = vmatprep.subr.mxu0 %v17092_v33 }
 0x1b3   :  { %13764 = vmatmul.mubr.msk.f32.gmra.mxu1 %vm552_vm2, %v17781_v35  ;;  %13768 = vmatmul.mubr.msk.f32.gmra.mxu0 %vm552_vm2, %v17781_v35  ;;  %v18020_v61 = vpop.f32.mrf.mxu1  ;;  %v1444_v55 = vpop.f32.mrf.mxu0  ;;  %v18040_v35 = vld [vmem:[%s22859_s7 + $0x80] sm:$0xff] }
 0x1b4   :  { %3063 = vmatprep.mubr.f32.mxu1 %v23103_v47  ;;  %3152 = vmatprep.mubr.f32.mxu0 %v23103_v47  ;;  %v18025_v4 = vadd.f32 %v1444_v55, %v17795_v53 }
 0x1b5   :  { %v18027_v3 = vpop.f32.mrf.mxu1  ;;  %v18029_v37 = vpop.f32.mrf.mxu0 }
 0x1b6   :  { %23220 = vst [vmem:[#allocation109_spill] sm:$0xff] %v18027_v3  ;;  %23221 = vst [vmem:[#allocation110_spill] sm:$0xff] %v18029_v37 }
 0x1b7   :  { %13765 = vmatmul.mubr.msk.f32.gmra.mxu1 %vm552_vm2, %v17804_v8  ;;  %13769 = vmatmul.mubr.msk.f32.gmra.mxu0 %vm552_vm2, %v17804_v8 }
 0x1b8   :  { %3296 = vmatprep.mubr.f32.mxu1 %v23103_v47  ;;  %3385 = vmatprep.mubr.f32.mxu0 %v23103_v47 }
 0x1b9   :  { %v18042_v53 = vpop.f32.mrf.mxu1  ;;  %v1450_v55 = vpop.f32.mrf.mxu0 }
 0x1ba   :  { %v18045_v37 = vadd.f32 %v1450_v55, %v17816_v34  ;;  %v18064_v34 = vld [vmem:[%s22859_s7 + $0x88] sm:$0xff] }
 0x1bb   :  { %13774 = vmatmul.mubr.msk.f32.vlgmr.msra.gmra.mxu1 %vm552_vm2, %v18040_v35  ;;  %13778 = vmatmul.mubr.msk.f32.vlgmr.msra.gmra.mxu0 %vm552_vm2, %v18040_v35  ;;  %v18051_v8 = vpop.f32.mrf.mxu1  ;;  %v18053_v3 = vpop.f32.mrf.mxu0 }
 0x1bc   :  { %23222 = vst [vmem:[#allocation111_spill] sm:$0xff] %v18051_v8  ;;  %23223 = vst [vmem:[#allocation112_spill] sm:$0xff] %v18053_v3  ;;  %3435 = vmatpush1.msra.mxu1 %v23156_v23  ;;  %3524 = vmatpush1.msra.mxu0 %v23166_v45 }
 0x1bd   :  { %3436 = vmatprep.subr.mxu1 %v17105_v60  ;;  %3525 = vmatprep.subr.mxu0 %v17133_v52 }
 0x1be   :  { %3437 = vmatpush1.msra.mxu1 %v23159_v32  ;;  %3526 = vmatpush1.msra.mxu0 %v17095_v46 }
 0x1bf   :  { %3302 = vmatprep.mubr.f32.mxu1 %v23103_v47  ;;  %3391 = vmatprep.mubr.f32.mxu0 %v23103_v47  ;;  %v18068_v55 = vpop.f32.mrf.mxu1  ;;  %v1456_v3 = vpop.f32.mrf.mxu0 }
 0x1c0   :  { %3438 = vmatprep.subr.mxu1 %v17122_v42  ;;  %3527 = vmatprep.subr.mxu0 %v17149_v2  ;;  %v18073_v8 = vadd.f32 %v1456_v3, %v17836_v58 }
 0x1c1   :  { %13775 = vmatmul.mubr.msk.f32.gmra.mxu1 %vm552_vm2, %v18064_v34  ;;  %13779 = vmatmul.mubr.msk.f32.gmra.mxu0 %vm552_vm2, %v18064_v34  ;;  %v18079_v41 = vpop.f32.mrf.mxu1  ;;  %v18081_v15 = vpop.f32.mrf.mxu0 }
 0x1c2   :  { %23224 = vst [vmem:[#allocation113_spill] sm:$0xff] %v18073_v8  ;;  %23225 = vst [vmem:[#allocation114_spill] sm:$0xff] %v18079_v41  ;;  %3439 = vmatpush1.msra.mxu1 %v23162_v16  ;;  %3528 = vmatpush1.msra.mxu0 %v17117_v24  ;;  %v18094_v41 = vld [vmem:[%s22859_s7 + $0x90] sm:$0xff]  ;;  %v23242_v8 = vld [vmem:[#allocation32_spill] sm:$0xff] }
 0x1c3   :  { %23226 = vst [vmem:[#allocation115_spill] sm:$0xff] %v18081_v15  ;;  %3440 = vmatprep.subr.mxu1 %v17160_v31  ;;  %3529 = vmatprep.subr.mxu0 %v17163_v25  ;;  %v18087_v58 = vpop.f32.mrf.mxu1  ;;  %v1462_v3 = vpop.f32.mrf.mxu0 }
 0x1c4   :  { %3441 = vmatpush1.msra.mxu1 %v23165_v44  ;;  %3530 = vmatpush1.msra.mxu0 %v17152_v27  ;;  %v18097_v15 = vadd.f32 %v1462_v3, %v17854_v57 }
 0x1c5   :  { %3308 = vmatprep.mubr.f32.mxu1 %v23103_v47  ;;  %3397 = vmatprep.mubr.f32.mxu0 %v23103_v47  ;;  %v18101_v20 = vpop.f32.mrf.mxu1  ;;  %v18103_v38 = vpop.f32.mrf.mxu0 }
 0x1c6   :  { %23227 = vst [vmem:[#allocation116_spill] sm:$0xff] %v18097_v15  ;;  %23228 = vst [vmem:[#allocation117_spill] sm:$0xff] %v18101_v20  ;;  %3612 = vmatprep.subr.mxu1 %v17318_v62  ;;  %3701 = vmatprep.subr.mxu0 %v17187_v1 }
 0x1c7   :  { %23229 = vst [vmem:[#allocation118_spill] sm:$0xff] %v18103_v38  ;;  %13776 = vmatmul.mubr.msk.f32.gmra.mxu1 %vm552_vm2, %v18094_v41  ;;  %13780 = vmatmul.mubr.msk.f32.gmra.mxu0 %vm552_vm2, %v18094_v41  ;;  %v18111_v57 = vpop.f32.mrf.mxu1  ;;  %v1622_v3 = vpop.f32.mrf.mxu0  ;;  %v18118_v38 = vld [vmem:[%s22859_s7 + $0x98] sm:$0xff] }
 0x1c8   :  { %3314 = vmatprep.mubr.f32.mxu1 %v23103_v47  ;;  %3403 = vmatprep.mubr.f32.mxu0 %v23103_v47  ;;  %v18121_v20 = vadd.f32 %v1622_v3, %v17872_v17 }
 0x1c9   :  { %v18123_v1 = vpop.f32.mrf.mxu1  ;;  %v18125_v15 = vpop.f32.mrf.mxu0 }
 0x1ca   :  { %23230 = vst [vmem:[#allocation119_spill] sm:$0xff] %v18121_v20  ;;  %23231 = vst [vmem:[#allocation120_spill] sm:$0xff] %v18123_v1  ;;  %v23236_v1 = vld [vmem:[#allocation38_spill] sm:$0xff] }
 0x1cb   :  { %23232 = vst [vmem:[#allocation121_spill] sm:$0xff] %v18125_v15  ;;  %13777 = vmatmul.mubr.msk.f32.gmra.mxu1 %vm552_vm2, %v18118_v38  ;;  %13781 = vmatmul.mubr.msk.f32.gmra.mxu0 %vm552_vm2, %v18118_v38 }
 0x1cc   :  { %3474 = vmatprep.mubr.f32.mxu1 %v23103_v47  ;;  %3563 = vmatprep.mubr.f32.mxu0 %v23103_v47 }
 0x1cd   :  { %v18133_v25 = vpop.f32.mrf.mxu1  ;;  %v1628_v2 = vpop.f32.mrf.mxu0 }
 0x1ce   :  { %v18136_v17 = vadd.f32 %v1628_v2, %v17888_v10  ;;  %v23237_v10 = vld [vmem:[#allocation27_spill] sm:$0xff]  ;;  %v23238_v2 = vld [vmem:[#allocation60_spill] sm:$0xff] }
 0x1cf   :  { %13782 = vmatmul.mubr.msk.f32.vlgmr.msra.gmra.mxu1 %vm552_vm2, %v18040_v35  ;;  %13786 = vmatmul.mubr.msk.f32.vlgmr.msra.gmra.mxu0 %vm552_vm2, %v18040_v35  ;;  %v18142_v3 = vpop.f32.mrf.mxu1  ;;  %v18144_v15 = vpop.f32.mrf.mxu0 }
 0x1d0   :  { %23233 = vst [vmem:[#allocation122_spill] sm:$0xff] %v18136_v17  ;;  %23234 = vst [vmem:[#allocation123_spill] sm:$0xff] %v18142_v3  ;;  %3613 = vmatpush1.msra.mxu1 %v23167_v54  ;;  %3702 = vmatpush1.msra.mxu0 %v23236_v1 }
 0x1d1   :  { %23235 = vst [vmem:[#allocation124_spill] sm:$0xff] %v18144_v15  ;;  %3614 = vmatprep.subr.mxu1 %v17332_v6  ;;  %3703 = vmatprep.subr.mxu0 %v17190_v30 }
 0x1d2   :  { %3615 = vmatpush1.msra.mxu1 %v23237_v10  ;;  %3704 = vmatpush1.msra.mxu0 %v23238_v2 }
 0x1d3   :  { %3480 = vmatprep.mubr.f32.mxu1 %v23103_v47  ;;  %3569 = vmatprep.mubr.f32.mxu0 %v23103_v47  ;;  %v18154_v17 = vpop.f32.mrf.mxu1  ;;  %v1634_v3 = vpop.f32.mrf.mxu0 }
 0x1d4   :  { %3616 = vmatprep.subr.mxu1 %v17353_v39  ;;  %3705 = vmatprep.subr.mxu0 %v17193_v43  ;;  %v18159_v15 = vadd.f32 %v1634_v3, %v17908_v29  ;;  %v23243_v43 = vld [vmem:[#allocation35_spill] sm:$0xff] }
 0x1d5   :  { %13783 = vmatmul.mubr.msk.f32.gmra.mxu1 %vm552_vm2, %v18064_v34  ;;  %13787 = vmatmul.mubr.msk.f32.gmra.mxu0 %vm552_vm2, %v18064_v34  ;;  %v18165_v30 = vpop.f32.mrf.mxu1  ;;  %v18167_v20 = vpop.f32.mrf.mxu0 }
 0x1d6   :  { %23239 = vst [vmem:[#allocation125_spill] sm:$0xff] %v18159_v15  ;;  %23240 = vst [vmem:[#allocation126_spill] sm:$0xff] %v18165_v30  ;;  %3617 = vmatpush1.msra.mxu1 %v23242_v8  ;;  %3706 = vmatpush1.msra.mxu0 %v17341_v19 }
 0x1d7   :  { %23241 = vst [vmem:[#allocation127_spill] sm:$0xff] %v18167_v20  ;;  %3618 = vmatprep.subr.mxu1 %v17366_v56  ;;  %3707 = vmatprep.subr.mxu0 %v17198_v7  ;;  %v18173_v29 = vpop.f32.mrf.mxu1  ;;  %v1640_v3 = vpop.f32.mrf.mxu0  ;;  %v23247_v56 = vld [vmem:[#allocation47_spill] sm:$0xff] }
 0x1d8   :  { %3619 = vmatpush1.msra.mxu1 %v23243_v43  ;;  %3708 = vmatpush1.msra.mxu0 %v17362_v0  ;;  %v18178_v15 = vadd.f32 %v1640_v3, %v17926_v50 }
 0x1d9   :  { %3486 = vmatprep.mubr.f32.mxu1 %v23103_v47  ;;  %3575 = vmatprep.mubr.f32.mxu0 %v23103_v47  ;;  %v18182_v20 = vpop.f32.mrf.mxu1  ;;  %v18184_v30 = vpop.f32.mrf.mxu0 }
 0x1da   :  { %23244 = vst [vmem:[#allocation128_spill] sm:$0xff] %v18178_v15  ;;  %23245 = vst [vmem:[#allocation129_spill] sm:$0xff] %v18182_v20  ;;  %3790 = vmatprep.subr.mxu1 %v23247_v56  ;;  %3952 = vmatprep.subr.mxu0 %v23155_v51  ;;  %v23249_v20 = vld [vmem:[#allocation100_spill] sm:$0xff] }
 0x1db   :  { %23246 = vst [vmem:[#allocation130_spill] sm:$0xff] %v18184_v30  ;;  %13784 = vmatmul.mubr.msk.f32.gmra.mxu1 %vm552_vm2, %v18094_v41  ;;  %13788 = vmatmul.mubr.msk.f32.gmra.mxu0 %vm552_vm2, %v18094_v41  ;;  %v18192_v50 = vpop.f32.mrf.mxu1  ;;  %v1800_v3 = vpop.f32.mrf.mxu0 }
 0x1dc   :  { %23248 = vst [vmem:[#allocation131_spill] sm:$0xff] %v18192_v50  ;;  %3492 = vmatprep.mubr.f32.mxu1 %v23103_v47  ;;  %3581 = vmatprep.mubr.f32.mxu0 %v23103_v47  ;;  %v18197_v15 = vadd.f32 %v1800_v3, %v23249_v20  ;;  %v23258_v50 = vld [vmem:[#allocation48_spill] sm:$0xff] }
 0x1dd   :  { %v18199_v30 = vpop.f32.mrf.mxu1  ;;  %v18201_v7 = vpop.f32.mrf.mxu0 }
 0x1de   :  { %23250 = vst [vmem:[#allocation100_spill] sm:$0xff] %v18197_v15  ;;  %23251 = vst [vmem:[#allocation132_spill] sm:$0xff] %v18199_v30  ;;  %v23256_v30 = vld [vmem:[#allocation43_spill] sm:$0xff]  ;;  %v23257_v15 = vld [vmem:[#allocation10_spill] sm:$0xff] }
 0x1df   :  { %23252 = vst [vmem:[#allocation133_spill] sm:$0xff] %v18201_v7  ;;  %13785 = vmatmul.mubr.msk.f32.gmra.mxu1 %vm552_vm2, %v18118_v38  ;;  %13789 = vmatmul.mubr.msk.f32.gmra.mxu0 %vm552_vm2, %v18118_v38 }
 0x1e0   :  { %3652 = vmatprep.mubr.f32.mxu1 %v23103_v47  ;;  %3741 = vmatprep.mubr.f32.mxu0 %v23103_v47 }
 0x1e1   :  { %v18209_v51 = vpop.f32.mrf.mxu1  ;;  %v1806_v56 = vpop.f32.mrf.mxu0 }
 0x1e2   :  { %v18212_v20 = vadd.f32 %v1806_v56, %v17961_v59  ;;  %v23259_v56 = vld [vmem:[#allocation44_spill] sm:$0xff] }
 0x1e3   :  { %13790 = vmatmul.mubr.msk.f32.vlgmr.msra.gmra.mxu1 %vm552_vm2, %v18040_v35  ;;  %13794 = vmatmul.mubr.msk.f32.vlgmr.msra.gmra.mxu0 %vm552_vm2, %v18040_v35  ;;  %v18218_v3 = vpop.f32.mrf.mxu1  ;;  %v18220_v7 = vpop.f32.mrf.mxu0 }
 0x1e4   :  { %23253 = vst [vmem:[#allocation134_spill] sm:$0xff] %v18212_v20  ;;  %23254 = vst [vmem:[#allocation135_spill] sm:$0xff] %v18218_v3  ;;  %3791 = vmatpush1.msra.mxu1 %v23256_v30  ;;  %3953 = vmatpush1.msra.mxu0 %v23257_v15  ;;  %v23264_v20 = vld [vmem:[#allocation45_spill] sm:$0xff] }
 0x1e5   :  { %23255 = vst [vmem:[#allocation136_spill] sm:$0xff] %v18220_v7  ;;  %3792 = vmatprep.subr.mxu1 %v23258_v50  ;;  %3954 = vmatprep.subr.mxu0 %v23158_v63  ;;  %v23260_v7 = vld [vmem:[#allocation49_spill] sm:$0xff] }
 0x1e6   :  { %3793 = vmatpush1.msra.mxu1 %v23259_v56  ;;  %3955 = vmatpush1.msra.mxu0 %v16994_v26 }
 0x1e7   :  { %3658 = vmatprep.mubr.f32.mxu1 %v23103_v47  ;;  %3747 = vmatprep.mubr.f32.mxu0 %v23103_v47  ;;  %v18230_v59 = vpop.f32.mrf.mxu1  ;;  %v1812_v3 = vpop.f32.mrf.mxu0 }
 0x1e8   :  { %3794 = vmatprep.subr.mxu1 %v23260_v7  ;;  %3956 = vmatprep.subr.mxu0 %v23161_v13  ;;  %v18235_v15 = vadd.f32 %v1812_v3, %v17982_v5  ;;  %v23265_v7 = vld [vmem:[#allocation50_spill] sm:$0xff] }
 0x1e9   :  { %13791 = vmatmul.mubr.msk.f32.gmra.mxu1 %vm552_vm2, %v18064_v34  ;;  %13795 = vmatmul.mubr.msk.f32.gmra.mxu0 %vm552_vm2, %v18064_v34  ;;  %v18241_v26 = vpop.f32.mrf.mxu1  ;;  %v18243_v63 = vpop.f32.mrf.mxu0  ;;  %v23266_v13 = vld [vmem:[#allocation46_spill] sm:$0xff] }
 0x1ea   :  { %23261 = vst [vmem:[#allocation10_spill] sm:$0xff] %v18235_v15  ;;  %23262 = vst [vmem:[#allocation137_spill] sm:$0xff] %v18241_v26  ;;  %3795 = vmatpush1.msra.mxu1 %v23264_v20  ;;  %3957 = vmatpush1.msra.mxu0 %v17027_v48  ;;  %v23269_v26 = vld [vmem:[#allocation5_spill] sm:$0xff] }
 0x1eb   :  { %23263 = vst [vmem:[#allocation138_spill] sm:$0xff] %v18243_v63  ;;  %3796 = vmatprep.subr.mxu1 %v23265_v7  ;;  %3958 = vmatprep.subr.mxu0 %v23164_v49  ;;  %v18249_v5 = vpop.f32.mrf.mxu1  ;;  %v1818_v3 = vpop.f32.mrf.mxu0  ;;  %v1356_v49 = vadd.f32 %v18020_v61, %v23269_v26 }
 0x1ec   :  { %3797 = vmatpush1.msra.mxu1 %v23266_v13  ;;  %3959 = vmatpush1.msra.mxu0 %v23151_v21  ;;  %v18254_v15 = vadd.f32 %v1818_v3, %v18001_v14 }
 0x1ed   :  { %3664 = vmatprep.mubr.f32.mxu1 %v23103_v47  ;;  %3753 = vmatprep.mubr.f32.mxu0 %v23103_v47  ;;  %v18258_v63 = vpop.f32.mrf.mxu1  ;;  %v18260_v48 = vpop.f32.mrf.mxu0 }
 0x1ee   :  { %23267 = vst [vmem:[#allocation139_spill] sm:$0xff] %v18258_v63  ;;  %23268 = vst [vmem:[#allocation140_spill] sm:$0xff] %v18260_v48  ;;  %4041 = vmatprep.subr.mxu1 %v23156_v23  ;;  %4130 = vmatprep.subr.mxu0 %v23166_v45  ;;  %v23272_v63 = vld [vmem:[#allocation67_spill] sm:$0xff] }
 0x1ef   :  { %13792 = vmatmul.mubr.msk.f32.gmra.mxu1 %vm552_vm2, %v18094_v41  ;;  %13796 = vmatmul.mubr.msk.f32.gmra.mxu0 %vm552_vm2, %v18094_v41  ;;  %v1906_v21 = vpop.f32.mrf.mxu1  ;;  %v1995_v14 = vpop.f32.mrf.mxu0  ;;  %v1362_v45 = vadd.f32 %v18042_v53, %v23272_v63 }
 0x1f0   :  { %3670 = vmatprep.mubr.f32.mxu1 %v23103_v47  ;;  %3759 = vmatprep.mubr.f32.mxu0 %v23103_v47  ;;  %v18273_v3 = vadd.f32 %v1906_v21, %v17949_v9  ;;  %v18275_v61 = vadd.f32 %v1995_v14, %v1356_v49  ;;  %v18292_v49 = vld [vmem:[%s22859_s7 + $0xa0] sm:$0xff] }
 0x1f1   :  { %v18277_v26 = vpop.f32.mrf.mxu1  ;;  %v18279_v48 = vpop.f32.mrf.mxu0 }
 0x1f2   :  { %23270 = vst [vmem:[#allocation5_spill] sm:$0xff] %v18277_v26  ;;  %23271 = vst [vmem:[#allocation141_spill] sm:$0xff] %v18279_v48  ;;  %v23276_v26 = vld [vmem:[#allocation11_spill] sm:$0xff] }
 0x1f3   :  { %13793 = vmatmul.mubr.msk.f32.gmra.mxu1 %vm552_vm2, %v18118_v38  ;;  %13797 = vmatmul.mubr.msk.f32.gmra.mxu0 %vm552_vm2, %v18118_v38 }
 0x1f4   :  { %3830 = vmatprep.mubr.f32.mxu1 %v23103_v47  ;;  %3992 = vmatprep.mubr.f32.mxu0 %v23103_v47 }
 0x1f5   :  { %v1912_v9 = vpop.f32.mrf.mxu1  ;;  %v2001_v21 = vpop.f32.mrf.mxu0 }
 0x1f6   :  { %v18295_v14 = vadd.f32 %v1912_v9, %v17964_v40  ;;  %v18297_v48 = vadd.f32 %v2001_v21, %v1362_v45  ;;  %v23277_v45 = vld [vmem:[#allocation70_spill] sm:$0xff] }
 0x1f7   :  { %13798 = vmatmul.mubr.msk.f32.vlgmr.msra.gmra.mxu1 %vm552_vm2, %v18040_v35  ;;  %13806 = vmatmul.mubr.msk.f32.vlgmr.msra.gmra.mxu0 %vm552_vm2, %v18292_v49  ;;  %v18303_v63 = vpop.f32.mrf.mxu1  ;;  %v18305_v53 = vpop.f32.mrf.mxu0  ;;  %v1368_v40 = vadd.f32 %v18068_v55, %v23277_v45  ;;  %v18318_v35 = vld [vmem:[%s22859_s7 + $0xa8] sm:$0xff] }
 0x1f8   :  { %23273 = vst [vmem:[#allocation67_spill] sm:$0xff] %v18297_v48  ;;  %23274 = vst [vmem:[#allocation142_spill] sm:$0xff] %v18303_v63  ;;  %4042 = vmatpush1.msra.mxu1 %v23276_v26  ;;  %4131 = vmatpush1.msra.mxu0 %v17057_v18 }
 0x1f9   :  { %23275 = vst [vmem:[#allocation143_spill] sm:$0xff] %v18305_v53  ;;  %4043 = vmatprep.subr.mxu1 %v23159_v32  ;;  %4132 = vmatprep.subr.mxu0 %v17095_v46  ;;  %v23280_v46 = vld [vmem:[#allocation73_spill] sm:$0xff] }
 0x1fa   :  { %4044 = vmatpush1.msra.mxu1 %v23157_v28  ;;  %4133 = vmatpush1.msra.mxu0 %v17105_v60  ;;  %v1374_v48 = vadd.f32 %v18087_v58, %v23280_v46 }
 0x1fb   :  { %3836 = vmatprep.mubr.f32.mxu1 %v23103_v47  ;;  %3998 = vmatprep.mubr.f32.mxu0 %v23103_v47  ;;  %v1918_v9 = vpop.f32.mrf.mxu1  ;;  %v2007_v21 = vpop.f32.mrf.mxu0 }
 0x1fc   :  { %4045 = vmatprep.subr.mxu1 %v23162_v16  ;;  %4134 = vmatprep.subr.mxu0 %v17117_v24  ;;  %v18325_v55 = vadd.f32 %v1918_v9, %v17987_v12  ;;  %v18327_v45 = vadd.f32 %v2007_v21, %v1368_v40  ;;  %v18348_v40 = vld [vmem:[%s22859_s7 + $0xb0] sm:$0xff] }
 0x1fd   :  { %13799 = vmatmul.mubr.msk.f32.gmra.mxu1 %vm552_vm2, %v18064_v34  ;;  %13807 = vmatmul.mubr.msk.f32.gmra.mxu0 %vm552_vm2, %v18318_v35  ;;  %v18333_v53 = vpop.f32.mrf.mxu1  ;;  %v18335_v63 = vpop.f32.mrf.mxu0 }
 0x1fe   :  { %23278 = vst [vmem:[#allocation70_spill] sm:$0xff] %v18333_v53  ;;  %23279 = vst [vmem:[#allocation144_spill] sm:$0xff] %v18335_v63  ;;  %4046 = vmatpush1.msra.mxu1 %v23160_v36  ;;  %4135 = vmatpush1.msra.mxu0 %v17122_v42  ;;  %v23283_v63 = vld [vmem:[#allocation76_spill] sm:$0xff] }
 0x1ff   :  { %4047 = vmatprep.subr.mxu1 %v23165_v44  ;;  %4136 = vmatprep.subr.mxu0 %v17152_v27  ;;  %v1924_v12 = vpop.f32.mrf.mxu1  ;;  %v2013_v34 = vpop.f32.mrf.mxu0  ;;  %v1534_v53 = vadd.f32 %v18111_v57, %v23283_v63  ;;  %v18374_v57 = vld [vmem:[%s22859_s7 + $0xb8] sm:$0xff] }
 0x200   :  { %4048 = vmatpush1.msra.mxu1 %v23163_v22  ;;  %4137 = vmatpush1.msra.mxu0 %v17160_v31  ;;  %v18351_v46 = vadd.f32 %v1924_v12, %v18006_v11  ;;  %v18353_v58 = vadd.f32 %v2013_v34, %v1374_v48 }
 0x201   :  { %3842 = vmatprep.mubr.f32.mxu1 %v23103_v47  ;;  %4004 = vmatprep.mubr.f32.mxu0 %v23103_v47  ;;  %v18357_v9 = vpop.f32.mrf.mxu1  ;;  %v18359_v21 = vpop.f32.mrf.mxu0 }
 0x202   :  { %23281 = vst [vmem:[#allocation73_spill] sm:$0xff] %v18357_v9  ;;  %23282 = vst [vmem:[#allocation145_spill] sm:$0xff] %v18359_v21  ;;  %4219 = vmatprep.subr.mxu1 %v23167_v54  ;;  %4308 = vmatprep.subr.mxu0 %v23236_v1  ;;  %v23286_v21 = vld [vmem:[#allocation79_spill] sm:$0xff] }
 0x203   :  { %13800 = vmatmul.mubr.msk.f32.gmra.mxu1 %vm552_vm2, %v18094_v41  ;;  %13808 = vmatmul.mubr.msk.f32.gmra.mxu0 %vm552_vm2, %v18348_v40  ;;  %v2084_v11 = vpop.f32.mrf.mxu1  ;;  %v2173_v48 = vpop.f32.mrf.mxu0  ;;  %v1540_v9 = vadd.f32 %v18133_v25, %v23286_v21 }
 0x204   :  { %3848 = vmatprep.mubr.f32.mxu1 %v23103_v47  ;;  %4010 = vmatprep.mubr.f32.mxu0 %v23103_v47  ;;  %v18377_v63 = vadd.f32 %v2084_v11, %v18025_v4  ;;  %v18379_v12 = vadd.f32 %v2173_v48, %v1534_v53 }
 0x205   :  { %v18381_v41 = vpop.f32.mrf.mxu1  ;;  %v18383_v34 = vpop.f32.mrf.mxu0 }
 0x206   :  { %23284 = vst [vmem:[#allocation76_spill] sm:$0xff] %v18381_v41  ;;  %23285 = vst [vmem:[#allocation146_spill] sm:$0xff] %v18383_v34 }
 0x207   :  { %13801 = vmatmul.mubr.msk.f32.gmra.mxu1 %vm552_vm2, %v18118_v38  ;;  %13809 = vmatmul.mubr.msk.f32.gmra.mxu0 %vm552_vm2, %v18374_v57 }
 0x208   :  { %4081 = vmatprep.mubr.f32.mxu1 %v23103_v47  ;;  %4170 = vmatprep.mubr.f32.mxu0 %v23103_v47 }
 0x209   :  { %v2090_v4 = vpop.f32.mrf.mxu1  ;;  %v2179_v53 = vpop.f32.mrf.mxu0 }
 0x20a   :  { %v18394_v11 = vadd.f32 %v2090_v4, %v18045_v37  ;;  %v18396_v48 = vadd.f32 %v2179_v53, %v1540_v9  ;;  %v23290_v37 = vld [vmem:[#allocation82_spill] sm:$0xff]  ;;  %v23291_v53 = vld [vmem:[#allocation113_spill] sm:$0xff] }
 0x20b   :  { %13810 = vmatmul.mubr.msk.f32.vlgmr.msra.gmra.mxu1 %vm552_vm2, %v18292_v49  ;;  %13814 = vmatmul.mubr.msk.f32.vlgmr.msra.gmra.mxu0 %vm552_vm2, %v18292_v49  ;;  %v18402_v38 = vpop.f32.mrf.mxu1  ;;  %v18404_v25 = vpop.f32.mrf.mxu0  ;;  %v1546_v9 = vadd.f32 %v18154_v17, %v23290_v37 }
 0x20c   :  { %23287 = vst [vmem:[#allocation79_spill] sm:$0xff] %v18396_v48  ;;  %23288 = vst [vmem:[#allocation147_spill] sm:$0xff] %v18402_v38  ;;  %4220 = vmatpush1.msra.mxu1 %v17092_v33  ;;  %4309 = vmatpush1.msra.mxu0 %v17318_v62  ;;  %v23295_v38 = vld [vmem:[#allocation85_spill] sm:$0xff]  ;;  %v23305_v48 = vld [vmem:[#allocation51_spill] sm:$0xff] }
 0x20d   :  { %23289 = vst [vmem:[#allocation148_spill] sm:$0xff] %v18404_v25  ;;  %4221 = vmatprep.subr.mxu1 %v23237_v10  ;;  %4310 = vmatprep.subr.mxu0 %v23238_v2  ;;  %v1552_v41 = vadd.f32 %v18173_v29, %v23295_v38  ;;  %v23296_v2 = vld [vmem:[#allocation33_spill] sm:$0xff] }
 0x20e   :  { %4222 = vmatpush1.msra.mxu1 %v17133_v52  ;;  %4311 = vmatpush1.msra.mxu0 %v17332_v6 }
 0x20f   :  { %4087 = vmatprep.mubr.f32.mxu1 %v23103_v47  ;;  %4176 = vmatprep.mubr.f32.mxu0 %v23103_v47  ;;  %v2096_v21 = vpop.f32.mrf.mxu1  ;;  %v2185_v4 = vpop.f32.mrf.mxu0 }
 0x210   :  { %4223 = vmatprep.subr.mxu1 %v23242_v8  ;;  %4312 = vmatprep.subr.mxu0 %v17341_v19  ;;  %v18419_v34 = vadd.f32 %v2096_v21, %v23291_v53  ;;  %v18421_v25 = vadd.f32 %v2185_v4, %v1546_v9  ;;  %v23297_v4 = vld [vmem:[#allocation37_spill] sm:$0xff] }
 0x211   :  { %13811 = vmatmul.mubr.msk.f32.gmra.mxu1 %vm552_vm2, %v18318_v35  ;;  %13815 = vmatmul.mubr.msk.f32.gmra.mxu0 %vm552_vm2, %v18318_v35  ;;  %v18427_v17 = vpop.f32.mrf.mxu1  ;;  %v18429_v37 = vpop.f32.mrf.mxu0  ;;  %v23298_v53 = vld [vmem:[#allocation65_spill] sm:$0xff] }
 0x212   :  { %23292 = vst [vmem:[#allocation82_spill] sm:$0xff] %v18421_v25  ;;  %23293 = vst [vmem:[#allocation113_spill] sm:$0xff] %v18427_v17  ;;  %4224 = vmatpush1.msra.mxu1 %v23296_v2  ;;  %4313 = vmatpush1.msra.mxu0 %v17353_v39  ;;  %v23299_v17 = vld [vmem:[#allocation116_spill] sm:$0xff]  ;;  %v23304_v25 = vld [vmem:[#allocation131_spill] sm:$0xff] }
 0x213   :  { %23294 = vst [vmem:[#allocation149_spill] sm:$0xff] %v18429_v37  ;;  %4225 = vmatprep.subr.mxu1 %v23243_v43  ;;  %4314 = vmatprep.subr.mxu0 %v17362_v0  ;;  %v2102_v9 = vpop.f32.mrf.mxu1  ;;  %v2191_v21 = vpop.f32.mrf.mxu0  ;;  %v23303_v0 = vld [vmem:[#allocation88_spill] sm:$0xff] }
 0x214   :  { %4226 = vmatpush1.msra.mxu1 %v23297_v4  ;;  %4315 = vmatpush1.msra.mxu0 %v23298_v53  ;;  %v18440_v19 = vadd.f32 %v2102_v9, %v23299_v17  ;;  %v18442_v37 = vadd.f32 %v2191_v21, %v1552_v41  ;;  %v1712_v1 = vadd.f32 %v23304_v25, %v23303_v0  ;;  %v23306_v9 = vld [vmem:[#allocation119_spill] sm:$0xff] }
 0x215   :  { %4093 = vmatprep.mubr.f32.mxu1 %v23103_v47  ;;  %4182 = vmatprep.mubr.f32.mxu0 %v23103_v47  ;;  %v18446_v29 = vpop.f32.mrf.mxu1  ;;  %v18448_v38 = vpop.f32.mrf.mxu0 }
 0x216   :  { %23300 = vst [vmem:[#allocation85_spill] sm:$0xff] %v18442_v37  ;;  %23301 = vst [vmem:[#allocation116_spill] sm:$0xff] %v18446_v29  ;;  %4397 = vmatprep.subr.mxu1 %v23256_v30  ;;  %4486 = vmatprep.subr.mxu0 %v23305_v48  ;;  %v23310_v29 = vld [vmem:[#allocation91_spill] sm:$0xff]  ;;  %v23321_v37 = vld [vmem:[#allocation125_spill] sm:$0xff] }
 0x217   :  { %23302 = vst [vmem:[#allocation150_spill] sm:$0xff] %v18448_v38  ;;  %13812 = vmatmul.mubr.msk.f32.gmra.mxu1 %vm552_vm2, %v18348_v40  ;;  %13816 = vmatmul.mubr.msk.f32.gmra.mxu0 %vm552_vm2, %v18348_v40  ;;  %v2262_v41 = vpop.f32.mrf.mxu1  ;;  %v2351_v17 = vpop.f32.mrf.mxu0  ;;  %v1718_v48 = vadd.f32 %v18209_v51, %v23310_v29  ;;  %v23315_v29 = vld [vmem:[#allocation39_spill] sm:$0xff] }
 0x218   :  { %4099 = vmatprep.mubr.f32.mxu1 %v23103_v47  ;;  %4188 = vmatprep.mubr.f32.mxu0 %v23103_v47  ;;  %v18461_v21 = vadd.f32 %v2262_v41, %v23306_v9  ;;  %v18463_v0 = vadd.f32 %v2351_v17, %v1712_v1  ;;  %v23311_v17 = vld [vmem:[#allocation122_spill] sm:$0xff] }
 0x219   :  { %v18465_v25 = vpop.f32.mrf.mxu1  ;;  %v18467_v38 = vpop.f32.mrf.mxu0 }
 0x21a   :  { %23307 = vst [vmem:[#allocation88_spill] sm:$0xff] %v18463_v0  ;;  %23308 = vst [vmem:[#allocation131_spill] sm:$0xff] %v18465_v25  ;;  %v23316_v0 = vld [vmem:[#allocation47_spill] sm:$0xff] }
 0x21b   :  { %23309 = vst [vmem:[#allocation119_spill] sm:$0xff] %v18467_v38  ;;  %13813 = vmatmul.mubr.msk.f32.gmra.mxu1 %vm552_vm2, %v18374_v57  ;;  %13817 = vmatmul.mubr.msk.f32.gmra.mxu0 %vm552_vm2, %v18374_v57 }
 0x21c   :  { %4259 = vmatprep.mubr.f32.mxu1 %v23103_v47  ;;  %4348 = vmatprep.mubr.f32.mxu0 %v23103_v47 }
 0x21d   :  { %v2268_v41 = vpop.f32.mrf.mxu1  ;;  %v2357_v1 = vpop.f32.mrf.mxu0 }
 0x21e   :  { %v18478_v9 = vadd.f32 %v2268_v41, %v23311_v17  ;;  %v18480_v25 = vadd.f32 %v2357_v1, %v1718_v48  ;;  %v23317_v41 = vld [vmem:[#allocation52_spill] sm:$0xff]  ;;  %v23318_v48 = vld [vmem:[#allocation94_spill] sm:$0xff] }
 0x21f   :  { %13818 = vmatmul.mubr.msk.f32.vlgmr.msra.gmra.mxu1 %vm552_vm2, %v18292_v49  ;;  %13822 = vmatmul.mubr.msk.f32.vlgmr.msra.gmra.mxu0 %vm552_vm2, %v18292_v49  ;;  %v18486_v38 = vpop.f32.mrf.mxu1  ;;  %v18488_v51 = vpop.f32.mrf.mxu0  ;;  %v1724_v1 = vadd.f32 %v18230_v59, %v23318_v48  ;;  %v23319_v17 = vld [vmem:[#allocation40_spill] sm:$0xff] }
 0x220   :  { %23312 = vst [vmem:[#allocation91_spill] sm:$0xff] %v18480_v25  ;;  %23313 = vst [vmem:[#allocation122_spill] sm:$0xff] %v18486_v38  ;;  %4398 = vmatpush1.msra.mxu1 %v23315_v29  ;;  %4487 = vmatpush1.msra.mxu0 %v23316_v0  ;;  %v23320_v25 = vld [vmem:[#allocation53_spill] sm:$0xff] }
 0x221   :  { %23314 = vst [vmem:[#allocation151_spill] sm:$0xff] %v18488_v51  ;;  %4399 = vmatprep.subr.mxu1 %v23259_v56  ;;  %4488 = vmatprep.subr.mxu0 %v23317_v41 }
 0x222   :  { %4400 = vmatpush1.msra.mxu1 %v23319_v17  ;;  %4489 = vmatpush1.msra.mxu0 %v23258_v50  ;;  %v23325_v50 = vld [vmem:[#allocation97_spill] sm:$0xff] }
 0x223   :  { %4265 = vmatprep.mubr.f32.mxu1 %v23103_v47  ;;  %4354 = vmatprep.mubr.f32.mxu0 %v23103_v47  ;;  %v2274_v51 = vpop.f32.mrf.mxu1  ;;  %v2363_v38 = vpop.f32.mrf.mxu0  ;;  %v23326_v17 = vld [vmem:[#allocation41_spill] sm:$0xff] }
 0x224   :  { %4401 = vmatprep.subr.mxu1 %v23264_v20  ;;  %4490 = vmatprep.subr.mxu0 %v23320_v25  ;;  %v18503_v56 = vadd.f32 %v2274_v51, %v23321_v37  ;;  %v18505_v41 = vadd.f32 %v2363_v38, %v1724_v1  ;;  %v1730_v20 = vadd.f32 %v18249_v5, %v23325_v50  ;;  %v23327_v25 = vld [vmem:[#allocation49_spill] sm:$0xff]  ;;  %v23328_v37 = vld [vmem:[#allocation54_spill] sm:$0xff] }
 0x225   :  { %13819 = vmatmul.mubr.msk.f32.gmra.mxu1 %vm552_vm2, %v18318_v35  ;;  %13823 = vmatmul.mubr.msk.f32.gmra.mxu0 %vm552_vm2, %v18318_v35  ;;  %v18511_v59 = vpop.f32.mrf.mxu1  ;;  %v18513_v48 = vpop.f32.mrf.mxu0  ;;  %v23329_v1 = vld [vmem:[#allocation42_spill] sm:$0xff] }
 0x226   :  { %23322 = vst [vmem:[#allocation94_spill] sm:$0xff] %v18505_v41  ;;  %23323 = vst [vmem:[#allocation125_spill] sm:$0xff] %v18511_v59  ;;  %4402 = vmatpush1.msra.mxu1 %v23326_v17  ;;  %4491 = vmatpush1.msra.mxu0 %v23327_v25  ;;  %v23330_v59 = vld [vmem:[#allocation128_spill] sm:$0xff] }
 0x227   :  { %23324 = vst [vmem:[#allocation152_spill] sm:$0xff] %v18513_v48  ;;  %4403 = vmatprep.subr.mxu1 %v23266_v13  ;;  %4492 = vmatprep.subr.mxu0 %v23328_v37  ;;  %v2280_v38 = vpop.f32.mrf.mxu1  ;;  %v2369_v51 = vpop.f32.mrf.mxu0 }
 0x228   :  { %4404 = vmatpush1.msra.mxu1 %v23329_v1  ;;  %4493 = vmatpush1.msra.mxu0 %v23265_v7  ;;  %v18524_v41 = vadd.f32 %v2280_v38, %v23330_v59  ;;  %v18526_v48 = vadd.f32 %v2369_v51, %v1730_v20  ;;  %v23334_v38 = vld [vmem:[#allocation100_spill] sm:$0xff] }
 0x229   :  { %4271 = vmatprep.mubr.f32.mxu1 %v23103_v47  ;;  %4360 = vmatprep.mubr.f32.mxu0 %v23103_v47  ;;  %v18530_v50 = vpop.f32.mrf.mxu1  ;;  %v18532_v5 = vpop.f32.mrf.mxu0 }
 0x22a   :  { %23331 = vst [vmem:[#allocation97_spill] sm:$0xff] %v18526_v48  ;;  %23332 = vst [vmem:[#allocation128_spill] sm:$0xff] %v18530_v50  ;;  %4648 = vmatprep.subr.mxu1 %v23276_v26  ;;  %4737 = vmatprep.subr.mxu0 %v17057_v18 }
 0x22b   :  { %23333 = vst [vmem:[#allocation153_spill] sm:$0xff] %v18532_v5  ;;  %13820 = vmatmul.mubr.msk.f32.gmra.mxu1 %vm552_vm2, %v18348_v40  ;;  %13824 = vmatmul.mubr.msk.f32.gmra.mxu0 %vm552_vm2, %v18348_v40  ;;  %v2440_v20 = vpop.f32.mrf.mxu1  ;;  %v2602_v59 = vpop.f32.mrf.mxu0 }
 0x22c   :  { %4277 = vmatprep.mubr.f32.mxu1 %v23103_v47  ;;  %4366 = vmatprep.mubr.f32.mxu0 %v23103_v47  ;;  %v18543_v51 = vadd.f32 %v2440_v20, %v23334_v38  ;;  %v18546_v5 = vadd.f32 %v2602_v59, %v18273_v3  ;;  %v23337_v38 = vld [vmem:[#allocation134_spill] sm:$0xff] }
 0x22d   :  { %v18548_v26 = vpop.f32.mrf.mxu1  ;;  %v18550_v18 = vpop.f32.mrf.mxu0 }
 0x22e   :  { %23335 = vst [vmem:[#allocation100_spill] sm:$0xff] %v18548_v26  ;;  %23336 = vst [vmem:[#allocation154_spill] sm:$0xff] %v18550_v18  ;;  %v23339_v18 = vld [vmem:[#allocation8_spill] sm:$0xff] }
 0x22f   :  { %13821 = vmatmul.mubr.msk.f32.gmra.mxu1 %vm552_vm2, %v18374_v57  ;;  %13825 = vmatmul.mubr.msk.f32.gmra.mxu0 %vm552_vm2, %v18374_v57 }
 0x230   :  { %4437 = vmatprep.mubr.f32.mxu1 %v23103_v47  ;;  %4526 = vmatprep.mubr.f32.mxu0 %v23103_v47 }
 0x231   :  { %v2446_v50 = vpop.f32.mrf.mxu1  ;;  %v2608_v20 = vpop.f32.mrf.mxu0 }
 0x232   :  { %v18559_v48 = vadd.f32 %v2446_v50, %v23337_v38  ;;  %v18562_v3 = vadd.f32 %v2608_v20, %v18295_v14  ;;  %v23340_v14 = vld [vmem:[#allocation12_spill] sm:$0xff]  ;;  %v23341_v20 = vld [vmem:[#allocation10_spill] sm:$0xff] }
 0x233   :  { %13826 = vmatmul.mubr.msk.f32.vlgmr.msra.gmra.mxu1 %vm552_vm2, %v18292_v49  ;;  %13830 = vmatmul.mubr.msk.f32.vlgmr.msra.gmra.mxu0 %vm552_vm2, %v18292_v49  ;;  %v18568_v59 = vpop.f32.mrf.mxu1  ;;  %v18570_v26 = vpop.f32.mrf.mxu0 }
 0x234   :  { %23338 = vst [vmem:[#allocation134_spill] sm:$0xff] %v18568_v59  ;;  %4649 = vmatpush1.msra.mxu1 %v23339_v18  ;;  %4738 = vmatpush1.msra.mxu0 %v23156_v23  ;;  %v23380_v23 = vld [vmem:[#allocation56_spill] sm:$0xff] }
 0x235   :  { %4650 = vmatprep.subr.mxu1 %v23157_v28  ;;  %4739 = vmatprep.subr.mxu0 %v17105_v60 }
 0x236   :  { %4651 = vmatpush1.msra.mxu1 %v23340_v14  ;;  %4740 = vmatpush1.msra.mxu0 %v23159_v32  ;;  %v23343_v32 = vld [vmem:[#allocation15_spill] sm:$0xff] }
 0x237   :  { %4443 = vmatprep.mubr.f32.mxu1 %v23103_v47  ;;  %4532 = vmatprep.mubr.f32.mxu0 %v23103_v47  ;;  %v2452_v49 = vpop.f32.mrf.mxu1  ;;  %v2614_v50 = vpop.f32.mrf.mxu0 }
 0x238   :  { %4652 = vmatprep.subr.mxu1 %v23160_v36  ;;  %4741 = vmatprep.subr.mxu0 %v17122_v42  ;;  %v18583_v38 = vadd.f32 %v2452_v49, %v23341_v20  ;;  %v18586_v28 = vadd.f32 %v2614_v50, %v18325_v55  ;;  %v23344_v50 = vld [vmem:[#allocation18_spill] sm:$0xff] }
 0x239   :  { %13827 = vmatmul.mubr.msk.f32.gmra.mxu1 %vm552_vm2, %v18318_v35  ;;  %13831 = vmatmul.mubr.msk.f32.gmra.mxu0 %vm552_vm2, %v18318_v35  ;;  %v18592_v14 = vpop.f32.mrf.mxu1  ;;  %v18594_v18 = vpop.f32.mrf.mxu0 }
 0x23a   :  { %23342 = vst [vmem:[#allocation10_spill] sm:$0xff] %v18592_v14  ;;  %4653 = vmatpush1.msra.mxu1 %v23343_v32  ;;  %4742 = vmatpush1.msra.mxu0 %v23162_v16  ;;  %v23377_v16 = vld [vmem:[#allocation51_spill] sm:$0xff] }
 0x23b   :  { %4654 = vmatprep.subr.mxu1 %v23163_v22  ;;  %4743 = vmatprep.subr.mxu0 %v17160_v31  ;;  %v2458_v55 = vpop.f32.mrf.mxu1  ;;  %v2620_v49 = vpop.f32.mrf.mxu0 }
 0x23c   :  { %4655 = vmatpush1.msra.mxu1 %v23344_v50  ;;  %4744 = vmatpush1.msra.mxu0 %v23165_v44  ;;  %v18603_v35 = vadd.f32 %v2458_v55, %v18254_v15  ;;  %v18606_v20 = vadd.f32 %v2620_v49, %v18351_v46  ;;  %v23349_v44 = vld [vmem:[#allocation23_spill] sm:$0xff] }
 0x23d   :  { %4449 = vmatprep.mubr.f32.mxu1 %v23103_v47  ;;  %4538 = vmatprep.mubr.f32.mxu0 %v23103_v47  ;;  %v18610_v32 = vpop.f32.mrf.mxu1  ;;  %v18612_v22 = vpop.f32.mrf.mxu0 }
 0x23e   :  { %23345 = vst [vmem:[#allocation155_spill] sm:$0xff] %v18610_v32  ;;  %4826 = vmatprep.subr.mxu1 %v17092_v33  ;;  %4915 = vmatprep.subr.mxu0 %v17318_v62 }
 0x23f   :  { %13828 = vmatmul.mubr.msk.f32.gmra.mxu1 %vm552_vm2, %v18348_v40  ;;  %13832 = vmatmul.mubr.msk.f32.gmra.mxu0 %vm552_vm2, %v18348_v40  ;;  %v2691_v15 = vpop.f32.mrf.mxu1  ;;  %v2780_v46 = vpop.f32.mrf.mxu0 }
 0x240   :  { %4455 = vmatprep.mubr.f32.mxu1 %v23103_v47  ;;  %4544 = vmatprep.mubr.f32.mxu0 %v23103_v47  ;;  %v18623_v55 = vadd.f32 %v2691_v15, %v18275_v61  ;;  %v18626_v49 = vadd.f32 %v2780_v46, %v18377_v63  ;;  %v18641_v61 = vld [vmem:[%s22859_s7 + $0xc0] sm:$0xff] }
 0x241   :  { %v18628_v50 = vpop.f32.mrf.mxu1  ;;  %v18630_v62 = vpop.f32.mrf.mxu0  ;;  %v23347_v15 = vld [vmem:[#allocation67_spill] sm:$0xff] }
 0x242   :  { %23346 = vst [vmem:[#allocation156_spill] sm:$0xff] %v18630_v62 }
 0x243   :  { %13829 = vmatmul.mubr.msk.f32.gmra.mxu1 %vm552_vm2, %v18374_v57  ;;  %13833 = vmatmul.mubr.msk.f32.gmra.mxu0 %vm552_vm2, %v18374_v57 }
 0x244   :  { %4688 = vmatprep.mubr.f32.mxu1 %v23103_v47  ;;  %4777 = vmatprep.mubr.f32.mxu0 %v23103_v47 }
 0x245   :  { %v2697_v40 = vpop.f32.mrf.mxu1  ;;  %v2786_v63 = vpop.f32.mrf.mxu0 }
 0x246   :  { %v18644_v46 = vadd.f32 %v2697_v40, %v23347_v15  ;;  %v18647_v36 = vadd.f32 %v2786_v63, %v18394_v11  ;;  %v23350_v11 = vld [vmem:[#allocation26_spill] sm:$0xff]  ;;  %v18666_v40 = vld [vmem:[%s22859_s7 + $0xc8] sm:$0xff] }
 0x247   :  { %13838 = vmatmul.mubr.msk.f32.vlgmr.msra.gmra.mxu1 %vm552_vm2, %v18641_v61  ;;  %13842 = vmatmul.mubr.msk.f32.vlgmr.msra.gmra.mxu0 %vm552_vm2, %v18641_v61  ;;  %v18653_v57 = vpop.f32.mrf.mxu1  ;;  %v18655_v33 = vpop.f32.mrf.mxu0 }
 0x248   :  { %23348 = vst [vmem:[#allocation67_spill] sm:$0xff] %v18655_v33  ;;  %4827 = vmatpush1.msra.mxu1 %v23349_v44  ;;  %4916 = vmatpush1.msra.mxu0 %v23167_v54 }
 0x249   :  { %4828 = vmatprep.subr.mxu1 %v17133_v52  ;;  %4917 = vmatprep.subr.mxu0 %v17332_v6  ;;  %v23359_v52 = vld [vmem:[#allocation40_spill] sm:$0xff] }
 0x24a   :  { %4829 = vmatpush1.msra.mxu1 %v23350_v11  ;;  %4918 = vmatpush1.msra.mxu0 %v23237_v10 }
 0x24b   :  { %4694 = vmatprep.mubr.f32.mxu1 %v23103_v47  ;;  %4783 = vmatprep.mubr.f32.mxu0 %v23103_v47  ;;  %v2703_v63 = vpop.f32.mrf.mxu1  ;;  %v2792_v15 = vpop.f32.mrf.mxu0 }
 0x24c   :  { %4830 = vmatprep.subr.mxu1 %v23296_v2  ;;  %4919 = vmatprep.subr.mxu0 %v17353_v39  ;;  %v18673_v6 = vadd.f32 %v2703_v63, %v18327_v45  ;;  %v18676_v10 = vadd.f32 %v2792_v15, %v18419_v34  ;;  %v18695_v63 = vld [vmem:[%s22859_s7 + $0xd0] sm:$0xff]  ;;  %v23358_v2 = vld [vmem:[#allocation38_spill] sm:$0xff] }
 0x24d   :  { %13839 = vmatmul.mubr.msk.f32.gmra.mxu1 %vm552_vm2, %v18666_v40  ;;  %13843 = vmatmul.mubr.msk.f32.gmra.mxu0 %vm552_vm2, %v18666_v40  ;;  %v18682_v54 = vpop.f32.mrf.mxu1  ;;  %v18684_v11 = vpop.f32.mrf.mxu0 }
 0x24e   :  { %23351 = vst [vmem:[#allocation157_spill] sm:$0xff] %v18684_v11  ;;  %4831 = vmatpush1.msra.mxu1 %v17117_v24  ;;  %4920 = vmatpush1.msra.mxu0 %v23242_v8 }
 0x24f   :  { %4832 = vmatprep.subr.mxu1 %v23297_v4  ;;  %4921 = vmatprep.subr.mxu0 %v23298_v53  ;;  %v2709_v45 = vpop.f32.mrf.mxu1  ;;  %v2798_v34 = vpop.f32.mrf.mxu0 }
 0x250   :  { %4833 = vmatpush1.msra.mxu1 %v17152_v27  ;;  %4922 = vmatpush1.msra.mxu0 %v23243_v43  ;;  %v18698_v15 = vadd.f32 %v2709_v45, %v18353_v58  ;;  %v18701_v8 = vadd.f32 %v2798_v34, %v18440_v19  ;;  %v18720_v45 = vld [vmem:[%s22859_s7 + $0xd8] sm:$0xff] }
 0x251   :  { %4700 = vmatprep.mubr.f32.mxu1 %v23103_v47  ;;  %4789 = vmatprep.mubr.f32.mxu0 %v23103_v47  ;;  %v18705_v53 = vpop.f32.mrf.mxu1  ;;  %v18707_v39 = vpop.f32.mrf.mxu0 }
 0x252   :  { %23352 = vst [vmem:[#allocation158_spill] sm:$0xff] %v18707_v39  ;;  %5004 = vmatprep.subr.mxu1 %v23315_v29  ;;  %5093 = vmatprep.subr.mxu0 %v23316_v0  ;;  %v23473_v39 = vld [vmem:[#allocation80_spill] sm:$0xff] }
 0x253   :  { %13840 = vmatmul.mubr.msk.f32.gmra.mxu1 %vm552_vm2, %v18695_v63  ;;  %13844 = vmatmul.mubr.msk.f32.gmra.mxu0 %vm552_vm2, %v18695_v63  ;;  %v2869_v19 = vpop.f32.mrf.mxu1  ;;  %v2958_v58 = vpop.f32.mrf.mxu0 }
 0x254   :  { %4706 = vmatprep.mubr.f32.mxu1 %v23103_v47  ;;  %4795 = vmatprep.mubr.f32.mxu0 %v23103_v47  ;;  %v18723_v34 = vadd.f32 %v2869_v19, %v18379_v12  ;;  %v18726_v0 = vadd.f32 %v2958_v58, %v18461_v21  ;;  %v23355_v19 = vld [vmem:[#allocation79_spill] sm:$0xff] }
 0x255   :  { %v18728_v29 = vpop.f32.mrf.mxu1  ;;  %v18730_v43 = vpop.f32.mrf.mxu0 }
 0x256   :  { %23353 = vst [vmem:[#allocation159_spill] sm:$0xff] %v18728_v29  ;;  %23354 = vst [vmem:[#allocation160_spill] sm:$0xff] %v18730_v43 }
 0x257   :  { %13841 = vmatmul.mubr.msk.f32.gmra.mxu1 %vm552_vm2, %v18720_v45  ;;  %13845 = vmatmul.mubr.msk.f32.gmra.mxu0 %vm552_vm2, %v18720_v45 }
 0x258   :  { %4866 = vmatprep.mubr.f32.mxu1 %v23103_v47  ;;  %4955 = vmatprep.mubr.f32.mxu0 %v23103_v47 }
 0x259   :  { %v2875_v27 = vpop.f32.mrf.mxu1  ;;  %v2964_v12 = vpop.f32.mrf.mxu0 }
 0x25a   :  { %v18739_v4 = vadd.f32 %v2875_v27, %v23355_v19  ;;  %v18742_v21 = vadd.f32 %v2964_v12, %v18478_v9  ;;  %v23360_v27 = vld [vmem:[#allocation48_spill] sm:$0xff] }
 0x25b   :  { %13846 = vmatmul.mubr.msk.f32.vlgmr.msra.gmra.mxu1 %vm552_vm2, %v18641_v61  ;;  %13850 = vmatmul.mubr.msk.f32.vlgmr.msra.gmra.mxu0 %vm552_vm2, %v18641_v61  ;;  %v18748_v58 = vpop.f32.mrf.mxu1  ;;  %v18750_v24 = vpop.f32.mrf.mxu0  ;;  %v23361_v9 = vld [vmem:[#allocation60_spill] sm:$0xff] }
 0x25c   :  { %23356 = vst [vmem:[#allocation79_spill] sm:$0xff] %v18748_v58  ;;  %23357 = vst [vmem:[#allocation161_spill] sm:$0xff] %v18750_v24  ;;  %5005 = vmatpush1.msra.mxu1 %v23358_v2  ;;  %5094 = vmatpush1.msra.mxu0 %v23256_v30  ;;  %v23362_v12 = vld [vmem:[#allocation44_spill] sm:$0xff]  ;;  %v23363_v2 = vld [vmem:[#allocation82_spill] sm:$0xff] }
 0x25d   :  { %5006 = vmatprep.subr.mxu1 %v23359_v52  ;;  %5095 = vmatprep.subr.mxu0 %v23360_v27 }
 0x25e   :  { %5007 = vmatpush1.msra.mxu1 %v23361_v9  ;;  %5096 = vmatpush1.msra.mxu0 %v23362_v12  ;;  %v23366_v9 = vld [vmem:[#allocation62_spill] sm:$0xff] }
 0x25f   :  { %4872 = vmatprep.mubr.f32.mxu1 %v23103_v47  ;;  %4961 = vmatprep.mubr.f32.mxu0 %v23103_v47  ;;  %v2881_v19 = vpop.f32.mrf.mxu1  ;;  %v2970_v44 = vpop.f32.mrf.mxu0 }
 0x260   :  { %5008 = vmatprep.subr.mxu1 %v23326_v17  ;;  %5097 = vmatprep.subr.mxu0 %v23327_v25  ;;  %v18763_v30 = vadd.f32 %v2881_v19, %v23363_v2  ;;  %v18766_v52 = vadd.f32 %v2970_v44, %v18503_v56  ;;  %v23367_v17 = vld [vmem:[#allocation45_spill] sm:$0xff]  ;;  %v23368_v56 = vld [vmem:[#allocation64_spill] sm:$0xff] }
 0x261   :  { %13847 = vmatmul.mubr.msk.f32.gmra.mxu1 %vm552_vm2, %v18666_v40  ;;  %13851 = vmatmul.mubr.msk.f32.gmra.mxu0 %vm552_vm2, %v18666_v40  ;;  %v18772_v12 = vpop.f32.mrf.mxu1  ;;  %v18774_v27 = vpop.f32.mrf.mxu0  ;;  %v23369_v19 = vld [vmem:[#allocation85_spill] sm:$0xff] }
 0x262   :  { %23364 = vst [vmem:[#allocation82_spill] sm:$0xff] %v18772_v12  ;;  %23365 = vst [vmem:[#allocation162_spill] sm:$0xff] %v18774_v27  ;;  %5009 = vmatpush1.msra.mxu1 %v23366_v9  ;;  %5098 = vmatpush1.msra.mxu0 %v23367_v17 }
 0x263   :  { %5010 = vmatprep.subr.mxu1 %v23329_v1  ;;  %5099 = vmatprep.subr.mxu0 %v23265_v7  ;;  %v2887_v44 = vpop.f32.mrf.mxu1  ;;  %v2976_v2 = vpop.f32.mrf.mxu0  ;;  %v23372_v7 = vld [vmem:[#allocation55_spill] sm:$0xff] }
 0x264   :  { %5011 = vmatpush1.msra.mxu1 %v23368_v56  ;;  %5100 = vmatpush1.msra.mxu0 %v23266_v13  ;;  %v18783_v25 = vadd.f32 %v2887_v44, %v23369_v19  ;;  %v18786_v31 = vadd.f32 %v2976_v2, %v18524_v41  ;;  %v23373_v2 = vld [vmem:[#allocation88_spill] sm:$0xff] }
 0x265   :  { %4878 = vmatprep.mubr.f32.mxu1 %v23103_v47  ;;  %4967 = vmatprep.mubr.f32.mxu0 %v23103_v47  ;;  %v18790_v17 = vpop.f32.mrf.mxu1  ;;  %v18792_v1 = vpop.f32.mrf.mxu0 }
 0x266   :  { %23370 = vst [vmem:[#allocation85_spill] sm:$0xff] %v18790_v17  ;;  %23371 = vst [vmem:[#allocation163_spill] sm:$0xff] %v18792_v1  ;;  %5182 = vmatprep.subr.mxu1 %v23372_v7  ;;  %13848 = vmatmul.mubr.msk.f32.gmra.mxu1 %vm552_vm2, %v18695_v63 }
 0x267   :  { %13852 = vmatmul.mubr.msk.f32.gmra.mxu0 %vm552_vm2, %v18695_v63  ;;  %4884 = vmatprep.mubr.f32.mxu1 %v23103_v47  ;;  %v3047_v41 = vpop.f32.mrf.mxu1  ;;  %v3136_v44 = vpop.f32.mrf.mxu0 }
 0x268   :  { %4973 = vmatprep.mubr.f32.mxu0 %v23103_v47  ;;  %v18802_v19 = vadd.f32 %v3047_v41, %v23373_v2  ;;  %v18805_v13 = vadd.f32 %v3136_v44, %v18543_v51  ;;  %v23376_v51 = vld [vmem:[#allocation91_spill] sm:$0xff] }
 0x269   :  { %v18807_v56 = vpop.f32.mrf.mxu1  ;;  %v18809_v7 = vpop.f32.mrf.mxu0 }
 0x26a   :  { %23374 = vst [vmem:[#allocation88_spill] sm:$0xff] %v18807_v56  ;;  %23375 = vst [vmem:[#allocation164_spill] sm:$0xff] %v18809_v7  ;;  %13849 = vmatmul.mubr.msk.f32.gmra.mxu1 %vm552_vm2, %v18720_v45  ;;  %v23381_v7 = vld [vmem:[#allocation52_spill] sm:$0xff] }
 0x26b   :  { %13853 = vmatmul.mubr.msk.f32.gmra.mxu0 %vm552_vm2, %v18720_v45  ;;  %5044 = vmatprep.mubr.f32.mxu1 %v23103_v47 }
 0x26c   :  { %5133 = vmatprep.mubr.f32.mxu0 %v23103_v47 }
 0x26d   :  { %v3053_v9 = vpop.f32.mrf.mxu1  ;;  %v3142_v41 = vpop.f32.mrf.mxu0 }
 0x26e   :  { %13854 = vmatmul.mubr.msk.f32.vlgmr.msra.gmra.mxu1 %vm552_vm2, %v18641_v61  ;;  %v18820_v44 = vadd.f32 %v3053_v9, %v23376_v51  ;;  %v18823_v2 = vadd.f32 %v3142_v41, %v18559_v48  ;;  %v23382_v9 = vld [vmem:[#allocation57_spill] sm:$0xff] }
 0x26f   :  { %13858 = vmatmul.mubr.msk.f32.vlgmr.msra.gmra.mxu0 %vm552_vm2, %v18641_v61  ;;  %5183 = vmatpush1.msra.mxu1 %v23377_v16  ;;  %v18828_v42 = vpop.f32.mrf.mxu1  ;;  %v18830_v60 = vpop.f32.mrf.mxu0  ;;  %v23383_v48 = vld [vmem:[#allocation53_spill] sm:$0xff]  ;;  %v23384_v16 = vld [vmem:[#allocation58_spill] sm:$0xff] }
 0x270   :  { %23378 = vst [vmem:[#allocation91_spill] sm:$0xff] %v18828_v42  ;;  %23379 = vst [vmem:[#allocation165_spill] sm:$0xff] %v18830_v60  ;;  %5184 = vmatprep.subr.mxu1 %v23380_v23  ;;  %5050 = vmatprep.mubr.f32.mxu1 %v23103_v47  ;;  %v23385_v23 = vld [vmem:[#allocation94_spill] sm:$0xff] }
 0x271   :  { %5185 = vmatpush1.msra.mxu1 %v23381_v7  ;;  %5139 = vmatprep.mubr.f32.mxu0 %v23103_v47 }
 0x272   :  { %5186 = vmatprep.subr.mxu1 %v23382_v9  ;;  %13855 = vmatmul.mubr.msk.f32.gmra.mxu1 %vm552_vm2, %v18666_v40 }
 0x273   :  { %13859 = vmatmul.mubr.msk.f32.gmra.mxu0 %vm552_vm2, %v18666_v40  ;;  %5187 = vmatpush1.msra.mxu1 %v23383_v48  ;;  %v3059_v41 = vpop.f32.mrf.mxu1  ;;  %v3148_v51 = vpop.f32.mrf.mxu0 }
 0x274   :  { %5188 = vmatprep.subr.mxu1 %v23384_v16  ;;  %5056 = vmatprep.mubr.f32.mxu1 %v23103_v47  ;;  %v18845_v7 = vadd.f32 %v3059_v41, %v23385_v23  ;;  %v18848_v60 = vadd.f32 %v3148_v51, %v18583_v38  ;;  %v23388_v38 = vld [vmem:[#allocation97_spill] sm:$0xff] }
 0x275   :  { %5189 = vmatpush1.msra.mxu1 %v23328_v37  ;;  %5145 = vmatprep.mubr.f32.mxu0 %v23103_v47  ;;  %v18852_v9 = vpop.f32.mrf.mxu1  ;;  %v18854_v59 = vpop.f32.mrf.mxu0 }
 0x276   :  { %23386 = vst [vmem:[#allocation94_spill] sm:$0xff] %v18852_v9  ;;  %23387 = vst [vmem:[#allocation166_spill] sm:$0xff] %v18854_v59  ;;  %13856 = vmatmul.mubr.msk.f32.gmra.mxu1 %vm552_vm2, %v18695_v63 }
 0x277   :  { %13860 = vmatmul.mubr.msk.f32.gmra.mxu0 %vm552_vm2, %v18695_v63  ;;  %5062 = vmatprep.mubr.f32.mxu1 %v23103_v47  ;;  %v3065_v23 = vpop.f32.mrf.mxu1  ;;  %v3154_v41 = vpop.f32.mrf.mxu0 }
 0x278   :  { %5151 = vmatprep.mubr.f32.mxu0 %v23103_v47  ;;  %v18863_v51 = vadd.f32 %v3065_v23, %v23388_v38  ;;  %v18866_v37 = vadd.f32 %v3154_v41, %v18603_v35 }
 0x279   :  { %v18868_v16 = vpop.f32.mrf.mxu1  ;;  %v18870_v48 = vpop.f32.mrf.mxu0 }
 0x27a   :  { %23389 = vst [vmem:[#allocation97_spill] sm:$0xff] %v18868_v16  ;;  %23390 = vst [vmem:[#allocation167_spill] sm:$0xff] %v18870_v48  ;;  %13857 = vmatmul.mubr.msk.f32.gmra.mxu1 %vm552_vm2, %v18720_v45 }
 0x27b   :  { %13861 = vmatmul.mubr.msk.f32.gmra.mxu0 %vm552_vm2, %v18720_v45  ;;  %5222 = vmatprep.mubr.f32.mxu1 %v23103_v47  ;;  %v3298_v59 = vpop.f32.mrf.mxu1  ;;  %v3387_v14 = vpop.f32.mrf.mxu0 }
 0x27c   :  { %v18878_v23 = vadd.f32 %v3298_v59, %v18546_v5  ;;  %v18881_v35 = vadd.f32 %v3387_v14, %v18623_v55 }
 0x27d   :  { %v18883_v41 = vpop.f32.mrf.mxu1  ;;  %v18885_v38 = vpop.f32.mrf.mxu0 }
 0x27e   :  { %23391 = vst [vmem:[#allocation168_spill] sm:$0xff] %v18885_v38  ;;  %13862 = vmatmul.mubr.msk.f32.vlgmr.msra.gmra.mxu1 %vm552_vm2, %v18641_v61  ;;  %v19225_v38 = vpop.permute.xlu1 %5319 }
 0x27f   :  { %5228 = vmatprep.mubr.f32.mxu1 %v23103_v47 }
 0x281   :  { %v3304_v48 = vpop.f32.mrf.mxu1  ;;  %v3393_v32 = vpop.f32.mrf.mxu0 }
 0x282   :  { %13863 = vmatmul.mubr.msk.f32.gmra.mxu1 %vm552_vm2, %v18666_v40  ;;  %v18893_v5 = vadd.f32 %v3304_v48, %v18562_v3  ;;  %v18896_v59 = vadd.f32 %v3393_v32, %v18644_v46 }
 0x283   :  { %5234 = vmatprep.mubr.f32.mxu1 %v23103_v47  ;;  %v18899_v14 = vpop.f32.mrf.mxu1  ;;  %v18901_v55 = vpop.f32.mrf.mxu0 }
 0x284   :  { %23392 = vst [vmem:[#allocation169_spill] sm:$0xff] %v18901_v55  ;;  %v23481_v55 = vld [vmem:[#allocation70_spill] sm:$0xff] }
 0x286   :  { %13864 = vmatmul.mubr.msk.f32.gmra.mxu1 %vm552_vm2, %v18695_v63 }
 0x287   :  { %5240 = vmatprep.mubr.f32.mxu1 %v23103_v47  ;;  %v3310_v61 = vpop.f32.mrf.mxu1  ;;  %v3399_v56 = vpop.f32.mrf.mxu0 }
 0x288   :  { %v18907_v40 = vadd.f32 %v3310_v61, %v18586_v28  ;;  %v18910_v3 = vadd.f32 %v3399_v56, %v18673_v6 }
 0x289   :  { %v18912_v32 = vpop.f32.mrf.mxu1  ;;  %v18914_v46 = vpop.f32.mrf.mxu0 }
 0x28a   :  { %13865 = vmatmul.mubr.msk.f32.gmra.mxu1 %vm552_vm2, %v18720_v45 }
 0x28b   :  { %v3316_v48 = vpop.f32.mrf.mxu1  ;;  %v3405_v42 = vpop.f32.mrf.mxu0 }
 0x28c   :  { %v18919_v63 = vadd.f32 %v3316_v48, %v18606_v20  ;;  %v18922_v47 = vadd.f32 %v3405_v42, %v18698_v15 }
 0x28d   :  { %v18924_v28 = vpop.f32.mrf.mxu1  ;;  %v18926_v61 = vpop.f32.mrf.mxu0 }
 0x28f   :  { %v3476_v6 = vpop.f32.mrf.mxu1  ;;  %v3565_v56 = vpop.f32.mrf.mxu0 }
 0x290   :  { %v18929_v9 = vadd.f32 %v3476_v6, %v18626_v49  ;;  %v18932_v16 = vadd.f32 %v3565_v56, %v18723_v34 }
 0x291   :  { %v18934_v45 = vpop.f32.mrf.mxu1  ;;  %v18936_v43 = vpop.f32.mrf.mxu0 }
 0x292   :  { %23393 = vst [vmem:[#allocation170_spill] sm:$0xff] %v18934_v45  ;;  %23394 = vst [vmem:[#allocation171_spill] sm:$0xff] %v18936_v43 }
 0x295   :  { %v3482_v20 = vpop.f32.mrf.mxu1  ;;  %v3571_v48 = vpop.f32.mrf.mxu0 }
 0x296   :  { %v18939_v42 = vadd.f32 %v3482_v20, %v18647_v36  ;;  %v18942_v15 = vadd.f32 %v3571_v48, %v18739_v4 }
 0x297   :  { %v18944_v24 = vpop.f32.mrf.mxu1  ;;  %v18946_v27 = vpop.f32.mrf.mxu0 }
 0x298   :  { %23395 = vst [vmem:[#allocation172_spill] sm:$0xff] %v18944_v24  ;;  %23396 = vst [vmem:[#allocation173_spill] sm:$0xff] %v18946_v27 }
 0x29b   :  { %v3488_v49 = vpop.f32.mrf.mxu1  ;;  %v3577_v6 = vpop.f32.mrf.mxu0 }
 0x29c   :  { %v18949_v34 = vadd.f32 %v3488_v49, %v18676_v10  ;;  %v18952_v56 = vadd.f32 %v3577_v6, %v18763_v30 }
 0x29d   :  { %v18954_v1 = vpop.f32.mrf.mxu1  ;;  %v18956_v43 = vpop.f32.mrf.mxu0 }
 0x29e   :  { %23397 = vst [vmem:[#allocation174_spill] sm:$0xff] %v18954_v1  ;;  %23398 = vst [vmem:[#allocation175_spill] sm:$0xff] %v18956_v43 }
 0x29f   :  { %v3494_v36 = vpop.f32.mrf.mxu1  ;;  %v3583_v20 = vpop.f32.mrf.mxu0 }
 0x2a0   :  { %v18959_v4 = vadd.f32 %v3494_v36, %v18701_v8  ;;  %v18962_v48 = vadd.f32 %v3583_v20, %v18783_v25  ;;  %v5383_v8 = vld [vmem:[%s22860_s9] sm:$0xff] }
 0x2a1   :  { %v18964_v27 = vpop.f32.mrf.mxu1  ;;  %v18966_v29 = vpop.f32.mrf.mxu0  ;;  %14957 = vmatprep.mubr.msk.f32.mxu0 %vm552_vm2, %v5383_v8 }
 0x2a2   :  { %23399 = vst [vmem:[#allocation176_spill] sm:$0xff] %v18962_v48  ;;  %23400 = vst [vmem:[#allocation177_spill] sm:$0xff] %v18964_v27 }
 0x2a3   :  { %23401 = vst [vmem:[#allocation178_spill] sm:$0xff] %v18966_v29  ;;  %v3654_v10 = vpop.f32.mrf.mxu1  ;;  %v3743_v49 = vpop.f32.mrf.mxu0 }
 0x2a4   :  { %v18969_v30 = vadd.f32 %v3654_v10, %v18726_v0  ;;  %v18972_v6 = vadd.f32 %v3743_v49, %v18802_v19  ;;  %v13878_v49 = vld [vmem:[%s22860_s9 + $0x40] sm:$0xff] }
 0x2a5   :  { %v18974_v58 = vpop.f32.mrf.mxu1  ;;  %v18976_v43 = vpop.f32.mrf.mxu0  ;;  %14985 = vmatprep.mubr.msk.f32.mxu1 %vm552_vm2, %v13878_v49 }
 0x2a6   :  { %23402 = vst [vmem:[#allocation179_spill] sm:$0xff] %v18974_v58  ;;  %23403 = vst [vmem:[#allocation180_spill] sm:$0xff] %v18976_v43 }
 0x2a9   :  { %v3660_v25 = vpop.f32.mrf.mxu1  ;;  %v3749_v36 = vpop.f32.mrf.mxu0 }
 0x2aa   :  { %v18983_v20 = vadd.f32 %v3660_v25, %v18742_v21  ;;  %v18986_v0 = vadd.f32 %v3749_v36, %v18820_v44 }
 0x2ab   :  { %v18988_v19 = vpop.f32.mrf.mxu1  ;;  %v18990_v10 = vpop.f32.mrf.mxu0 }
 0x2ac   :  { %23404 = vst [vmem:[#allocation181_spill] sm:$0xff] %v18988_v19  ;;  %23405 = vst [vmem:[#allocation182_spill] sm:$0xff] %v18990_v10 }
 0x2af   :  { %v3666_v43 = vpop.f32.mrf.mxu1  ;;  %v3755_v8 = vpop.f32.mrf.mxu0 }
 0x2b0   :  { %v18997_v58 = vadd.f32 %v3666_v43, %v18766_v52  ;;  %v19000_v21 = vadd.f32 %v3755_v8, %v18845_v7 }
 0x2b1   :  { %v19002_v44 = vpop.f32.mrf.mxu1  ;;  %v19004_v25 = vpop.f32.mrf.mxu0 }
 0x2b2   :  { %23406 = vst [vmem:[#allocation183_spill] sm:$0xff] %v19002_v44  ;;  %23407 = vst [vmem:[#allocation184_spill] sm:$0xff] %v19004_v25 }
 0x2b3   :  { %v3672_v36 = vpop.f32.mrf.mxu1  ;;  %v3761_v10 = vpop.f32.mrf.mxu0 }
 0x2b4   :  { %v19007_v19 = vadd.f32 %v3672_v36, %v18786_v31  ;;  %v19010_v29 = vadd.f32 %v3761_v10, %v18863_v51 }
 0x2b5   :  { %v19012_v49 = vpop.f32.mrf.mxu1  ;;  %v19014_v12 = vpop.f32.mrf.mxu0 }
 0x2b6   :  { %23408 = vst [vmem:[#allocation185_spill] sm:$0xff] %v19012_v49  ;;  %23409 = vst [vmem:[#allocation186_spill] sm:$0xff] %v19014_v12 }
 0x2b7   :  { %v3832_v52 = vpop.f32.mrf.mxu1  ;;  %v3994_v43 = vpop.f32.mrf.mxu0 }
 0x2b8   :  { %v19017_v7 = vadd.f32 %v3832_v52, %v18805_v13  ;;  %v19020_v8 = vadd.f32 %v3994_v43, %v18878_v23 }
 0x2b9   :  { %v19022_v25 = vpop.f32.mrf.mxu1  ;;  %v19024_v44 = vpop.f32.mrf.mxu0 }
 0x2ba   :  { %23410 = vst [vmem:[#allocation187_spill] sm:$0xff] %v19022_v25 }
 0x2bd   :  { %v3838_v31 = vpop.f32.mrf.mxu1  ;;  %v4000_v36 = vpop.f32.mrf.mxu0 }
 0x2be   :  { %v19027_v51 = vadd.f32 %v3838_v31, %v18823_v2  ;;  %v19030_v10 = vadd.f32 %v4000_v36, %v18893_v5 }
 0x2bf   :  { %v19032_v12 = vpop.f32.mrf.mxu1  ;;  %v19034_v49 = vpop.f32.mrf.mxu0 }
 0x2c0   :  { %23411 = vst [vmem:[#allocation188_spill] sm:$0xff] %v19032_v12 }
 0x2c3   :  { %v3844_v13 = vpop.f32.mrf.mxu1  ;;  %v4006_v52 = vpop.f32.mrf.mxu0 }
 0x2c4   :  { %v19037_v23 = vadd.f32 %v3844_v13, %v18848_v60  ;;  %v19040_v43 = vadd.f32 %v4006_v52, %v18907_v40 }
 0x2c5   :  { %v19042_v25 = vpop.f32.mrf.mxu1  ;;  %v19044_v17 = vpop.f32.mrf.mxu0 }
 0x2c6   :  { %23412 = vst [vmem:[#allocation189_spill] sm:$0xff] %v19042_v25 }
 0x2c7   :  { %v3850_v2 = vpop.f32.mrf.mxu1  ;;  %v19046_v31 = vpop.f32.mrf.mxu0 }
 0x2c8   :  { %v19049_v5 = vadd.f32 %v3850_v2, %v18866_v37 }
 0x2c9   :  { %v19051_v36 = vpop.f32.mrf.mxu1  ;;  %v19053_v12 = vpop.f32.mrf.mxu0 }
 0x2ca   :  { %23413 = vst [vmem:[#allocation190_spill] sm:$0xff] %v19051_v36 }
 0x2cb   :  { %v4083_v45 = vpop.f32.mrf.mxu1  ;;  %v4172_v60 = vpop.f32.mrf.mxu0 }
 0x2cc   :  { %v19056_v13 = vadd.f32 %v4083_v45, %v18881_v35  ;;  %v19059_v40 = vadd.f32 %v4172_v60, %v18929_v9 }
 0x2cd   :  { %v19061_v52 = vpop.f32.mrf.mxu1  ;;  %v19063_v25 = vpop.f32.mrf.mxu0 }
 0x2ce   :  { %23414 = vst [vmem:[#allocation191_spill] sm:$0xff] %v19059_v40  ;;  %23415 = vst [vmem:[#allocation192_spill] sm:$0xff] %v19061_v52 }
 0x2cf   :  { %23416 = vst [vmem:[#allocation193_spill] sm:$0xff] %v19063_v25 }
 0x2d1   :  { %v19065_v24 = vpop.f32.mrf.mxu1  ;;  %v4178_v37 = vpop.f32.mrf.mxu0 }
 0x2d2   :  { %v19068_v2 = vadd.f32 %v4178_v37, %v18939_v42 }
 0x2d3   :  { %v19070_v36 = vpop.f32.mrf.mxu1  ;;  %v19072_v62 = vpop.f32.mrf.mxu0 }
 0x2d4   :  { %23417 = vst [vmem:[#allocation194_spill] sm:$0xff] %v19068_v2  ;;  %23418 = vst [vmem:[#allocation195_spill] sm:$0xff] %v19070_v36 }
 0x2d5   :  { %23419 = vst [vmem:[#allocation196_spill] sm:$0xff] %v19072_v62 }
 0x2d7   :  { %v19074_v33 = vpop.f32.mrf.mxu1  ;;  %v4184_v35 = vpop.f32.mrf.mxu0 }
 0x2d8   :  { %v19077_v9 = vadd.f32 %v4184_v35, %v18949_v34 }
 0x2d9   :  { %v19079_v45 = vpop.f32.mrf.mxu1  ;;  %v19081_v60 = vpop.f32.mrf.mxu0 }
 0x2da   :  { %23420 = vst [vmem:[#allocation197_spill] sm:$0xff] %v19077_v9  ;;  %23421 = vst [vmem:[#allocation198_spill] sm:$0xff] %v19081_v60 }
 0x2db   :  { %v19083_v25 = vpop.f32.mrf.mxu1  ;;  %v4190_v48 = vpop.f32.mrf.mxu0 }
 0x2dc   :  { %v19086_v42 = vadd.f32 %v4190_v48, %v18959_v4 }
 0x2dd   :  { %v19088_v37 = vpop.f32.mrf.mxu1  ;;  %v19090_v40 = vpop.f32.mrf.mxu0 }
 0x2de   :  { %23422 = vst [vmem:[#allocation199_spill] sm:$0xff] %v19086_v42  ;;  %23423 = vst [vmem:[#allocation200_spill] sm:$0xff] %v19090_v40 }
 0x2df   :  { %v4261_v62 = vpop.f32.mrf.mxu1  ;;  %v4350_v1 = vpop.f32.mrf.mxu0 }
 0x2e0   :  { %v19093_v27 = vadd.f32 %v4261_v62, %v18932_v16  ;;  %v19096_v34 = vadd.f32 %v4350_v1, %v18969_v30 }
 0x2e1   :  { %v19098_v35 = vpop.f32.mrf.mxu1  ;;  %v19100_v60 = vpop.f32.mrf.mxu0 }
 0x2e2   :  { %23424 = vst [vmem:[#allocation201_spill] sm:$0xff] %v19093_v27  ;;  %23425 = vst [vmem:[#allocation202_spill] sm:$0xff] %v19096_v34 }
 0x2e3   :  { %23426 = vst [vmem:[#allocation203_spill] sm:$0xff] %v19098_v35  ;;  %23427 = vst [vmem:[#allocation204_spill] sm:$0xff] %v19100_v60 }
 0x2e5   :  { %v4267_v2 = vpop.f32.mrf.mxu1  ;;  %v4356_v11 = vpop.f32.mrf.mxu0 }
 0x2e6   :  { %v19103_v4 = vadd.f32 %v4267_v2, %v18942_v15  ;;  %v19106_v48 = vadd.f32 %v4356_v11, %v18983_v20 }
 0x2e7   :  { %v19108_v40 = vpop.f32.mrf.mxu1  ;;  %v19110_v52 = vpop.f32.mrf.mxu0 }
 0x2e8   :  { %23428 = vst [vmem:[#allocation205_spill] sm:$0xff] %v19103_v4  ;;  %23429 = vst [vmem:[#allocation206_spill] sm:$0xff] %v19106_v48  ;;  %v23467_v4 = vld [vmem:[#allocation66_spill] sm:$0xff] }
 0x2e9   :  { %23430 = vst [vmem:[#allocation207_spill] sm:$0xff] %v19108_v40  ;;  %23431 = vst [vmem:[#allocation208_spill] sm:$0xff] %v19110_v52 }
 0x2eb   :  { %v4273_v62 = vpop.f32.mrf.mxu1  ;;  %v4362_v16 = vpop.f32.mrf.mxu0 }
 0x2ec   :  { %v19113_v1 = vadd.f32 %v4273_v62, %v18952_v56  ;;  %v19116_v30 = vadd.f32 %v4362_v16, %v18997_v58 }
 0x2ed   :  { %v19118_v60 = vpop.f32.mrf.mxu1  ;;  %v19120_v34 = vpop.f32.mrf.mxu0 }
 0x2ee   :  { %23432 = vst [vmem:[#allocation209_spill] sm:$0xff] %v19113_v1  ;;  %23433 = vst [vmem:[#allocation210_spill] sm:$0xff] %v19116_v30  ;;  %v23468_v1 = vld [vmem:[#allocation109_spill] sm:$0xff] }
 0x2ef   :  { %23434 = vst [vmem:[#allocation211_spill] sm:$0xff] %v19118_v60  ;;  %23435 = vst [vmem:[#allocation212_spill] sm:$0xff] %v19120_v34  ;;  %v19122_v15 = vpop.f32.mrf.mxu1  ;;  %v4368_v11 = vpop.f32.mrf.mxu0 }
 0x2f0   :  { %23436 = vst [vmem:[#allocation213_spill] sm:$0xff] %v19122_v15  ;;  %v19125_v20 = vadd.f32 %v4368_v11, %v19007_v19  ;;  %v19193_v15 = vadd.f32 %v23468_v1, %v23467_v4  ;;  %v4581_v4 = vadd.f32 %v19074_v33, %v18910_v3 }
 0x2f1   :  { %v19127_v2 = vpop.f32.mrf.mxu1  ;;  %v19129_v52 = vpop.f32.mrf.mxu0 }
 0x2f2   :  { %23437 = vst [vmem:[#allocation214_spill] sm:$0xff] %v19125_v20  ;;  %23438 = vst [vmem:[#allocation215_spill] sm:$0xff] %v19127_v2  ;;  %v23465_v20 = vld [vmem:[#allocation74_spill] sm:$0xff]  ;;  %v23466_v2 = vld [vmem:[#allocation108_spill] sm:$0xff] }
 0x2f3   :  { %23439 = vst [vmem:[#allocation216_spill] sm:$0xff] %v19129_v52  ;;  %v4439_v48 = vpop.f32.mrf.mxu1  ;;  %v4528_v56 = vpop.f32.mrf.mxu0  ;;  %v1287_v27 = vadd.f32 %v23466_v2, %v23465_v20  ;;  %v23474_v20 = vld [vmem:[#allocation112_spill] sm:$0xff] }
 0x2f4   :  { %v19132_v62 = vadd.f32 %v4439_v48, %v18972_v6  ;;  %v19135_v58 = vadd.f32 %v4528_v56, %v19017_v7  ;;  %v19209_v2 = vadd.f32 %v23474_v20, %v23473_v39  ;;  %v4567_v39 = vadd.f32 %v19065_v24, %v18896_v59  ;;  %v23483_v59 = vld [vmem:[#allocation142_spill] sm:$0xff] }
 0x2f5   :  { %v19137_v16 = vpop.f32.mrf.mxu1  ;;  %v19139_v34 = vpop.f32.mrf.mxu0 }
 0x2f6   :  { %23440 = vst [vmem:[#allocation217_spill] sm:$0xff] %v19132_v62  ;;  %23441 = vst [vmem:[#allocation218_spill] sm:$0xff] %v19135_v58  ;;  %v23462_v62 = vld [vmem:[#allocation71_spill] sm:$0xff] }
 0x2f7   :  { %23442 = vst [vmem:[#allocation219_spill] sm:$0xff] %v19137_v16  ;;  %23443 = vst [vmem:[#allocation220_spill] sm:$0xff] %v19139_v34 }
 0x2f9   :  { %v4445_v35 = vpop.f32.mrf.mxu1  ;;  %v4534_v40 = vpop.f32.mrf.mxu0 }
 0x2fa   :  { %v19142_v19 = vadd.f32 %v4445_v35, %v18986_v0  ;;  %v19145_v11 = vadd.f32 %v4534_v40, %v19027_v51 }
 0x2fb   :  { %v19147_v52 = vpop.f32.mrf.mxu1  ;;  %v19149_v30 = vpop.f32.mrf.mxu0 }
 0x2fc   :  { %23444 = vst [vmem:[#allocation221_spill] sm:$0xff] %v19142_v19  ;;  %23445 = vst [vmem:[#allocation222_spill] sm:$0xff] %v19145_v11  ;;  %v23463_v19 = vld [vmem:[#allocation106_spill] sm:$0xff] }
 0x2fd   :  { %23446 = vst [vmem:[#allocation223_spill] sm:$0xff] %v19147_v52  ;;  %23447 = vst [vmem:[#allocation224_spill] sm:$0xff] %v19149_v30 }
 0x2ff   :  { %v4451_v6 = vpop.f32.mrf.mxu1  ;;  %v4540_v48 = vpop.f32.mrf.mxu0 }
 0x300   :  { %v19152_v7 = vadd.f32 %v4451_v6, %v19000_v21  ;;  %v19155_v56 = vadd.f32 %v4540_v48, %v19037_v23 }
 0x301   :  { %v19157_v34 = vpop.f32.mrf.mxu1  ;;  %v19159_v58 = vpop.f32.mrf.mxu0 }
 0x302   :  { %23448 = vst [vmem:[#allocation225_spill] sm:$0xff] %v19152_v7  ;;  %23449 = vst [vmem:[#allocation226_spill] sm:$0xff] %v19155_v56  ;;  %v1281_v7 = vadd.f32 %v23463_v19, %v23462_v62  ;;  %v23471_v19 = vld [vmem:[#allocation69_spill] sm:$0xff] }
 0x303   :  { %23450 = vst [vmem:[#allocation227_spill] sm:$0xff] %v19157_v34  ;;  %23451 = vst [vmem:[#allocation228_spill] sm:$0xff] %v19159_v58  ;;  %v4457_v0 = vpop.f32.mrf.mxu1  ;;  %v4546_v35 = vpop.f32.mrf.mxu0 }
 0x304   :  { %v19162_v51 = vadd.f32 %v4457_v0, %v19010_v29  ;;  %v19165_v40 = vadd.f32 %v4546_v35, %v19049_v5  ;;  %v23458_v5 = vld [vmem:[#allocation6_spill] sm:$0xff] }
 0x305   :  { %v19167_v30 = vpop.f32.mrf.mxu1  ;;  %v19169_v11 = vpop.f32.mrf.mxu0  ;;  %v23459_v35 = vld [vmem:[#allocation102_spill] sm:$0xff] }
 0x306   :  { %23452 = vst [vmem:[#allocation229_spill] sm:$0xff] %v19162_v51  ;;  %23453 = vst [vmem:[#allocation230_spill] sm:$0xff] %v19165_v40  ;;  %v1269_v34 = vadd.f32 %v23459_v35, %v23458_v5  ;;  %v23460_v40 = vld [vmem:[#allocation68_spill] sm:$0xff]  ;;  %v4593_v5 = vadd.f32 %v19046_v31, %v18919_v63  ;;  %v23470_v35 = vld [vmem:[#allocation110_spill] sm:$0xff]  ;;  %v19213_v31 = vpop.permute.xlu0 %5324 }
 0x307   :  { %23454 = vst [vmem:[#allocation231_spill] sm:$0xff] %v19167_v30  ;;  %23455 = vst [vmem:[#allocation232_spill] sm:$0xff] %v19169_v11  ;;  %v4690_v21 = vpop.f32.mrf.mxu1  ;;  %v4779_v6 = vpop.f32.mrf.mxu0  ;;  %v23461_v30 = vld [vmem:[#allocation104_spill] sm:$0xff] }
 0x308   :  { %v1275_v11 = vadd.f32 %v23461_v30, %v23460_v40  ;;  %v4595_v30 = vadd.f32 %v19083_v25, %v18922_v47  ;;  %v23469_v40 = vld [vmem:[#allocation77_spill] sm:$0xff]  ;;  %23475 = vst [vmem:[#allocation102_spill] sm:$0xff] %v19209_v2  ;;  %v23476_v47 = vld [vmem:[#allocation72_spill] sm:$0xff]  ;;  %v23477_v25 = vld [vmem:[#allocation114_spill] sm:$0xff] }
 0x309   :  { %v19171_v23 = vpop.f32.mrf.mxu1  ;;  %v19173_v48 = vpop.f32.mrf.mxu0  ;;  %v19201_v62 = vadd.f32 %v23470_v35, %v23469_v40  ;;  %v1370_v42 = vadd.f32 %v23477_v25, %v23476_v47  ;;  %v23478_v40 = vld [vmem:[#allocation73_spill] sm:$0xff]  ;;  %v2492_v47 = vadd.f32 %v23481_v55, %v1281_v7  ;;  %v23484_v55 = vld [vmem:[#allocation144_spill] sm:$0xff] }
 0x30a   :  { %23456 = vst [vmem:[#allocation233_spill] sm:$0xff] %v19173_v48  ;;  %v23472_v48 = vld [vmem:[#allocation111_spill] sm:$0xff]  ;;  %v2506_v35 = vadd.f32 %v23478_v40, %v1287_v27 }
 0x30b   :  { %v2494_v7 = vadd.f32 %v23484_v55, %v1370_v42 }
 0x30c   :  { %v3202_v27 = vadd.f32 %v18612_v22, %v2506_v35  ;;  %v3188_v22 = vadd.f32 %v18594_v18, %v2492_v47  ;;  %v19260_v18 = vpop.permute.xlu0 %5314  ;;  %v23489_v47 = vld [vmem:[#allocation83_spill] sm:$0xff] }
 0x30d   :  { %v4696_v16 = vpop.f32.mrf.mxu1  ;;  %v4785_v58 = vpop.f32.mrf.mxu0 }
 0x30f   :  { %v19175_v52 = vpop.f32.mrf.mxu1  ;;  %v19177_v56 = vpop.f32.mrf.mxu0 }
 0x310   :  { %23457 = vst [vmem:[#allocation234_spill] sm:$0xff] %v19177_v56  ;;  %v19205_v56 = vadd.f32 %v23472_v48, %v23471_v19  ;;  %v23479_v48 = vld [vmem:[#allocation75_spill] sm:$0xff]  ;;  %v23480_v19 = vld [vmem:[#allocation117_spill] sm:$0xff] }
 0x313   :  { %v4702_v29 = vpop.f32.mrf.mxu1  ;;  %v4791_v0 = vpop.f32.mrf.mxu0 }
 0x314   :  { %v5275_v20 = vadd.f32 %v4702_v29, %v19040_v43  ;;  %v5277_v33 = vadd.f32 %v4791_v0, %v4581_v4  ;;  %v2478_v43 = vadd.f32 %v23483_v59, %v1275_v11  ;;  %v5261_v29 = vadd.f32 %v4696_v16, %v19030_v10  ;;  %v23492_v59 = vld [vmem:[#allocation118_spill] sm:$0xff] }
 0x315   :  { %v19185_v51 = vpop.f32.mrf.mxu1  ;;  %v19187_v60 = vpop.f32.mrf.mxu0  ;;  %v5263_v0 = vadd.f32 %v4785_v58, %v4567_v39  ;;  %v3884_v16 = vadd.f32 %v18912_v32, %v3188_v22 }
 0x316   :  { %23464 = vst [vmem:[#allocation6_spill] sm:$0xff] %v19187_v60  ;;  %v1376_v60 = vadd.f32 %v23480_v19, %v23479_v48  ;;  %v19249_v11 = vadd.f32 %v19225_v38, %v5275_v20  ;;  %v19252_v10 = vadd.f32 %v19225_v38, %v5277_v33  ;;  %v19269_v40 = vadd.f32 %v19260_v18, %v5261_v29 }
 0x317   :  { %v4708_v1 = vpop.f32.mrf.mxu1  ;;  %v4797_v63 = vpop.f32.mrf.mxu0  ;;  %v19272_v35 = vadd.f32 %v19260_v18, %v5263_v0 }
 0x318   :  { %v5289_v9 = vadd.f32 %v4708_v1, %v4593_v5  ;;  %v5291_v36 = vadd.f32 %v4797_v63, %v4595_v30  ;;  %v23482_v1 = vld [vmem:[#allocation5_spill] sm:$0xff] }
 0x319   :  { %v4710_v3 = vpop.f32.mrf.mxu1  ;;  %v19223_v2 = vpop.f32.mrf.mxu0  ;;  %v2464_v24 = vadd.f32 %v23482_v1, %v1269_v34  ;;  %v5249_v34 = vadd.f32 %v4779_v6, %v19056_v13  ;;  %v3174_v13 = vadd.f32 %v18570_v26, %v2478_v43  ;;  %v23486_v6 = vld [vmem:[#allocation154_spill] sm:$0xff]  ;;  %23487 = vst [vmem:[#allocation68_spill] sm:$0xff] %v19272_v35 }
 0x31a   :  { %v19230_v5 = vadd.f32 %v19213_v31, %v5289_v9  ;;  %v19233_v30 = vadd.f32 %v19213_v31, %v5291_v36  ;;  %v3898_v9 = vadd.f32 %v18924_v28, %v3202_v27  ;;  %v5247_v36 = vadd.f32 %v4690_v21, %v19020_v8  ;;  %v23485_v28 = vld [vmem:[#allocation145_spill] sm:$0xff]  ;;  %v23490_v27 = vld [vmem:[#allocation115_spill] sm:$0xff] }
 0x31b   :  { %v19238_v4 = vpop.f32.mrf.mxu1  ;;  %v19240_v63 = vpop.f32.mrf.mxu0  ;;  %v2508_v8 = vadd.f32 %v23485_v28, %v1376_v60  ;;  %v3160_v25 = vadd.f32 %v23486_v6, %v2464_v24  ;;  %v3870_v26 = vadd.f32 %v18899_v14, %v3174_v13  ;;  %v1459_v1 = vadd.f32 %v23490_v27, %v23489_v47  ;;  %v23491_v24 = vld [vmem:[#allocation86_spill] sm:$0xff] }
 0x31c   :  { %14949 = vmatprep.subr.mxu0 %v19230_v5  ;;  %14977 = vmatprep.subr.mxu1 %v19233_v30  ;;  %v4594_v21 = vadd.f32 %v19053_v12, %v3898_v9  ;;  %v19276_v60 = vpop.permute.xlu1 %5309  ;;  %v4580_v12 = vadd.f32 %v19044_v17, %v3884_v16  ;;  %v1465_v43 = vadd.f32 %v23492_v59, %v23491_v24  ;;  %v23493_v9 = vld [vmem:[#allocation141_spill] sm:$0xff]  ;;  %v13881_v24 = vld [vmem:[%s22860_s9 + $0x58] sm:$0xff]  ;;  %v23502_v59 = vld [vmem:[#allocation168_spill] sm:$0xff] }
 0x31d   :  { %v19255_v58 = vpop.f32.mrf.mxu1  ;;  %v19257_v42 = vpop.f32.mrf.mxu0  ;;  %14950 = vmatpush3.msra.mxu0 %v19230_v5  ;;  %14978 = vmatpush3.msra.mxu1 %v19233_v30  ;;  %v3204_v48 = vadd.f32 %v18705_v53, %v2508_v8  ;;  %v19284_v19 = vadd.f32 %v19276_v60, %v5247_v36  ;;  %v19287_v39 = vadd.f32 %v19276_v60, %v5249_v34  ;;  %v23494_v34 = vld [vmem:[#allocation143_spill] sm:$0xff] }
 0x31e   :  { %14951 = vmatprep.subr.mxu0 %v19249_v11  ;;  %14979 = vmatprep.subr.mxu1 %v19252_v10  ;;  %v5290_v32 = vadd.f32 %v4710_v3, %v4594_v21  ;;  %v3856_v17 = vadd.f32 %v18883_v41, %v3160_v25  ;;  %v4566_v14 = vadd.f32 %v19034_v49, %v3870_v26  ;;  %v5384_v3 = vld [vmem:[%s22860_s9 + $0x8] sm:$0xff] }
 0x31f   :  { %14952 = vmatpush3.msra.mxu0 %v19249_v11  ;;  %14980 = vmatpush3.msra.mxu1 %v19252_v10  ;;  %23488 = vst [vmem:[#allocation104_spill] sm:$0xff] %v19287_v39  ;;  %v5276_v53 = vadd.f32 %v19185_v51, %v4580_v12  ;;  %v3190_v41 = vadd.f32 %v18682_v54, %v2494_v7  ;;  %v5385_v51 = vld [vmem:[%s22860_s9 + $0x10] sm:$0xff]  ;;  %v13879_v7 = vld [vmem:[%s22860_s9 + $0x48] sm:$0xff] }
 0x320   :  { %14953 = vmatprep.subr.mxu0 %v19269_v40  ;;  %14981 = vmatprep.subr.mxu1 %v19272_v35  ;;  %v3900_v0 = vadd.f32 %v18926_v61, %v3204_v48  ;;  %v4552_v55 = vadd.f32 %v19024_v44, %v3856_v17  ;;  %v5262_v22 = vadd.f32 %v19175_v52, %v4566_v14  ;;  %v13880_v44 = vld [vmem:[%s22860_s9 + $0x50] sm:$0xff]  ;;  %v23498_v48 = vld [vmem:[#allocation126_spill] sm:$0xff] }
 0x321   :  { %v19289_v20 = vpop.f32.mrf.mxu1  ;;  %v19291_v33 = vpop.f32.mrf.mxu0  ;;  %14954 = vmatpush3.msra.mxu0 %v19269_v40  ;;  %14982 = vmatpush3.msra.mxu1 %v19272_v35  ;;  %v19321_v54 = vadd.f32 %v19213_v31, %v5290_v32  ;;  %v2466_v36 = vadd.f32 %v23493_v9, %v19193_v15  ;;  %v2480_v28 = vadd.f32 %v23494_v34, %v19205_v56  ;;  %v23496_v56 = vld [vmem:[#allocation120_spill] sm:$0xff]  ;;  %v23505_v9 = vld [vmem:[#allocation197_spill] sm:$0xff]  ;;  %v23506_v34 = vld [vmem:[#allocation199_spill] sm:$0xff] }
 0x322   :  { %14955 = vmatprep.subr.mxu0 %v19284_v19  ;;  %14983 = vmatprep.subr.mxu1 %v19287_v39  ;;  %v3886_v61 = vadd.f32 %v18914_v46, %v3190_v41  ;;  %v4596_v52 = vadd.f32 %v19088_v37, %v3900_v0  ;;  %v5248_v8 = vadd.f32 %v19171_v23, %v4552_v55  ;;  %v23495_v46 = vld [vmem:[#allocation78_spill] sm:$0xff]  ;;  %v23497_v32 = vld [vmem:[#allocation84_spill] sm:$0xff] }
 0x323   :  { %v19308_v29 = vpop.f32.mrf.mxu1  ;;  %v19310_v49 = vpop.f32.mrf.mxu0  ;;  %14956 = vmatpush3.msra.mxu0 %v19284_v19  ;;  %14984 = vmatpush3.msra.mxu1 %v19287_v39  ;;  %v19340_v13 = vadd.f32 %v19225_v38, %v5276_v53  ;;  %v19346_v16 = vadd.f32 %v23496_v56, %v23495_v46  ;;  %v3162_v21 = vadd.f32 %v18628_v50, %v2466_v36  ;;  %v5386_v37 = vld [vmem:[%s22860_s9 + $0x18] sm:$0xff]  ;;  %v23500_v53 = vld [vmem:[#allocation116_spill] sm:$0xff] }
 0x324   :  { %14958 = vmatmul.mubr.msk.f32.vlgmr.msra.gmra.mxu0 %vm552_vm2, %v5384_v3  ;;  %14963 = vmatprep.subr.mxu0 %v19321_v54  ;;  %v3176_v6 = vadd.f32 %v18653_v57, %v2480_v28  ;;  %v4582_v23 = vadd.f32 %v19079_v45, %v3886_v61  ;;  %v19359_v26 = vadd.f32 %v19260_v18, %v5262_v22  ;;  %v13870_v57 = vld [vmem:[%s22860_s9 + $0x20] sm:$0xff]  ;;  %v23499_v45 = vld [vmem:[#allocation76_spill] sm:$0xff]  ;;  %v23501_v3 = vld [vmem:[#allocation169_spill] sm:$0xff] }
 0x325   :  { %14960 = vmatprep.mubr.msk.f32.mxu0 %vm552_vm2, %v5385_v51  ;;  %14964 = vmatpush3.msra.mxu0 %v19321_v54  ;;  %v5292_v12 = vadd.f32 %v19223_v2, %v4596_v52  ;;  %v19371_v17 = vadd.f32 %v23498_v48, %v23497_v32  ;;  %v19375_v14 = vadd.f32 %v23499_v45, %v19201_v62  ;;  %v23503_v0 = vld [vmem:[#allocation6_spill] sm:$0xff]  ;;  %v23504_v22 = vld [vmem:[#allocation195_spill] sm:$0xff]  ;;  %v23507_v52 = vld [vmem:[#allocation113_spill] sm:$0xff] }
 0x326   :  { %v4880_v15 = vpop.f32.mrf.mxu1  ;;  %14986 = vmatmul.mubr.msk.f32.vlgmr.msra.gmra.mxu1 %vm552_vm2, %v13879_v7  ;;  %14965 = vmatprep.subr.mxu0 %v19340_v13  ;;  %v2510_v2 = vadd.f32 %v23500_v53, %v1465_v43  ;;  %v3872_v47 = vadd.f32 %v23501_v3, %v3176_v6  ;;  %v3858_v41 = vadd.f32 %v23502_v59, %v3162_v21  ;;  %v13894_v43 = vld [vmem:[%s22860_s9 + $0x80] sm:$0xff]  ;;  %v23508_v46 = vld [vmem:[#allocation158_spill] sm:$0xff] }
 0x327   :  { %v19350_v25 = vpop.f32.mrf.mxu0  ;;  %14988 = vmatprep.mubr.msk.f32.mxu1 %vm552_vm2, %v13880_v44  ;;  %14966 = vmatpush3.msra.mxu0 %v19340_v13  ;;  %v19387_v51 = vadd.f32 %v19276_v60, %v5248_v8  ;;  %v5278_v62 = vadd.f32 %v23503_v0, %v4582_v23  ;;  %v5279_v36 = vadd.f32 %v4880_v15, %v23505_v9  ;;  %v13871_v44 = vld [vmem:[%s22860_s9 + $0x28] sm:$0xff]  ;;  %v23510_v23 = vld [vmem:[#allocation234_spill] sm:$0xff]  ;;  %v23518_v9 = vld [vmem:[#allocation191_spill] sm:$0xff] }
 0x328   :  { %v19362_v50 = vpop.f32.mrf.mxu1  ;;  %14961 = vmatmul.mubr.msk.f32.gmra.mxu0 %vm552_vm2, %v5386_v37  ;;  %14967 = vmatprep.subr.mxu0 %v19359_v26  ;;  %v4568_v7 = vadd.f32 %v23504_v22, %v3872_v47  ;;  %v2496_v8 = vadd.f32 %v23507_v52, %v1459_v1  ;;  %v3206_v56 = vadd.f32 %v23508_v46, %v2510_v2  ;;  %v23509_v15 = vld [vmem:[#allocation192_spill] sm:$0xff]  ;;  %v23511_v1 = vld [vmem:[#allocation157_spill] sm:$0xff]  ;;  %v23512_v53 = vld [vmem:[#allocation194_spill] sm:$0xff] }
 0x329   :  { %v19379_v27 = vpop.f32.mrf.mxu0  ;;  %14968 = vmatpush3.msra.mxu0 %v19359_v26  ;;  %14971 = vmatprep.mubr.msk.f32.mxu0 %vm552_vm2, %v13870_v57  ;;  %v19406_v21 = vadd.f32 %v19213_v31, %v5292_v12  ;;  %v4554_v37 = vadd.f32 %v23509_v15, %v3858_v41  ;;  %v19421_v45 = vadd.f32 %v19225_v38, %v5278_v62  ;;  %v13872_v47 = vld [vmem:[%s22860_s9 + $0x30] sm:$0xff]  ;;  %v23517_v22 = vld [vmem:[#allocation174_spill] sm:$0xff]  ;;  %v23519_v52 = vld [vmem:[#allocation200_spill] sm:$0xff] }
 0x32a   :  { %v4886_v55 = vpop.f32.mrf.mxu1  ;;  %14969 = vmatprep.subr.mxu0 %v19387_v51  ;;  %14989 = vmatmul.mubr.msk.f32.gmra.mxu1 %vm552_vm2, %v13881_v24  ;;  %v5264_v57 = vadd.f32 %v23510_v23, %v4568_v7  ;;  %v3192_v12 = vadd.f32 %v23511_v1, %v2496_v8  ;;  %v5265_v2 = vadd.f32 %v19289_v20, %v23512_v53  ;;  %v23513_v24 = vld [vmem:[#allocation177_spill] sm:$0xff]  ;;  %v23515_v20 = vld [vmem:[#allocation102_spill] sm:$0xff]  ;;  %v23520_v46 = vld [vmem:[#allocation176_spill] sm:$0xff] }
 0x32b   :  { %v5293_v28 = vadd.f32 %v4886_v55, %v23506_v34  ;;  %v4975_v61 = vpop.f32.mrf.mxu0  ;;  %14970 = vmatpush3.msra.mxu0 %v19387_v51  ;;  %15013 = vmatprep.mubr.msk.f32.mxu1 %vm552_vm2, %v13894_v43  ;;  %v3902_v59 = vadd.f32 %v23513_v24, %v3206_v56  ;;  %v23514_v41 = vld [vmem:[#allocation233_spill] sm:$0xff]  ;;  %v19435_v62 = vadd.f32 %v19225_v38, %v5279_v36  ;;  %v23516_v55 = vld [vmem:[#allocation147_spill] sm:$0xff]  ;;  %v13873_v36 = vld [vmem:[%s22860_s9 + $0x38] sm:$0xff] }
 0x32c   :  { %v4888_v6 = vpop.f32.mrf.mxu1  ;;  %14972 = vmatmul.mubr.msk.f32.vlgmr.msra.gmra.mxu0 %vm552_vm2, %v13871_v44  ;;  %14991 = vmatprep.subr.mxu0 %v19406_v21  ;;  %v5250_v0 = vadd.f32 %v23514_v41, %v4554_v37  ;;  %v2482_v43 = vadd.f32 %v23516_v55, %v23515_v20  ;;  %v3888_v7 = vadd.f32 %v23517_v22, %v3192_v12  ;;  %v23521_v56 = vld [vmem:[#allocation213_spill] sm:$0xff]  ;;  %v23523_v1 = vld [vmem:[#allocation198_spill] sm:$0xff] }
 0x32d   :  { %v19413_v32 = vadd.f32 %v19213_v31, %v5293_v28  ;;  %v19415_v48 = vpop.f32.mrf.mxu0  ;;  %14992 = vmatpush3.msra.mxu0 %v19406_v21  ;;  %v5251_v34 = vadd.f32 %v19238_v4, %v23518_v9  ;;  %v4598_v8 = vadd.f32 %v23519_v52, %v3902_v59  ;;  %v4599_v15 = vadd.f32 %v23521_v56, %v23520_v46  ;;  %v23522_v4 = vld [vmem:[#allocation67_spill] sm:$0xff]  ;;  %v23527_v20 = vld [vmem:[#allocation129_spill] sm:$0xff]  ;;  %v13887_v52 = vld [vmem:[%s22860_s9 + $0x68] sm:$0xff] }
 0x32e   :  { %v19425_v3 = vpop.f32.mrf.mxu1  ;;  %14993 = vmatprep.subr.mxu0 %v19421_v45  ;;  %v19457_v37 = vadd.f32 %v19260_v18, %v5264_v57  ;;  %14974 = vmatprep.mubr.msk.f32.mxu0 %vm552_vm2, %v13872_v47  ;;  %v3178_v23 = vadd.f32 %v23522_v4, %v2482_v43  ;;  %v4584_v12 = vadd.f32 %v23523_v1, %v3888_v7  ;;  %v23526_v47 = vld [vmem:[#allocation87_spill] sm:$0xff]  ;;  %v23532_v46 = vld [vmem:[#allocation149_spill] sm:$0xff]  ;;  %v23535_v1 = vld [vmem:[#allocation196_spill] sm:$0xff] }
 0x32f   :  { %15005 = vmatprep.subr.mxu1 %v19413_v32  ;;  %v19444_v28 = vpop.f32.mrf.mxu0  ;;  %v19464_v53 = vadd.f32 %v19260_v18, %v5265_v2  ;;  %14994 = vmatpush3.msra.mxu0 %v19421_v45  ;;  %v19471_v57 = vadd.f32 %v19276_v60, %v5250_v0  ;;  %v5295_v59 = vadd.f32 %v4975_v61, %v4599_v15  ;;  %v23528_v2 = vld [vmem:[#allocation156_spill] sm:$0xff]  ;;  %v13886_v61 = vld [vmem:[%s22860_s9 + $0x60] sm:$0xff]  ;;  %v23533_v15 = vld [vmem:[#allocation150_spill] sm:$0xff] }
 0x330   :  { %v19446_v44 = vpop.f32.mrf.mxu1  ;;  %15006 = vmatpush3.msra.mxu1 %v19413_v32  ;;  %v5294_v41 = vadd.f32 %v4888_v6, %v4598_v8  ;;  %14975 = vmatmul.mubr.msk.f32.gmra.mxu0 %vm552_vm2, %v13873_v36  ;;  %v1554_v55 = vadd.f32 %v23527_v20, %v23526_v47  ;;  %v3164_v43 = vadd.f32 %v23528_v2, %v19375_v14  ;;  %v23530_v6 = vld [vmem:[#allocation172_spill] sm:$0xff]  ;;  %v23531_v36 = vld [vmem:[#allocation209_spill] sm:$0xff] }
 0x331   :  { %15007 = vmatprep.subr.mxu1 %v19435_v62  ;;  %23524 = vst [vmem:[#allocation71_spill] sm:$0xff] %v19464_v53  ;;  %23525 = vst [vmem:[#allocation106_spill] sm:$0xff] %v19471_v57  ;;  %14995 = vmatprep.subr.mxu0 %v19457_v37  ;;  %v19480_v22 = vadd.f32 %v19276_v60, %v5251_v34  ;;  %v19482_v7 = vpop.f32.mrf.mxu0  ;;  %v3874_v9 = vadd.f32 %v23530_v6, %v3178_v23  ;;  %v13895_v8 = vld [vmem:[%s22860_s9 + $0x88] sm:$0xff]  ;;  %v23538_v2 = vld [vmem:[#allocation193_spill] sm:$0xff] }
 0x332   :  { %v19466_v24 = vpop.f32.mrf.mxu1  ;;  %15008 = vmatpush3.msra.mxu1 %v19435_v62  ;;  %14996 = vmatpush3.msra.mxu0 %v19457_v37  ;;  %v5281_v14 = vadd.f32 %v19350_v25, %v23531_v36  ;;  %v5280_v34 = vadd.f32 %v19362_v50, %v4584_v12  ;;  %v2498_v56 = vadd.f32 %v23532_v46, %v19371_v17  ;;  %v23534_v25 = vld [vmem:[#allocation170_spill] sm:$0xff]  ;;  %v23537_v17 = vld [vmem:[#allocation85_spill] sm:$0xff] }
 0x333   :  { %23529 = vst [vmem:[#allocation74_spill] sm:$0xff] %v19480_v22  ;;  %15009 = vmatprep.subr.mxu1 %v19464_v53  ;;  %14997 = vmatprep.subr.mxu0 %v19471_v57  ;;  %v2512_v4 = vadd.f32 %v23533_v15, %v1554_v55  ;;  %v3860_v23 = vadd.f32 %v23534_v25, %v3164_v43  ;;  %v23539_v6 = vld [vmem:[#allocation205_spill] sm:$0xff]  ;;  %v19524_v46 = vpop.f32.mrf.mxu0  ;;  %v23544_v25 = vld [vmem:[#allocation178_spill] sm:$0xff] }
 0x334   :  { %v19485_v0 = vpop.f32.mrf.mxu1  ;;  %15010 = vmatpush3.msra.mxu1 %v19464_v53  ;;  %14998 = vmatpush3.msra.mxu0 %v19471_v57  ;;  %v4570_v12 = vadd.f32 %v23535_v1, %v3874_v9  ;;  %v19513_v47 = vadd.f32 %v19213_v31, %v5295_v59  ;;  %v19516_v20 = vadd.f32 %v19213_v31, %v5294_v41  ;;  %v23545_v1 = vld [vmem:[#allocation95_spill] sm:$0xff]  ;;  %v23568_v57 = vld [vmem:[#allocation125_spill] sm:$0xff] }
 0x335   :  { %15011 = vmatprep.subr.mxu1 %v19480_v22  ;;  %14999 = vmatprep.mubr.msk.f32.mxu0 %vm552_vm2, %v13886_v61  ;;  %v3208_v55 = vadd.f32 %v23537_v17, %v2512_v4  ;;  %v4556_v43 = vadd.f32 %v23538_v2, %v3860_v23  ;;  %v5267_v36 = vadd.f32 %v19291_v33, %v23539_v6  ;;  %v13888_v33 = vld [vmem:[%s22860_s9 + $0x70] sm:$0xff] }
 0x336   :  { %v19508_v50 = vpop.f32.mrf.mxu1  ;;  %23536 = vst [vmem:[#allocation108_spill] sm:$0xff] %v19513_v47  ;;  %15012 = vmatpush3.msra.mxu1 %v19480_v22  ;;  %15000 = vmatmul.mubr.msk.f32.vlgmr.msra.gmra.mxu0 %vm552_vm2, %v13887_v52  ;;  %v5266_v41 = vadd.f32 %v19308_v29, %v4570_v12  ;;  %v19532_v61 = vadd.f32 %v19225_v38, %v5281_v14  ;;  %v13896_v52 = vld [vmem:[%s22860_s9 + $0x90] sm:$0xff]  ;;  %v23542_v29 = vld [vmem:[#allocation123_spill] sm:$0xff]  ;;  %v23543_v14 = vld [vmem:[#allocation82_spill] sm:$0xff] }
 0x337   :  { %15014 = vmatmul.mubr.msk.f32.vlgmr.msra.gmra.mxu1 %vm552_vm2, %v13895_v8  ;;  %v19535_v9 = vadd.f32 %v19225_v38, %v5280_v34  ;;  %15019 = vmatprep.subr.mxu0 %v19516_v20  ;;  %v23541_v8 = vld [vmem:[#allocation81_spill] sm:$0xff]  ;;  %v3194_v4 = vadd.f32 %v23543_v14, %v2498_v56  ;;  %v3904_v34 = vadd.f32 %v23544_v25, %v3208_v55  ;;  %v23546_v12 = vld [vmem:[#allocation127_spill] sm:$0xff]  ;;  %v13889_v56 = vld [vmem:[%s22860_s9 + $0x78] sm:$0xff] }
 0x338   :  { %v19528_v59 = vpop.f32.mrf.mxu1  ;;  %23540 = vst [vmem:[#allocation66_spill] sm:$0xff] %v19532_v61  ;;  %15033 = vmatprep.subr.mxu1 %v19513_v47  ;;  %v1542_v15 = vadd.f32 %v23542_v29, %v23541_v8  ;;  %15020 = vmatpush3.msra.mxu0 %v19516_v20  ;;  %v1637_v17 = vadd.f32 %v23546_v12, %v23545_v1  ;;  %v23547_v2 = vld [vmem:[#allocation201_spill] sm:$0xff]  ;;  %v13897_v55 = vld [vmem:[%s22860_s9 + $0x98] sm:$0xff]  ;;  %v23548_v8 = vld [vmem:[#allocation148_spill] sm:$0xff]  ;;  %v19567_v12 = vpop.f32.mrf.mxu0 }
 0x339   :  { %15034 = vmatpush3.msra.mxu1 %v19513_v47  ;;  %v5253_v6 = vadd.f32 %v19240_v63, %v23547_v2  ;;  %v5252_v22 = vadd.f32 %v19255_v58, %v4556_v43  ;;  %15021 = vmatprep.subr.mxu0 %v19535_v9  ;;  %v23549_v14 = vld [vmem:[#allocation175_spill] sm:$0xff]  ;;  %v19574_v43 = vadd.f32 %v19260_v18, %v5267_v36  ;;  %v23552_v47 = vld [vmem:[#allocation214_spill] sm:$0xff] }
 0x33a   :  { %v5064_v23 = vpop.f32.mrf.mxu1  ;;  %15035 = vmatprep.subr.mxu1 %v19532_v61  ;;  %v2484_v29 = vadd.f32 %v23548_v8, %v1542_v15  ;;  %v3890_v25 = vadd.f32 %v23549_v14, %v3194_v4  ;;  %v23550_v1 = vld [vmem:[#allocation215_spill] sm:$0xff]  ;;  %15002 = vmatprep.mubr.msk.f32.mxu0 %vm552_vm2, %v13888_v33  ;;  %v19577_v2 = vadd.f32 %v19260_v18, %v5266_v41  ;;  %v23553_v4 = vld [vmem:[#allocation146_spill] sm:$0xff] }
 0x33b   :  { %v4600_v63 = vadd.f32 %v23550_v1, %v3904_v34  ;;  %15016 = vmatprep.mubr.msk.f32.mxu1 %vm552_vm2, %v13896_v52  ;;  %23551 = vst [vmem:[#allocation109_spill] sm:$0xff] %v19574_v43  ;;  %v5297_v15 = vadd.f32 %v5064_v23, %v23552_v47  ;;  %15022 = vmatpush3.msra.mxu0 %v19535_v9  ;;  %v23554_v33 = vld [vmem:[#allocation79_spill] sm:$0xff] }
 0x33c   :  { %v19571_v58 = vpop.f32.mrf.mxu1  ;;  %15036 = vmatpush3.msra.mxu1 %v19532_v61  ;;  %v2470_v34 = vadd.f32 %v23553_v4, %v19346_v16  ;;  %v3180_v8 = vadd.f32 %v23554_v33, %v2484_v29  ;;  %v23555_v52 = vld [vmem:[#allocation211_spill] sm:$0xff]  ;;  %15003 = vmatmul.mubr.msk.f32.gmra.mxu0 %vm552_vm2, %v13889_v56  ;;  %v19591_v41 = vadd.f32 %v19276_v60, %v5253_v6  ;;  %v23557_v56 = vld [vmem:[#allocation98_spill] sm:$0xff]  ;;  %v23560_v6 = vld [vmem:[#allocation173_spill] sm:$0xff]  ;;  %v19606_v33 = vpop.f32.mrf.mxu0 }
 0x33d   :  { %v4586_v14 = vadd.f32 %v23555_v52, %v3890_v25  ;;  %15017 = vmatmul.mubr.msk.f32.gmra.mxu1 %vm552_vm2, %v13897_v55  ;;  %v19594_v47 = vadd.f32 %v19276_v60, %v5252_v22  ;;  %v5296_v23 = vadd.f32 %v19415_v48, %v4600_v63  ;;  %15023 = vmatprep.subr.mxu0 %v19577_v2  ;;  %v13902_v16 = vld [vmem:[%s22860_s9 + $0xa0] sm:$0xff]  ;;  %v23558_v55 = vld [vmem:[#allocation130_spill] sm:$0xff]  ;;  %v23567_v61 = vld [vmem:[#allocation121_spill] sm:$0xff] }
 0x33e   :  { %v19588_v36 = vpop.f32.mrf.mxu1  ;;  %23556 = vst [vmem:[#allocation77_spill] sm:$0xff] %v19591_v41  ;;  %15037 = vmatprep.subr.mxu1 %v19574_v43  ;;  %v1643_v29 = vadd.f32 %v23558_v55, %v23557_v56  ;;  %v23559_v25 = vld [vmem:[#allocation159_spill] sm:$0xff]  ;;  %v3876_v4 = vadd.f32 %v23560_v6, %v3180_v8  ;;  %15024 = vmatpush3.msra.mxu0 %v19577_v2  ;;  %v23561_v52 = vld [vmem:[#allocation210_spill] sm:$0xff]  ;;  %v13903_v8 = vld [vmem:[%s22860_s9 + $0xa8] sm:$0xff] }
 0x33f   :  { %v3166_v1 = vadd.f32 %v23559_v25, %v2470_v34  ;;  %15038 = vmatpush3.msra.mxu1 %v19574_v43  ;;  %v13910_v48 = vld [vmem:[%s22860_s9 + $0xc0] sm:$0xff]  ;;  %v5282_v63 = vadd.f32 %v19379_v27, %v4586_v14  ;;  %v5283_v56 = vadd.f32 %v19508_v50, %v23561_v52  ;;  %v19619_v34 = vadd.f32 %v19213_v31, %v5297_v15  ;;  %v13911_v55 = vld [vmem:[%s22860_s9 + $0xc8] sm:$0xff]  ;;  %v23566_v43 = vld [vmem:[#allocation89_spill] sm:$0xff] }
 0x340   :  { %v19613_v22 = vpop.f32.mrf.mxu1  ;;  %15025 = vmatprep.subr.mxu0 %v19594_v47  ;;  %15039 = vmatprep.subr.mxu1 %v19591_v41  ;;  %v23563_v25 = vld [vmem:[#allocation128_spill] sm:$0xff]  ;;  %v23564_v14 = vld [vmem:[#allocation171_spill] sm:$0xff]  ;;  %v1625_v39 = vadd.f32 %v23567_v61, %v23566_v43  ;;  %v2500_v53 = vadd.f32 %v23568_v57, %v1637_v17  ;;  %v19640_v35 = vadd.f32 %v19213_v31, %v5296_v23  ;;  %v23571_v61 = vld [vmem:[#allocation206_spill] sm:$0xff] }
 0x341   :  { %23562 = vst [vmem:[#allocation110_spill] sm:$0xff] %v19619_v34  ;;  %v2514_v27 = vadd.f32 %v23563_v25, %v1643_v29  ;;  %v3862_v6 = vadd.f32 %v23564_v14, %v3166_v1  ;;  %v23565_v50 = vld [vmem:[#allocation207_spill] sm:$0xff]  ;;  %15026 = vmatpush3.msra.mxu0 %v19594_v47  ;;  %15027 = vmatprep.mubr.msk.f32.mxu0 %vm552_vm2, %v13902_v16  ;;  %v19647_v14 = vpop.f32.mrf.mxu0  ;;  %v13912_v23 = vld [vmem:[%s22860_s9 + $0xd0] sm:$0xff] }
 0x342   :  { %v4572_v52 = vadd.f32 %v23565_v50, %v3876_v4  ;;  %v19634_v15 = vpop.f32.mrf.mxu1  ;;  %15040 = vmatpush3.msra.mxu1 %v19591_v41  ;;  %15041 = vmatprep.mubr.msk.f32.mxu1 %vm552_vm2, %v13910_v48  ;;  %v23569_v29 = vld [vmem:[#allocation163_spill] sm:$0xff]  ;;  %v19652_v57 = vadd.f32 %v19225_v38, %v5282_v63  ;;  %v5269_v17 = vadd.f32 %v19466_v24, %v23571_v61  ;;  %v23573_v48 = vld [vmem:[#allocation92_spill] sm:$0xff]  ;;  %v23579_v61 = vld [vmem:[#allocation202_spill] sm:$0xff] }
 0x343   :  { %v3210_v1 = vadd.f32 %v23569_v29, %v2514_v27  ;;  %v23570_v4 = vld [vmem:[#allocation203_spill] sm:$0xff]  ;;  %15028 = vmatmul.mubr.msk.f32.vlgmr.msra.gmra.mxu0 %vm552_vm2, %v13903_v8  ;;  %15042 = vmatmul.mubr.msk.f32.vlgmr.msra.gmra.mxu1 %vm552_vm2, %v13911_v55  ;;  %v19657_v43 = vadd.f32 %v19225_v38, %v5283_v56  ;;  %v23574_v63 = vld [vmem:[#allocation124_spill] sm:$0xff]  ;;  %v23575_v55 = vld [vmem:[#allocation162_spill] sm:$0xff]  ;;  %v5255_v41 = vadd.f32 %v19425_v3, %v23579_v61 }
 0x344   :  { %v4558_v25 = vadd.f32 %v23570_v4, %v3862_v6  ;;  %v5268_v16 = vadd.f32 %v19310_v49, %v4572_v52  ;;  %15047 = vmatprep.subr.mxu0 %v19640_v35  ;;  %15061 = vmatprep.subr.mxu1 %v19619_v34  ;;  %v13904_v49 = vld [vmem:[%s22860_s9 + $0xb0] sm:$0xff]  ;;  %v1631_v8 = vadd.f32 %v23574_v63, %v23573_v48  ;;  %v19673_v27 = vpop.f32.mrf.mxu1  ;;  %v23576_v6 = vld [vmem:[#allocation90_spill] sm:$0xff]  ;;  %v23577_v50 = vld [vmem:[#allocation132_spill] sm:$0xff] }
 0x345   :  { %23572 = vst [vmem:[#allocation69_spill] sm:$0xff] %v19657_v43  ;;  %v3196_v24 = vadd.f32 %v23575_v55, %v2500_v53  ;;  %15048 = vmatpush3.msra.mxu0 %v19640_v35  ;;  %15062 = vmatpush3.msra.mxu1 %v19619_v34  ;;  %v19677_v52 = vadd.f32 %v23577_v50, %v23576_v6  ;;  %v23578_v29 = vld [vmem:[#allocation185_spill] sm:$0xff]  ;;  %v13913_v53 = vld [vmem:[%s22860_s9 + $0xd8] sm:$0xff]  ;;  %v5153_v50 = vpop.f32.mrf.mxu0  ;;  %v23583_v3 = vld [vmem:[#allocation216_spill] sm:$0xff] }
 0x346   :  { %v5254_v56 = vadd.f32 %v19257_v42, %v4558_v25  ;;  %v3906_v4 = vadd.f32 %v23578_v29, %v3210_v1  ;;  %15049 = vmatprep.subr.mxu0 %v19652_v57  ;;  %15063 = vmatprep.subr.mxu1 %v19657_v43  ;;  %v13905_v42 = vld [vmem:[%s22860_s9 + $0xb8] sm:$0xff]  ;;  %v23580_v25 = vld [vmem:[#allocation131_spill] sm:$0xff]  ;;  %v19697_v61 = vadd.f32 %v19260_v18, %v5268_v16  ;;  %v19711_v16 = vpop.f32.mrf.mxu1 }
 0x347   :  { %v2472_v48 = vadd.f32 %v23580_v25, %v1625_v39  ;;  %v23581_v63 = vld [vmem:[#allocation122_spill] sm:$0xff]  ;;  %v23582_v1 = vld [vmem:[#allocation183_spill] sm:$0xff]  ;;  %15030 = vmatprep.mubr.msk.f32.mxu0 %vm552_vm2, %v13904_v49  ;;  %15044 = vmatprep.mubr.msk.f32.mxu1 %vm552_vm2, %v13912_v23  ;;  %v19700_v34 = vadd.f32 %v19260_v18, %v5269_v17  ;;  %v23585_v39 = vld [vmem:[#allocation161_spill] sm:$0xff]  ;;  %v19714_v17 = vadd.f32 %v19276_v60, %v5255_v41 }
 0x348   :  { %v2486_v55 = vadd.f32 %v23581_v63, %v1631_v8  ;;  %v3892_v6 = vadd.f32 %v23582_v1, %v3196_v24  ;;  %v4602_v29 = vadd.f32 %v23583_v3, %v3906_v4  ;;  %15050 = vmatpush3.msra.mxu0 %v19652_v57  ;;  %15064 = vmatpush3.msra.mxu1 %v19657_v43  ;;  %v23586_v24 = vld [vmem:[#allocation212_spill] sm:$0xff]  ;;  %v23588_v23 = vld [vmem:[#allocation229_spill] sm:$0xff]  ;;  %v23591_v1 = vld [vmem:[#allocation99_spill] sm:$0xff] }
 0x349   :  { %23584 = vst [vmem:[#allocation111_spill] sm:$0xff] %v19700_v34  ;;  %v19707_v49 = vadd.f32 %v19276_v60, %v5254_v56  ;;  %15031 = vmatmul.mubr.msk.f32.gmra.mxu0 %vm552_vm2, %v13905_v42  ;;  %15045 = vmatmul.mubr.msk.f32.gmra.mxu1 %vm552_vm2, %v13913_v53  ;;  %23587 = vst [vmem:[#allocation80_spill] sm:$0xff] %v19714_v17  ;;  %v5299_v4 = vadd.f32 %v5153_v50, %v23588_v23  ;;  %v13918_v56 = vld [vmem:[%s22860_s9 + $0xe0] sm:$0xff]  ;;  %v23589_v42 = vld [vmem:[#allocation96_spill] sm:$0xff] }
 0x34a   :  { %v3182_v8 = vadd.f32 %v23585_v39, %v2486_v55  ;;  %v4588_v25 = vadd.f32 %v23586_v24, %v3892_v6  ;;  %v5298_v63 = vadd.f32 %v19571_v58, %v4602_v29  ;;  %15051 = vmatprep.subr.mxu0 %v19697_v61  ;;  %15065 = vmatprep.subr.mxu1 %v19700_v34  ;;  %v23590_v55 = vld [vmem:[#allocation137_spill] sm:$0xff]  ;;  %v23592_v6 = vld [vmem:[#allocation139_spill] sm:$0xff]  ;;  %v23593_v41 = vld [vmem:[#allocation160_spill] sm:$0xff] }
 0x34b   :  { %v1726_v53 = vadd.f32 %v23590_v55, %v23589_v42  ;;  %v1732_v3 = vadd.f32 %v23592_v6, %v23591_v1  ;;  %v3168_v39 = vadd.f32 %v23593_v41, %v2472_v48  ;;  %15052 = vmatpush3.msra.mxu0 %v19697_v61  ;;  %15066 = vmatpush3.msra.mxu1 %v19700_v34  ;;  %v13926_v58 = vld [vmem:[%s22860_s9 + $0x100] sm:$0xff]  ;;  %v23594_v50 = vld [vmem:[#allocation181_spill] sm:$0xff]  ;;  %v13919_v48 = vld [vmem:[%s22860_s9 + $0xe8] sm:$0xff] }
 0x34c   :  { %v3878_v29 = vadd.f32 %v23594_v50, %v3182_v8  ;;  %v23595_v24 = vld [vmem:[#allocation225_spill] sm:$0xff]  ;;  %v5284_v42 = vadd.f32 %v19528_v59, %v4588_v25  ;;  %15053 = vmatprep.subr.mxu0 %v19707_v49  ;;  %15067 = vmatprep.subr.mxu1 %v19714_v17  ;;  %v13927_v55 = vld [vmem:[%s22860_s9 + $0x108] sm:$0xff]  ;;  %v23598_v50 = vld [vmem:[#allocation179_spill] sm:$0xff]  ;;  %v19750_v59 = vpop.f32.mrf.mxu1  ;;  %v19754_v34 = vadd.f32 %v19213_v31, %v5299_v4 }
 0x34d   :  { %v5285_v23 = vadd.f32 %v19606_v33, %v23595_v24  ;;  %v23596_v1 = vld [vmem:[#allocation152_spill] sm:$0xff]  ;;  %v23597_v8 = vld [vmem:[#allocation153_spill] sm:$0xff]  ;;  %v3864_v33 = vadd.f32 %v23598_v50, %v3168_v39  ;;  %15054 = vmatpush3.msra.mxu0 %v19707_v49  ;;  %15055 = vmatprep.mubr.msk.f32.mxu0 %vm552_vm2, %v13918_v56  ;;  %v19757_v43 = vadd.f32 %v19213_v31, %v5298_v63  ;;  %v23607_v50 = vld [vmem:[#allocation186_spill] sm:$0xff] }
 0x34e   :  { %v2502_v6 = vadd.f32 %v23596_v1, %v1726_v53  ;;  %v2516_v41 = vadd.f32 %v23597_v8, %v1732_v3  ;;  %v23599_v25 = vld [vmem:[#allocation208_spill] sm:$0xff]  ;;  %23600 = vst [vmem:[#allocation112_spill] sm:$0xff] %v19754_v34  ;;  %15068 = vmatpush3.msra.mxu1 %v19714_v17  ;;  %15069 = vmatprep.mubr.msk.f32.mxu1 %vm552_vm2, %v13926_v58  ;;  %v23601_v53 = vld [vmem:[#allocation97_spill] sm:$0xff] }
 0x34f   :  { %v4574_v24 = vadd.f32 %v23599_v25, %v3878_v29  ;;  %v23602_v39 = vld [vmem:[#allocation204_spill] sm:$0xff]  ;;  %v23603_v8 = vld [vmem:[#allocation221_spill] sm:$0xff]  ;;  %15056 = vmatmul.mubr.msk.f32.vlgmr.msra.gmra.mxu0 %vm552_vm2, %v13919_v48  ;;  %15070 = vmatmul.mubr.msk.f32.vlgmr.msra.gmra.mxu1 %vm552_vm2, %v13927_v55  ;;  %v19769_v63 = vadd.f32 %v19225_v38, %v5285_v23  ;;  %v19772_v29 = vadd.f32 %v19225_v38, %v5284_v42  ;;  %v23606_v23 = vld [vmem:[#allocation94_spill] sm:$0xff] }
 0x350   :  { %v3212_v3 = vadd.f32 %v23601_v53, %v2516_v41  ;;  %v4560_v1 = vadd.f32 %v23602_v39, %v3864_v33  ;;  %v5271_v56 = vadd.f32 %v19524_v46, %v23603_v8  ;;  %15075 = vmatprep.subr.mxu0 %v19757_v43  ;;  %15089 = vmatprep.subr.mxu1 %v19754_v34  ;;  %v13920_v46 = vld [vmem:[%s22860_s9 + $0xf0] sm:$0xff]  ;;  %v5242_v33 = vpop.f32.mrf.mxu1 }
 0x351   :  { %v5270_v4 = vadd.f32 %v19485_v0, %v4574_v24  ;;  %v13928_v58 = vld [vmem:[%s22860_s9 + $0x110] sm:$0xff]  ;;  %v23605_v0 = vld [vmem:[#allocation135_spill] sm:$0xff]  ;;  %v3198_v41 = vadd.f32 %v23606_v23, %v2502_v6  ;;  %15076 = vmatpush3.msra.mxu0 %v19757_v43  ;;  %15090 = vmatpush3.msra.mxu1 %v19754_v34  ;;  %v23609_v24 = vld [vmem:[#allocation138_spill] sm:$0xff] }
 0x352   :  { %v23604_v48 = vld [vmem:[#allocation93_spill] sm:$0xff]  ;;  %v3908_v42 = vadd.f32 %v23607_v50, %v3212_v3  ;;  %v5256_v17 = vadd.f32 %v19446_v44, %v4560_v1  ;;  %15077 = vmatprep.subr.mxu0 %v19772_v29  ;;  %15091 = vmatprep.subr.mxu1 %v19769_v63  ;;  %v13921_v6 = vld [vmem:[%s22860_s9 + $0xf8] sm:$0xff]  ;;  %v23612_v23 = vld [vmem:[#allocation184_spill] sm:$0xff]  ;;  %v19807_v44 = vadd.f32 %v19260_v18, %v5271_v56 }
 0x353   :  { %v1720_v55 = vadd.f32 %v23605_v0, %v23604_v48  ;;  %v23608_v25 = vld [vmem:[#allocation105_spill] sm:$0xff]  ;;  %v13929_v3 = vld [vmem:[%s22860_s9 + $0x118] sm:$0xff]  ;;  %v23611_v48 = vld [vmem:[#allocation151_spill] sm:$0xff]  ;;  %v3894_v50 = vadd.f32 %v23612_v23, %v3198_v41  ;;  %15058 = vmatprep.mubr.msk.f32.mxu0 %vm552_vm2, %v13920_v46  ;;  %15072 = vmatprep.mubr.msk.f32.mxu1 %vm552_vm2, %v13928_v58  ;;  %v19810_v1 = vadd.f32 %v19260_v18, %v5270_v4 }
 0x354   :  { %v1815_v53 = vadd.f32 %v23609_v24, %v23608_v25  ;;  %v23610_v39 = vld [vmem:[#allocation217_spill] sm:$0xff]  ;;  %v23613_v25 = vld [vmem:[#allocation231_spill] sm:$0xff]  ;;  %v5155_v24 = vpop.f32.mrf.mxu0  ;;  %15078 = vmatpush3.msra.mxu0 %v19772_v29  ;;  %15092 = vmatpush3.msra.mxu1 %v19769_v63  ;;  %v19825_v4 = vadd.f32 %v19276_v60, %v5256_v17 }
 0x355   :  { %v5257_v8 = vadd.f32 %v19444_v28, %v23610_v39  ;;  %v2488_v0 = vadd.f32 %v23611_v48, %v1720_v55  ;;  %v4604_v28 = vadd.f32 %v23613_v25, %v3908_v42  ;;  %v23614_v39 = vld [vmem:[#allocation230_spill] sm:$0xff]  ;;  %v23615_v55 = vld [vmem:[#allocation119_spill] sm:$0xff]  ;;  %15059 = vmatmul.mubr.msk.f32.gmra.mxu0 %vm552_vm2, %v13921_v6  ;;  %15073 = vmatmul.mubr.msk.f32.gmra.mxu1 %vm552_vm2, %v13929_v3 }
 0x356   :  { %v5301_v34 = vadd.f32 %v5242_v33, %v23614_v39  ;;  %v2474_v41 = vadd.f32 %v23615_v55, %v19677_v52  ;;  %v23616_v42 = vld [vmem:[#allocation91_spill] sm:$0xff]  ;;  %15079 = vmatprep.subr.mxu0 %v19810_v1  ;;  %15093 = vmatprep.subr.mxu1 %v19807_v44  ;;  %v23621_v25 = vld [vmem:[#allocation182_spill] sm:$0xff] }
 0x357   :  { %v3184_v48 = vadd.f32 %v23616_v42, %v2488_v0  ;;  %v23617_v46 = vld [vmem:[#allocation227_spill] sm:$0xff]  ;;  %v19822_v56 = vadd.f32 %v19276_v60, %v5257_v8  ;;  %v5300_v58 = vadd.f32 %v5155_v24, %v4604_v28  ;;  %v23619_v0 = vld [vmem:[#allocation140_spill] sm:$0xff]  ;;  %15080 = vmatpush3.msra.mxu0 %v19810_v1  ;;  %15094 = vmatpush3.msra.mxu1 %v19807_v44  ;;  %v23622_v24 = vld [vmem:[#allocation226_spill] sm:$0xff] }
 0x358   :  { %v4590_v23 = vadd.f32 %v23617_v46, %v3894_v50  ;;  %v13934_v52 = vld [vmem:[%s22860_s9 + $0x120] sm:$0xff]  ;;  %v23620_v50 = vld [vmem:[#allocation88_spill] sm:$0xff]  ;;  %v5287_v39 = vadd.f32 %v19711_v16, %v23622_v24  ;;  %v19845_v55 = vadd.f32 %v19213_v31, %v5301_v34  ;;  %15081 = vmatprep.subr.mxu0 %v19825_v4  ;;  %v23626_v34 = vld [vmem:[#allocation10_spill] sm:$0xff] }
 0x359   :  { %v23618_v33 = vld [vmem:[#allocation107_spill] sm:$0xff]  ;;  %v3170_v3 = vadd.f32 %v23620_v50, %v2474_v41  ;;  %v3880_v8 = vadd.f32 %v23621_v25, %v3184_v48  ;;  %15095 = vmatprep.subr.mxu1 %v19822_v56  ;;  %v13935_v41 = vld [vmem:[%s22860_s9 + $0x128] sm:$0xff]  ;;  %15082 = vmatpush3.msra.mxu0 %v19825_v4  ;;  %v19862_v50 = vadd.f32 %v19213_v31, %v5300_v58 }
 0x35a   :  { %v1821_v6 = vadd.f32 %v23619_v0, %v23618_v33  ;;  %v13942_v17 = vld [vmem:[%s22860_s9 + $0x140] sm:$0xff]  ;;  %v5286_v28 = vadd.f32 %v19647_v14, %v4590_v23  ;;  %v13943_v42 = vld [vmem:[%s22860_s9 + $0x148] sm:$0xff]  ;;  %15083 = vmatprep.mubr.msk.f32.mxu0 %vm552_vm2, %v13934_v52  ;;  %v2504_v0 = vadd.f32 %v23626_v34, %v1815_v53  ;;  %15096 = vmatpush3.msra.mxu1 %v19822_v56  ;;  %v23629_v53 = vld [vmem:[#allocation222_spill] sm:$0xff] }
 0x35b   :  { %v23623_v48 = vld [vmem:[#allocation155_spill] sm:$0xff]  ;;  %v23624_v46 = vld [vmem:[#allocation180_spill] sm:$0xff]  ;;  %15097 = vmatprep.mubr.msk.f32.mxu1 %vm552_vm2, %v13942_v17  ;;  %15084 = vmatmul.mubr.msk.f32.vlgmr.msra.gmra.mxu0 %vm552_vm2, %v13935_v41  ;;  %v5273_v58 = vadd.f32 %v19634_v15, %v23629_v53  ;;  %v13944_v17 = vld [vmem:[%s22860_s9 + $0x150] sm:$0xff] }
 0x35c   :  { %v2518_v14 = vadd.f32 %v23623_v48, %v1821_v6  ;;  %v3866_v23 = vadd.f32 %v23624_v46, %v3170_v3  ;;  %v23625_v16 = vld [vmem:[#allocation223_spill] sm:$0xff]  ;;  %15098 = vmatmul.mubr.msk.f32.vlgmr.msra.gmra.mxu1 %vm552_vm2, %v13943_v42  ;;  %v19872_v52 = vadd.f32 %v19225_v38, %v5286_v28  ;;  %15103 = vmatprep.subr.mxu0 %v19862_v50  ;;  %v23631_v41 = vld [vmem:[#allocation136_spill] sm:$0xff]  ;;  %v13937_v34 = vld [vmem:[%s22860_s9 + $0x138] sm:$0xff] }
 0x35d   :  { %v4576_v33 = vadd.f32 %v23625_v16, %v3880_v8  ;;  %v23627_v25 = vld [vmem:[#allocation167_spill] sm:$0xff]  ;;  %v19877_v8 = vadd.f32 %v19225_v38, %v5287_v39  ;;  %15117 = vmatprep.subr.mxu1 %v19845_v55  ;;  %15104 = vmatpush3.msra.mxu0 %v19862_v50  ;;  %v23633_v39 = vld [vmem:[#allocation190_spill] sm:$0xff] }
 0x35e   :  { %v3214_v24 = vadd.f32 %v23627_v25, %v2518_v14  ;;  %v23628_v6 = vld [vmem:[#allocation219_spill] sm:$0xff]  ;;  %v23632_v14 = vld [vmem:[#allocation166_spill] sm:$0xff]  ;;  %15118 = vmatpush3.msra.mxu1 %v19845_v55  ;;  %15105 = vmatprep.subr.mxu0 %v19872_v52  ;;  %v23635_v25 = vld [vmem:[#allocation101_spill] sm:$0xff] }
 0x35f   :  { %v4562_v48 = vadd.f32 %v23628_v6, %v3866_v23  ;;  %v5272_v3 = vadd.f32 %v19567_v12, %v4576_v33  ;;  %v13936_v12 = vld [vmem:[%s22860_s9 + $0x130] sm:$0xff]  ;;  %v23630_v28 = vld [vmem:[#allocation103_spill] sm:$0xff]  ;;  %v3200_v15 = vadd.f32 %v23632_v14, %v2504_v0  ;;  %v23634_v16 = vld [vmem:[#allocation218_spill] sm:$0xff]  ;;  %15119 = vmatprep.subr.mxu1 %v19877_v8  ;;  %15100 = vmatprep.mubr.msk.f32.mxu1 %vm552_vm2, %v13944_v17 }
 0x360   :  { %v1809_v42 = vadd.f32 %v23631_v41, %v23630_v28  ;;  %v3910_v46 = vadd.f32 %v23633_v39, %v3214_v24  ;;  %v5259_v33 = vadd.f32 %v19588_v36, %v23634_v16  ;;  %v13945_v0 = vld [vmem:[%s22860_s9 + $0x158] sm:$0xff]  ;;  %v23636_v6 = vld [vmem:[#allocation133_spill] sm:$0xff]  ;;  %v5244_v36 = vpop.f32.mrf.mxu1  ;;  %15086 = vmatprep.mubr.msk.f32.mxu0 %vm552_vm2, %v13936_v12  ;;  %v23639_v41 = vld [vmem:[#allocation232_spill] sm:$0xff]  ;;  %v19915_v16 = vadd.f32 %v19260_v18, %v5273_v58 }
 0x361   :  { %v5258_v23 = vadd.f32 %v19482_v7, %v4562_v48  ;;  %v1803_v24 = vadd.f32 %v23636_v6, %v23635_v25  ;;  %v23637_v53 = vld [vmem:[#allocation134_spill] sm:$0xff]  ;;  %v23638_v48 = vld [vmem:[#allocation189_spill] sm:$0xff]  ;;  %v19912_v39 = vadd.f32 %v19260_v18, %v5272_v3  ;;  %15106 = vmatpush3.msra.mxu0 %v19872_v52  ;;  %15120 = vmatpush3.msra.mxu1 %v19877_v8 }
 0x362   :  { %v2490_v7 = vadd.f32 %v23637_v53, %v1809_v42  ;;  %v3896_v28 = vadd.f32 %v23638_v48, %v3200_v15  ;;  %v4606_v14 = vadd.f32 %v23639_v41, %v3910_v46  ;;  %v23640_v42 = vld [vmem:[#allocation100_spill] sm:$0xff]  ;;  %v23641_v15 = vld [vmem:[#allocation165_spill] sm:$0xff]  ;;  %15087 = vmatmul.mubr.msk.f32.gmra.mxu0 %vm552_vm2, %v13937_v34  ;;  %15101 = vmatmul.mubr.msk.f32.gmra.mxu1 %vm552_vm2, %v13945_v0  ;;  %v13950_v46 = vld [vmem:[%s22860_s9 + $0x160] sm:$0xff] }
 0x363   :  { %v2476_v25 = vadd.f32 %v23640_v42, %v1803_v24  ;;  %v23642_v53 = vld [vmem:[#allocation228_spill] sm:$0xff]  ;;  %v19925_v3 = vadd.f32 %v19276_v60, %v5258_v23  ;;  %v19928_v58 = vadd.f32 %v19276_v60, %v5259_v33  ;;  %15107 = vmatprep.subr.mxu0 %v19912_v39  ;;  %15121 = vmatprep.subr.mxu1 %v19915_v16  ;;  %v13958_v23 = vld [vmem:[%s22860_s9 + $0x180] sm:$0xff] }
 0x364   :  { %v3186_v6 = vadd.f32 %v23641_v15, %v2490_v7  ;;  %v4592_v12 = vadd.f32 %v23642_v53, %v3896_v28  ;;  %v5302_v17 = vadd.f32 %v5244_v36, %v4606_v14  ;;  %15108 = vmatpush3.msra.mxu0 %v19912_v39  ;;  %15122 = vmatpush3.msra.mxu1 %v19915_v16  ;;  %v23643_v34 = vld [vmem:[#allocation164_spill] sm:$0xff]  ;;  %v23645_v36 = vld [vmem:[#allocation187_spill] sm:$0xff] }
 0x365   :  { %v3172_v33 = vadd.f32 %v23643_v34, %v2476_v25  ;;  %v23644_v0 = vld [vmem:[#allocation188_spill] sm:$0xff]  ;;  %15109 = vmatprep.subr.mxu0 %v19925_v3  ;;  %15123 = vmatprep.subr.mxu1 %v19928_v58  ;;  %v23648_v34 = vmov 0.0  }
 0x366   :  { %v3882_v24 = vadd.f32 %v23644_v0, %v3186_v6  ;;  %v5288_v7 = vadd.f32 %v19750_v59, %v4592_v12  ;;  %v13951_v48 = vld [vmem:[%s22860_s9 + $0x168] sm:$0xff]  ;;  %15110 = vmatpush3.msra.mxu0 %v19925_v3  ;;  %15111 = vmatprep.mubr.msk.f32.mxu0 %vm552_vm2, %v13950_v46  ;;  %v19956_v42 = vadd.f32 %v19213_v31, %v5302_v17  ;;  %v13952_v31 = vld [vmem:[%s22860_s9 + $0x170] sm:$0xff]  ;;  %v13961_v17 = vld [vmem:[%s22860_s9 + $0x198] sm:$0xff] }
 0x367   :  { %v13959_v28 = vld [vmem:[%s22860_s9 + $0x188] sm:$0xff]  ;;  %v3868_v41 = vadd.f32 %v23645_v36, %v3172_v33  ;;  %15124 = vmatpush3.msra.mxu1 %v19928_v58  ;;  %15125 = vmatprep.mubr.msk.f32.mxu1 %vm552_vm2, %v13958_v23  ;;  %v13960_v12 = vld [vmem:[%s22860_s9 + $0x190] sm:$0xff]  ;;  %v20013_v23 = vld [vmem:[%s22861_s11] sm:$0xff] }
 0x368   :  { %v23646_v14 = vld [vmem:[#allocation224_spill] sm:$0xff]  ;;  %15112 = vmatmul.mubr.msk.f32.vlgmr.msra.gmra.mxu0 %vm552_vm2, %v13951_v48  ;;  %15126 = vmatmul.mubr.msk.f32.vlgmr.msra.gmra.mxu1 %vm552_vm2, %v13959_v28  ;;  %v19965_v53 = vadd.f32 %v19225_v38, %v5288_v7  ;;  %v13953_v38 = vld [vmem:[%s22860_s9 + $0x178] sm:$0xff]  ;;  %v13968_v33 = vld [vmem:[%s22860_s9 + $0x1b0] sm:$0xff] }
 0x369   :  { %v4578_v59 = vadd.f32 %v23646_v14, %v3882_v24  ;;  %v23647_v25 = vld [vmem:[#allocation220_spill] sm:$0xff]  ;;  %15131 = vmatprep.subr.mxu0 %v19956_v42  ;;  %6934 = vmatprep.subr.mxu1 %v19321_v54  ;;  %v13969_v0 = vld [vmem:[%s22860_s9 + $0x1b8] sm:$0xff]  ;;  %v23650_v48 = vld [vmem:[#allocation71_spill] sm:$0xff] }
 0x36a   :  { %v4564_v15 = vadd.f32 %v23647_v25, %v3868_v41  ;;  %15132 = vmatpush3.msra.mxu0 %v19956_v42  ;;  %6935 = vmatpush1.msra.mxu1 %v19230_v5  ;;  %v20037_v24 = vld [vmem:[%s22861_s11 + $0x8] sm:$0xff]  ;;  %v23651_v28 = vld [vmem:[#allocation106_spill] sm:$0xff]  ;;  %v20055_v36 = vld [vmem:[%s22861_s11 + $0x10] sm:$0xff] }
 0x36b   :  { %v5274_v6 = vadd.f32 %v19673_v27, %v4578_v59  ;;  %15133 = vmatprep.subr.mxu0 %v19965_v53  ;;  %6936 = vmatprep.subr.mxu1 %v19340_v13  ;;  %v23649_v7 = vld [vmem:[#allocation68_spill] sm:$0xff]  ;;  %v23653_v14 = vld [vmem:[#allocation74_spill] sm:$0xff] }
 0x36c   :  { %v5260_v27 = vadd.f32 %v19613_v22, %v4564_v15  ;;  %15114 = vmatprep.mubr.msk.f32.mxu0 %vm552_vm2, %v13952_v31  ;;  %15128 = vmatprep.mubr.msk.f32.mxu1 %vm552_vm2, %v13960_v12  ;;  %v23652_v41 = vld [vmem:[#allocation104_spill] sm:$0xff]  ;;  %v20070_v59 = vld [vmem:[%s22861_s11 + $0x18] sm:$0xff]  ;;  %v23657_v31 = vld [vmem:[#allocation77_spill] sm:$0xff] }
 0x36d   :  { %v19989_v46 = vadd.f32 %v19260_v18, %v5274_v6  ;;  %15134 = vmatpush3.msra.mxu0 %v19965_v53  ;;  %6937 = vmatpush1.msra.mxu1 %v19249_v11  ;;  %v13966_v18 = vld [vmem:[%s22860_s9 + $0x1a0] sm:$0xff]  ;;  %v23654_v25 = vld [vmem:[#allocation108_spill] sm:$0xff]  ;;  %v23655_v15 = vld [vmem:[#allocation66_spill] sm:$0xff] }
 0x36e   :  { %15115 = vmatmul.mubr.msk.f32.gmra.mxu0 %vm552_vm2, %v13953_v38  ;;  %15129 = vmatmul.mubr.msk.f32.gmra.mxu1 %vm552_vm2, %v13961_v17  ;;  %v19996_v22 = vadd.f32 %v19276_v60, %v5260_v27  ;;  %v13967_v60 = vld [vmem:[%s22860_s9 + $0x1a8] sm:$0xff]  ;;  %v23656_v6 = vld [vmem:[#allocation109_spill] sm:$0xff]  ;;  %v23658_v12 = vld [vmem:[#allocation110_spill] sm:$0xff] }
 0x36f   :  { %15135 = vmatprep.subr.mxu0 %v19989_v46  ;;  %6938 = vmatprep.subr.mxu1 %v19359_v26  ;;  %v23659_v27 = vld [vmem:[#allocation69_spill] sm:$0xff]  ;;  %v23660_v38 = vld [vmem:[#allocation111_spill] sm:$0xff]  ;;  %v23661_v17 = vld [vmem:[#allocation80_spill] sm:$0xff] }
 0x370   :  { %15136 = vmatpush3.msra.mxu0 %v19989_v46  ;;  %6939 = vmatpush1.msra.mxu1 %v19269_v40 }
 0x371   :  { %15137 = vmatprep.subr.mxu0 %v19996_v22  ;;  %6940 = vmatprep.subr.mxu1 %v19387_v51 }
 0x372   :  { %15138 = vmatpush3.msra.mxu0 %v19996_v22  ;;  %15139 = vmatprep.mubr.msk.f32.mxu0 %vm552_vm2, %v13966_v18  ;;  %v23662_v18 = vld [vmem:[#allocation112_spill] sm:$0xff] }
 0x373   :  { %6941 = vmatpush1.msra.mxu1 %v19284_v19  ;;  %6974 = vmatprep.mubr.f32.mxu1 %v23648_v34 }
 0x374   :  { %15140 = vmatmul.mubr.msk.f32.vlgmr.msra.gmra.mxu0 %vm552_vm2, %v13967_v60  ;;  %13974 = vmatmul.mubr.msk.f32.vlgmr.msra.gmra.mxu1 %vm552_vm2, %v20013_v23  ;;  %v20186_v60 = vld [vmem:[%s22862_s12] sm:$0xff] }
 0x375   :  { %7023 = vmatprep.subr.mxu0 %v19406_v21  ;;  %7112 = vmatprep.subr.mxu1 %v19516_v20 }
 0x376   :  { %7024 = vmatpush1.msra.mxu0 %v19233_v30  ;;  %7113 = vmatpush1.msra.mxu1 %v19413_v32 }
 0x377   :  { %7025 = vmatprep.subr.mxu0 %v19421_v45  ;;  %7114 = vmatprep.subr.mxu1 %v19535_v9 }
 0x378   :  { %15142 = vmatprep.mubr.msk.f32.mxu0 %vm552_vm2, %v13968_v33  ;;  %6980 = vmatprep.mubr.f32.mxu1 %v23648_v34  ;;  %v20218_v33 = vld [vmem:[%s22862_s12 + $0x10] sm:$0xff] }
 0x379   :  { %7026 = vmatpush1.msra.mxu0 %v19252_v10  ;;  %7115 = vmatpush1.msra.mxu1 %v19435_v62 }
 0x37a   :  { %15143 = vmatmul.mubr.msk.f32.gmra.mxu0 %vm552_vm2, %v13969_v0  ;;  %13975 = vmatmul.mubr.msk.f32.gmra.mxu1 %vm552_vm2, %v20037_v24  ;;  %v20224_v0 = vpop.permute.xlu1 %11431 }
 0x37b   :  { %7027 = vmatprep.subr.mxu0 %v19457_v37  ;;  %7116 = vmatprep.subr.mxu1 %v19577_v2  ;;  %23663 = vst [vmem:[#allocation72_spill] sm:$0xff] %v20224_v0 }
 0x37c   :  { %7028 = vmatpush1.msra.mxu0 %v23649_v7  ;;  %7117 = vmatpush1.msra.mxu1 %v23650_v48 }
 0x37d   :  { %7029 = vmatprep.subr.mxu0 %v23651_v28  ;;  %7118 = vmatprep.subr.mxu1 %v19594_v47 }
 0x37e   :  { %6986 = vmatprep.mubr.f32.mxu1 %v23648_v34  ;;  %7030 = vmatpush1.msra.mxu0 %v23652_v41 }
 0x37f   :  { %7063 = vmatprep.mubr.f32.mxu0 %v23648_v34  ;;  %7119 = vmatpush1.msra.mxu1 %v23653_v14 }
 0x380   :  { %13976 = vmatmul.mubr.msk.f32.gmra.mxu1 %vm552_vm2, %v20055_v36  ;;  %13978 = vmatmul.mubr.msk.f32.vlgmr.msra.gmra.mxu0 %vm552_vm2, %v20013_v23 }
 0x381   :  { %7201 = vmatprep.subr.mxu0 %v19640_v35  ;;  %7290 = vmatprep.subr.mxu1 %v19757_v43 }
 0x382   :  { %7202 = vmatpush1.msra.mxu0 %v23654_v25  ;;  %6992 = vmatprep.mubr.f32.mxu1 %v23648_v34 }
 0x383   :  { %7203 = vmatprep.subr.mxu0 %v19652_v57  ;;  %7069 = vmatprep.mubr.f32.mxu0 %v23648_v34 }
 0x384   :  { %7204 = vmatpush1.msra.mxu0 %v23655_v15  ;;  %13977 = vmatmul.mubr.msk.f32.gmra.mxu1 %vm552_vm2, %v20070_v59 }
 0x385   :  { %13979 = vmatmul.mubr.msk.f32.gmra.mxu0 %vm552_vm2, %v20037_v24  ;;  %7205 = vmatprep.subr.mxu0 %v19697_v61 }
 0x386   :  { %7206 = vmatpush1.msra.mxu0 %v23656_v6  ;;  %7075 = vmatprep.mubr.f32.mxu0 %v23648_v34 }
 0x387   :  { %7207 = vmatprep.subr.mxu0 %v19707_v49  ;;  %7152 = vmatprep.mubr.f32.mxu1 %v23648_v34 }
 0x388   :  { %7208 = vmatpush1.msra.mxu0 %v23657_v31  ;;  %13982 = vmatmul.mubr.msk.f32.vlgmr.msra.gmra.mxu1 %vm552_vm2, %v20013_v23 }
 0x389   :  { %13980 = vmatmul.mubr.msk.f32.gmra.mxu0 %vm552_vm2, %v20055_v36  ;;  %7291 = vmatpush1.msra.mxu1 %v23658_v12 }
 0x38a   :  { %7379 = vmatprep.subr.mxu0 %v19862_v50  ;;  %7292 = vmatprep.subr.mxu1 %v19772_v29 }
 0x38b   :  { %7293 = vmatpush1.msra.mxu1 %v23659_v27  ;;  %7081 = vmatprep.mubr.f32.mxu0 %v23648_v34 }
 0x38c   :  { %7158 = vmatprep.mubr.f32.mxu1 %v23648_v34  ;;  %7294 = vmatprep.subr.mxu1 %v19810_v1 }
 0x38d   :  { %13981 = vmatmul.mubr.msk.f32.gmra.mxu0 %vm552_vm2, %v20070_v59  ;;  %13983 = vmatmul.mubr.msk.f32.gmra.mxu1 %vm552_vm2, %v20037_v24 }
 0x38e   :  { %7295 = vmatpush1.msra.mxu1 %v23660_v38  ;;  %7164 = vmatprep.mubr.f32.mxu1 %v23648_v34 }
 0x38f   :  { %7296 = vmatprep.subr.mxu1 %v19825_v4  ;;  %7241 = vmatprep.mubr.f32.mxu0 %v23648_v34 }
 0x390   :  { %7297 = vmatpush1.msra.mxu1 %v23661_v17 }
 0x391   :  { %7468 = vmatprep.subr.mxu1 %v19956_v42  ;;  %13984 = vmatmul.mubr.msk.f32.gmra.mxu1 %vm552_vm2, %v20055_v36 }
 0x392   :  { %13986 = vmatmul.mubr.msk.f32.vlgmr.msra.gmra.mxu0 %vm552_vm2, %v20013_v23  ;;  %7170 = vmatprep.mubr.f32.mxu1 %v23648_v34 }
 0x393   :  { %7380 = vmatpush1.msra.mxu0 %v23662_v18  ;;  %7247 = vmatprep.mubr.f32.mxu0 %v23648_v34 }
 0x394   :  { %7381 = vmatprep.subr.mxu0 %v19872_v52 }
 0x395   :  { %7382 = vmatpush1.msra.mxu0 %v19769_v63  ;;  %13985 = vmatmul.mubr.msk.f32.gmra.mxu1 %vm552_vm2, %v20070_v59 }
 0x396   :  { %7383 = vmatprep.subr.mxu0 %v19912_v39  ;;  %13987 = vmatmul.mubr.msk.f32.gmra.mxu0 %vm552_vm2, %v20037_v24 }
 0x397   :  { %7384 = vmatpush1.msra.mxu0 %v19807_v44  ;;  %7253 = vmatprep.mubr.f32.mxu0 %v23648_v34 }
 0x398   :  { %7385 = vmatprep.subr.mxu0 %v19925_v3  ;;  %7330 = vmatprep.mubr.f32.mxu1 %v23648_v34 }
 0x399   :  { %7386 = vmatpush1.msra.mxu0 %v19822_v56  ;;  %13990 = vmatmul.mubr.msk.f32.vlgmr.msra.gmra.mxu1 %vm552_vm2, %v20013_v23 }
 0x39a   :  { %7573 = vmatprep.subr.mxu0 %v19321_v54  ;;  %13988 = vmatmul.mubr.msk.f32.gmra.mxu0 %vm552_vm2, %v20055_v36 }
 0x39b   :  { %7469 = vmatpush1.msra.mxu1 %v19845_v55  ;;  %7259 = vmatprep.mubr.f32.mxu0 %v23648_v34 }
 0x39c   :  { %7470 = vmatprep.subr.mxu1 %v19965_v53  ;;  %7336 = vmatprep.mubr.f32.mxu1 %v23648_v34 }
 0x39d   :  { %7471 = vmatpush1.msra.mxu1 %v19877_v8 }
 0x39e   :  { %7472 = vmatprep.subr.mxu1 %v19989_v46  ;;  %13989 = vmatmul.mubr.msk.f32.gmra.mxu0 %vm552_vm2, %v20070_v59 }
 0x39f   :  { %13991 = vmatmul.mubr.msk.f32.gmra.mxu1 %vm552_vm2, %v20037_v24  ;;  %7419 = vmatprep.mubr.f32.mxu0 %v23648_v34 }
 0x3a0   :  { %7473 = vmatpush1.msra.mxu1 %v19915_v16  ;;  %7342 = vmatprep.mubr.f32.mxu1 %v23648_v34 }
 0x3a1   :  { %7474 = vmatprep.subr.mxu1 %v19996_v22 }
 0x3a2   :  { %7475 = vmatpush1.msra.mxu1 %v19928_v58  ;;  %13994 = vmatmul.mubr.msk.f32.vlgmr.msra.gmra.mxu0 %vm552_vm2, %v20013_v23 }
 0x3a3   :  { %7662 = vmatprep.subr.mxu1 %v19406_v21  ;;  %13992 = vmatmul.mubr.msk.f32.gmra.mxu1 %vm552_vm2, %v20055_v36 }
 0x3a4   :  { %7574 = vmatpush1.msra.mxu0 %v19230_v5  ;;  %7348 = vmatprep.mubr.f32.mxu1 %v23648_v34 }
 0x3a5   :  { %7575 = vmatprep.subr.mxu0 %v19340_v13  ;;  %7425 = vmatprep.mubr.f32.mxu0 %v23648_v34 }
 0x3a6   :  { %7576 = vmatpush1.msra.mxu0 %v19249_v11 }
 0x3a7   :  { %7577 = vmatprep.subr.mxu0 %v19359_v26  ;;  %13993 = vmatmul.mubr.msk.f32.gmra.mxu1 %vm552_vm2, %v20070_v59 }
 0x3a8   :  { %13995 = vmatmul.mubr.msk.f32.gmra.mxu0 %vm552_vm2, %v20037_v24  ;;  %7508 = vmatprep.mubr.f32.mxu1 %v23648_v34 }
 0x3a9   :  { %7578 = vmatpush1.msra.mxu0 %v19269_v40  ;;  %7431 = vmatprep.mubr.f32.mxu0 %v23648_v34 }
 0x3aa   :  { %7579 = vmatprep.subr.mxu0 %v19387_v51 }
 0x3ab   :  { %7580 = vmatpush1.msra.mxu0 %v19284_v19  ;;  %13998 = vmatmul.mubr.msk.f32.vlgmr.msra.gmra.mxu1 %vm552_vm2, %v20013_v23  ;;  %v20204_v23 = vld [vmem:[%s22862_s12 + $0x8] sm:$0xff] }
 0x3ac   :  { %7751 = vmatprep.subr.mxu0 %v19516_v20  ;;  %13996 = vmatmul.mubr.msk.f32.gmra.mxu0 %vm552_vm2, %v20055_v36 }
 0x3ad   :  { %7663 = vmatpush1.msra.mxu1 %v19233_v30  ;;  %7437 = vmatprep.mubr.f32.mxu0 %v23648_v34 }
 0x3ae   :  { %7664 = vmatprep.subr.mxu1 %v19421_v45  ;;  %7514 = vmatprep.mubr.f32.mxu1 %v23648_v34 }
 0x3af   :  { %7665 = vmatpush1.msra.mxu1 %v19252_v10 }
 0x3b0   :  { %7666 = vmatprep.subr.mxu1 %v19457_v37  ;;  %13997 = vmatmul.mubr.msk.f32.gmra.mxu0 %vm552_vm2, %v20070_v59 }
 0x3b1   :  { %13999 = vmatmul.mubr.msk.f32.gmra.mxu1 %vm552_vm2, %v20037_v24  ;;  %7613 = vmatprep.mubr.f32.mxu0 %v23648_v34  ;;  %v20234_v24 = vld [vmem:[%s22862_s12 + $0x18] sm:$0xff] }
 0x3b2   :  { %7667 = vmatpush1.msra.mxu1 %v23649_v7  ;;  %7520 = vmatprep.mubr.f32.mxu1 %v23648_v34 }
 0x3b3   :  { %7668 = vmatprep.subr.mxu1 %v23651_v28 }
 0x3b4   :  { %7669 = vmatpush1.msra.mxu1 %v23652_v41  ;;  %14002 = vmatmul.mubr.msk.f32.vlgmr.msra.gmra.mxu0 %vm552_vm2, %v20186_v60 }
 0x3b5   :  { %7840 = vmatprep.subr.mxu1 %v19640_v35  ;;  %14000 = vmatmul.mubr.msk.f32.gmra.mxu1 %vm552_vm2, %v20055_v36  ;;  %v20245_v36 = vpop.permute.xlu1 %11421 }
 0x3b6   :  { %7752 = vmatpush1.msra.mxu0 %v19413_v32  ;;  %7526 = vmatprep.mubr.f32.mxu1 %v23648_v34  ;;  %23664 = vst [vmem:[#allocation114_spill] sm:$0xff] %v20245_v36 }
 0x3b7   :  { %7753 = vmatprep.subr.mxu0 %v19535_v9  ;;  %7619 = vmatprep.mubr.f32.mxu0 %v23648_v34 }
 0x3b8   :  { %7754 = vmatpush1.msra.mxu0 %v19435_v62 }
 0x3b9   :  { %7755 = vmatprep.subr.mxu0 %v19577_v2  ;;  %14001 = vmatmul.mubr.msk.f32.gmra.mxu1 %vm552_vm2, %v20070_v59  ;;  %v20260_v59 = vpop.permute.xlu1 %12404 }
 0x3ba   :  { %14003 = vmatmul.mubr.msk.f32.gmra.mxu0 %vm552_vm2, %v20204_v23  ;;  %7702 = vmatprep.mubr.f32.mxu1 %v23648_v34  ;;  %23665 = vst [vmem:[#allocation73_spill] sm:$0xff] %v20260_v59 }
 0x3bb   :  { %7756 = vmatpush1.msra.mxu0 %v23650_v48  ;;  %7625 = vmatprep.mubr.f32.mxu0 %v23648_v34 }
 0x3bc   :  { %7757 = vmatprep.subr.mxu0 %v19594_v47 }
 0x3bd   :  { %7758 = vmatpush1.msra.mxu0 %v23653_v14  ;;  %14006 = vmatmul.mubr.msk.f32.vlgmr.msra.gmra.mxu1 %vm552_vm2, %v20186_v60  ;;  %v20275_v59 = vpop.permute.xlu1 %12394 }
 0x3be   :  { %7929 = vmatprep.subr.mxu0 %v19757_v43  ;;  %14004 = vmatmul.mubr.msk.f32.gmra.mxu0 %vm552_vm2, %v20218_v33  ;;  %23666 = vst [vmem:[#allocation75_spill] sm:$0xff] %v20275_v59 }
 0x3bf   :  { %7841 = vmatpush1.msra.mxu1 %v23654_v25  ;;  %7631 = vmatprep.mubr.f32.mxu0 %v23648_v34 }
 0x3c0   :  { %7842 = vmatprep.subr.mxu1 %v19652_v57  ;;  %7708 = vmatprep.mubr.f32.mxu1 %v23648_v34 }
 0x3c1   :  { %7843 = vmatpush1.msra.mxu1 %v23655_v15  ;;  %v20291_v59 = vpop.permute.xlu1 %13362 }
 0x3c2   :  { %7844 = vmatprep.subr.mxu1 %v19697_v61  ;;  %14005 = vmatmul.mubr.msk.f32.gmra.mxu0 %vm552_vm2, %v20234_v24  ;;  %23667 = vst [vmem:[#allocation117_spill] sm:$0xff] %v20291_v59 }
 0x3c3   :  { %14007 = vmatmul.mubr.msk.f32.gmra.mxu1 %vm552_vm2, %v20204_v23  ;;  %7791 = vmatprep.mubr.f32.mxu0 %v23648_v34 }
 0x3c4   :  { %7845 = vmatpush1.msra.mxu1 %v23656_v6  ;;  %7714 = vmatprep.mubr.f32.mxu1 %v23648_v34 }
 0x3c5   :  { %7846 = vmatprep.subr.mxu1 %v19707_v49  ;;  %v20306_v59 = vpop.permute.xlu1 %13352 }
 0x3c6   :  { %7847 = vmatpush1.msra.mxu1 %v23657_v31  ;;  %14010 = vmatmul.mubr.msk.f32.vlgmr.msra.gmra.mxu0 %vm552_vm2, %v20186_v60  ;;  %23668 = vst [vmem:[#allocation70_spill] sm:$0xff] %v20306_v59  ;;  %v23669_v59 = vld [vmem:[#allocation3_spill] sm:$0xff] }
 0x3c7   :  { %8018 = vmatprep.subr.mxu1 %v19862_v50  ;;  %14008 = vmatmul.mubr.msk.f32.gmra.mxu1 %vm552_vm2, %v20218_v33 }
 0x3c8   :  { %7930 = vmatpush1.msra.mxu0 %v23658_v12  ;;  %7720 = vmatprep.mubr.f32.mxu1 %v23648_v34 }
 0x3c9   :  { %7931 = vmatprep.subr.mxu0 %v19772_v29  ;;  %7797 = vmatprep.mubr.f32.mxu0 %v23648_v34 }
 0x3ca   :  { %7932 = vmatpush1.msra.mxu0 %v23659_v27 }
 0x3cb   :  { %7933 = vmatprep.subr.mxu0 %v19810_v1  ;;  %14009 = vmatmul.mubr.msk.f32.gmra.mxu1 %vm552_vm2, %v20234_v24 }
 0x3cc   :  { %14011 = vmatmul.mubr.msk.f32.gmra.mxu0 %vm552_vm2, %v20204_v23  ;;  %7880 = vmatprep.mubr.f32.mxu1 %v23648_v34 }
 0x3cd   :  { %7934 = vmatpush1.msra.mxu0 %v23660_v38  ;;  %7803 = vmatprep.mubr.f32.mxu0 %v23648_v34 }
 0x3ce   :  { %7935 = vmatprep.subr.mxu0 %v19825_v4 }
 0x3cf   :  { %7936 = vmatpush1.msra.mxu0 %v23661_v17  ;;  %14014 = vmatmul.mubr.msk.f32.vlgmr.msra.gmra.mxu1 %vm552_vm2, %v20186_v60 }
 0x3d0   :  { %8107 = vmatprep.subr.mxu0 %v19956_v42  ;;  %14012 = vmatmul.mubr.msk.f32.gmra.mxu0 %vm552_vm2, %v20218_v33 }
 0x3d1   :  { %8019 = vmatpush1.msra.mxu1 %v23662_v18  ;;  %7809 = vmatprep.mubr.f32.mxu0 %v23648_v34 }
 0x3d2   :  { %8020 = vmatprep.subr.mxu1 %v19872_v52  ;;  %7886 = vmatprep.mubr.f32.mxu1 %v23648_v34 }
 0x3d3   :  { %8021 = vmatpush1.msra.mxu1 %v19769_v63 }
 0x3d4   :  { %8022 = vmatprep.subr.mxu1 %v19912_v39  ;;  %14013 = vmatmul.mubr.msk.f32.gmra.mxu0 %vm552_vm2, %v20234_v24 }
 0x3d5   :  { %14015 = vmatmul.mubr.msk.f32.gmra.mxu1 %vm552_vm2, %v20204_v23  ;;  %7969 = vmatprep.mubr.f32.mxu0 %v23648_v34 }
 0x3d6   :  { %8023 = vmatpush1.msra.mxu1 %v19807_v44  ;;  %7892 = vmatprep.mubr.f32.mxu1 %v23648_v34 }
 0x3d7   :  { %8024 = vmatprep.subr.mxu1 %v19925_v3 }
 0x3d8   :  { %8025 = vmatpush1.msra.mxu1 %v19822_v56  ;;  %14018 = vmatmul.mubr.msk.f32.vlgmr.msra.gmra.mxu0 %vm552_vm2, %v20186_v60 }
 0x3d9   :  { %8212 = vmatprep.subr.mxu1 %v19321_v54  ;;  %14016 = vmatmul.mubr.msk.f32.gmra.mxu1 %vm552_vm2, %v20218_v33  ;;  %v429_v54 = vpop.permute.xlu1 %428 }
 0x3da   :  { %8108 = vmatpush1.msra.mxu0 %v19845_v55  ;;  %7898 = vmatprep.mubr.f32.mxu1 %v23648_v34  ;;  %v530_v36 = vadd.f32 %v23669_v59, %v429_v54 }
 0x3db   :  { %8109 = vmatprep.subr.mxu0 %v19965_v53  ;;  %7975 = vmatprep.mubr.f32.mxu0 %v23648_v34 }
 0x3dc   :  { %8110 = vmatpush1.msra.mxu0 %v19877_v8 }
 0x3dd   :  { %8111 = vmatprep.subr.mxu0 %v19989_v46  ;;  %14017 = vmatmul.mubr.msk.f32.gmra.mxu1 %vm552_vm2, %v20234_v24  ;;  %v439_v59 = vpop.permute.xlu1 %438 }
 0x3de   :  { %14019 = vmatmul.mubr.msk.f32.gmra.mxu0 %vm552_vm2, %v20204_v23  ;;  %8058 = vmatprep.mubr.f32.mxu1 %v23648_v34 }
 0x3df   :  { %8112 = vmatpush1.msra.mxu0 %v19915_v16  ;;  %7981 = vmatprep.mubr.f32.mxu0 %v23648_v34 }
 0x3e0   :  { %8113 = vmatprep.subr.mxu0 %v19996_v22 }
 0x3e1   :  { %8114 = vmatpush1.msra.mxu0 %v19928_v58  ;;  %14022 = vmatmul.mubr.msk.f32.vlgmr.msra.gmra.mxu1 %vm552_vm2, %v20186_v60 }
 0x3e2   :  { %8301 = vmatprep.subr.mxu0 %v19406_v21  ;;  %14020 = vmatmul.mubr.msk.f32.gmra.mxu0 %vm552_vm2, %v20218_v33 }
 0x3e3   :  { %8213 = vmatpush1.msra.mxu1 %v19230_v5  ;;  %7987 = vmatprep.mubr.f32.mxu0 %v23648_v34 }
 0x3e4   :  { %8214 = vmatprep.subr.mxu1 %v19340_v13  ;;  %8064 = vmatprep.mubr.f32.mxu1 %v23648_v34  ;;  %v14959_v0 = vpop.f32.mrf.mxu0 }
 0x3e5   :  { %8215 = vmatpush1.msra.mxu1 %v19249_v11  ;;  %v5485_v21 = vadd.f32 %v14959_v0, %v530_v36  ;;  %v23671_v11 = vld [vmem:[#allocation7_spill] sm:$0xff] }
 0x3e6   :  { %8216 = vmatprep.subr.mxu1 %v19359_v26  ;;  %14021 = vmatmul.mubr.msk.f32.gmra.mxu0 %vm552_vm2, %v20234_v24  ;;  %v20336_v5 = vpop.f32.mrf.mxu0  ;;  %v540_v13 = vadd.f32 %v23671_v11, %v439_v59  ;;  %v14987_v0 = vpop.f32.mrf.mxu1 }
 0x3e7   :  { %14023 = vmatmul.mubr.msk.f32.gmra.mxu1 %vm552_vm2, %v20204_v23  ;;  %8147 = vmatprep.mubr.f32.mxu0 %v23648_v34  ;;  %23670 = vst [vmem:[#allocation5_spill] sm:$0xff] %v20336_v5 }
 0x3e8   :  { %8217 = vmatpush1.msra.mxu1 %v19269_v40  ;;  %8070 = vmatprep.mubr.f32.mxu1 %v23648_v34  ;;  %v14962_v26 = vpop.f32.mrf.mxu0 }
 0x3e9   :  { %8218 = vmatprep.subr.mxu1 %v19387_v51  ;;  %v5487_v36 = vadd.f32 %v14962_v26, %v540_v13  ;;  %v20355_v51 = vpop.f32.mrf.mxu1 }
 0x3ea   :  { %8219 = vmatpush1.msra.mxu1 %v19284_v19  ;;  %14026 = vmatmul.mubr.msk.f32.vlgmr.msra.gmra.mxu0 %vm552_vm2, %v20186_v60  ;;  %v20350_v40 = vpop.f32.mrf.mxu0  ;;  %23673 = vst [vmem:[#allocation144_spill] sm:$0xff] %v20355_v51 }
 0x3eb   :  { %8390 = vmatprep.subr.mxu1 %v19516_v20  ;;  %14024 = vmatmul.mubr.msk.f32.gmra.mxu1 %vm552_vm2, %v20218_v33  ;;  %23672 = vst [vmem:[#allocation142_spill] sm:$0xff] %v20350_v40 }
 0x3ec   :  { %8302 = vmatpush1.msra.mxu0 %v19233_v30  ;;  %8076 = vmatprep.mubr.f32.mxu1 %v23648_v34  ;;  %v14973_v19 = vpop.f32.mrf.mxu0  ;;  %v20366_v30 = vld [vmem:[%s22863_s13] sm:$0xff] }
 0x3ed   :  { %8303 = vmatprep.subr.mxu0 %v19421_v45  ;;  %8153 = vmatprep.mubr.f32.mxu0 %v23648_v34  ;;  %v5591_v20 = vadd.f32 %v14973_v19, %v5485_v21  ;;  %v20541_v19 = vld [vmem:[%s22864_s2 + $0x68] sm:$0xff] }
 0x3ee   :  { %8304 = vmatpush1.msra.mxu0 %v19252_v10  ;;  %v20368_v10 = vpop.f32.mrf.mxu0 }
 0x3ef   :  { %8305 = vmatprep.subr.mxu0 %v19457_v37  ;;  %14025 = vmatmul.mubr.msk.f32.gmra.mxu1 %vm552_vm2, %v20234_v24  ;;  %23674 = vst [vmem:[#allocation145_spill] sm:$0xff] %v20368_v10  ;;  %v5697_v45 = vadd.f32 %v14987_v0, %v5591_v20  ;;  %v14990_v37 = vpop.f32.mrf.mxu1 }
 0x3f0   :  { %14027 = vmatmul.mubr.msk.f32.gmra.mxu0 %vm552_vm2, %v20204_v23  ;;  %8252 = vmatprep.mubr.f32.mxu1 %v23648_v34  ;;  %v14976_v60 = vpop.f32.mrf.mxu0 }
 0x3f1   :  { %8306 = vmatpush1.msra.mxu0 %v23649_v7  ;;  %8159 = vmatprep.mubr.f32.mxu0 %v23648_v34  ;;  %v5593_v23 = vadd.f32 %v14976_v60, %v5487_v36  ;;  %v20555_v60 = vld [vmem:[%s22864_s2 + $0x60] sm:$0xff] }
 0x3f2   :  { %8307 = vmatprep.subr.mxu0 %v23651_v28  ;;  %v20381_v7 = vpop.f32.mrf.mxu0  ;;  %v20388_v28 = vld [vmem:[%s22863_s13 + $0x8] sm:$0xff] }
 0x3f3   :  { %8308 = vmatpush1.msra.mxu0 %v23652_v41  ;;  %14030 = vmatmul.mubr.msk.f32.vlgmr.msra.gmra.mxu1 %vm552_vm2, %v20366_v30  ;;  %23675 = vst [vmem:[#allocation154_spill] sm:$0xff] %v20381_v7  ;;  %v5699_v41 = vadd.f32 %v14990_v37, %v5593_v23 }
 0x3f4   :  { %8479 = vmatprep.subr.mxu0 %v19640_v35  ;;  %14028 = vmatmul.mubr.msk.f32.gmra.mxu0 %vm552_vm2, %v20218_v33  ;;  %v20390_v35 = vpop.f32.mrf.mxu1 }
 0x3f5   :  { %8391 = vmatpush1.msra.mxu1 %v19413_v32  ;;  %8165 = vmatprep.mubr.f32.mxu0 %v23648_v34  ;;  %23676 = vst [vmem:[#allocation83_spill] sm:$0xff] %v20390_v35 }
 0x3f6   :  { %8392 = vmatprep.subr.mxu1 %v19535_v9  ;;  %8258 = vmatprep.mubr.f32.mxu1 %v23648_v34  ;;  %v15001_v32 = vpop.f32.mrf.mxu0 }
 0x3f7   :  { %8393 = vmatpush1.msra.mxu1 %v19435_v62  ;;  %v15015_v33 = vpop.f32.mrf.mxu1  ;;  %v5803_v9 = vadd.f32 %v15001_v32, %v5697_v45  ;;  %v20404_v62 = vld [vmem:[%s22863_s13 + $0x10] sm:$0xff] }
 0x3f8   :  { %8394 = vmatprep.subr.mxu1 %v19577_v2  ;;  %14029 = vmatmul.mubr.msk.f32.gmra.mxu0 %vm552_vm2, %v20234_v24  ;;  %v20406_v2 = vpop.f32.mrf.mxu0 }
 0x3f9   :  { %14031 = vmatmul.mubr.msk.f32.gmra.mxu1 %vm552_vm2, %v20388_v28  ;;  %8341 = vmatprep.mubr.f32.mxu0 %v23648_v34  ;;  %23677 = vst [vmem:[#allocation115_spill] sm:$0xff] %v20406_v2  ;;  %v20408_v24 = vpop.f32.mrf.mxu1  ;;  %v5909_v54 = vadd.f32 %v15015_v33, %v5803_v9  ;;  %v20575_v9 = vld [vmem:[%s22864_s2 + $0x50] sm:$0xff] }
 0x3fa   :  { %8395 = vmatpush1.msra.mxu1 %v23650_v48  ;;  %8264 = vmatprep.mubr.f32.mxu1 %v23648_v34  ;;  %23678 = vst [vmem:[#allocation86_spill] sm:$0xff] %v20408_v24  ;;  %v20422_v48 = vld [vmem:[%s22863_s13 + $0x18] sm:$0xff] }
 0x3fb   :  { %8396 = vmatprep.subr.mxu1 %v19594_v47 }
 0x3fc   :  { %8397 = vmatpush1.msra.mxu1 %v23653_v14  ;;  %14034 = vmatmul.mubr.msk.f32.vlgmr.msra.gmra.mxu0 %vm552_vm2, %v20366_v30  ;;  %v15004_v47 = vpop.f32.mrf.mxu0 }
 0x3fd   :  { %8568 = vmatprep.subr.mxu1 %v19757_v43  ;;  %14032 = vmatmul.mubr.msk.f32.gmra.mxu1 %vm552_vm2, %v20404_v62  ;;  %v15018_v21 = vpop.f32.mrf.mxu1  ;;  %v5805_v14 = vadd.f32 %v15004_v47, %v5699_v41  ;;  %v20565_v41 = vld [vmem:[%s22864_s2 + $0x58] sm:$0xff] }
 0x3fe   :  { %8480 = vmatpush1.msra.mxu0 %v23654_v25  ;;  %8270 = vmatprep.mubr.f32.mxu1 %v23648_v34  ;;  %v20427_v43 = vpop.f32.mrf.mxu0 }
 0x3ff   :  { %8481 = vmatprep.subr.mxu0 %v19652_v57  ;;  %8347 = vmatprep.mubr.f32.mxu0 %v23648_v34  ;;  %23679 = vst [vmem:[#allocation118_spill] sm:$0xff] %v20427_v43  ;;  %v20429_v59 = vpop.f32.mrf.mxu1  ;;  %v5911_v25 = vadd.f32 %v15018_v21, %v5805_v14  ;;  %v20589_v21 = vld [vmem:[%s22864_s2 + $0x48] sm:$0xff] }
 0x400   :  { %8482 = vmatpush1.msra.mxu0 %v23655_v15  ;;  %23680 = vst [vmem:[#allocation141_spill] sm:$0xff] %v20429_v59 }
 0x401   :  { %8483 = vmatprep.subr.mxu0 %v19697_v61  ;;  %14033 = vmatmul.mubr.msk.f32.gmra.mxu1 %vm552_vm2, %v20422_v48 }
 0x402   :  { %14035 = vmatmul.mubr.msk.f32.gmra.mxu0 %vm552_vm2, %v20388_v28  ;;  %8430 = vmatprep.mubr.f32.mxu1 %v23648_v34 }
 0x403   :  { %8484 = vmatpush1.msra.mxu0 %v23656_v6  ;;  %8353 = vmatprep.mubr.f32.mxu0 %v23648_v34  ;;  %v15029_v57 = vpop.f32.mrf.mxu0  ;;  %v15043_v15 = vpop.f32.mrf.mxu1 }
 0x404   :  { %8485 = vmatprep.subr.mxu0 %v19707_v49  ;;  %v6015_v61 = vadd.f32 %v15029_v57, %v5909_v54 }
 0x405   :  { %8486 = vmatpush1.msra.mxu0 %v23657_v31  ;;  %14038 = vmatmul.mubr.msk.f32.vlgmr.msra.gmra.mxu1 %vm552_vm2, %v20366_v30  ;;  %v20446_v11 = vpop.f32.mrf.mxu0  ;;  %v20448_v6 = vpop.f32.mrf.mxu1 }
 0x406   :  { %8657 = vmatprep.subr.mxu0 %v19862_v50  ;;  %14036 = vmatmul.mubr.msk.f32.gmra.mxu0 %vm552_vm2, %v20404_v62  ;;  %23681 = vst [vmem:[#allocation143_spill] sm:$0xff] %v20446_v11  ;;  %23682 = vst [vmem:[#allocation78_spill] sm:$0xff] %v20448_v6  ;;  %v6121_v49 = vadd.f32 %v15043_v15, %v6015_v61  ;;  %v20608_v61 = vld [vmem:[%s22864_s2 + $0x38] sm:$0xff] }
 0x407   :  { %8569 = vmatpush1.msra.mxu1 %v23658_v12  ;;  %8359 = vmatprep.mubr.f32.mxu0 %v23648_v34 }
 0x408   :  { %8570 = vmatprep.subr.mxu1 %v19772_v29  ;;  %8436 = vmatprep.mubr.f32.mxu1 %v23648_v34 }
 0x409   :  { %8571 = vmatpush1.msra.mxu1 %v23659_v27  ;;  %v15032_v50 = vpop.f32.mrf.mxu0  ;;  %v15046_v31 = vpop.f32.mrf.mxu1 }
 0x40a   :  { %8572 = vmatprep.subr.mxu1 %v19810_v1  ;;  %14037 = vmatmul.mubr.msk.f32.gmra.mxu0 %vm552_vm2, %v20422_v48  ;;  %v6017_v12 = vadd.f32 %v15032_v50, %v5911_v25  ;;  %v20598_v25 = vld [vmem:[%s22864_s2 + $0x40] sm:$0xff] }
 0x40b   :  { %14039 = vmatmul.mubr.msk.f32.gmra.mxu1 %vm552_vm2, %v20388_v28  ;;  %8519 = vmatprep.mubr.f32.mxu0 %v23648_v34  ;;  %v20463_v29 = vpop.f32.mrf.mxu0  ;;  %v20465_v27 = vpop.f32.mrf.mxu1 }
 0x40c   :  { %8573 = vmatpush1.msra.mxu1 %v23660_v38  ;;  %8442 = vmatprep.mubr.f32.mxu1 %v23648_v34  ;;  %23683 = vst [vmem:[#allocation120_spill] sm:$0xff] %v20463_v29  ;;  %23684 = vst [vmem:[#allocation84_spill] sm:$0xff] %v20465_v27  ;;  %v6123_v1 = vadd.f32 %v15046_v31, %v6017_v12  ;;  %v20621_v12 = vld [vmem:[%s22864_s2 + $0x30] sm:$0xff] }
 0x40d   :  { %8574 = vmatprep.subr.mxu1 %v19825_v4 }
 0x40e   :  { %8575 = vmatpush1.msra.mxu1 %v23661_v17  ;;  %14042 = vmatmul.mubr.msk.f32.vlgmr.msra.gmra.mxu0 %vm552_vm2, %v20366_v30 }
 0x40f   :  { %8746 = vmatprep.subr.mxu1 %v19956_v42  ;;  %14040 = vmatmul.mubr.msk.f32.gmra.mxu1 %vm552_vm2, %v20404_v62  ;;  %v15057_v38 = vpop.f32.mrf.mxu0  ;;  %v15071_v13 = vpop.f32.mrf.mxu1 }
 0x410   :  { %8658 = vmatpush1.msra.mxu0 %v23662_v18  ;;  %8448 = vmatprep.mubr.f32.mxu1 %v23648_v34  ;;  %v6227_v4 = vadd.f32 %v15057_v38, %v6121_v49  ;;  %v20630_v38 = vld [vmem:[%s22864_s2 + $0x28] sm:$0xff] }
 0x411   :  { %8659 = vmatprep.subr.mxu0 %v19872_v52  ;;  %8525 = vmatprep.mubr.f32.mxu0 %v23648_v34  ;;  %v20479_v17 = vpop.f32.mrf.mxu0  ;;  %v20481_v26 = vpop.f32.mrf.mxu1 }
 0x412   :  { %8660 = vmatpush1.msra.mxu0 %v19769_v63  ;;  %23685 = vst [vmem:[#allocation126_spill] sm:$0xff] %v20479_v17  ;;  %23686 = vst [vmem:[#allocation76_spill] sm:$0xff] %v20481_v26  ;;  %v6333_v42 = vadd.f32 %v15071_v13, %v6227_v4 }
 0x413   :  { %8661 = vmatprep.subr.mxu0 %v19912_v39  ;;  %14041 = vmatmul.mubr.msk.f32.gmra.mxu1 %vm552_vm2, %v20422_v48  ;;  %v20496_v39 = vld [vmem:[%s22864_s2 + $0x78] sm:$0xff] }
 0x414   :  { %8662 = vmatpush1.msra.mxu0 %v19807_v44  ;;  %8608 = vmatprep.mubr.f32.mxu1 %v23648_v34 }
 0x415   :  { %8663 = vmatprep.subr.mxu0 %v19925_v3  ;;  %14043 = vmatmul.mubr.msk.f32.gmra.mxu0 %vm552_vm2, %v20388_v28  ;;  %v15060_v63 = vpop.f32.mrf.mxu0  ;;  %v15074_v52 = vpop.f32.mrf.mxu1 }
 0x416   :  { %8664 = vmatpush1.msra.mxu0 %v19822_v56  ;;  %8531 = vmatprep.mubr.f32.mxu0 %v23648_v34  ;;  %v6229_v44 = vadd.f32 %v15060_v63, %v6123_v1 }
 0x417   :  { %14046 = vmatmul.mubr.msk.f32.vlgmr.msra.gmra.mxu1 %vm552_vm2, %v20366_v30  ;;  %15145 = vmatprep.subr.mxu0 %v20496_v39  ;;  %v20502_v3 = vpop.f32.mrf.mxu0  ;;  %v20504_v56 = vpop.f32.mrf.mxu1 }
 0x418   :  { %8747 = vmatpush1.msra.mxu1 %v19845_v55  ;;  %23687 = vst [vmem:[#allocation116_spill] sm:$0xff] %v20502_v3  ;;  %23688 = vst [vmem:[#allocation169_spill] sm:$0xff] %v20504_v56  ;;  %8614 = vmatprep.mubr.f32.mxu1 %v23648_v34  ;;  %v6335_v18 = vadd.f32 %v15074_v52, %v6229_v44 }
 0x419   :  { %8748 = vmatprep.subr.mxu1 %v19965_v53  ;;  %14044 = vmatmul.mubr.msk.f32.gmra.mxu0 %vm552_vm2, %v20404_v62 }
 0x41a   :  { %8749 = vmatpush1.msra.mxu1 %v19877_v8  ;;  %8537 = vmatprep.mubr.f32.mxu0 %v23648_v34 }
 0x41b   :  { %8750 = vmatprep.subr.mxu1 %v19989_v46  ;;  %14047 = vmatmul.mubr.msk.f32.gmra.mxu1 %vm552_vm2, %v20388_v28  ;;  %v15085_v55 = vpop.f32.mrf.mxu0 }
 0x41c   :  { %8751 = vmatpush1.msra.mxu1 %v19915_v16  ;;  %v15099_v0 = vpop.f32.mrf.mxu1  ;;  %8620 = vmatprep.mubr.f32.mxu1 %v23648_v34  ;;  %v6439_v53 = vadd.f32 %v15085_v55, %v6333_v42  ;;  %v20532_v16 = vld [vmem:[%s22864_s2 + $0x70] sm:$0xff]  ;;  %v20641_v42 = vld [vmem:[%s22864_s2 + $0x20] sm:$0xff] }
 0x41d   :  { %8752 = vmatprep.subr.mxu1 %v19996_v22  ;;  %14045 = vmatmul.mubr.msk.f32.gmra.mxu0 %vm552_vm2, %v20422_v48  ;;  %v20521_v8 = vpop.f32.mrf.mxu0  ;;  %v20665_v55 = vld [vmem:[%s22864_s2 + $0x10] sm:$0xff] }
 0x41e   :  { %8753 = vmatpush1.msra.mxu1 %v19928_v58  ;;  %23689 = vst [vmem:[#allocation168_spill] sm:$0xff] %v20521_v8  ;;  %v20523_v46 = vpop.f32.mrf.mxu1  ;;  %8697 = vmatprep.mubr.f32.mxu0 %v23648_v34  ;;  %v6545_v36 = vadd.f32 %v15099_v0, %v6439_v53 }
 0x41f   :  { %23690 = vst [vmem:[#allocation6_spill] sm:$0xff] %v20523_v46  ;;  %14048 = vmatmul.mubr.msk.f32.gmra.mxu1 %vm552_vm2, %v20404_v62  ;;  %15183 = vmatprep.subr.mxu1 %v20496_v39 }
 0x420   :  { %8626 = vmatprep.mubr.f32.mxu1 %v23648_v34 }
 0x421   :  { %14050 = vmatmul.mubr.msk.f32.vlgmr.msra.gmra.mxu0 %vm552_vm2, %v20366_v30 }
 0x422   :  { %v15088_v58 = vpop.f32.mrf.mxu0  ;;  %v15102_v22 = vpop.f32.mrf.mxu1  ;;  %15146 = vmatpush3.msra.mxu0 %v20496_v39  ;;  %8703 = vmatprep.mubr.f32.mxu0 %v23648_v34 }
 0x423   :  { %v6441_v20 = vadd.f32 %v15088_v58, %v6335_v18  ;;  %15147 = vmatprep.subr.mxu0 %v20532_v16  ;;  %14049 = vmatmul.mubr.msk.f32.gmra.mxu1 %vm552_vm2, %v20422_v48  ;;  %v20656_v18 = vld [vmem:[%s22864_s2 + $0x18] sm:$0xff] }
 0x424   :  { %v20547_v45 = vpop.f32.mrf.mxu0  ;;  %v20549_v37 = vpop.f32.mrf.mxu1  ;;  %15148 = vmatpush3.msra.mxu0 %v20532_v16  ;;  %8786 = vmatprep.mubr.f32.mxu1 %v23648_v34 }
 0x425   :  { %23691 = vst [vmem:[#allocation195_spill] sm:$0xff] %v20547_v45  ;;  %23692 = vst [vmem:[#allocation197_spill] sm:$0xff] %v20549_v37  ;;  %v6547_v23 = vadd.f32 %v15102_v22, %v6441_v20  ;;  %15149 = vmatprep.subr.mxu0 %v20541_v19  ;;  %14051 = vmatmul.mubr.msk.f32.gmra.mxu0 %vm552_vm2, %v20388_v28  ;;  %v20689_v20 = vld [vmem:[%s22864_s2] sm:$0xff] }
 0x426   :  { %15150 = vmatpush3.msra.mxu0 %v20541_v19  ;;  %8709 = vmatprep.mubr.f32.mxu0 %v23648_v34 }
 0x427   :  { %15151 = vmatprep.subr.mxu0 %v20555_v60  ;;  %14054 = vmatmul.mubr.msk.f32.vlgmr.msra.gmra.mxu1 %vm552_vm2, %v20366_v30 }
 0x428   :  { %v15113_v32 = vpop.f32.mrf.mxu0  ;;  %v15127_v33 = vpop.f32.mrf.mxu1  ;;  %15152 = vmatpush3.msra.mxu0 %v20555_v60  ;;  %15184 = vmatpush3.msra.mxu1 %v20496_v39 }
 0x429   :  { %v6651_v54 = vadd.f32 %v15113_v32, %v6545_v36  ;;  %15153 = vmatprep.subr.mxu0 %v20565_v41  ;;  %14052 = vmatmul.mubr.msk.f32.gmra.mxu0 %vm552_vm2, %v20404_v62  ;;  %v20676_v36 = vld [vmem:[%s22864_s2 + $0x8] sm:$0xff] }
 0x42a   :  { %v20581_v47 = vpop.f32.mrf.mxu0  ;;  %v20583_v30 = vpop.f32.mrf.mxu1  ;;  %15154 = vmatpush3.msra.mxu0 %v20565_v41  ;;  %8715 = vmatprep.mubr.f32.mxu0 %v23648_v34 }
 0x42b   :  { %23693 = vst [vmem:[#allocation199_spill] sm:$0xff] %v20581_v47  ;;  %23694 = vst [vmem:[#allocation113_spill] sm:$0xff] %v20583_v30  ;;  %v6757_v14 = vadd.f32 %v15127_v33, %v6651_v54  ;;  %15155 = vmatprep.subr.mxu0 %v20575_v9  ;;  %15185 = vmatprep.subr.mxu1 %v20532_v16 }
 0x42c   :  { %15156 = vmatpush3.msra.mxu0 %v20575_v9  ;;  %15186 = vmatpush3.msra.mxu1 %v20532_v16 }
 0x42d   :  { %15157 = vmatprep.subr.mxu0 %v20589_v21  ;;  %14053 = vmatmul.mubr.msk.f32.gmra.mxu0 %vm552_vm2, %v20422_v48 }
 0x42e   :  { %v15116_v57 = vpop.f32.mrf.mxu0  ;;  %v15130_v15 = vpop.f32.mrf.mxu1  ;;  %15158 = vmatpush3.msra.mxu0 %v20589_v21  ;;  %15187 = vmatprep.subr.mxu1 %v20541_v19 }
 0x42f   :  { %v6653_v49 = vadd.f32 %v15116_v57, %v6547_v23  ;;  %15159 = vmatprep.subr.mxu0 %v20598_v25  ;;  %15188 = vmatpush3.msra.mxu1 %v20541_v19 }
 0x430   :  { %v20613_v50 = vpop.f32.mrf.mxu0  ;;  %v20615_v31 = vpop.f32.mrf.mxu1  ;;  %15160 = vmatpush3.msra.mxu0 %v20598_v25  ;;  %15189 = vmatprep.subr.mxu1 %v20555_v60 }
 0x431   :  { %23695 = vst [vmem:[#allocation158_spill] sm:$0xff] %v20613_v50  ;;  %23696 = vst [vmem:[#allocation192_spill] sm:$0xff] %v20615_v31  ;;  %v6759_v1 = vadd.f32 %v15130_v15, %v6653_v49  ;;  %15161 = vmatprep.subr.mxu0 %v20608_v61  ;;  %15190 = vmatpush3.msra.mxu1 %v20555_v60 }
 0x432   :  { %15162 = vmatpush3.msra.mxu0 %v20608_v61  ;;  %15191 = vmatprep.subr.mxu1 %v20565_v41 }
 0x433   :  { %15163 = vmatprep.subr.mxu0 %v20621_v12  ;;  %15192 = vmatpush3.msra.mxu1 %v20565_v41 }
 0x434   :  { %v15141_v13 = vpop.f32.mrf.mxu0  ;;  %v20635_v4 = vpop.f32.mrf.mxu1  ;;  %15164 = vmatpush3.msra.mxu0 %v20621_v12  ;;  %15193 = vmatprep.subr.mxu1 %v20575_v9 }
 0x435   :  { %23697 = vst [vmem:[#allocation234_spill] sm:$0xff] %v20635_v4  ;;  %v20644_v63 = vadd.f32 %v15141_v13, %v6757_v14  ;;  %15165 = vmatprep.subr.mxu0 %v20630_v38  ;;  %15194 = vmatpush3.msra.mxu1 %v20575_v9 }
 0x436   :  { %v20648_v52 = vpop.f32.mrf.mxu0  ;;  %v20650_v44 = vpop.f32.mrf.mxu1  ;;  %15166 = vmatpush3.msra.mxu0 %v20630_v38  ;;  %15195 = vmatprep.subr.mxu1 %v20589_v21 }
 0x437   :  { %23698 = vst [vmem:[#allocation157_spill] sm:$0xff] %v20644_v63  ;;  %23699 = vst [vmem:[#allocation194_spill] sm:$0xff] %v20648_v52  ;;  %15167 = vmatprep.subr.mxu0 %v20641_v42  ;;  %15196 = vmatpush3.msra.mxu1 %v20589_v21 }
 0x438   :  { %23700 = vst [vmem:[#allocation177_spill] sm:$0xff] %v20650_v44  ;;  %15168 = vmatpush3.msra.mxu0 %v20641_v42  ;;  %15197 = vmatprep.subr.mxu1 %v20598_v25 }
 0x439   :  { %15169 = vmatprep.subr.mxu0 %v20656_v18  ;;  %15198 = vmatpush3.msra.mxu1 %v20598_v25 }
 0x43a   :  { %v15144_v0 = vpop.f32.mrf.mxu0  ;;  %v20670_v53 = vpop.f32.mrf.mxu1  ;;  %15170 = vmatpush3.msra.mxu0 %v20656_v18  ;;  %15199 = vmatprep.subr.mxu1 %v20608_v61 }
 0x43b   :  { %23701 = vst [vmem:[#allocation233_spill] sm:$0xff] %v20670_v53  ;;  %v20679_v58 = vadd.f32 %v15144_v0, %v6759_v1  ;;  %15171 = vmatprep.subr.mxu0 %v20665_v55  ;;  %15200 = vmatpush3.msra.mxu1 %v20608_v61 }
 0x43c   :  { %v20683_v22 = vpop.f32.mrf.mxu1  ;;  %15172 = vmatpush3.msra.mxu0 %v20665_v55  ;;  %8792 = vmatprep.mubr.f32.mxu1 %v23648_v34  ;;  %v20694_v23 = vpop.f32.mrf.mxu0 }
 0x43d   :  { %23702 = vst [vmem:[#allocation102_spill] sm:$0xff] %v20679_v58  ;;  %23703 = vst [vmem:[#allocation147_spill] sm:$0xff] %v20683_v22  ;;  %15173 = vmatprep.subr.mxu0 %v20676_v36  ;;  %15201 = vmatprep.subr.mxu1 %v20621_v12 }
 0x43e   :  { %23704 = vst [vmem:[#allocation174_spill] sm:$0xff] %v20694_v23  ;;  %15174 = vmatpush3.msra.mxu0 %v20676_v36  ;;  %14055 = vmatmul.mubr.msk.f32.gmra.mxu1 %vm552_vm2, %v20388_v28 }
 0x43f   :  { %15175 = vmatprep.subr.mxu0 %v20689_v20  ;;  %15202 = vmatpush3.msra.mxu1 %v20621_v12 }
 0x440   :  { %v20701_v32 = vpop.f32.mrf.mxu1  ;;  %v20703_v33 = vpop.f32.mrf.mxu0  ;;  %15176 = vmatpush3.msra.mxu0 %v20689_v20  ;;  %15203 = vmatprep.subr.mxu1 %v20630_v38 }
 0x441   :  { %23705 = vst [vmem:[#allocation191_spill] sm:$0xff] %v20701_v32  ;;  %23706 = vst [vmem:[#allocation200_spill] sm:$0xff] %v20703_v33  ;;  %15221 = vmatprep.subr.mxu0 %v20496_v39  ;;  %15204 = vmatpush3.msra.mxu1 %v20630_v38 }
 0x442   :  { %v20709_v54 = vpop.f32.mrf.mxu1  ;;  %v20711_v14 = vpop.f32.mrf.mxu0  ;;  %8798 = vmatprep.mubr.f32.mxu1 %v23648_v34  ;;  %15205 = vmatprep.subr.mxu1 %v20641_v42 }
 0x443   :  { %23707 = vst [vmem:[#allocation176_spill] sm:$0xff] %v20709_v54  ;;  %23708 = vst [vmem:[#allocation213_spill] sm:$0xff] %v20711_v14  ;;  %14056 = vmatmul.mubr.msk.f32.gmra.mxu1 %vm552_vm2, %v20404_v62 }
 0x444   :  { %v20717_v28 = vpop.f32.mrf.mxu1  ;;  %15206 = vmatpush3.msra.mxu1 %v20641_v42  ;;  %8804 = vmatprep.mubr.f32.mxu1 %v23648_v34 }
 0x445   :  { %23709 = vst [vmem:[#allocation67_spill] sm:$0xff] %v20717_v28  ;;  %v20721_v57 = vpop.f32.mrf.mxu0  ;;  %15207 = vmatprep.subr.mxu1 %v20656_v18 }
 0x446   :  { %23710 = vst [vmem:[#allocation198_spill] sm:$0xff] %v20721_v57  ;;  %v20724_v15 = vpop.f32.mrf.mxu1  ;;  %15208 = vmatpush3.msra.mxu1 %v20656_v18 }
 0x447   :  { %23711 = vst [vmem:[#allocation87_spill] sm:$0xff] %v20724_v15  ;;  %v20727_v49 = vpop.f32.mrf.mxu0  ;;  %15209 = vmatprep.subr.mxu1 %v20665_v55  ;;  %14057 = vmatmul.mubr.msk.f32.gmra.mxu1 %vm552_vm2, %v20422_v48 }
 0x448   :  { %23712 = vst [vmem:[#allocation129_spill] sm:$0xff] %v20727_v49  ;;  %v20732_v62 = vpop.f32.mrf.mxu1  ;;  %15210 = vmatpush3.msra.mxu1 %v20665_v55 }
 0x449   :  { %23713 = vst [vmem:[#allocation156_spill] sm:$0xff] %v20732_v62  ;;  %v20735_v1 = vpop.f32.mrf.mxu0  ;;  %15211 = vmatprep.subr.mxu1 %v20676_v36 }
 0x44a   :  { %23714 = vst [vmem:[#allocation172_spill] sm:$0xff] %v20735_v1  ;;  %v20738_v13 = vpop.f32.mrf.mxu1  ;;  %15212 = vmatpush3.msra.mxu1 %v20676_v36 }
 0x44b   :  { %23715 = vst [vmem:[#allocation209_spill] sm:$0xff] %v20738_v13  ;;  %v20741_v0 = vpop.f32.mrf.mxu0  ;;  %15213 = vmatprep.subr.mxu1 %v20689_v20 }
 0x44c   :  { %23716 = vst [vmem:[#allocation149_spill] sm:$0xff] %v20741_v0  ;;  %15214 = vmatpush3.msra.mxu1 %v20689_v20 }
 0x44d   :  { %v20745_v58 = vpop.f32.mrf.mxu1  ;;  %v20747_v48 = vpop.f32.mrf.mxu0  ;;  %15259 = vmatprep.subr.mxu1 %v20496_v39 }
 0x44e   :  { %23717 = vst [vmem:[#allocation150_spill] sm:$0xff] %v20745_v58  ;;  %23718 = vst [vmem:[#allocation170_spill] sm:$0xff] %v20747_v48 }
 0x44f   :  { %v20750_v23 = vpop.f32.mrf.mxu1  ;;  %v20752_v31 = vpop.f32.mrf.mxu0 }
 0x450   :  { %23719 = vst [vmem:[#allocation196_spill] sm:$0xff] %v20750_v23  ;;  %23720 = vst [vmem:[#allocation85_spill] sm:$0xff] %v20752_v31 }
 0x451   :  { %v20754_v63 = vpop.f32.mrf.mxu1 }
 0x452   :  { %23721 = vst [vmem:[#allocation193_spill] sm:$0xff] %v20754_v63  ;;  %v20756_v52 = vpop.f32.mrf.mxu0 }
 0x453   :  { %23722 = vst [vmem:[#allocation205_spill] sm:$0xff] %v20756_v52  ;;  %v20758_v50 = vpop.f32.mrf.mxu1 }
 0x454   :  { %23723 = vst [vmem:[#allocation81_spill] sm:$0xff] %v20758_v50  ;;  %v20760_v30 = vpop.f32.mrf.mxu0 }
 0x455   :  { %23724 = vst [vmem:[#allocation123_spill] sm:$0xff] %v20760_v30  ;;  %v20762_v37 = vpop.f32.mrf.mxu1 }
 0x456   :  { %23725 = vst [vmem:[#allocation82_spill] sm:$0xff] %v20762_v37  ;;  %v20764_v47 = vpop.f32.mrf.mxu0 }
 0x457   :  { %23726 = vst [vmem:[#allocation178_spill] sm:$0xff] %v20764_v47  ;;  %v20766_v45 = vpop.f32.mrf.mxu1 }
 0x458   :  { %23727 = vst [vmem:[#allocation95_spill] sm:$0xff] %v20766_v45  ;;  %v20768_v46 = vpop.f32.mrf.mxu0 }
 0x459   :  { %23728 = vst [vmem:[#allocation127_spill] sm:$0xff] %v20768_v46  ;;  %v20770_v56 = vpop.f32.mrf.mxu1 }
 0x45a   :  { %23729 = vst [vmem:[#allocation201_spill] sm:$0xff] %v20770_v56  ;;  %v20772_v8 = vpop.f32.mrf.mxu0 }
 0x45b   :  { %23730 = vst [vmem:[#allocation148_spill] sm:$0xff] %v20772_v8  ;;  %v20774_v3 = vpop.f32.mrf.mxu1 }
 0x45c   :  { %23731 = vst [vmem:[#allocation175_spill] sm:$0xff] %v20774_v3  ;;  %v20776_v26 = vpop.f32.mrf.mxu0 }
 0x45d   :  { %23732 = vst [vmem:[#allocation215_spill] sm:$0xff] %v20776_v26 }
 0x45e   :  { %v20778_v27 = vpop.f32.mrf.mxu0 }
 0x45f   :  { %23733 = vst [vmem:[#allocation214_spill] sm:$0xff] %v20778_v27  ;;  %v20780_v17 = vpop.f32.mrf.mxu1 }
 0x460   :  { %23734 = vst [vmem:[#allocation146_spill] sm:$0xff] %v20780_v17  ;;  %v20782_v29 = vpop.f32.mrf.mxu0 }
 0x461   :  { %23735 = vst [vmem:[#allocation79_spill] sm:$0xff] %v20782_v29  ;;  %v20784_v6 = vpop.f32.mrf.mxu1 }
 0x462   :  { %23736 = vst [vmem:[#allocation211_spill] sm:$0xff] %v20784_v6  ;;  %v20786_v59 = vpop.f32.mrf.mxu0 }
 0x463   :  { %23737 = vst [vmem:[#allocation98_spill] sm:$0xff] %v20786_v59  ;;  %v20788_v11 = vpop.f32.mrf.mxu1 }
 0x464   :  { %23738 = vst [vmem:[#allocation130_spill] sm:$0xff] %v20788_v11  ;;  %v20790_v43 = vpop.f32.mrf.mxu0 }
 0x465   :  { %23739 = vst [vmem:[#allocation159_spill] sm:$0xff] %v20790_v43  ;;  %v20792_v24 = vpop.f32.mrf.mxu1 }
 0x466   :  { %23740 = vst [vmem:[#allocation173_spill] sm:$0xff] %v20792_v24 }
 0x467   :  { %v20794_v35 = vpop.f32.mrf.mxu1 }
 0x468   :  { %23741 = vst [vmem:[#allocation210_spill] sm:$0xff] %v20794_v35  ;;  %v20796_v2 = vpop.f32.mrf.mxu0 }
 0x469   :  { %23742 = vst [vmem:[#allocation128_spill] sm:$0xff] %v20796_v2  ;;  %v20798_v7 = vpop.f32.mrf.mxu1 }
 0x46a   :  { %23743 = vst [vmem:[#allocation171_spill] sm:$0xff] %v20798_v7  ;;  %v20800_v51 = vpop.f32.mrf.mxu0 }
 0x46b   :  { %23744 = vst [vmem:[#allocation207_spill] sm:$0xff] %v20800_v51  ;;  %v20802_v40 = vpop.f32.mrf.mxu1 }
 0x46c   :  { %23745 = vst [vmem:[#allocation89_spill] sm:$0xff] %v20802_v40  ;;  %v20804_v10 = vpop.f32.mrf.mxu0 }
 0x46d   :  { %23746 = vst [vmem:[#allocation121_spill] sm:$0xff] %v20804_v10  ;;  %v20806_v5 = vpop.f32.mrf.mxu1 }
 0x46e   :  { %23747 = vst [vmem:[#allocation125_spill] sm:$0xff] %v20806_v5  ;;  %v20808_v59 = vpop.f32.mrf.mxu0 }
 0x46f   :  { %23748 = vst [vmem:[#allocation163_spill] sm:$0xff] %v20808_v59 }
 0x470   :  { %v20810_v56 = vpop.f32.mrf.mxu0 }
 0x471   :  { %23749 = vst [vmem:[#allocation203_spill] sm:$0xff] %v20810_v56  ;;  %v20812_v43 = vpop.f32.mrf.mxu1 }
 0x472   :  { %23750 = vst [vmem:[#allocation206_spill] sm:$0xff] %v20812_v43  ;;  %v20814_v24 = vpop.f32.mrf.mxu0 }
 0x473   :  { %23751 = vst [vmem:[#allocation92_spill] sm:$0xff] %v20814_v24  ;;  %v20816_v3 = vpop.f32.mrf.mxu1 }
 0x474   :  { %23752 = vst [vmem:[#allocation124_spill] sm:$0xff] %v20816_v3  ;;  %v20818_v2 = vpop.f32.mrf.mxu0 }
 0x475   :  { %v20820_v7 = vpop.f32.mrf.mxu1 }
 0x476   :  { %23753 = vst [vmem:[#allocation162_spill] sm:$0xff] %v20820_v7  ;;  %v20822_v51 = vpop.f32.mrf.mxu0 }
 0x477   :  { %v20824_v40 = vpop.f32.mrf.mxu1 }
 0x478   :  { %23754 = vst [vmem:[#allocation90_spill] sm:$0xff] %v20824_v40 }
 0x479   :  { %v20826_v10 = vpop.f32.mrf.mxu1 }
 0x47a   :  { %23755 = vst [vmem:[#allocation132_spill] sm:$0xff] %v20826_v10  ;;  %v20828_v5 = vpop.f32.mrf.mxu0 }
 0x47b   :  { %v20830_v59 = vpop.f32.mrf.mxu1 }
 0x47c   :  { %23756 = vst [vmem:[#allocation185_spill] sm:$0xff] %v20830_v59  ;;  %v20832_v56 = vpop.f32.mrf.mxu0 }
 0x47d   :  { %v20834_v43 = vpop.f32.mrf.mxu1 }
 0x47e   :  { %v20836_v24 = vpop.f32.mrf.mxu0 }
 0x47f   :  { %v20838_v3 = vpop.f32.mrf.mxu1 }
 0x480   :  { %v20840_v17 = vpop.f32.mrf.mxu0 }
 0x482   :  { %v20842_v7 = vpop.f32.mrf.mxu0 }
 0x483   :  { %v20844_v6 = vpop.f32.mrf.mxu1 }
 0x484   :  { %v20846_v40 = vpop.f32.mrf.mxu0 }
 0x485   :  { %v20848_v10 = vpop.f32.mrf.mxu1 }
 0x486   :  { %v20850_v11 = vpop.f32.mrf.mxu0 }
 0x487   :  { %v20852_v59 = vpop.f32.mrf.mxu1 }
 0x488   :  { %v20854_v35 = vpop.f32.mrf.mxu0 }
 0x489   :  { %v20856_v26 = vpop.f32.mrf.mxu1 }
 0x48b   :  { %v20858_v52 = vpop.f32.mrf.mxu1 }
 0x48c   :  { %v20860_v29 = vpop.f32.mrf.mxu0 }
 0x48d   :  { %v20862_v30 = vpop.f32.mrf.mxu1 }
 0x48e   :  { %v20864_v47 = vpop.f32.mrf.mxu0 }
 0x48f   :  { %v20866_v46 = vpop.f32.mrf.mxu1 }
 0x490   :  { %v20868_v8 = vpop.f32.mrf.mxu0 }
 0x491   :  { %v20870_v27 = vpop.f32.mrf.mxu1 }
 0x492   :  { %v20872_v4 = vpop.f32.mrf.mxu0 }
 0x494   :  { %v20876_v53 = vpop.f32.mrf.mxu0 }
 0x495   :  { %v20874_v44 = vpop.f32.mrf.mxu1 }
 0x496   :  { %v20882_v54 = vpop.f32.mrf.mxu0 }
 0x497   :  { %v20878_v22 = vpop.f32.mrf.mxu1 }
 0x498   :  { %23757 = vst [vmem:[#allocation202_spill] sm:$0xff] %v20878_v22  ;;  %v20888_v50 = vpop.f32.mrf.mxu0 }
 0x499   :  { %v20880_v32 = vpop.f32.mrf.mxu1  ;;  %23758 = vst [vmem:[#allocation131_spill] sm:$0xff] %v20888_v50  ;;  %v21161_v50 = vld [vmem:[%s22864_s2 + $0x78] sm:$0xff] }
 0x49a   :  { %v20894_v13 = vpop.f32.mrf.mxu0 }
 0x49b   :  { %v20884_v28 = vpop.f32.mrf.mxu1  ;;  %23761 = vst [vmem:[#allocation216_spill] sm:$0xff] %v20894_v13 }
 0x49d   :  { %v20886_v15 = vpop.f32.mrf.mxu1 }
 0x49e   :  { %v20898_v23 = vpop.f32.mrf.mxu0 }
 0x49f   :  { %v20890_v62 = vpop.f32.mrf.mxu1  ;;  %23763 = vst [vmem:[#allocation212_spill] sm:$0xff] %v20898_v23 }
 0x4a0   :  { %23759 = vst [vmem:[#allocation122_spill] sm:$0xff] %v20890_v62  ;;  %v20904_v33 = vpop.f32.mrf.mxu0 }
 0x4a1   :  { %v20892_v45 = vpop.f32.mrf.mxu1  ;;  %23766 = vst [vmem:[#allocation137_spill] sm:$0xff] %v20904_v33 }
 0x4a2   :  { %23760 = vst [vmem:[#allocation183_spill] sm:$0xff] %v20892_v45  ;;  %v20910_v57 = vpop.f32.mrf.mxu0 }
 0x4a3   :  { %v20896_v58 = vpop.f32.mrf.mxu1  ;;  %23769 = vst [vmem:[#allocation160_spill] sm:$0xff] %v20910_v57 }
 0x4a4   :  { %23762 = vst [vmem:[#allocation161_spill] sm:$0xff] %v20896_v58  ;;  %v20916_v49 = vpop.f32.mrf.mxu0 }
 0x4a5   :  { %23772 = vst [vmem:[#allocation152_spill] sm:$0xff] %v20916_v49 }
 0x4a7   :  { %v20900_v63 = vpop.f32.mrf.mxu1 }
 0x4a8   :  { %23764 = vst [vmem:[#allocation229_spill] sm:$0xff] %v20900_v63  ;;  %v20918_v63 = vpop.f32.mrf.mxu0 }
 0x4a9   :  { %v20902_v37 = vpop.f32.mrf.mxu1  ;;  %23773 = vst [vmem:[#allocation153_spill] sm:$0xff] %v20918_v63 }
 0x4aa   :  { %23765 = vst [vmem:[#allocation96_spill] sm:$0xff] %v20902_v37  ;;  %v20920_v33 = vpop.f32.mrf.mxu0 }
 0x4ab   :  { %v20906_v0 = vpop.f32.mrf.mxu1  ;;  %23774 = vst [vmem:[#allocation179_spill] sm:$0xff] %v20920_v33 }
 0x4ac   :  { %23767 = vst [vmem:[#allocation99_spill] sm:$0xff] %v20906_v0 }
 0x4ad   :  { %v20908_v14 = vpop.f32.mrf.mxu1 }
 0x4ae   :  { %23768 = vst [vmem:[#allocation139_spill] sm:$0xff] %v20908_v14 }
 0x4af   :  { %v20912_v31 = vpop.f32.mrf.mxu1 }
 0x4b0   :  { %23770 = vst [vmem:[#allocation181_spill] sm:$0xff] %v20912_v31 }
 0x4b1   :  { %v20914_v45 = vpop.f32.mrf.mxu1 }
 0x4b2   :  { %23771 = vst [vmem:[#allocation225_spill] sm:$0xff] %v20914_v45  ;;  %v20926_v45 = vpop.f32.mrf.mxu0 }
 0x4b3   :  { %v8254_v58 = vpop.f32.mrf.mxu1  ;;  %23775 = vst [vmem:[#allocation208_spill] sm:$0xff] %v20926_v45 }
 0x4b4   :  { %15177 = vmatprep.mubr.f32.mxu0 %v8254_v58  ;;  %v20932_v0 = vpop.f32.mrf.mxu0 }
 0x4b5   :  { %v8256_v1 = vpop.f32.mrf.mxu1  ;;  %23776 = vst [vmem:[#allocation97_spill] sm:$0xff] %v20932_v0 }
 0x4b9   :  { %v8260_v37 = vpop.f32.mrf.mxu1 }
 0x4ba   :  { %15178 = vmatmul.mubr.f32.vlgmr.msra.gmra.mxu0 %v8260_v37 }
 0x4bb   :  { %15222 = vmatpush3.msra.mxu0 %v20496_v39  ;;  %v8262_v14 = vpop.f32.mrf.mxu1 }
 0x4bc   :  { %15223 = vmatprep.subr.mxu0 %v20532_v16 }
 0x4bd   :  { %15224 = vmatpush3.msra.mxu0 %v20532_v16  ;;  %v8266_v31 = vpop.f32.mrf.mxu1 }
 0x4be   :  { %15225 = vmatprep.subr.mxu0 %v20541_v19  ;;  %15180 = vmatprep.mubr.f32.mxu0 %v8266_v31  ;;  %v20938_v31 = vpop.f32.mrf.mxu0 }
 0x4bf   :  { %15226 = vmatpush3.msra.mxu0 %v20541_v19  ;;  %v8268_v58 = vpop.f32.mrf.mxu1  ;;  %23777 = vst [vmem:[#allocation204_spill] sm:$0xff] %v20938_v31 }
 0x4c0   :  { %15227 = vmatprep.subr.mxu0 %v20555_v60 }
 0x4c1   :  { %15228 = vmatpush3.msra.mxu0 %v20555_v60  ;;  %v8272_v37 = vpop.f32.mrf.mxu1 }
 0x4c2   :  { %15229 = vmatprep.subr.mxu0 %v20565_v41  ;;  %15181 = vmatmul.mubr.f32.gmra.mxu0 %v8272_v37  ;;  %v20944_v37 = vpop.f32.mrf.mxu0 }
 0x4c3   :  { %15230 = vmatpush3.msra.mxu0 %v20565_v41  ;;  %15253 = vmatprep.mubr.f32.mxu0 %v8256_v1  ;;  %23778 = vst [vmem:[#allocation221_spill] sm:$0xff] %v20944_v37 }
 0x4c4   :  { %15231 = vmatprep.subr.mxu0 %v20575_v9  ;;  %v20950_v1 = vpop.f32.mrf.mxu0 }
 0x4c5   :  { %15232 = vmatpush3.msra.mxu0 %v20575_v9  ;;  %23779 = vst [vmem:[#allocation93_spill] sm:$0xff] %v20950_v1  ;;  %v8274_v1 = vpop.f32.mrf.mxu1 }
 0x4c6   :  { %15233 = vmatprep.subr.mxu0 %v20589_v21  ;;  %v20956_v0 = vpop.f32.mrf.mxu0 }
 0x4c7   :  { %15234 = vmatpush3.msra.mxu0 %v20589_v21  ;;  %23780 = vst [vmem:[#allocation135_spill] sm:$0xff] %v20956_v0 }
 0x4c8   :  { %15235 = vmatprep.subr.mxu0 %v20598_v25  ;;  %v20962_v37 = vpop.f32.mrf.mxu0 }
 0x4c9   :  { %15236 = vmatpush3.msra.mxu0 %v20598_v25  ;;  %23781 = vst [vmem:[#allocation94_spill] sm:$0xff] %v20962_v37 }
 0x4ca   :  { %15237 = vmatprep.subr.mxu0 %v20608_v61  ;;  %v20968_v0 = vpop.f32.mrf.mxu0 }
 0x4cb   :  { %15238 = vmatpush3.msra.mxu0 %v20608_v61  ;;  %23782 = vst [vmem:[#allocation186_spill] sm:$0xff] %v20968_v0 }
 0x4cc   :  { %15239 = vmatprep.subr.mxu0 %v20621_v12  ;;  %v8343_v37 = vpop.f32.mrf.mxu0 }
 0x4cd   :  { %15240 = vmatpush3.msra.mxu0 %v20621_v12 }
 0x4ce   :  { %15241 = vmatprep.subr.mxu0 %v20630_v38 }
 0x4cf   :  { %15242 = vmatpush3.msra.mxu0 %v20630_v38 }
 0x4d0   :  { %15243 = vmatprep.subr.mxu0 %v20641_v42 }
 0x4d1   :  { %15244 = vmatpush3.msra.mxu0 %v20641_v42 }
 0x4d2   :  { %15245 = vmatprep.subr.mxu0 %v20656_v18 }
 0x4d3   :  { %15246 = vmatpush3.msra.mxu0 %v20656_v18 }
 0x4d4   :  { %15247 = vmatprep.subr.mxu0 %v20665_v55 }
 0x4d5   :  { %15248 = vmatpush3.msra.mxu0 %v20665_v55 }
 0x4d6   :  { %15249 = vmatprep.subr.mxu0 %v20676_v36 }
 0x4d7   :  { %15250 = vmatpush3.msra.mxu0 %v20676_v36 }
 0x4d8   :  { %15251 = vmatprep.subr.mxu0 %v20689_v20 }
 0x4d9   :  { %15252 = vmatpush3.msra.mxu0 %v20689_v20 }
 0x4da   :  { %15254 = vmatmul.mubr.f32.vlgmr.msra.gmra.mxu0 %v8262_v14  ;;  %15297 = vmatprep.subr.mxu0 %v20496_v39  ;;  %v8345_v14 = vpop.f32.mrf.mxu0 }
 0x4db   :  { %15256 = vmatprep.mubr.f32.mxu0 %v8268_v58  ;;  %15298 = vmatpush3.msra.mxu0 %v20496_v39 }
 0x4dc   :  { %15299 = vmatprep.subr.mxu0 %v20532_v16  ;;  %v8349_v58 = vpop.f32.mrf.mxu0 }
 0x4dd   :  { %15300 = vmatpush3.msra.mxu0 %v20532_v16 }
 0x4de   :  { %15257 = vmatmul.mubr.f32.gmra.mxu0 %v8274_v1  ;;  %15301 = vmatprep.subr.mxu0 %v20541_v19 }
 0x4df   :  { %15302 = vmatpush3.msra.mxu0 %v20541_v19  ;;  %15329 = vmatprep.mubr.f32.mxu0 %v8343_v37  ;;  %v8351_v37 = vpop.f32.mrf.mxu0 }
 0x4e0   :  { %15303 = vmatprep.subr.mxu0 %v20555_v60 }
 0x4e1   :  { %15304 = vmatpush3.msra.mxu0 %v20555_v60  ;;  %v8355_v1 = vpop.f32.mrf.mxu0 }
 0x4e2   :  { %15305 = vmatprep.subr.mxu0 %v20565_v41 }
 0x4e3   :  { %15306 = vmatpush3.msra.mxu0 %v20565_v41  ;;  %v8357_v0 = vpop.f32.mrf.mxu0 }
 0x4e4   :  { %15307 = vmatprep.subr.mxu0 %v20575_v9 }
 0x4e5   :  { %15308 = vmatpush3.msra.mxu0 %v20575_v9  ;;  %v8361_v31 = vpop.f32.mrf.mxu0 }
 0x4e6   :  { %15309 = vmatprep.subr.mxu0 %v20589_v21 }
 0x4e7   :  { %15310 = vmatpush3.msra.mxu0 %v20589_v21 }
 0x4e8   :  { %15311 = vmatprep.subr.mxu0 %v20598_v25 }
 0x4e9   :  { %15312 = vmatpush3.msra.mxu0 %v20598_v25 }
 0x4ea   :  { %15313 = vmatprep.subr.mxu0 %v20608_v61 }
 0x4eb   :  { %15314 = vmatpush3.msra.mxu0 %v20608_v61 }
 0x4ec   :  { %15315 = vmatprep.subr.mxu0 %v20621_v12 }
 0x4ed   :  { %15316 = vmatpush3.msra.mxu0 %v20621_v12 }
 0x4ee   :  { %15317 = vmatprep.subr.mxu0 %v20630_v38 }
 0x4ef   :  { %15318 = vmatpush3.msra.mxu0 %v20630_v38 }
 0x4f0   :  { %15319 = vmatprep.subr.mxu0 %v20641_v42 }
 0x4f1   :  { %15320 = vmatpush3.msra.mxu0 %v20641_v42 }
 0x4f2   :  { %15321 = vmatprep.subr.mxu0 %v20656_v18 }
 0x4f3   :  { %15322 = vmatpush3.msra.mxu0 %v20656_v18 }
 0x4f4   :  { %15323 = vmatprep.subr.mxu0 %v20665_v55 }
 0x4f5   :  { %15324 = vmatpush3.msra.mxu0 %v20665_v55 }
 0x4f6   :  { %15325 = vmatprep.subr.mxu0 %v20676_v36 }
 0x4f7   :  { %15326 = vmatpush3.msra.mxu0 %v20676_v36 }
 0x4f8   :  { %15327 = vmatprep.subr.mxu0 %v20689_v20 }
 0x4f9   :  { %15328 = vmatpush3.msra.mxu0 %v20689_v20 }
 0x4fa   :  { %15330 = vmatmul.mubr.f32.vlgmr.msra.gmra.mxu0 %v8349_v58  ;;  %15373 = vmatprep.subr.mxu0 %v20496_v39 }
 0x4fb   :  { %15374 = vmatpush3.msra.mxu0 %v20496_v39  ;;  %15332 = vmatprep.mubr.f32.mxu0 %v8355_v1 }
 0x4fc   :  { %15375 = vmatprep.subr.mxu0 %v20532_v16 }
 0x4fd   :  { %15376 = vmatpush3.msra.mxu0 %v20532_v16 }
 0x4fe   :  { %15333 = vmatmul.mubr.f32.gmra.mxu0 %v8361_v31  ;;  %15377 = vmatprep.subr.mxu0 %v20541_v19  ;;  %v8363_v31 = vpop.f32.mrf.mxu0 }
 0x4ff   :  { %15378 = vmatpush3.msra.mxu0 %v20541_v19  ;;  %15405 = vmatprep.mubr.f32.mxu0 %v8345_v14  ;;  %v8432_v14 = vpop.f32.mrf.mxu1 }
 0x500   :  { %15379 = vmatprep.subr.mxu0 %v20555_v60  ;;  %v8521_v45 = vpop.f32.mrf.mxu0 }
 0x501   :  { %15380 = vmatpush3.msra.mxu0 %v20555_v60 }
 0x502   :  { %15381 = vmatprep.subr.mxu0 %v20565_v41 }
 0x503   :  { %15382 = vmatpush3.msra.mxu0 %v20565_v41 }
 0x504   :  { %15383 = vmatprep.subr.mxu0 %v20575_v9 }
 0x505   :  { %15384 = vmatpush3.msra.mxu0 %v20575_v9 }
 0x506   :  { %15385 = vmatprep.subr.mxu0 %v20589_v21 }
 0x507   :  { %15386 = vmatpush3.msra.mxu0 %v20589_v21 }
 0x508   :  { %15387 = vmatprep.subr.mxu0 %v20598_v25 }
 0x509   :  { %15388 = vmatpush3.msra.mxu0 %v20598_v25 }
 0x50a   :  { %15389 = vmatprep.subr.mxu0 %v20608_v61 }
 0x50b   :  { %15390 = vmatpush3.msra.mxu0 %v20608_v61 }
 0x50c   :  { %15391 = vmatprep.subr.mxu0 %v20621_v12 }
 0x50d   :  { %15392 = vmatpush3.msra.mxu0 %v20621_v12 }
 0x50e   :  { %15393 = vmatprep.subr.mxu0 %v20630_v38 }
 0x50f   :  { %15394 = vmatpush3.msra.mxu0 %v20630_v38 }
 0x510   :  { %15395 = vmatprep.subr.mxu0 %v20641_v42 }
 0x511   :  { %15396 = vmatpush3.msra.mxu0 %v20641_v42 }
 0x512   :  { %15397 = vmatprep.subr.mxu0 %v20656_v18 }
 0x513   :  { %15398 = vmatpush3.msra.mxu0 %v20656_v18 }
 0x514   :  { %15399 = vmatprep.subr.mxu0 %v20665_v55 }
 0x515   :  { %15400 = vmatpush3.msra.mxu0 %v20665_v55 }
 0x516   :  { %15401 = vmatprep.subr.mxu0 %v20676_v36 }
 0x517   :  { %15402 = vmatpush3.msra.mxu0 %v20676_v36 }
 0x518   :  { %15403 = vmatprep.subr.mxu0 %v20689_v20 }
 0x519   :  { %15404 = vmatpush3.msra.mxu0 %v20689_v20 }
 0x51a   :  { %15406 = vmatmul.mubr.f32.vlgmr.msra.gmra.mxu0 %v8351_v37  ;;  %15449 = vmatprep.subr.mxu0 %v20496_v39 }
 0x51b   :  { %15408 = vmatprep.mubr.f32.mxu0 %v8357_v0  ;;  %15450 = vmatpush3.msra.mxu0 %v20496_v39  ;;  %v8434_v0 = vpop.f32.mrf.mxu1 }
 0x51c   :  { %15451 = vmatprep.subr.mxu0 %v20532_v16 }
 0x51d   :  { %15452 = vmatpush3.msra.mxu0 %v20532_v16  ;;  %v8438_v58 = vpop.f32.mrf.mxu1 }
 0x51e   :  { %15409 = vmatmul.mubr.f32.gmra.mxu0 %v8363_v31  ;;  %15453 = vmatprep.subr.mxu0 %v20541_v19 }
 0x51f   :  { %15454 = vmatpush3.msra.mxu0 %v20541_v19  ;;  %15481 = vmatprep.mubr.f32.mxu0 %v8432_v14  ;;  %v8440_v37 = vpop.f32.mrf.mxu1 }
 0x520   :  { %15455 = vmatprep.subr.mxu0 %v20555_v60 }
 0x521   :  { %15456 = vmatpush3.msra.mxu0 %v20555_v60  ;;  %v8444_v1 = vpop.f32.mrf.mxu1 }
 0x522   :  { %15457 = vmatprep.subr.mxu0 %v20565_v41 }
 0x523   :  { %15458 = vmatpush3.msra.mxu0 %v20565_v41  ;;  %v8446_v31 = vpop.f32.mrf.mxu1 }
 0x524   :  { %15459 = vmatprep.subr.mxu0 %v20575_v9 }
 0x525   :  { %15460 = vmatpush3.msra.mxu0 %v20575_v9  ;;  %v8450_v14 = vpop.f32.mrf.mxu1 }
 0x526   :  { %15461 = vmatprep.subr.mxu0 %v20589_v21 }
 0x527   :  { %15462 = vmatpush3.msra.mxu0 %v20589_v21  ;;  %v8452_v13 = vpop.f32.mrf.mxu1 }
 0x528   :  { %15463 = vmatprep.subr.mxu0 %v20598_v25 }
 0x529   :  { %15464 = vmatpush3.msra.mxu0 %v20598_v25 }
 0x52a   :  { %15465 = vmatprep.subr.mxu0 %v20608_v61 }
 0x52b   :  { %15466 = vmatpush3.msra.mxu0 %v20608_v61 }
 0x52c   :  { %15467 = vmatprep.subr.mxu0 %v20621_v12 }
 0x52d   :  { %15468 = vmatpush3.msra.mxu0 %v20621_v12 }
 0x52e   :  { %15469 = vmatprep.subr.mxu0 %v20630_v38 }
 0x52f   :  { %15470 = vmatpush3.msra.mxu0 %v20630_v38 }
 0x530   :  { %15471 = vmatprep.subr.mxu0 %v20641_v42 }
 0x531   :  { %15472 = vmatpush3.msra.mxu0 %v20641_v42 }
 0x532   :  { %15473 = vmatprep.subr.mxu0 %v20656_v18 }
 0x533   :  { %15474 = vmatpush3.msra.mxu0 %v20656_v18 }
 0x534   :  { %15475 = vmatprep.subr.mxu0 %v20665_v55 }
 0x535   :  { %15476 = vmatpush3.msra.mxu0 %v20665_v55 }
 0x536   :  { %15477 = vmatprep.subr.mxu0 %v20676_v36 }
 0x537   :  { %15478 = vmatpush3.msra.mxu0 %v20676_v36 }
 0x538   :  { %15479 = vmatprep.subr.mxu0 %v20689_v20 }
 0x539   :  { %15480 = vmatpush3.msra.mxu0 %v20689_v20 }
 0x53a   :  { %15482 = vmatmul.mubr.f32.vlgmr.msra.gmra.mxu0 %v8438_v58  ;;  %15525 = vmatprep.subr.mxu0 %v20496_v39  ;;  %v21074_v58 = vpop.f32.mrf.mxu0 }
 0x53b   :  { %15526 = vmatpush3.msra.mxu0 %v20496_v39  ;;  %15484 = vmatprep.mubr.f32.mxu0 %v8444_v1 }
 0x53c   :  { %15527 = vmatprep.subr.mxu0 %v20532_v16  ;;  %v21080_v1 = vpop.f32.mrf.mxu0 }
 0x53d   :  { %15528 = vmatpush3.msra.mxu0 %v20532_v16 }
 0x53e   :  { %15485 = vmatmul.mubr.f32.gmra.mxu0 %v8450_v14  ;;  %15529 = vmatprep.subr.mxu0 %v20541_v19 }
 0x53f   :  { %15530 = vmatpush3.msra.mxu0 %v20541_v19  ;;  %15557 = vmatprep.mubr.f32.mxu0 %v8434_v0  ;;  %v21086_v0 = vpop.f32.mrf.mxu0 }
 0x540   :  { %15531 = vmatprep.subr.mxu0 %v20555_v60 }
 0x541   :  { %15532 = vmatpush3.msra.mxu0 %v20555_v60  ;;  %v21092_v14 = vpop.f32.mrf.mxu0 }
 0x542   :  { %15533 = vmatprep.subr.mxu0 %v20565_v41 }
 0x543   :  { %15534 = vmatpush3.msra.mxu0 %v20565_v41  ;;  %v21098_v33 = vpop.f32.mrf.mxu0 }
 0x544   :  { %15535 = vmatprep.subr.mxu0 %v20575_v9 }
 0x545   :  { %15536 = vmatpush3.msra.mxu0 %v20575_v9  ;;  %v8539_v49 = vpop.f32.mrf.mxu0 }
 0x546   :  { %15537 = vmatprep.subr.mxu0 %v20589_v21 }
 0x547   :  { %15538 = vmatpush3.msra.mxu0 %v20589_v21  ;;  %v21107_v48 = vpop.f32.mrf.mxu0 }
 0x548   :  { %15539 = vmatprep.subr.mxu0 %v20598_v25 }
 0x549   :  { %15540 = vmatpush3.msra.mxu0 %v20598_v25  ;;  %v21113_v63 = vpop.f32.mrf.mxu0 }
 0x54a   :  { %15541 = vmatprep.subr.mxu0 %v20608_v61 }
 0x54b   :  { %15542 = vmatpush3.msra.mxu0 %v20608_v61 }
 0x54c   :  { %15543 = vmatprep.subr.mxu0 %v20621_v12 }
 0x54d   :  { %15544 = vmatpush3.msra.mxu0 %v20621_v12 }
 0x54e   :  { %15545 = vmatprep.subr.mxu0 %v20630_v38 }
 0x54f   :  { %15546 = vmatpush3.msra.mxu0 %v20630_v38 }
 0x550   :  { %15547 = vmatprep.subr.mxu0 %v20641_v42 }
 0x551   :  { %15548 = vmatpush3.msra.mxu0 %v20641_v42 }
 0x552   :  { %15549 = vmatprep.subr.mxu0 %v20656_v18 }
 0x553   :  { %15550 = vmatpush3.msra.mxu0 %v20656_v18 }
 0x554   :  { %15551 = vmatprep.subr.mxu0 %v20665_v55 }
 0x555   :  { %15552 = vmatpush3.msra.mxu0 %v20665_v55 }
 0x556   :  { %15553 = vmatprep.subr.mxu0 %v20676_v36 }
 0x557   :  { %15554 = vmatpush3.msra.mxu0 %v20676_v36 }
 0x558   :  { %15555 = vmatprep.subr.mxu0 %v20689_v20 }
 0x559   :  { %15556 = vmatpush3.msra.mxu0 %v20689_v20 }
 0x55a   :  { %15558 = vmatmul.mubr.f32.vlgmr.msra.gmra.mxu0 %v8440_v37  ;;  %15601 = vmatprep.subr.mxu0 %v20496_v39  ;;  %v21119_v37 = vpop.f32.mrf.mxu0 }
 0x55b   :  { %15560 = vmatprep.mubr.f32.mxu0 %v8446_v31  ;;  %15602 = vmatpush3.msra.mxu0 %v20496_v39 }
 0x55c   :  { %15603 = vmatprep.subr.mxu0 %v20532_v16  ;;  %v21124_v39 = vpop.f32.mrf.mxu0 }
 0x55d   :  { %15604 = vmatpush3.msra.mxu0 %v20532_v16 }
 0x55e   :  { %15561 = vmatmul.mubr.f32.gmra.mxu0 %v8452_v13  ;;  %15605 = vmatprep.subr.mxu0 %v20541_v19 }
 0x55f   :  { %15606 = vmatpush3.msra.mxu0 %v20541_v19  ;;  %15633 = vmatprep.mubr.f32.mxu0 %v8521_v45  ;;  %v21130_v45 = vpop.f32.mrf.mxu0 }
 0x560   :  { %15607 = vmatprep.subr.mxu0 %v20555_v60 }
 0x561   :  { %15608 = vmatpush3.msra.mxu0 %v20555_v60  ;;  %v21136_v13 = vpop.f32.mrf.mxu0 }
 0x562   :  { %15609 = vmatprep.subr.mxu0 %v20565_v41 }
 0x563   :  { %15610 = vmatpush3.msra.mxu0 %v20565_v41  ;;  %v21142_v31 = vpop.f32.mrf.mxu0 }
 0x564   :  { %15611 = vmatprep.subr.mxu0 %v20575_v9 }
 0x565   :  { %15612 = vmatpush3.msra.mxu0 %v20575_v9  ;;  %v21148_v23 = vpop.f32.mrf.mxu0 }
 0x566   :  { %15613 = vmatprep.subr.mxu0 %v20589_v21 }
 0x567   :  { %15614 = vmatpush3.msra.mxu0 %v20589_v21  ;;  %v21153_v57 = vpop.f32.mrf.mxu0 }
 0x568   :  { %15615 = vmatprep.subr.mxu0 %v20598_v25 }
 0x569   :  { %15616 = vmatpush3.msra.mxu0 %v20598_v25 }
 0x56a   :  { %15617 = vmatprep.subr.mxu0 %v20608_v61 }
 0x56b   :  { %15618 = vmatpush3.msra.mxu0 %v20608_v61 }
 0x56c   :  { %15619 = vmatprep.subr.mxu0 %v20621_v12 }
 0x56d   :  { %15620 = vmatpush3.msra.mxu0 %v20621_v12 }
 0x56e   :  { %15621 = vmatprep.subr.mxu0 %v20630_v38 }
 0x56f   :  { %15622 = vmatpush3.msra.mxu0 %v20630_v38 }
 0x570   :  { %15623 = vmatprep.subr.mxu0 %v20641_v42 }
 0x571   :  { %15624 = vmatpush3.msra.mxu0 %v20641_v42 }
 0x572   :  { %15625 = vmatprep.subr.mxu0 %v20656_v18 }
 0x573   :  { %15626 = vmatpush3.msra.mxu0 %v20656_v18 }
 0x574   :  { %15627 = vmatprep.subr.mxu0 %v20665_v55 }
 0x575   :  { %15628 = vmatpush3.msra.mxu0 %v20665_v55 }
 0x576   :  { %15629 = vmatprep.subr.mxu0 %v20676_v36 }
 0x577   :  { %15630 = vmatpush3.msra.mxu0 %v20676_v36 }
 0x578   :  { %15631 = vmatprep.subr.mxu0 %v20689_v20 }
 0x579   :  { %15632 = vmatpush3.msra.mxu0 %v20689_v20 }
 0x57a   :  { %15634 = vmatmul.mubr.f32.vlgmr.msra.gmra.mxu0 %v21080_v1  ;;  %15677 = vmatprep.subr.mxu0 %v21161_v50  ;;  %v15179_v34 = vpop.f32.mrf.mxu0 }
 0x57b   :  { %15636 = vmatprep.mubr.f32.mxu0 %v21092_v14  ;;  %15678 = vmatpush3.msra.mxu0 %v21161_v50  ;;  %v8897_v1 = vadd.f32 %v15179_v34, %v20828_v5  ;;  %v21362_v14 = vld [vmem:[%s22864_s2 + $0x8] sm:$0xff] }
 0x57c   :  { %15679 = vmatprep.subr.mxu0 %v20532_v16  ;;  %v8877_v62 = vpop.f32.mrf.mxu0 }
 0x57d   :  { %v8896_v22 = vadd.f32 %v8877_v62, %v20818_v2  ;;  %15680 = vmatpush3.msra.mxu0 %v20532_v16  ;;  %v21344_v62 = vld [vmem:[%s22864_s2 + $0x18] sm:$0xff] }
 0x57e   :  { %15637 = vmatmul.mubr.f32.gmra.mxu0 %v8539_v49  ;;  %15681 = vmatprep.subr.mxu0 %v20541_v19 }
 0x57f   :  { %15682 = vmatpush3.msra.mxu0 %v20541_v19  ;;  %15709 = vmatprep.mubr.f32.mxu0 %v21074_v58 }
 0x580   :  { %15215 = vmatprep.mubr.f32.mxu1 %v8896_v22  ;;  %15683 = vmatprep.subr.mxu0 %v20555_v60 }
 0x581   :  { %15216 = vmatmul.mubr.f32.vlgmr.msra.gmra.mxu1 %v8897_v1  ;;  %15684 = vmatpush3.msra.mxu0 %v20555_v60 }
 0x582   :  { %15260 = vmatpush3.msra.mxu1 %v21161_v50  ;;  %15685 = vmatprep.subr.mxu0 %v20565_v41  ;;  %v15182_v2 = vpop.f32.mrf.mxu0 }
 0x583   :  { %15261 = vmatprep.subr.mxu1 %v20532_v16  ;;  %15686 = vmatpush3.msra.mxu0 %v20565_v41  ;;  %v8899_v22 = vadd.f32 %v15182_v2, %v20842_v7  ;;  %v21371_v2 = vld [vmem:[%s22864_s2] sm:$0xff] }
 0x584   :  { %15262 = vmatpush3.msra.mxu1 %v20532_v16  ;;  %15687 = vmatprep.subr.mxu0 %v20575_v9  ;;  %v8887_v34 = vpop.f32.mrf.mxu0 }
 0x585   :  { %15263 = vmatprep.subr.mxu1 %v20541_v19  ;;  %v8898_v5 = vadd.f32 %v8887_v34, %v20836_v24  ;;  %15688 = vmatpush3.msra.mxu0 %v20575_v9 }
 0x586   :  { %15264 = vmatpush3.msra.mxu1 %v20541_v19  ;;  %15689 = vmatprep.subr.mxu0 %v20589_v21 }
 0x587   :  { %15265 = vmatprep.subr.mxu1 %v20555_v60  ;;  %15690 = vmatpush3.msra.mxu0 %v20589_v21 }
 0x588   :  { %15266 = vmatpush3.msra.mxu1 %v20555_v60  ;;  %15218 = vmatprep.mubr.f32.mxu1 %v8898_v5  ;;  %v21237_v60 = vld [vmem:[%s22864_s2 + $0x70] sm:$0xff] }
 0x589   :  { %15267 = vmatprep.subr.mxu1 %v20565_v41  ;;  %15691 = vmatprep.subr.mxu0 %v20598_v25 }
 0x58a   :  { %15219 = vmatmul.mubr.f32.gmra.mxu1 %v8899_v22  ;;  %15692 = vmatpush3.msra.mxu0 %v20598_v25 }
 0x58b   :  { %15268 = vmatpush3.msra.mxu1 %v20565_v41  ;;  %15693 = vmatprep.subr.mxu0 %v20608_v61 }
 0x58c   :  { %15269 = vmatprep.subr.mxu1 %v20575_v9  ;;  %15694 = vmatpush3.msra.mxu0 %v20608_v61 }
 0x58d   :  { %15270 = vmatpush3.msra.mxu1 %v20575_v9  ;;  %15695 = vmatprep.subr.mxu0 %v20621_v12 }
 0x58e   :  { %15271 = vmatprep.subr.mxu1 %v20589_v21  ;;  %15696 = vmatpush3.msra.mxu0 %v20621_v12 }
 0x58f   :  { %15272 = vmatpush3.msra.mxu1 %v20589_v21  ;;  %15697 = vmatprep.subr.mxu0 %v20630_v38 }
 0x590   :  { %15273 = vmatprep.subr.mxu1 %v20598_v25  ;;  %15698 = vmatpush3.msra.mxu0 %v20630_v38 }
 0x591   :  { %15274 = vmatpush3.msra.mxu1 %v20598_v25  ;;  %15699 = vmatprep.subr.mxu0 %v20641_v42 }
 0x592   :  { %15275 = vmatprep.subr.mxu1 %v20608_v61  ;;  %15700 = vmatpush3.msra.mxu0 %v20641_v42 }
 0x593   :  { %15276 = vmatpush3.msra.mxu1 %v20608_v61  ;;  %15701 = vmatprep.subr.mxu0 %v20656_v18  ;;  %v8610_v61 = vpop.f32.mrf.mxu1 }
 0x594   :  { %15277 = vmatprep.subr.mxu1 %v20621_v12  ;;  %15702 = vmatpush3.msra.mxu0 %v20656_v18 }
 0x595   :  { %15278 = vmatpush3.msra.mxu1 %v20621_v12  ;;  %15703 = vmatprep.subr.mxu0 %v20665_v55  ;;  %v21286_v12 = vld [vmem:[%s22864_s2 + $0x48] sm:$0xff] }
 0x596   :  { %15279 = vmatprep.subr.mxu1 %v20630_v38  ;;  %15704 = vmatpush3.msra.mxu0 %v20665_v55 }
 0x597   :  { %15280 = vmatpush3.msra.mxu1 %v20630_v38  ;;  %15705 = vmatprep.subr.mxu0 %v20676_v36  ;;  %v21295_v38 = vld [vmem:[%s22864_s2 + $0x40] sm:$0xff] }
 0x598   :  { %15281 = vmatprep.subr.mxu1 %v20641_v42  ;;  %15706 = vmatpush3.msra.mxu0 %v20676_v36 }
 0x599   :  { %15282 = vmatpush3.msra.mxu1 %v20641_v42  ;;  %15707 = vmatprep.subr.mxu0 %v20689_v20  ;;  %v21300_v42 = vpop.f32.mrf.mxu1 }
 0x59a   :  { %15283 = vmatprep.subr.mxu1 %v20656_v18  ;;  %15708 = vmatpush3.msra.mxu0 %v20689_v20  ;;  %v15255_v7 = vpop.f32.mrf.mxu0 }
 0x59b   :  { %15284 = vmatpush3.msra.mxu1 %v20656_v18  ;;  %15710 = vmatmul.mubr.f32.vlgmr.msra.gmra.mxu0 %v21086_v0  ;;  %v9079_v9 = vadd.f32 %v15255_v7, %v20832_v56  ;;  %v21258_v56 = vld [vmem:[%s22864_s2 + $0x60] sm:$0xff]  ;;  %v21306_v18 = vld [vmem:[%s22864_s2 + $0x38] sm:$0xff] }
 0x59c   :  { %15285 = vmatprep.subr.mxu1 %v20665_v55  ;;  %15753 = vmatprep.subr.mxu0 %v21161_v50  ;;  %v9059_v24 = vpop.f32.mrf.mxu0 }
 0x59d   :  { %15286 = vmatpush3.msra.mxu1 %v20665_v55  ;;  %15712 = vmatprep.mubr.f32.mxu0 %v21098_v33  ;;  %v9078_v16 = vadd.f32 %v9059_v24, %v20822_v51  ;;  %v21248_v51 = vld [vmem:[%s22864_s2 + $0x68] sm:$0xff]  ;;  %v21315_v55 = vld [vmem:[%s22864_s2 + $0x30] sm:$0xff]  ;;  %v21333_v33 = vld [vmem:[%s22864_s2 + $0x20] sm:$0xff] }
 0x59e   :  { %15754 = vmatpush3.msra.mxu0 %v21161_v50  ;;  %15287 = vmatprep.subr.mxu1 %v20676_v36  ;;  %v15258_v19 = vpop.f32.mrf.mxu0 }
 0x59f   :  { %15755 = vmatprep.subr.mxu0 %v21237_v60  ;;  %15288 = vmatpush3.msra.mxu1 %v20676_v36  ;;  %v9081_v25 = vadd.f32 %v15258_v19, %v20846_v40  ;;  %v21277_v40 = vld [vmem:[%s22864_s2 + $0x50] sm:$0xff]  ;;  %v8616_v36 = vpop.f32.mrf.mxu1 }
 0x5a0   :  { %15756 = vmatpush3.msra.mxu0 %v21237_v60  ;;  %15289 = vmatprep.subr.mxu1 %v20689_v20  ;;  %v9069_v41 = vpop.f32.mrf.mxu0 }
 0x5a1   :  { %15713 = vmatmul.mubr.f32.gmra.mxu0 %v21107_v48  ;;  %15757 = vmatprep.subr.mxu0 %v21248_v51  ;;  %v9080_v21 = vadd.f32 %v9069_v41, %v20840_v17  ;;  %v21268_v17 = vld [vmem:[%s22864_s2 + $0x58] sm:$0xff]  ;;  %v21338_v49 = vpop.f32.mrf.mxu1  ;;  %v21353_v48 = vld [vmem:[%s22864_s2 + $0x10] sm:$0xff] }
 0x5a2   :  { %15290 = vmatpush3.msra.mxu1 %v20689_v20  ;;  %15291 = vmatprep.mubr.f32.mxu1 %v9078_v16  ;;  %v21324_v20 = vld [vmem:[%s22864_s2 + $0x28] sm:$0xff] }
 0x5a3   :  { %15758 = vmatpush3.msra.mxu0 %v21248_v51  ;;  %15292 = vmatmul.mubr.f32.vlgmr.msra.gmra.mxu1 %v9079_v9  ;;  %v8622_v58 = vpop.f32.mrf.mxu1 }
 0x5a4   :  { %15335 = vmatprep.subr.mxu1 %v21161_v50  ;;  %15759 = vmatprep.subr.mxu0 %v21258_v56 }
 0x5a5   :  { %15336 = vmatpush3.msra.mxu1 %v21161_v50  ;;  %15760 = vmatpush3.msra.mxu0 %v21258_v56  ;;  %v21375_v34 = vpop.f32.mrf.mxu1 }
 0x5a6   :  { %15337 = vmatprep.subr.mxu1 %v21237_v60  ;;  %15761 = vmatprep.subr.mxu0 %v21268_v17 }
 0x5a7   :  { %15294 = vmatprep.mubr.f32.mxu1 %v9080_v21  ;;  %15338 = vmatpush3.msra.mxu1 %v21237_v60  ;;  %v8628_v7 = vpop.f32.mrf.mxu1 }
 0x5a8   :  { %15762 = vmatpush3.msra.mxu0 %v21268_v17  ;;  %15295 = vmatmul.mubr.f32.gmra.mxu1 %v9081_v25 }
 0x5a9   :  { %15339 = vmatprep.subr.mxu1 %v21248_v51  ;;  %15763 = vmatprep.subr.mxu0 %v21277_v40  ;;  %v8630_v9 = vpop.f32.mrf.mxu1 }
 0x5aa   :  { %15340 = vmatpush3.msra.mxu1 %v21248_v51  ;;  %15764 = vmatpush3.msra.mxu0 %v21277_v40 }
 0x5ab   :  { %15341 = vmatprep.subr.mxu1 %v21258_v56  ;;  %15765 = vmatprep.subr.mxu0 %v21286_v12 }
 0x5ac   :  { %15342 = vmatpush3.msra.mxu1 %v21258_v56  ;;  %15766 = vmatpush3.msra.mxu0 %v21286_v12 }
 0x5ad   :  { %15343 = vmatprep.subr.mxu1 %v21268_v17  ;;  %15767 = vmatprep.subr.mxu0 %v21295_v38 }
 0x5ae   :  { %15344 = vmatpush3.msra.mxu1 %v21268_v17  ;;  %15768 = vmatpush3.msra.mxu0 %v21295_v38 }
 0x5af   :  { %15345 = vmatprep.subr.mxu1 %v21277_v40  ;;  %15769 = vmatprep.subr.mxu0 %v21306_v18 }
 0x5b0   :  { %15346 = vmatpush3.msra.mxu1 %v21277_v40  ;;  %15770 = vmatpush3.msra.mxu0 %v21306_v18 }
 0x5b1   :  { %15347 = vmatprep.subr.mxu1 %v21286_v12  ;;  %15771 = vmatprep.subr.mxu0 %v21315_v55 }
 0x5b2   :  { %15348 = vmatpush3.msra.mxu1 %v21286_v12  ;;  %15772 = vmatpush3.msra.mxu0 %v21315_v55 }
 0x5b3   :  { %15349 = vmatprep.subr.mxu1 %v21295_v38  ;;  %15773 = vmatprep.subr.mxu0 %v21324_v20 }
 0x5b4   :  { %15350 = vmatpush3.msra.mxu1 %v21295_v38  ;;  %15774 = vmatpush3.msra.mxu0 %v21324_v20 }
 0x5b5   :  { %15351 = vmatprep.subr.mxu1 %v21306_v18  ;;  %15775 = vmatprep.subr.mxu0 %v21333_v33 }
 0x5b6   :  { %15352 = vmatpush3.msra.mxu1 %v21306_v18  ;;  %15776 = vmatpush3.msra.mxu0 %v21333_v33 }
 0x5b7   :  { %15353 = vmatprep.subr.mxu1 %v21315_v55  ;;  %15777 = vmatprep.subr.mxu0 %v21344_v62 }
 0x5b8   :  { %15354 = vmatpush3.msra.mxu1 %v21315_v55  ;;  %15778 = vmatpush3.msra.mxu0 %v21344_v62 }
 0x5b9   :  { %15355 = vmatprep.subr.mxu1 %v21324_v20  ;;  %15779 = vmatprep.subr.mxu0 %v21353_v48 }
 0x5ba   :  { %15356 = vmatpush3.msra.mxu1 %v21324_v20  ;;  %15780 = vmatpush3.msra.mxu0 %v21353_v48  ;;  %v15331_v0 = vpop.f32.mrf.mxu0 }
 0x5bb   :  { %15357 = vmatprep.subr.mxu1 %v21333_v33  ;;  %15781 = vmatprep.subr.mxu0 %v21362_v14  ;;  %v9261_v16 = vadd.f32 %v15331_v0, %v20844_v6 }
 0x5bc   :  { %15358 = vmatpush3.msra.mxu1 %v21333_v33  ;;  %15782 = vmatpush3.msra.mxu0 %v21362_v14  ;;  %v9241_v1 = vpop.f32.mrf.mxu0 }
 0x5bd   :  { %15785 = vmatprep.mubr.f32.mxu0 %v8610_v61  ;;  %15359 = vmatprep.subr.mxu1 %v21344_v62  ;;  %v9260_v22 = vadd.f32 %v9241_v1, %v20834_v43 }
 0x5be   :  { %15783 = vmatprep.subr.mxu0 %v21371_v2  ;;  %15360 = vmatpush3.msra.mxu1 %v21344_v62  ;;  %v15334_v5 = vpop.f32.mrf.mxu0 }
 0x5bf   :  { %15784 = vmatpush3.msra.mxu0 %v21371_v2  ;;  %15361 = vmatprep.subr.mxu1 %v21353_v48  ;;  %v9263_v6 = vadd.f32 %v15334_v5, %v20858_v52 }
 0x5c0   :  { %15786 = vmatmul.mubr.f32.vlgmr.msra.gmra.mxu0 %v8616_v36  ;;  %15829 = vmatprep.subr.mxu0 %v21161_v50  ;;  %v9251_v24 = vpop.f32.mrf.mxu0 }
 0x5c1   :  { %15362 = vmatpush3.msra.mxu1 %v21353_v48  ;;  %15830 = vmatpush3.msra.mxu0 %v21161_v50  ;;  %v9262_v43 = vadd.f32 %v9251_v24, %v20852_v59 }
 0x5c2   :  { %15363 = vmatprep.subr.mxu1 %v21362_v14  ;;  %15831 = vmatprep.subr.mxu0 %v21237_v60 }
 0x5c3   :  { %15364 = vmatpush3.msra.mxu1 %v21362_v14  ;;  %15788 = vmatprep.mubr.f32.mxu0 %v8622_v58 }
 0x5c4   :  { %15832 = vmatpush3.msra.mxu0 %v21237_v60  ;;  %15365 = vmatprep.subr.mxu1 %v21371_v2 }
 0x5c5   :  { %15789 = vmatmul.mubr.f32.gmra.mxu0 %v8628_v7  ;;  %15833 = vmatprep.subr.mxu0 %v21248_v51 }
 0x5c6   :  { %15366 = vmatpush3.msra.mxu1 %v21371_v2  ;;  %15367 = vmatprep.mubr.f32.mxu1 %v9260_v22 }
 0x5c7   :  { %15834 = vmatpush3.msra.mxu0 %v21248_v51  ;;  %15861 = vmatprep.mubr.f32.mxu0 %v21300_v42 }
 0x5c8   :  { %15368 = vmatmul.mubr.f32.vlgmr.msra.gmra.mxu1 %v9261_v16  ;;  %15411 = vmatprep.subr.mxu1 %v21161_v50 }
 0x5c9   :  { %15835 = vmatprep.subr.mxu0 %v21258_v56  ;;  %15412 = vmatpush3.msra.mxu1 %v21161_v50 }
 0x5ca   :  { %15836 = vmatpush3.msra.mxu0 %v21258_v56  ;;  %15413 = vmatprep.subr.mxu1 %v21237_v60 }
 0x5cb   :  { %15837 = vmatprep.subr.mxu0 %v21268_v17  ;;  %15370 = vmatprep.mubr.f32.mxu1 %v9262_v43 }
 0x5cc   :  { %15414 = vmatpush3.msra.mxu1 %v21237_v60  ;;  %15838 = vmatpush3.msra.mxu0 %v21268_v17 }
 0x5cd   :  { %15371 = vmatmul.mubr.f32.gmra.mxu1 %v9263_v6  ;;  %15415 = vmatprep.subr.mxu1 %v21248_v51 }
 0x5ce   :  { %15839 = vmatprep.subr.mxu0 %v21277_v40  ;;  %15416 = vmatpush3.msra.mxu1 %v21248_v51 }
 0x5cf   :  { %15840 = vmatpush3.msra.mxu0 %v21277_v40  ;;  %15417 = vmatprep.subr.mxu1 %v21258_v56 }
 0x5d0   :  { %15841 = vmatprep.subr.mxu0 %v21286_v12  ;;  %15418 = vmatpush3.msra.mxu1 %v21258_v56 }
 0x5d1   :  { %15842 = vmatpush3.msra.mxu0 %v21286_v12  ;;  %15419 = vmatprep.subr.mxu1 %v21268_v17 }
 0x5d2   :  { %15843 = vmatprep.subr.mxu0 %v21295_v38  ;;  %15420 = vmatpush3.msra.mxu1 %v21268_v17 }
 0x5d3   :  { %15844 = vmatpush3.msra.mxu0 %v21295_v38  ;;  %15421 = vmatprep.subr.mxu1 %v21277_v40 }
 0x5d4   :  { %15845 = vmatprep.subr.mxu0 %v21306_v18  ;;  %15422 = vmatpush3.msra.mxu1 %v21277_v40 }
 0x5d5   :  { %15846 = vmatpush3.msra.mxu0 %v21306_v18  ;;  %15423 = vmatprep.subr.mxu1 %v21286_v12 }
 0x5d6   :  { %15847 = vmatprep.subr.mxu0 %v21315_v55  ;;  %15424 = vmatpush3.msra.mxu1 %v21286_v12 }
 0x5d7   :  { %15848 = vmatpush3.msra.mxu0 %v21315_v55  ;;  %15425 = vmatprep.subr.mxu1 %v21295_v38 }
 0x5d8   :  { %15849 = vmatprep.subr.mxu0 %v21324_v20  ;;  %15426 = vmatpush3.msra.mxu1 %v21295_v38 }
 0x5d9   :  { %15850 = vmatpush3.msra.mxu0 %v21324_v20  ;;  %15427 = vmatprep.subr.mxu1 %v21306_v18 }
 0x5da   :  { %15851 = vmatprep.subr.mxu0 %v21333_v33  ;;  %15428 = vmatpush3.msra.mxu1 %v21306_v18  ;;  %v15407_v59 = vpop.f32.mrf.mxu0 }
 0x5db   :  { %15852 = vmatpush3.msra.mxu0 %v21333_v33  ;;  %15429 = vmatprep.subr.mxu1 %v21315_v55  ;;  %v9443_v25 = vadd.f32 %v15407_v59, %v20848_v10 }
 0x5dc   :  { %15853 = vmatprep.subr.mxu0 %v21344_v62  ;;  %15430 = vmatpush3.msra.mxu1 %v21315_v55  ;;  %v9423_v52 = vpop.f32.mrf.mxu0 }
 0x5dd   :  { %15854 = vmatpush3.msra.mxu0 %v21344_v62  ;;  %15431 = vmatprep.subr.mxu1 %v21324_v20  ;;  %v9442_v41 = vadd.f32 %v9423_v52, %v20838_v3 }
 0x5de   :  { %15855 = vmatprep.subr.mxu0 %v21353_v48  ;;  %15432 = vmatpush3.msra.mxu1 %v21324_v20  ;;  %v15410_v19 = vpop.f32.mrf.mxu0 }
 0x5df   :  { %15856 = vmatpush3.msra.mxu0 %v21353_v48  ;;  %15433 = vmatprep.subr.mxu1 %v21333_v33  ;;  %v9445_v10 = vadd.f32 %v15410_v19, %v20862_v30  ;;  %v23784_v19 = vld [vmem:[#allocation122_spill] sm:$0xff] }
 0x5e0   :  { %15857 = vmatprep.subr.mxu0 %v21362_v14  ;;  %15434 = vmatpush3.msra.mxu1 %v21333_v33  ;;  %v9433_v21 = vpop.f32.mrf.mxu0 }
 0x5e1   :  { %15858 = vmatpush3.msra.mxu0 %v21362_v14  ;;  %15435 = vmatprep.subr.mxu1 %v21344_v62  ;;  %v9444_v3 = vadd.f32 %v9433_v21, %v20856_v26 }
 0x5e2   :  { %15859 = vmatprep.subr.mxu0 %v21371_v2  ;;  %15436 = vmatpush3.msra.mxu1 %v21344_v62 }
 0x5e3   :  { %15860 = vmatpush3.msra.mxu0 %v21371_v2  ;;  %15437 = vmatprep.subr.mxu1 %v21353_v48 }
 0x5e4   :  { %15862 = vmatmul.mubr.f32.vlgmr.msra.gmra.mxu0 %v21338_v49  ;;  %15905 = vmatprep.subr.mxu0 %v21161_v50 }
 0x5e5   :  { %15438 = vmatpush3.msra.mxu1 %v21353_v48  ;;  %15864 = vmatprep.mubr.f32.mxu0 %v21375_v34 }
 0x5e6   :  { %15906 = vmatpush3.msra.mxu0 %v21161_v50  ;;  %15439 = vmatprep.subr.mxu1 %v21362_v14 }
 0x5e7   :  { %15907 = vmatprep.subr.mxu0 %v21237_v60  ;;  %15440 = vmatpush3.msra.mxu1 %v21362_v14 }
 0x5e8   :  { %15908 = vmatpush3.msra.mxu0 %v21237_v60  ;;  %15441 = vmatprep.subr.mxu1 %v21371_v2 }
 0x5e9   :  { %15865 = vmatmul.mubr.f32.gmra.mxu0 %v8630_v9  ;;  %15909 = vmatprep.subr.mxu0 %v21248_v51  ;;  %v23785_v9 = vmov 0.0  }
 0x5ea   :  { %15442 = vmatpush3.msra.mxu1 %v21371_v2  ;;  %15443 = vmatprep.mubr.f32.mxu1 %v9442_v41 }
 0x5eb   :  { %15910 = vmatpush3.msra.mxu0 %v21248_v51  ;;  %15937 = vmatprep.mubr.f32.mxu0 %v21113_v63 }
 0x5ec   :  { %15444 = vmatmul.mubr.f32.vlgmr.msra.gmra.mxu1 %v9443_v25  ;;  %15487 = vmatprep.subr.mxu1 %v21161_v50  ;;  %v23786_v25 = vld [vmem:[#allocation131_spill] sm:$0xff] }
 0x5ed   :  { %15911 = vmatprep.subr.mxu0 %v21258_v56  ;;  %15488 = vmatpush3.msra.mxu1 %v21161_v50 }
 0x5ee   :  { %15912 = vmatpush3.msra.mxu0 %v21258_v56  ;;  %15489 = vmatprep.subr.mxu1 %v21237_v60 }
 0x5ef   :  { %15913 = vmatprep.subr.mxu0 %v21268_v17  ;;  %15446 = vmatprep.mubr.f32.mxu1 %v9444_v3 }
 0x5f0   :  { %15490 = vmatpush3.msra.mxu1 %v21237_v60  ;;  %15914 = vmatpush3.msra.mxu0 %v21268_v17 }
 0x5f1   :  { %15447 = vmatmul.mubr.f32.gmra.mxu1 %v9445_v10  ;;  %15491 = vmatprep.subr.mxu1 %v21248_v51  ;;  %v23788_v10 = vld [vmem:[#allocation212_spill] sm:$0xff] }
 0x5f2   :  { %15915 = vmatprep.subr.mxu0 %v21277_v40  ;;  %15492 = vmatpush3.msra.mxu1 %v21248_v51 }
 0x5f3   :  { %15916 = vmatpush3.msra.mxu0 %v21277_v40  ;;  %15493 = vmatprep.subr.mxu1 %v21258_v56 }
 0x5f4   :  { %15917 = vmatprep.subr.mxu0 %v21286_v12  ;;  %15494 = vmatpush3.msra.mxu1 %v21258_v56 }
 0x5f5   :  { %15918 = vmatpush3.msra.mxu0 %v21286_v12  ;;  %15495 = vmatprep.subr.mxu1 %v21268_v17 }
 0x5f6   :  { %15919 = vmatprep.subr.mxu0 %v21295_v38  ;;  %15496 = vmatpush3.msra.mxu1 %v21268_v17 }
 0x5f7   :  { %15920 = vmatpush3.msra.mxu0 %v21295_v38  ;;  %15497 = vmatprep.subr.mxu1 %v21277_v40 }
 0x5f8   :  { %15921 = vmatprep.subr.mxu0 %v21306_v18  ;;  %15498 = vmatpush3.msra.mxu1 %v21277_v40 }
 0x5f9   :  { %15922 = vmatpush3.msra.mxu0 %v21306_v18  ;;  %15499 = vmatprep.subr.mxu1 %v21286_v12 }
 0x5fa   :  { %15923 = vmatprep.subr.mxu0 %v21315_v55  ;;  %15500 = vmatpush3.msra.mxu1 %v21286_v12  ;;  %v15483_v26 = vpop.f32.mrf.mxu0 }
 0x5fb   :  { %15924 = vmatpush3.msra.mxu0 %v21315_v55  ;;  %15501 = vmatprep.subr.mxu1 %v21295_v38 }
 0x5fc   :  { %15925 = vmatprep.subr.mxu0 %v21324_v20  ;;  %15502 = vmatpush3.msra.mxu1 %v21295_v38  ;;  %v9605_v30 = vpop.f32.mrf.mxu0 }
 0x5fd   :  { %15926 = vmatpush3.msra.mxu0 %v21324_v20  ;;  %15503 = vmatprep.subr.mxu1 %v21306_v18  ;;  %v9624_v61 = vadd.f32 %v9605_v30, %v20850_v11 }
 0x5fe   :  { %15927 = vmatprep.subr.mxu0 %v21333_v33  ;;  %15504 = vmatpush3.msra.mxu1 %v21306_v18  ;;  %v15486_v63 = vpop.f32.mrf.mxu0 }
 0x5ff   :  { %15928 = vmatpush3.msra.mxu0 %v21333_v33  ;;  %15505 = vmatprep.subr.mxu1 %v21315_v55 }
 0x600   :  { %15929 = vmatprep.subr.mxu0 %v21344_v62  ;;  %15506 = vmatpush3.msra.mxu1 %v21315_v55 }
 0x601   :  { %15930 = vmatpush3.msra.mxu0 %v21344_v62  ;;  %15507 = vmatprep.subr.mxu1 %v21324_v20 }
 0x602   :  { %15931 = vmatprep.subr.mxu0 %v21353_v48  ;;  %15508 = vmatpush3.msra.mxu1 %v21324_v20 }
 0x603   :  { %15932 = vmatpush3.msra.mxu0 %v21353_v48  ;;  %15509 = vmatprep.subr.mxu1 %v21333_v33 }
 0x604   :  { %15933 = vmatprep.subr.mxu0 %v21362_v14  ;;  %15510 = vmatpush3.msra.mxu1 %v21333_v33 }
 0x605   :  { %15934 = vmatpush3.msra.mxu0 %v21362_v14  ;;  %15511 = vmatprep.subr.mxu1 %v21344_v62 }
 0x606   :  { %15935 = vmatprep.subr.mxu0 %v21371_v2  ;;  %15512 = vmatpush3.msra.mxu1 %v21344_v62 }
 0x607   :  { %15936 = vmatpush3.msra.mxu0 %v21371_v2  ;;  %15513 = vmatprep.subr.mxu1 %v21353_v48 }
 0x608   :  { %15938 = vmatmul.mubr.f32.vlgmr.msra.gmra.mxu0 %v21124_v39  ;;  %15981 = vmatprep.subr.mxu0 %v21161_v50  ;;  %v9615_v39 = vpop.f32.mrf.mxu0 }
 0x609   :  { %15514 = vmatpush3.msra.mxu1 %v21353_v48  ;;  %15940 = vmatprep.mubr.f32.mxu0 %v21136_v13  ;;  %v9625_v13 = vadd.f32 %v15483_v26, %v20860_v29  ;;  %v9626_v11 = vadd.f32 %v9615_v39, %v20868_v8  ;;  %v9627_v29 = vadd.f32 %v15486_v63, %v20876_v53  ;;  %v21829_v39 = vld [vmem:[%s22864_s2 + $0x58] sm:$0xff] }
 0x60a   :  { %15982 = vmatpush3.msra.mxu0 %v21161_v50  ;;  %15515 = vmatprep.subr.mxu1 %v21362_v14 }
 0x60b   :  { %15983 = vmatprep.subr.mxu0 %v21237_v60  ;;  %15516 = vmatpush3.msra.mxu1 %v21362_v14 }
 0x60c   :  { %15984 = vmatpush3.msra.mxu0 %v21237_v60  ;;  %15517 = vmatprep.subr.mxu1 %v21371_v2 }
 0x60d   :  { %15941 = vmatmul.mubr.f32.gmra.mxu0 %v21148_v23  ;;  %15985 = vmatprep.subr.mxu0 %v21248_v51 }
 0x60e   :  { %15518 = vmatpush3.msra.mxu1 %v21371_v2  ;;  %15519 = vmatprep.mubr.f32.mxu1 %v9624_v61  ;;  %v21822_v61 = vld [vmem:[%s22864_s2 + $0x60] sm:$0xff] }
 0x60f   :  { %15986 = vmatpush3.msra.mxu0 %v21248_v51  ;;  %16013 = vmatprep.mubr.f32.mxu0 %v21119_v37 }
 0x610   :  { %15520 = vmatmul.mubr.f32.vlgmr.msra.gmra.mxu1 %v9625_v13  ;;  %15563 = vmatprep.subr.mxu1 %v21161_v50 }
 0x611   :  { %15987 = vmatprep.subr.mxu0 %v21258_v56  ;;  %15564 = vmatpush3.msra.mxu1 %v21161_v50 }
 0x612   :  { %15988 = vmatpush3.msra.mxu0 %v21258_v56  ;;  %15565 = vmatprep.subr.mxu1 %v21237_v60 }
 0x613   :  { %15989 = vmatprep.subr.mxu0 %v21268_v17  ;;  %15522 = vmatprep.mubr.f32.mxu1 %v9626_v11  ;;  %v21836_v11 = vld [vmem:[%s22864_s2 + $0x50] sm:$0xff] }
 0x614   :  { %15566 = vmatpush3.msra.mxu1 %v21237_v60  ;;  %15990 = vmatpush3.msra.mxu0 %v21268_v17 }
 0x615   :  { %15523 = vmatmul.mubr.f32.gmra.mxu1 %v9627_v29  ;;  %15567 = vmatprep.subr.mxu1 %v21248_v51 }
 0x616   :  { %15991 = vmatprep.subr.mxu0 %v21277_v40  ;;  %15568 = vmatpush3.msra.mxu1 %v21248_v51 }
 0x617   :  { %15992 = vmatpush3.msra.mxu0 %v21277_v40  ;;  %15569 = vmatprep.subr.mxu1 %v21258_v56 }
 0x618   :  { %15993 = vmatprep.subr.mxu0 %v21286_v12  ;;  %15570 = vmatpush3.msra.mxu1 %v21258_v56 }
 0x619   :  { %15994 = vmatpush3.msra.mxu0 %v21286_v12  ;;  %15571 = vmatprep.subr.mxu1 %v21268_v17 }
 0x61a   :  { %15995 = vmatprep.subr.mxu0 %v21295_v38  ;;  %15572 = vmatpush3.msra.mxu1 %v21268_v17  ;;  %v15559_v8 = vpop.f32.mrf.mxu0 }
 0x61b   :  { %15996 = vmatpush3.msra.mxu0 %v21295_v38  ;;  %15573 = vmatprep.subr.mxu1 %v21277_v40  ;;  %v9807_v42 = vadd.f32 %v15559_v8, %v20864_v47  ;;  %v8788_v47 = vpop.f32.mrf.mxu1  ;;  %v21843_v8 = vld [vmem:[%s22864_s2 + $0x48] sm:$0xff] }
 0x61c   :  { %15997 = vmatprep.subr.mxu0 %v21306_v18  ;;  %15574 = vmatpush3.msra.mxu1 %v21277_v40  ;;  %v9787_v53 = vpop.f32.mrf.mxu0 }
 0x61d   :  { %15998 = vmatpush3.msra.mxu0 %v21306_v18  ;;  %15575 = vmatprep.subr.mxu1 %v21286_v12  ;;  %v9806_v37 = vadd.f32 %v9787_v53, %v20854_v35 }
 0x61e   :  { %15999 = vmatprep.subr.mxu0 %v21315_v55  ;;  %15576 = vmatpush3.msra.mxu1 %v21286_v12  ;;  %v15562_v23 = vpop.f32.mrf.mxu0 }
 0x61f   :  { %16000 = vmatpush3.msra.mxu0 %v21315_v55  ;;  %15577 = vmatprep.subr.mxu1 %v21295_v38 }
 0x620   :  { %16001 = vmatprep.subr.mxu0 %v21324_v20  ;;  %15578 = vmatpush3.msra.mxu1 %v21295_v38 }
 0x621   :  { %16002 = vmatpush3.msra.mxu0 %v21324_v20  ;;  %15579 = vmatprep.subr.mxu1 %v21306_v18 }
 0x622   :  { %16003 = vmatprep.subr.mxu0 %v21333_v33  ;;  %15580 = vmatpush3.msra.mxu1 %v21306_v18 }
 0x623   :  { %16004 = vmatpush3.msra.mxu0 %v21333_v33  ;;  %15581 = vmatprep.subr.mxu1 %v21315_v55 }
 0x624   :  { %16005 = vmatprep.subr.mxu0 %v21344_v62  ;;  %15582 = vmatpush3.msra.mxu1 %v21315_v55 }
 0x625   :  { %16006 = vmatpush3.msra.mxu0 %v21344_v62  ;;  %15583 = vmatprep.subr.mxu1 %v21324_v20 }
 0x626   :  { %16007 = vmatprep.subr.mxu0 %v21353_v48  ;;  %15584 = vmatpush3.msra.mxu1 %v21324_v20 }
 0x627   :  { %16008 = vmatpush3.msra.mxu0 %v21353_v48  ;;  %15585 = vmatprep.subr.mxu1 %v21333_v33 }
 0x628   :  { %16009 = vmatprep.subr.mxu0 %v21362_v14  ;;  %15586 = vmatpush3.msra.mxu1 %v21333_v33 }
 0x629   :  { %16010 = vmatpush3.msra.mxu0 %v21362_v14  ;;  %15587 = vmatprep.subr.mxu1 %v21344_v62 }
 0x62a   :  { %16011 = vmatprep.subr.mxu0 %v21371_v2  ;;  %15588 = vmatpush3.msra.mxu1 %v21344_v62 }
 0x62b   :  { %16012 = vmatpush3.msra.mxu0 %v21371_v2  ;;  %15589 = vmatprep.subr.mxu1 %v21353_v48 }
 0x62c   :  { %16014 = vmatmul.mubr.f32.vlgmr.msra.gmra.mxu0 %v21130_v45  ;;  %16057 = vmatprep.subr.mxu0 %v21161_v50  ;;  %v9797_v45 = vpop.f32.mrf.mxu0 }
 0x62d   :  { %15590 = vmatpush3.msra.mxu1 %v21353_v48  ;;  %16016 = vmatprep.mubr.f32.mxu0 %v21142_v31  ;;  %v9808_v35 = vadd.f32 %v9797_v45, %v20872_v4  ;;  %v8790_v4 = vpop.f32.mrf.mxu1  ;;  %v23790_v45 = vld [vmem:[#allocation216_spill] sm:$0xff] }
 0x62e   :  { %16058 = vmatpush3.msra.mxu0 %v21161_v50  ;;  %15591 = vmatprep.subr.mxu1 %v21362_v14 }
 0x62f   :  { %16059 = vmatprep.subr.mxu0 %v21237_v60  ;;  %15592 = vmatpush3.msra.mxu1 %v21362_v14 }
 0x630   :  { %16060 = vmatpush3.msra.mxu0 %v21237_v60  ;;  %15593 = vmatprep.subr.mxu1 %v21371_v2 }
 0x631   :  { %16017 = vmatmul.mubr.f32.gmra.mxu0 %v21153_v57  ;;  %16061 = vmatprep.subr.mxu0 %v21248_v51  ;;  %v9809_v57 = vadd.f32 %v15562_v23, %v20882_v54  ;;  %v8794_v54 = vpop.f32.mrf.mxu1 }
 0x632   :  { %15594 = vmatpush3.msra.mxu1 %v21371_v2  ;;  %15595 = vmatprep.mubr.f32.mxu1 %v9806_v37  ;;  %v21850_v37 = vld [vmem:[%s22864_s2 + $0x40] sm:$0xff] }
 0x633   :  { %16062 = vmatpush3.msra.mxu0 %v21248_v51  ;;  %15596 = vmatmul.mubr.f32.vlgmr.msra.gmra.mxu1 %v9807_v42  ;;  %v21648_v31 = vpop.f32.mrf.mxu1 }
 0x634   :  { %15639 = vmatprep.subr.mxu1 %v21161_v50  ;;  %16063 = vmatprep.subr.mxu0 %v21258_v56 }
 0x635   :  { %15640 = vmatpush3.msra.mxu1 %v21161_v50  ;;  %16064 = vmatpush3.msra.mxu0 %v21258_v56  ;;  %v8800_v49 = vpop.f32.mrf.mxu1 }
 0x636   :  { %15641 = vmatprep.subr.mxu1 %v21237_v60  ;;  %16065 = vmatprep.subr.mxu0 %v21268_v17 }
 0x637   :  { %16089 = vmatprep.mubr.f32.mxu0 %v8788_v47  ;;  %15598 = vmatprep.mubr.f32.mxu1 %v9808_v35  ;;  %v21664_v0 = vpop.f32.mrf.mxu1  ;;  %v21858_v35 = vld [vmem:[%s22864_s2 + $0x38] sm:$0xff] }
 0x638   :  { %15642 = vmatpush3.msra.mxu1 %v21237_v60  ;;  %16066 = vmatpush3.msra.mxu0 %v21268_v17 }
 0x639   :  { %15599 = vmatmul.mubr.f32.gmra.mxu1 %v9809_v57  ;;  %15643 = vmatprep.subr.mxu1 %v21248_v51  ;;  %v8806_v5 = vpop.f32.mrf.mxu1  ;;  %v21865_v57 = vld [vmem:[%s22864_s2 + $0x30] sm:$0xff] }
 0x63a   :  { %16067 = vmatprep.subr.mxu0 %v21277_v40  ;;  %15644 = vmatpush3.msra.mxu1 %v21248_v51  ;;  %v15635_v36 = vpop.f32.mrf.mxu0 }
 0x63b   :  { %16068 = vmatpush3.msra.mxu0 %v21277_v40  ;;  %15645 = vmatprep.subr.mxu1 %v21258_v56  ;;  %v9989_v7 = vadd.f32 %v15635_v36, %v20874_v44  ;;  %v8808_v59 = vpop.f32.mrf.mxu1  ;;  %v21873_v36 = vld [vmem:[%s22864_s2 + $0x28] sm:$0xff] }
 0x63c   :  { %16069 = vmatprep.subr.mxu0 %v21286_v12  ;;  %15646 = vmatpush3.msra.mxu1 %v21258_v56  ;;  %v9969_v58 = vpop.f32.mrf.mxu0 }
 0x63d   :  { %16070 = vmatpush3.msra.mxu0 %v21286_v12  ;;  %15647 = vmatprep.subr.mxu1 %v21268_v17  ;;  %v9988_v34 = vadd.f32 %v9969_v58, %v20866_v46  ;;  %v21877_v58 = vpop.permute.xlu0 %11436 }
 0x63e   :  { %16071 = vmatprep.subr.mxu0 %v21295_v38  ;;  %15648 = vmatpush3.msra.mxu1 %v21268_v17  ;;  %v15638_v1 = vpop.f32.mrf.mxu0 }
 0x63f   :  { %16072 = vmatpush3.msra.mxu0 %v21295_v38  ;;  %15649 = vmatprep.subr.mxu1 %v21277_v40  ;;  %v9991_v44 = vadd.f32 %v15638_v1, %v20886_v15 }
 0x640   :  { %16073 = vmatprep.subr.mxu0 %v21306_v18  ;;  %15650 = vmatpush3.msra.mxu1 %v21277_v40  ;;  %v9979_v22 = vpop.f32.mrf.mxu0 }
 0x641   :  { %16074 = vmatpush3.msra.mxu0 %v21306_v18  ;;  %15651 = vmatprep.subr.mxu1 %v21286_v12  ;;  %v9990_v46 = vadd.f32 %v9979_v22, %v20880_v32 }
 0x642   :  { %16075 = vmatprep.subr.mxu0 %v21315_v55  ;;  %15652 = vmatpush3.msra.mxu1 %v21286_v12 }
 0x643   :  { %16076 = vmatpush3.msra.mxu0 %v21315_v55  ;;  %15653 = vmatprep.subr.mxu1 %v21295_v38 }
 0x644   :  { %16077 = vmatprep.subr.mxu0 %v21324_v20  ;;  %15654 = vmatpush3.msra.mxu1 %v21295_v38 }
 0x645   :  { %16078 = vmatpush3.msra.mxu0 %v21324_v20  ;;  %15655 = vmatprep.subr.mxu1 %v21306_v18 }
 0x646   :  { %16079 = vmatprep.subr.mxu0 %v21333_v33  ;;  %15656 = vmatpush3.msra.mxu1 %v21306_v18 }
 0x647   :  { %16080 = vmatpush3.msra.mxu0 %v21333_v33  ;;  %15657 = vmatprep.subr.mxu1 %v21315_v55 }
 0x648   :  { %16081 = vmatprep.subr.mxu0 %v21344_v62  ;;  %15658 = vmatpush3.msra.mxu1 %v21315_v55 }
 0x649   :  { %16082 = vmatpush3.msra.mxu0 %v21344_v62  ;;  %15659 = vmatprep.subr.mxu1 %v21324_v20 }
 0x64a   :  { %16083 = vmatprep.subr.mxu0 %v21353_v48  ;;  %15660 = vmatpush3.msra.mxu1 %v21324_v20 }
 0x64b   :  { %16084 = vmatpush3.msra.mxu0 %v21353_v48  ;;  %15661 = vmatprep.subr.mxu1 %v21333_v33 }
 0x64c   :  { %16085 = vmatprep.subr.mxu0 %v21362_v14  ;;  %15662 = vmatpush3.msra.mxu1 %v21333_v33 }
 0x64d   :  { %16086 = vmatpush3.msra.mxu0 %v21362_v14  ;;  %15663 = vmatprep.subr.mxu1 %v21344_v62 }
 0x64e   :  { %16087 = vmatprep.subr.mxu0 %v21371_v2  ;;  %15664 = vmatpush3.msra.mxu1 %v21344_v62 }
 0x64f   :  { %16088 = vmatpush3.msra.mxu0 %v21371_v2  ;;  %15665 = vmatprep.subr.mxu1 %v21353_v48 }
 0x650   :  { %16090 = vmatmul.mubr.f32.vlgmr.msra.gmra.mxu0 %v8794_v54  ;;  %16133 = vmatprep.subr.mxu0 %v21161_v50  ;;  %v23791_v54 = vld [vmem:[#allocation170_spill] sm:$0xff] }
 0x651   :  { %15666 = vmatpush3.msra.mxu1 %v21353_v48  ;;  %16092 = vmatprep.mubr.f32.mxu0 %v8800_v49 }
 0x652   :  { %16134 = vmatpush3.msra.mxu0 %v21161_v50  ;;  %15667 = vmatprep.subr.mxu1 %v21362_v14  ;;  %v21683_v50 = vld [vmem:[%s22864_s2 + $0x78] sm:$0xff] }
 0x653   :  { %16135 = vmatprep.subr.mxu0 %v21237_v60  ;;  %15668 = vmatpush3.msra.mxu1 %v21362_v14 }
 0x654   :  { %16136 = vmatpush3.msra.mxu0 %v21237_v60  ;;  %15669 = vmatprep.subr.mxu1 %v21371_v2 }
 0x655   :  { %16093 = vmatmul.mubr.f32.gmra.mxu0 %v8806_v5  ;;  %16137 = vmatprep.subr.mxu0 %v21248_v51  ;;  %v23792_v5 = vld [vmem:[#allocation172_spill] sm:$0xff] }
 0x656   :  { %15670 = vmatpush3.msra.mxu1 %v21371_v2  ;;  %15671 = vmatprep.mubr.f32.mxu1 %v9988_v34 }
 0x657   :  { %16138 = vmatpush3.msra.mxu0 %v21248_v51  ;;  %16165 = vmatprep.mubr.f32.mxu0 %v8790_v4 }
 0x658   :  { %15672 = vmatmul.mubr.f32.vlgmr.msra.gmra.mxu1 %v9989_v7  ;;  %15715 = vmatprep.subr.mxu1 %v21683_v50  ;;  %v21891_v7 = vld [vmem:[%s22864_s2 + $0x18] sm:$0xff] }
 0x659   :  { %16139 = vmatprep.subr.mxu0 %v21258_v56  ;;  %15716 = vmatpush3.msra.mxu1 %v21683_v50 }
 0x65a   :  { %16140 = vmatpush3.msra.mxu0 %v21258_v56  ;;  %15717 = vmatprep.subr.mxu1 %v21237_v60 }
 0x65b   :  { %16141 = vmatprep.subr.mxu0 %v21268_v17  ;;  %15674 = vmatprep.mubr.f32.mxu1 %v9990_v46  ;;  %v15711_v32 = vpop.f32.mrf.mxu0 }
 0x65c   :  { %15718 = vmatpush3.msra.mxu1 %v21237_v60  ;;  %16142 = vmatpush3.msra.mxu0 %v21268_v17 }
 0x65d   :  { %15675 = vmatmul.mubr.f32.gmra.mxu1 %v9991_v44  ;;  %15719 = vmatprep.subr.mxu1 %v21248_v51  ;;  %v10151_v15 = vpop.f32.mrf.mxu0  ;;  %v23793_v44 = vld [vmem:[#allocation129_spill] sm:$0xff] }
 0x65e   :  { %16143 = vmatprep.subr.mxu0 %v21277_v40  ;;  %15720 = vmatpush3.msra.mxu1 %v21248_v51  ;;  %v10170_v16 = vadd.f32 %v10151_v15, %v20870_v27  ;;  %v23783_v27 = vld [vmem:[#allocation202_spill] sm:$0xff]  ;;  %v23794_v15 = vld [vmem:[#allocation85_spill] sm:$0xff] }
 0x65f   :  { %16144 = vmatpush3.msra.mxu0 %v21277_v40  ;;  %15721 = vmatprep.subr.mxu1 %v21258_v56  ;;  %v10171_v52 = vadd.f32 %v15711_v32, %v23783_v27 }
 0x660   :  { %16145 = vmatprep.subr.mxu0 %v21286_v12  ;;  %15722 = vmatpush3.msra.mxu1 %v21258_v56 }
 0x661   :  { %16146 = vmatpush3.msra.mxu0 %v21286_v12  ;;  %15723 = vmatprep.subr.mxu1 %v21268_v17  ;;  %v15714_v24 = vpop.f32.mrf.mxu0 }
 0x662   :  { %16147 = vmatprep.subr.mxu0 %v21295_v38  ;;  %15724 = vmatpush3.msra.mxu1 %v21268_v17  ;;  %v10173_v41 = vadd.f32 %v15714_v24, %v23784_v19 }
 0x663   :  { %16148 = vmatpush3.msra.mxu0 %v21295_v38  ;;  %15725 = vmatprep.subr.mxu1 %v21277_v40  ;;  %v10161_v43 = vpop.f32.mrf.mxu0 }
 0x664   :  { %16149 = vmatprep.subr.mxu0 %v21306_v18  ;;  %15726 = vmatpush3.msra.mxu1 %v21277_v40  ;;  %v10172_v6 = vadd.f32 %v10161_v43, %v20884_v28 }
 0x665   :  { %16150 = vmatpush3.msra.mxu0 %v21306_v18  ;;  %15727 = vmatprep.subr.mxu1 %v21286_v12 }
 0x666   :  { %16151 = vmatprep.subr.mxu0 %v21315_v55  ;;  %15728 = vmatpush3.msra.mxu1 %v21286_v12 }
 0x667   :  { %16152 = vmatpush3.msra.mxu0 %v21315_v55  ;;  %15729 = vmatprep.subr.mxu1 %v21295_v38 }
 0x668   :  { %16153 = vmatprep.subr.mxu0 %v21324_v20  ;;  %15730 = vmatpush3.msra.mxu1 %v21295_v38 }
 0x669   :  { %16154 = vmatpush3.msra.mxu0 %v21324_v20  ;;  %15731 = vmatprep.subr.mxu1 %v21306_v18 }
 0x66a   :  { %16155 = vmatprep.subr.mxu0 %v21333_v33  ;;  %15732 = vmatpush3.msra.mxu1 %v21306_v18 }
 0x66b   :  { %16156 = vmatpush3.msra.mxu0 %v21333_v33  ;;  %15733 = vmatprep.subr.mxu1 %v21315_v55 }
 0x66c   :  { %16157 = vmatprep.subr.mxu0 %v21344_v62  ;;  %15734 = vmatpush3.msra.mxu1 %v21315_v55 }
 0x66d   :  { %16158 = vmatpush3.msra.mxu0 %v21344_v62  ;;  %15735 = vmatprep.subr.mxu1 %v21324_v20 }
 0x66e   :  { %16159 = vmatprep.subr.mxu0 %v21353_v48  ;;  %15736 = vmatpush3.msra.mxu1 %v21324_v20 }
 0x66f   :  { %16160 = vmatpush3.msra.mxu0 %v21353_v48  ;;  %15737 = vmatprep.subr.mxu1 %v21333_v33 }
 0x670   :  { %16161 = vmatprep.subr.mxu0 %v21362_v14  ;;  %15738 = vmatpush3.msra.mxu1 %v21333_v33 }
 0x671   :  { %16162 = vmatpush3.msra.mxu0 %v21362_v14  ;;  %15739 = vmatprep.subr.mxu1 %v21344_v62 }
 0x672   :  { %16163 = vmatprep.subr.mxu0 %v21371_v2  ;;  %15740 = vmatpush3.msra.mxu1 %v21344_v62 }
 0x673   :  { %16164 = vmatpush3.msra.mxu0 %v21371_v2  ;;  %15741 = vmatprep.subr.mxu1 %v21353_v48 }
 0x674   :  { %16166 = vmatmul.mubr.f32.vlgmr.msra.gmra.mxu0 %v21648_v31  ;;  %15742 = vmatpush3.msra.mxu1 %v21353_v48 }
 0x675   :  { %16168 = vmatprep.mubr.f32.mxu0 %v21664_v0  ;;  %15743 = vmatprep.subr.mxu1 %v21362_v14  ;;  %v21882_v0 = vld [vmem:[%s22864_s2 + $0x20] sm:$0xff] }
 0x676   :  { %15744 = vmatpush3.msra.mxu1 %v21362_v14  ;;  %15747 = vmatprep.mubr.f32.mxu1 %v10170_v16  ;;  %v23795_v16 = vld [vmem:[#allocation198_spill] sm:$0xff] }
 0x677   :  { %15745 = vmatprep.subr.mxu1 %v21371_v2 }
 0x678   :  { %16169 = vmatmul.mubr.f32.gmra.mxu0 %v8808_v59  ;;  %15746 = vmatpush3.msra.mxu1 %v21371_v2 }
 0x679   :  { %15748 = vmatmul.mubr.f32.vlgmr.msra.gmra.mxu1 %v10171_v52  ;;  %15791 = vmatprep.subr.mxu1 %v21683_v50  ;;  %v23796_v52 = vld [vmem:[#allocation213_spill] sm:$0xff] }
 0x67a   :  { %15792 = vmatpush3.msra.mxu1 %v21683_v50  ;;  %15750 = vmatprep.mubr.f32.mxu1 %v10172_v6  ;;  %v21901_v6 = vld [vmem:[%s22864_s2 + $0x10] sm:$0xff] }
 0x67b   :  { %15793 = vmatprep.subr.mxu1 %v21237_v60  ;;  %11692 = vmatprep.mubr.f32.mxu0 %v23785_v9 }
 0x67c   :  { %15794 = vmatpush3.msra.mxu1 %v21237_v60  ;;  %v21763_v60 = vpop.f32.mrf.mxu1 }
 0x67d   :  { %15751 = vmatmul.mubr.f32.gmra.mxu1 %v10173_v41  ;;  %15795 = vmatprep.subr.mxu1 %v21248_v51 }
 0x67e   :  { %15796 = vmatpush3.msra.mxu1 %v21248_v51  ;;  %v21769_v51 = vpop.f32.mrf.mxu1 }
 0x67f   :  { %15797 = vmatprep.subr.mxu1 %v21258_v56 }
 0x680   :  { %15798 = vmatpush3.msra.mxu1 %v21258_v56  ;;  %v15787_v28 = vpop.f32.mrf.mxu0  ;;  %v21773_v56 = vpop.f32.mrf.mxu1 }
 0x681   :  { %15799 = vmatprep.subr.mxu1 %v21268_v17  ;;  %v10353_v26 = vadd.f32 %v15787_v28, %v23788_v10  ;;  %v23797_v28 = vld [vmem:[#allocation149_spill] sm:$0xff]  ;;  %v21915_v10 = vld [vmem:[%s22864_s2 + $0x8] sm:$0xff] }
 0x682   :  { %15800 = vmatpush3.msra.mxu1 %v21268_v17  ;;  %v10333_v21 = vpop.f32.mrf.mxu0  ;;  %v21779_v17 = vpop.f32.mrf.mxu1 }
 0x683   :  { %15801 = vmatprep.subr.mxu1 %v21277_v40  ;;  %v10352_v3 = vadd.f32 %v10333_v21, %v23786_v25  ;;  %v21908_v25 = vpop.permute.xlu0 %11426 }
 0x684   :  { %15802 = vmatpush3.msra.mxu1 %v21277_v40 }
 0x685   :  { %15803 = vmatprep.subr.mxu1 %v21286_v12  ;;  %15823 = vmatprep.mubr.f32.mxu1 %v10352_v3  ;;  %v15790_v40 = vpop.f32.mrf.mxu0  ;;  %v23798_v3 = vld [vmem:[#allocation200_spill] sm:$0xff] }
 0x686   :  { %15804 = vmatpush3.msra.mxu1 %v21286_v12  ;;  %v21783_v12 = vpop.f32.mrf.mxu1 }
 0x687   :  { %15805 = vmatprep.subr.mxu1 %v21295_v38 }
 0x688   :  { %15806 = vmatpush3.msra.mxu1 %v21295_v38  ;;  %v10343_v38 = vpop.f32.mrf.mxu0 }
 0x689   :  { %15807 = vmatprep.subr.mxu1 %v21306_v18 }
 0x68a   :  { %15808 = vmatpush3.msra.mxu1 %v21306_v18  ;;  %v21789_v18 = vpop.f32.mrf.mxu1 }
 0x68b   :  { %15809 = vmatprep.subr.mxu1 %v21315_v55 }
 0x68c   :  { %15810 = vmatpush3.msra.mxu1 %v21315_v55  ;;  %v23787_v55 = vld [vmem:[#allocation160_spill] sm:$0xff] }
 0x68d   :  { %15811 = vmatprep.subr.mxu1 %v21324_v20 }
 0x68e   :  { %15812 = vmatpush3.msra.mxu1 %v21324_v20  ;;  %v10354_v20 = vadd.f32 %v10343_v38, %v23787_v55  ;;  %v23799_v55 = vld [vmem:[#allocation72_spill] sm:$0xff] }
 0x68f   :  { %15813 = vmatprep.subr.mxu1 %v21333_v33 }
 0x690   :  { %15814 = vmatpush3.msra.mxu1 %v21333_v33  ;;  %v21797_v33 = vpop.f32.mrf.mxu1 }
 0x691   :  { %15815 = vmatprep.subr.mxu1 %v21344_v62 }
 0x692   :  { %15816 = vmatpush3.msra.mxu1 %v21344_v62  ;;  %v23789_v62 = vld [vmem:[#allocation153_spill] sm:$0xff]  ;;  %v21809_v30 = vpop.f32.mrf.mxu1 }
 0x693   :  { %15817 = vmatprep.subr.mxu1 %v21353_v48 }
 0x694   :  { %15818 = vmatpush3.msra.mxu1 %v21353_v48  ;;  %v10355_v48 = vadd.f32 %v15790_v40, %v23789_v62  ;;  %v15369_v63 = vpop.f32.mrf.mxu1  ;;  %v23800_v62 = vld [vmem:[#allocation152_spill] sm:$0xff] }
 0x695   :  { %15819 = vmatprep.subr.mxu1 %v21362_v14  ;;  %v9350_v43 = vadd.f32 %v15369_v63, %v23795_v16 }
 0x696   :  { %15820 = vmatpush3.msra.mxu1 %v21362_v14  ;;  %v21806_v14 = vld [vmem:[%s22864_s2 + $0x70] sm:$0xff]  ;;  %v9330_v13 = vpop.f32.mrf.mxu1 }
 0x697   :  { %15821 = vmatprep.subr.mxu1 %v21371_v2  ;;  %v9349_v40 = vadd.f32 %v9330_v13, %v23798_v3  ;;  %v11455_v13 = vadd.f32 %v21908_v25, %v9350_v43 }
 0x698   :  { %15822 = vmatpush3.msra.mxu1 %v21371_v2  ;;  %v21815_v2 = vld [vmem:[%s22864_s2 + $0x68] sm:$0xff]  ;;  %v15372_v53 = vpop.f32.mrf.mxu1 }
 0x699   :  { %15824 = vmatmul.mubr.f32.vlgmr.msra.gmra.mxu1 %v10353_v26  ;;  %15867 = vmatprep.subr.mxu1 %v21683_v50  ;;  %v9352_v31 = vadd.f32 %v15372_v53, %v23791_v54 }
 0x69a   :  { %15868 = vmatpush3.msra.mxu1 %v21683_v50  ;;  %15826 = vmatprep.mubr.f32.mxu1 %v10354_v20  ;;  %v9340_v47 = vpop.f32.mrf.mxu1 }
 0x69b   :  { %15869 = vmatprep.subr.mxu1 %v21806_v14  ;;  %v11483_v34 = vadd.f32 %v21877_v58, %v9352_v31  ;;  %v9351_v22 = vadd.f32 %v9340_v47, %v23792_v5  ;;  %v23802_v47 = vld [vmem:[#allocation114_spill] sm:$0xff]  ;;  %v23803_v31 = vld [vmem:[#allocation20_spill] sm:$0xff] }
 0x69c   :  { %15870 = vmatpush3.msra.mxu1 %v21806_v14 }
 0x69d   :  { %15827 = vmatmul.mubr.f32.gmra.mxu1 %v10355_v48  ;;  %15871 = vmatprep.subr.mxu1 %v21815_v2  ;;  %v11539_v38 = vmax.f32 %v11483_v34, 0.0  ;;  %v11469_v20 = vadd.f32 %v23799_v55, %v9351_v22  ;;  %v11441_v34 = vadd.f32 %v23802_v47, %v9349_v40  ;;  %v23811_v40 = vld [vmem:[#allocation19_spill] sm:$0xff] }
 0x69e   :  { %15872 = vmatpush3.msra.mxu1 %v21815_v2 }
 0x69f   :  { %15873 = vmatprep.subr.mxu1 %v21822_v61  ;;  %v11525_v5 = vmax.f32 %v11469_v20, 0.0  ;;  %v14058_v20 = vld [vmem:[%s22865_s15 + $0x20] sm:$0xff] }
 0x6a0   :  { %15874 = vmatpush3.msra.mxu1 %v21822_v61 }
 0x6a1   :  { %15875 = vmatprep.subr.mxu1 %v21829_v39 }
 0x6a2   :  { %15876 = vmatpush3.msra.mxu1 %v21829_v39 }
 0x6a3   :  { %15877 = vmatprep.subr.mxu1 %v21836_v11 }
 0x6a4   :  { %15878 = vmatpush3.msra.mxu1 %v21836_v11  ;;  %v15863_v29 = vpop.f32.mrf.mxu0 }
 0x6a5   :  { %15879 = vmatprep.subr.mxu1 %v21843_v8 }
 0x6a6   :  { %15880 = vmatpush3.msra.mxu1 %v21843_v8  ;;  %v10515_v23 = vpop.f32.mrf.mxu0 }
 0x6a7   :  { %15881 = vmatprep.subr.mxu1 %v21850_v37  ;;  %v10534_v42 = vadd.f32 %v10515_v23, %v23790_v45  ;;  %v23801_v23 = vld [vmem:[#allocation137_spill] sm:$0xff] }
 0x6a8   :  { %15882 = vmatpush3.msra.mxu1 %v21850_v37  ;;  %v10535_v45 = vadd.f32 %v15863_v29, %v23801_v23  ;;  %v23804_v29 = vld [vmem:[#allocation9_spill] sm:$0xff]  ;;  %v23813_v23 = vld [vmem:[#allocation99_spill] sm:$0xff] }
 0x6a9   :  { %15883 = vmatprep.subr.mxu1 %v21858_v35  ;;  %15899 = vmatprep.mubr.f32.mxu1 %v10534_v42  ;;  %v15866_v1 = vpop.f32.mrf.mxu0  ;;  %v21927_v42 = vld [vmem:[%s22864_s2] sm:$0xff]  ;;  %v11595_v22 = vadd.f32 %v11539_v38, %v23804_v29 }
 0x6aa   :  { %15884 = vmatpush3.msra.mxu1 %v21858_v35 }
 0x6ab   :  { %15885 = vmatprep.subr.mxu1 %v21865_v57  ;;  %v10525_v59 = vpop.f32.mrf.mxu0 }
 0x6ac   :  { %15886 = vmatpush3.msra.mxu1 %v21865_v57  ;;  %v15445_v4 = vpop.f32.mrf.mxu1  ;;  %v10536_v48 = vadd.f32 %v10525_v59, %v23800_v62  ;;  %v11497_v59 = vmax.f32 %v11441_v34, 0.0 }
 0x6ad   :  { %15887 = vmatprep.subr.mxu1 %v21873_v36  ;;  %v9532_v32 = vadd.f32 %v15445_v4, %v23793_v44  ;;  %v23805_v44 = vld [vmem:[#allocation28_spill] sm:$0xff] }
 0x6ae   :  { %15888 = vmatpush3.msra.mxu1 %v21873_v36  ;;  %v9512_v49 = vpop.f32.mrf.mxu1  ;;  %v11553_v38 = vadd.f32 %v11497_v59, %v23811_v40  ;;  %v23817_v59 = vld [vmem:[#allocation82_spill] sm:$0xff]  ;;  %v23821_v40 = vld [vmem:[#allocation196_spill] sm:$0xff] }
 0x6af   :  { %15889 = vmatprep.subr.mxu1 %v21882_v0  ;;  %v9531_v19 = vadd.f32 %v9512_v49, %v23796_v52  ;;  %v11456_v26 = vadd.f32 %v21908_v25, %v9532_v32 }
 0x6b0   :  { %15890 = vmatpush3.msra.mxu1 %v21882_v0 }
 0x6b1   :  { %15891 = vmatprep.subr.mxu1 %v21891_v7  ;;  %v15448_v46 = vpop.f32.mrf.mxu1  ;;  %v11442_v4 = vadd.f32 %v23802_v47, %v9531_v19  ;;  %v23808_v19 = vld [vmem:[#allocation30_spill] sm:$0xff] }
 0x6b2   :  { %15892 = vmatpush3.msra.mxu1 %v21891_v7  ;;  %v9534_v24 = vadd.f32 %v15448_v46, %v23794_v15  ;;  %v11512_v46 = vmax.f32 %v11456_v26, 0.0  ;;  %v11511_v15 = vmax.f32 %v11455_v13, 0.0 }
 0x6b3   :  { %15893 = vmatprep.subr.mxu1 %v21901_v6  ;;  %v9522_v27 = vpop.f32.mrf.mxu1  ;;  %v11498_v43 = vmax.f32 %v11442_v4, 0.0  ;;  %v23814_v4 = vld [vmem:[#allocation229_spill] sm:$0xff] }
 0x6b4   :  { %15894 = vmatpush3.msra.mxu1 %v21901_v6  ;;  %v11484_v41 = vadd.f32 %v21877_v58, %v9534_v24  ;;  %v9533_v21 = vadd.f32 %v9522_v27, %v23797_v28  ;;  %v23806_v24 = vld [vmem:[#allocation179_spill] sm:$0xff]  ;;  %v23807_v27 = vld [vmem:[#allocation13_spill] sm:$0xff]  ;;  %v23809_v28 = vld [vmem:[#allocation16_spill] sm:$0xff] }
 0x6b5   :  { %15895 = vmatprep.subr.mxu1 %v21915_v10  ;;  %v10537_v16 = vadd.f32 %v15866_v1, %v23806_v24  ;;  %v11581_v52 = vadd.f32 %v11525_v5, %v23807_v27  ;;  %v11567_v1 = vadd.f32 %v11511_v15, %v23809_v28  ;;  %v23819_v28 = vld [vmem:[#allocation193_spill] sm:$0xff] }
 0x6b6   :  { %15896 = vmatpush3.msra.mxu1 %v21915_v10  ;;  %v11540_v63 = vmax.f32 %v11484_v41, 0.0  ;;  %v11470_v53 = vadd.f32 %v23799_v55, %v9533_v21  ;;  %v11568_v41 = vadd.f32 %v11512_v46, %v23808_v19  ;;  %v23810_v21 = vld [vmem:[#allocation36_spill] sm:$0xff]  ;;  %v23818_v19 = vld [vmem:[#allocation139_spill] sm:$0xff] }
 0x6b7   :  { %15897 = vmatprep.subr.mxu1 %v21927_v42  ;;  %v11554_v3 = vadd.f32 %v11498_v43, %v23810_v21  ;;  %v23820_v21 = vld [vmem:[#allocation96_spill] sm:$0xff] }
 0x6b8   :  { %15898 = vmatpush3.msra.mxu1 %v21927_v42  ;;  %v11526_v54 = vmax.f32 %v11470_v53, 0.0  ;;  %v11596_v49 = vadd.f32 %v11540_v63, %v23803_v31  ;;  %v23815_v31 = vld [vmem:[#allocation181_spill] sm:$0xff] }
 0x6b9   :  { %15900 = vmatmul.mubr.f32.vlgmr.msra.gmra.mxu1 %v10535_v45  ;;  %15943 = vmatprep.subr.mxu1 %v21683_v50 }
 0x6ba   :  { %15944 = vmatpush3.msra.mxu1 %v21683_v50  ;;  %15902 = vmatprep.mubr.f32.mxu1 %v10536_v48  ;;  %v11582_v32 = vadd.f32 %v11526_v54, %v23805_v44  ;;  %v23812_v48 = vld [vmem:[#allocation183_spill] sm:$0xff]  ;;  %v23816_v44 = vld [vmem:[#allocation161_spill] sm:$0xff] }
 0x6bb   :  { %15945 = vmatprep.subr.mxu1 %v21806_v14  ;;  %11652 = vmatprep.subr.mxu0 %v11596_v49 }
 0x6bc   :  { %15946 = vmatpush3.msra.mxu1 %v21806_v14  ;;  %11653 = vmatpush1.msra.mxu0 %v11595_v22 }
 0x6bd   :  { %15903 = vmatmul.mubr.f32.gmra.mxu1 %v10537_v16  ;;  %15947 = vmatprep.subr.mxu1 %v21815_v2 }
 0x6be   :  { %15948 = vmatpush3.msra.mxu1 %v21815_v2  ;;  %11654 = vmatprep.subr.mxu0 %v11582_v32 }
 0x6bf   :  { %15949 = vmatprep.subr.mxu1 %v21822_v61  ;;  %11655 = vmatpush1.msra.mxu0 %v11581_v52 }
 0x6c0   :  { %15950 = vmatpush3.msra.mxu1 %v21822_v61  ;;  %11656 = vmatprep.subr.mxu0 %v11568_v41 }
 0x6c1   :  { %15951 = vmatprep.subr.mxu1 %v21829_v39  ;;  %11657 = vmatpush1.msra.mxu0 %v11567_v1 }
 0x6c2   :  { %15952 = vmatpush3.msra.mxu1 %v21829_v39  ;;  %11658 = vmatprep.subr.mxu0 %v11554_v3 }
 0x6c3   :  { %15953 = vmatprep.subr.mxu1 %v21836_v11  ;;  %11659 = vmatpush1.msra.mxu0 %v11553_v38 }
 0x6c4   :  { %15954 = vmatpush3.msra.mxu1 %v21836_v11  ;;  %14062 = vmatmul.mubr.msk.f32.vlgmr.msra.gmra.mxu0 %vm552_vm2, %v14058_v20  ;;  %v23822_v20 = vld [vmem:[#allocation150_spill] sm:$0xff] }
 0x6c5   :  { %15955 = vmatprep.subr.mxu1 %v21843_v8  ;;  %11698 = vmatprep.mubr.f32.mxu0 %v23785_v9 }
 0x6c6   :  { %15956 = vmatpush3.msra.mxu1 %v21843_v8 }
 0x6c7   :  { %15957 = vmatprep.subr.mxu1 %v21850_v37 }
 0x6c8   :  { %15958 = vmatpush3.msra.mxu1 %v21850_v37  ;;  %v15939_v26 = vpop.f32.mrf.mxu0 }
 0x6c9   :  { %15959 = vmatprep.subr.mxu1 %v21858_v35  ;;  %v10717_v54 = vadd.f32 %v15939_v26, %v23814_v4 }
 0x6ca   :  { %15960 = vmatpush3.msra.mxu1 %v21858_v35  ;;  %v10697_v62 = vpop.f32.mrf.mxu0 }
 0x6cb   :  { %15961 = vmatprep.subr.mxu1 %v21865_v57  ;;  %v10716_v63 = vadd.f32 %v10697_v62, %v23812_v48 }
 0x6cc   :  { %15962 = vmatpush3.msra.mxu1 %v21865_v57 }
 0x6cd   :  { %15963 = vmatprep.subr.mxu1 %v21873_v36  ;;  %15975 = vmatprep.mubr.f32.mxu1 %v10716_v63  ;;  %v15942_v53 = vpop.f32.mrf.mxu0  ;;  %v23823_v63 = vld [vmem:[#allocation209_spill] sm:$0xff] }
 0x6ce   :  { %15964 = vmatpush3.msra.mxu1 %v21873_v36  ;;  %v10719_v49 = vadd.f32 %v15942_v53, %v23815_v31  ;;  %v23826_v31 = vld [vmem:[#allocation225_spill] sm:$0xff] }
 0x6cf   :  { %15965 = vmatprep.subr.mxu1 %v21882_v0  ;;  %v10707_v13 = vpop.f32.mrf.mxu0 }
 0x6d0   :  { %15966 = vmatpush3.msra.mxu1 %v21882_v0  ;;  %v10718_v45 = vadd.f32 %v10707_v13, %v23813_v23  ;;  %v15521_v34 = vpop.f32.mrf.mxu1  ;;  %v23824_v13 = vld [vmem:[#allocation95_spill] sm:$0xff] }
 0x6d1   :  { %15967 = vmatprep.subr.mxu1 %v21891_v7  ;;  %v9714_v26 = vadd.f32 %v15521_v34, %v23822_v20  ;;  %v23830_v20 = vld [vmem:[#allocation31_spill] sm:$0xff] }
 0x6d2   :  { %15968 = vmatpush3.msra.mxu1 %v21891_v7  ;;  %v9694_v5 = vpop.f32.mrf.mxu1 }
 0x6d3   :  { %15969 = vmatprep.subr.mxu1 %v21901_v6 }
 0x6d4   :  { %15970 = vmatpush3.msra.mxu1 %v21901_v6 }
 0x6d5   :  { %15971 = vmatprep.subr.mxu1 %v21915_v10  ;;  %v15524_v22 = vpop.f32.mrf.mxu1 }
 0x6d6   :  { %15972 = vmatpush3.msra.mxu1 %v21915_v10  ;;  %v9716_v27 = vadd.f32 %v15524_v22, %v23817_v59 }
 0x6d7   :  { %15973 = vmatprep.subr.mxu1 %v21927_v42  ;;  %v9704_v15 = vpop.f32.mrf.mxu1 }
 0x6d8   :  { %15974 = vmatpush3.msra.mxu1 %v21927_v42  ;;  %v9715_v1 = vadd.f32 %v9704_v15, %v23819_v28  ;;  %v11485_v62 = vadd.f32 %v21877_v58, %v9716_v27  ;;  %v23828_v28 = vld [vmem:[#allocation25_spill] sm:$0xff] }
 0x6d9   :  { %15976 = vmatmul.mubr.f32.vlgmr.msra.gmra.mxu1 %v10717_v54  ;;  %16019 = vmatprep.subr.mxu1 %v21683_v50 }
 0x6da   :  { %16020 = vmatpush3.msra.mxu1 %v21683_v50  ;;  %15978 = vmatprep.mubr.f32.mxu1 %v10718_v45  ;;  %v23825_v45 = vld [vmem:[#allocation156_spill] sm:$0xff]  ;;  %v11471_v54 = vadd.f32 %v23799_v55, %v9715_v1  ;;  %v11541_v15 = vmax.f32 %v11485_v62, 0.0 }
 0x6db   :  { %16021 = vmatprep.subr.mxu1 %v21806_v14  ;;  %v9713_v4 = vadd.f32 %v9694_v5, %v23825_v45  ;;  %v11457_v5 = vadd.f32 %v21908_v25, %v9714_v26 }
 0x6dc   :  { %16022 = vmatpush3.msra.mxu1 %v21806_v14  ;;  %v11527_v27 = vmax.f32 %v11471_v54, 0.0 }
 0x6dd   :  { %15979 = vmatmul.mubr.f32.gmra.mxu1 %v10719_v49  ;;  %16023 = vmatprep.subr.mxu1 %v21815_v2  ;;  %v11443_v59 = vadd.f32 %v23802_v47, %v9713_v4  ;;  %v23834_v4 = vld [vmem:[#allocation37_spill] sm:$0xff] }
 0x6de   :  { %16024 = vmatpush3.msra.mxu1 %v21815_v2 }
 0x6df   :  { %16025 = vmatprep.subr.mxu1 %v21822_v61  ;;  %v11499_v62 = vmax.f32 %v11443_v59, 0.0 }
 0x6e0   :  { %16026 = vmatpush3.msra.mxu1 %v21822_v61 }
 0x6e1   :  { %16027 = vmatprep.subr.mxu1 %v21829_v39 }
 0x6e2   :  { %16028 = vmatpush3.msra.mxu1 %v21829_v39 }
 0x6e3   :  { %16029 = vmatprep.subr.mxu1 %v21836_v11 }
 0x6e4   :  { %16030 = vmatpush3.msra.mxu1 %v21836_v11 }
 0x6e5   :  { %16031 = vmatprep.subr.mxu1 %v21843_v8 }
 0x6e6   :  { %16032 = vmatpush3.msra.mxu1 %v21843_v8 }
 0x6e7   :  { %16033 = vmatprep.subr.mxu1 %v21850_v37 }
 0x6e8   :  { %16034 = vmatpush3.msra.mxu1 %v21850_v37 }
 0x6e9   :  { %16035 = vmatprep.subr.mxu1 %v21858_v35 }
 0x6ea   :  { %16036 = vmatpush3.msra.mxu1 %v21858_v35 }
 0x6eb   :  { %16037 = vmatprep.subr.mxu1 %v21865_v57 }
 0x6ec   :  { %16038 = vmatpush3.msra.mxu1 %v21865_v57  ;;  %v16015_v29 = vpop.f32.mrf.mxu0 }
 0x6ed   :  { %16039 = vmatprep.subr.mxu1 %v21873_v36  ;;  %v10899_v3 = vadd.f32 %v16015_v29, %v23820_v21  ;;  %v14059_v29 = vld [vmem:[%s22865_s15 + $0x28] sm:$0xff]  ;;  %v11513_v21 = vmax.f32 %v11457_v5, 0.0 }
 0x6ee   :  { %16040 = vmatpush3.msra.mxu1 %v21873_v36  ;;  %v10879_v46 = vpop.f32.mrf.mxu0  ;;  %14063 = vmatmul.mubr.msk.f32.gmra.mxu0 %vm552_vm2, %v14059_v29  ;;  %v14070_v29 = vld [vmem:[%s22865_s15 + $0x40] sm:$0xff] }
 0x6ef   :  { %16041 = vmatprep.subr.mxu1 %v21882_v0  ;;  %v10898_v32 = vadd.f32 %v10879_v46, %v23816_v44  ;;  %v23827_v44 = vld [vmem:[#allocation81_spill] sm:$0xff]  ;;  %11704 = vmatprep.mubr.f32.mxu0 %v23785_v9 }
 0x6f0   :  { %16042 = vmatpush3.msra.mxu1 %v21882_v0 }
 0x6f1   :  { %16043 = vmatprep.subr.mxu1 %v21891_v7  ;;  %v16018_v24 = vpop.f32.mrf.mxu0  ;;  %16051 = vmatprep.mubr.f32.mxu1 %v10898_v32 }
 0x6f2   :  { %16044 = vmatpush3.msra.mxu1 %v21891_v7  ;;  %v10901_v49 = vadd.f32 %v16018_v24, %v23826_v31  ;;  %v23835_v31 = vld [vmem:[#allocation34_spill] sm:$0xff] }
 0x6f3   :  { %16045 = vmatprep.subr.mxu1 %v21901_v6  ;;  %v15597_v16 = vpop.f32.mrf.mxu1  ;;  %v10889_v43 = vpop.f32.mrf.mxu0 }
 0x6f4   :  { %16046 = vmatpush3.msra.mxu1 %v21901_v6  ;;  %v10900_v41 = vadd.f32 %v10889_v43, %v23818_v19  ;;  %v9896_v38 = vadd.f32 %v15597_v16, %v23821_v40 }
 0x6f5   :  { %16047 = vmatprep.subr.mxu1 %v21915_v10  ;;  %v9876_v52 = vpop.f32.mrf.mxu1 }
 0x6f6   :  { %16048 = vmatpush3.msra.mxu1 %v21915_v10  ;;  %v9895_v53 = vadd.f32 %v9876_v52, %v23823_v63  ;;  %v11458_v22 = vadd.f32 %v21908_v25, %v9896_v38  ;;  %v14060_v52 = vld [vmem:[%s22865_s15 + $0x30] sm:$0xff] }
 0x6f7   :  { %16049 = vmatprep.subr.mxu1 %v21927_v42  ;;  %14064 = vmatmul.mubr.msk.f32.gmra.mxu0 %vm552_vm2, %v14060_v52 }
 0x6f8   :  { %16050 = vmatpush3.msra.mxu1 %v21927_v42  ;;  %v11444_v24 = vadd.f32 %v23802_v47, %v9895_v53  ;;  %v11514_v19 = vmax.f32 %v11458_v22, 0.0  ;;  %11710 = vmatprep.mubr.f32.mxu0 %v23785_v9  ;;  %v23832_v53 = vld [vmem:[#allocation33_spill] sm:$0xff] }
 0x6f9   :  { %16052 = vmatmul.mubr.f32.vlgmr.msra.gmra.mxu1 %v10899_v3  ;;  %16095 = vmatprep.subr.mxu1 %v21683_v50  ;;  %v15600_v48 = vpop.f32.mrf.mxu1  ;;  %v23829_v3 = vld [vmem:[#allocation23_spill] sm:$0xff] }
 0x6fa   :  { %16096 = vmatpush3.msra.mxu1 %v21683_v50  ;;  %16054 = vmatprep.mubr.f32.mxu1 %v10900_v41  ;;  %v9898_v23 = vadd.f32 %v15600_v48, %v23824_v13  ;;  %v11597_v40 = vadd.f32 %v11541_v15, %v23829_v3  ;;  %v11500_v38 = vmax.f32 %v11444_v24, 0.0  ;;  %v23831_v48 = vld [vmem:[#allocation26_spill] sm:$0xff]  ;;  %v11570_v13 = vadd.f32 %v11514_v19, %v23832_v53  ;;  %v23837_v15 = vld [vmem:[#allocation204_spill] sm:$0xff]  ;;  %v23848_v53 = vld [vmem:[#allocation97_spill] sm:$0xff] }
 0x6fb   :  { %16097 = vmatprep.subr.mxu1 %v21806_v14  ;;  %v9886_v34 = vpop.f32.mrf.mxu1  ;;  %v11583_v63 = vadd.f32 %v11527_v27, %v23831_v48  ;;  %v23839_v27 = vld [vmem:[#allocation94_spill] sm:$0xff] }
 0x6fc   :  { %16098 = vmatpush3.msra.mxu1 %v21806_v14  ;;  %v11486_v46 = vadd.f32 %v21877_v58, %v9898_v23  ;;  %v9897_v32 = vadd.f32 %v9886_v34, %v23827_v44  ;;  %v23833_v23 = vld [vmem:[#allocation29_spill] sm:$0xff]  ;;  %v11556_v54 = vadd.f32 %v11500_v38, %v23834_v4  ;;  %v14061_v34 = vld [vmem:[%s22865_s15 + $0x38] sm:$0xff]  ;;  %v23836_v44 = vld [vmem:[#allocation208_spill] sm:$0xff] }
 0x6fd   :  { %16055 = vmatmul.mubr.f32.gmra.mxu1 %v10901_v49  ;;  %16099 = vmatprep.subr.mxu1 %v21815_v2  ;;  %v11569_v45 = vadd.f32 %v11513_v21, %v23833_v23  ;;  %v11555_v49 = vadd.f32 %v11499_v62, %v23835_v31  ;;  %v23847_v21 = vld [vmem:[#allocation234_spill] sm:$0xff]  ;;  %v23850_v4 = vld [vmem:[#allocation221_spill] sm:$0xff] }
 0x6fe   :  { %v11542_v16 = vmax.f32 %v11486_v46, 0.0  ;;  %16100 = vmatpush3.msra.mxu1 %v21815_v2  ;;  %v11472_v43 = vadd.f32 %v23799_v55, %v9897_v32  ;;  %14065 = vmatmul.mubr.msk.f32.gmra.mxu0 %vm552_vm2, %v14061_v34  ;;  %v8985_v3 = vadd.f32 %v21769_v51, %v23847_v21  ;;  %v23851_v34 = vld [vmem:[#allocation8_spill] sm:$0xff]  ;;  %v23864_v21 = vld [vmem:[#allocation22_spill] sm:$0xff] }
 0x6ff   :  { %16101 = vmatprep.subr.mxu1 %v21822_v61  ;;  %11899 = vmatprep.mubr.f32.mxu0 %v23785_v9 }
 0x700   :  { %v11528_v41 = vmax.f32 %v11472_v43, 0.0  ;;  %16102 = vmatpush3.msra.mxu1 %v21822_v61  ;;  %v11598_v1 = vadd.f32 %v11542_v16, %v23828_v28  ;;  %v23838_v43 = vld [vmem:[#allocation93_spill] sm:$0xff]  ;;  %v11439_v62 = vadd.f32 %v23802_v47, %v8985_v3 }
 0x701   :  { %16103 = vmatprep.subr.mxu1 %v21829_v39 }
 0x702   :  { %16104 = vmatpush3.msra.mxu1 %v21829_v39  ;;  %11859 = vmatprep.subr.mxu0 %v11598_v1  ;;  %v11584_v26 = vadd.f32 %v11528_v41, %v23830_v20 }
 0x703   :  { %16105 = vmatprep.subr.mxu1 %v21836_v11  ;;  %11860 = vmatpush1.msra.mxu0 %v11597_v40 }
 0x704   :  { %16106 = vmatpush3.msra.mxu1 %v21836_v11  ;;  %11861 = vmatprep.subr.mxu0 %v11584_v26 }
 0x705   :  { %16107 = vmatprep.subr.mxu1 %v21843_v8  ;;  %11862 = vmatpush1.msra.mxu0 %v11583_v63 }
 0x706   :  { %16108 = vmatpush3.msra.mxu1 %v21843_v8  ;;  %11863 = vmatprep.subr.mxu0 %v11570_v13 }
 0x707   :  { %16109 = vmatprep.subr.mxu1 %v21850_v37  ;;  %11864 = vmatpush1.msra.mxu0 %v11569_v45 }
 0x708   :  { %16110 = vmatpush3.msra.mxu1 %v21850_v37  ;;  %11865 = vmatprep.subr.mxu0 %v11556_v54 }
 0x709   :  { %16111 = vmatprep.subr.mxu1 %v21858_v35  ;;  %11866 = vmatpush1.msra.mxu0 %v11555_v49 }
 0x70a   :  { %16112 = vmatpush3.msra.mxu1 %v21858_v35  ;;  %14074 = vmatmul.mubr.msk.f32.vlgmr.msra.gmra.mxu0 %vm552_vm2, %v14070_v29 }
 0x70b   :  { %16113 = vmatprep.subr.mxu1 %v21865_v57  ;;  %11905 = vmatprep.mubr.f32.mxu0 %v23785_v9 }
 0x70c   :  { %16114 = vmatpush3.msra.mxu1 %v21865_v57 }
 0x70d   :  { %16115 = vmatprep.subr.mxu1 %v21873_v36 }
 0x70e   :  { %16116 = vmatpush3.msra.mxu1 %v21873_v36 }
 0x70f   :  { %16117 = vmatprep.subr.mxu1 %v21882_v0 }
 0x710   :  { %16118 = vmatpush3.msra.mxu1 %v21882_v0  ;;  %v16091_v22 = vpop.f32.mrf.mxu0 }
 0x711   :  { %16119 = vmatprep.subr.mxu1 %v21891_v7  ;;  %v11081_v24 = vadd.f32 %v16091_v22, %v23837_v15 }
 0x712   :  { %16120 = vmatpush3.msra.mxu1 %v21891_v7  ;;  %v11061_v46 = vpop.f32.mrf.mxu0 }
 0x713   :  { %16121 = vmatprep.subr.mxu1 %v21901_v6  ;;  %v11080_v32 = vadd.f32 %v11061_v46, %v23836_v44 }
 0x714   :  { %16122 = vmatpush3.msra.mxu1 %v21901_v6 }
 0x715   :  { %16123 = vmatprep.subr.mxu1 %v21915_v10  ;;  %v16094_v5 = vpop.f32.mrf.mxu0  ;;  %16127 = vmatprep.mubr.f32.mxu1 %v11080_v32 }
 0x716   :  { %16124 = vmatpush3.msra.mxu1 %v21915_v10  ;;  %v11083_v52 = vadd.f32 %v16094_v5, %v23839_v27  ;;  %v23853_v5 = vld [vmem:[#allocation14_spill] sm:$0xff] }
 0x717   :  { %16125 = vmatprep.subr.mxu1 %v21927_v42  ;;  %v11071_v16 = vpop.f32.mrf.mxu0 }
 0x718   :  { %16126 = vmatpush3.msra.mxu1 %v21927_v42  ;;  %v11082_v59 = vadd.f32 %v11071_v16, %v23838_v43  ;;  %v23854_v16 = vld [vmem:[#allocation12_spill] sm:$0xff] }
 0x719   :  { %16128 = vmatmul.mubr.f32.vlgmr.msra.gmra.mxu1 %v11081_v24  ;;  %16171 = vmatprep.subr.mxu1 %v21683_v50  ;;  %v11495_v24 = vmax.f32 %v11439_v62, 0.0 }
 0x71a   :  { %16172 = vmatpush3.msra.mxu1 %v21683_v50  ;;  %16130 = vmatprep.mubr.f32.mxu1 %v11082_v59  ;;  %v23840_v50 = vld [vmem:[#allocation87_spill] sm:$0xff]  ;;  %v23855_v59 = vld [vmem:[#allocation148_spill] sm:$0xff] }
 0x71b   :  { %16173 = vmatprep.subr.mxu1 %v21806_v14 }
 0x71c   :  { %16174 = vmatpush3.msra.mxu1 %v21806_v14  ;;  %v9170_v14 = vadd.f32 %v21797_v33, %v23840_v50 }
 0x71d   :  { %16131 = vmatmul.mubr.f32.gmra.mxu1 %v11083_v52  ;;  %16175 = vmatprep.subr.mxu1 %v21815_v2  ;;  %v23856_v52 = vld [vmem:[#allocation135_spill] sm:$0xff] }
 0x71e   :  { %16176 = vmatpush3.msra.mxu1 %v21815_v2  ;;  %v22119_v2 = vpop.f32.mrf.mxu1  ;;  %v11482_v33 = vadd.f32 %v21877_v58, %v9170_v14  ;;  %v23857_v14 = vld [vmem:[#allocation186_spill] sm:$0xff] }
 0x71f   :  { %16177 = vmatprep.subr.mxu1 %v21822_v61 }
 0x720   :  { %16178 = vmatpush3.msra.mxu1 %v21822_v61  ;;  %v23841_v61 = vld [vmem:[#allocation67_spill] sm:$0xff]  ;;  %v22132_v19 = vpop.f32.mrf.mxu1 }
 0x721   :  { %16179 = vmatprep.subr.mxu1 %v21829_v39 }
 0x722   :  { %16180 = vmatpush3.msra.mxu1 %v21829_v39  ;;  %v8988_v39 = vadd.f32 %v21773_v56, %v23841_v61  ;;  %v23845_v56 = vld [vmem:[#allocation233_spill] sm:$0xff]  ;;  %v15676_v40 = vpop.f32.mrf.mxu1 }
 0x723   :  { %16181 = vmatprep.subr.mxu1 %v21836_v11  ;;  %v8986_v28 = vadd.f32 %v21763_v60, %v23845_v56 }
 0x724   :  { %16182 = vmatpush3.msra.mxu1 %v21836_v11  ;;  %v23842_v11 = vld [vmem:[#allocation176_spill] sm:$0xff]  ;;  %v10068_v63 = vpop.f32.mrf.mxu1 }
 0x725   :  { %16183 = vmatprep.subr.mxu1 %v21843_v8  ;;  %v10079_v27 = vadd.f32 %v10068_v63, %v23855_v59 }
 0x726   :  { %16184 = vmatpush3.msra.mxu1 %v21843_v8  ;;  %v9169_v8 = vadd.f32 %v21809_v30, %v23842_v11  ;;  %v11481_v30 = vadd.f32 %v21877_v58, %v8988_v39  ;;  %v23858_v39 = vld [vmem:[#allocation127_spill] sm:$0xff] }
 0x727   :  { %16185 = vmatprep.subr.mxu1 %v21850_v37 }
 0x728   :  { %16186 = vmatpush3.msra.mxu1 %v21850_v37  ;;  %v23843_v37 = vld [vmem:[#allocation191_spill] sm:$0xff]  ;;  %v11468_v1 = vadd.f32 %v23799_v55, %v9169_v8  ;;  %v11537_v20 = vmax.f32 %v11481_v30, 0.0  ;;  %v23859_v8 = vld [vmem:[#allocation17_spill] sm:$0xff] }
 0x729   :  { %16187 = vmatprep.subr.mxu1 %v21858_v35  ;;  %v23862_v30 = vld [vmem:[#allocation123_spill] sm:$0xff] }
 0x72a   :  { %16188 = vmatpush3.msra.mxu1 %v21858_v35  ;;  %v8987_v35 = vadd.f32 %v21779_v17, %v23843_v37  ;;  %v11524_v26 = vmax.f32 %v11468_v1, 0.0  ;;  %v11593_v29 = vadd.f32 %v11537_v20, %v23851_v34  ;;  %v23869_v34 = vld [vmem:[#allocation24_spill] sm:$0xff] }
 0x72b   :  { %16189 = vmatprep.subr.mxu1 %v21865_v57 }
 0x72c   :  { %16190 = vmatpush3.msra.mxu1 %v21865_v57  ;;  %v23844_v57 = vld [vmem:[#allocation147_spill] sm:$0xff]  ;;  %v11580_v15 = vadd.f32 %v11524_v26, %v23853_v5 }
 0x72d   :  { %16191 = vmatprep.subr.mxu1 %v21873_v36  ;;  %v9168_v41 = vadd.f32 %v21783_v12, %v23844_v57  ;;  %v11467_v12 = vadd.f32 %v23799_v55, %v8987_v35  ;;  %v23860_v35 = vld [vmem:[#allocation15_spill] sm:$0xff]  ;;  %v23861_v57 = vld [vmem:[#allocation178_spill] sm:$0xff] }
 0x72e   :  { %16192 = vmatpush3.msra.mxu1 %v21873_v36  ;;  %v23846_v36 = vld [vmem:[#allocation177_spill] sm:$0xff]  ;;  %v23867_v26 = vld [vmem:[#allocation215_spill] sm:$0xff] }
 0x72f   :  { %16193 = vmatprep.subr.mxu1 %v21882_v0  ;;  %v9167_v17 = vadd.f32 %v21789_v18, %v23846_v36  ;;  %v11454_v60 = vadd.f32 %v21908_v25, %v9168_v41  ;;  %v11453_v18 = vadd.f32 %v21908_v25, %v8986_v28  ;;  %v11523_v48 = vmax.f32 %v11467_v12, 0.0  ;;  %v23865_v12 = vld [vmem:[#allocation18_spill] sm:$0xff] }
 0x730   :  { %16194 = vmatpush3.msra.mxu1 %v21882_v0  ;;  %v11538_v0 = vmax.f32 %v11482_v33, 0.0  ;;  %v10078_v41 = vadd.f32 %v22119_v2, %v23861_v57  ;;  %v11473_v2 = vadd.f32 %v23799_v55, %v10079_v27  ;;  %v23874_v27 = vld [vmem:[#allocation65_spill] sm:$0xff] }
 0x731   :  { %16195 = vmatprep.subr.mxu1 %v21891_v7  ;;  %v11510_v45 = vmax.f32 %v11454_v60, 0.0  ;;  %v11509_v49 = vmax.f32 %v11453_v18, 0.0  ;;  %v11579_v43 = vadd.f32 %v11523_v48, %v23854_v16  ;;  %v11607_v18 = vld [vmem:[%s22865_s15] sm:$0xff] }
 0x732   :  { %16196 = vmatpush3.msra.mxu1 %v21891_v7  ;;  %v11440_v7 = vadd.f32 %v23802_v47, %v9167_v17  ;;  %v23863_v17 = vld [vmem:[#allocation79_spill] sm:$0xff]  ;;  %v11459_v62 = vadd.f32 %v21908_v25, %v10078_v41 }
 0x733   :  { %16197 = vmatprep.subr.mxu1 %v21901_v6  ;;  %v11566_v37 = vadd.f32 %v11510_v45, %v23859_v8  ;;  %v11565_v33 = vadd.f32 %v11509_v49, %v23860_v35  ;;  %v14072_v8 = vld [vmem:[%s22865_s15 + $0x50] sm:$0xff]  ;;  %v14073_v35 = vld [vmem:[%s22865_s15 + $0x58] sm:$0xff] }
 0x734   :  { %v16167_v38 = vpop.f32.mrf.mxu0  ;;  %16198 = vmatpush3.msra.mxu1 %v21901_v6  ;;  %v23849_v6 = vld [vmem:[#allocation11_spill] sm:$0xff]  ;;  %v11496_v44 = vmax.f32 %v11440_v7, 0.0  ;;  %v11515_v49 = vmax.f32 %v11459_v62, 0.0 }
 0x735   :  { %16199 = vmatprep.subr.mxu1 %v21915_v10  ;;  %v11594_v23 = vadd.f32 %v11538_v0, %v23849_v6  ;;  %v11263_v54 = vadd.f32 %v16167_v38, %v23850_v4  ;;  %v11551_v0 = vadd.f32 %v11495_v24, %v23865_v12  ;;  %v11529_v6 = vmax.f32 %v11473_v2, 0.0  ;;  %v23872_v24 = vld [vmem:[#allocation63_spill] sm:$0xff] }
 0x736   :  { %v11243_v51 = vpop.f32.mrf.mxu0  ;;  %16200 = vmatpush3.msra.mxu1 %v21915_v10  ;;  %v23852_v10 = vld [vmem:[#allocation214_spill] sm:$0xff]  ;;  %v11552_v3 = vadd.f32 %v11496_v44, %v23864_v21  ;;  %v23878_v12 = vld [vmem:[#allocation211_spill] sm:$0xff] }
 0x737   :  { %v11262_v13 = vadd.f32 %v11243_v51, %v23848_v53  ;;  %16201 = vmatprep.subr.mxu1 %v21927_v42  ;;  %v10080_v22 = vadd.f32 %v15676_v40, %v23852_v10  ;;  %v23866_v40 = vld [vmem:[#allocation205_spill] sm:$0xff] }
 0x738   :  { %v16170_v31 = vpop.f32.mrf.mxu0  ;;  %16202 = vmatpush3.msra.mxu1 %v21927_v42  ;;  %v10077_v60 = vadd.f32 %v22132_v19, %v23866_v40  ;;  %v23879_v40 = vld [vmem:[#allocation146_spill] sm:$0xff] }
 0x739   :  { %16203 = vmatprep.mubr.f32.mxu1 %v11262_v13  ;;  %v15749_v46 = vpop.f32.mrf.mxu1  ;;  %11753 = vmatprep.subr.mxu1 %v11594_v23  ;;  %v11265_v61 = vadd.f32 %v16170_v31, %v23857_v14  ;;  %v11487_v56 = vadd.f32 %v21877_v58, %v10080_v22  ;;  %v11608_v23 = vld [vmem:[%s22865_s15 + $0x8] sm:$0xff]  ;;  %v23870_v22 = vld [vmem:[#allocation61_spill] sm:$0xff]  ;;  %v11610_v14 = vld [vmem:[%s22865_s15 + $0x18] sm:$0xff] }
 0x73a   :  { %v11253_v32 = vpop.f32.mrf.mxu0  ;;  %16204 = vmatmul.mubr.f32.vlgmr.msra.gmra.mxu1 %v11263_v54  ;;  %v10260_v11 = vadd.f32 %v15749_v46, %v23858_v39  ;;  %v11445_v13 = vadd.f32 %v23802_v47, %v10077_v60  ;;  %v23868_v54 = vld [vmem:[#allocation59_spill] sm:$0xff] }
 0x73b   :  { %v11264_v42 = vadd.f32 %v11253_v32, %v23856_v52  ;;  %11754 = vmatpush1.msra.mxu1 %v11593_v29  ;;  %v10240_v50 = vpop.f32.mrf.mxu1  ;;  %v11543_v19 = vmax.f32 %v11487_v56, 0.0  ;;  %v23871_v32 = vld [vmem:[#allocation27_spill] sm:$0xff] }
 0x73c   :  { %11755 = vmatprep.subr.mxu1 %v11580_v15  ;;  %v10259_v36 = vadd.f32 %v10240_v50, %v23862_v30  ;;  %v11460_v20 = vadd.f32 %v21908_v25, %v10260_v11  ;;  %v11501_v44 = vmax.f32 %v11445_v13, 0.0  ;;  %v11585_v5 = vadd.f32 %v11529_v6, %v23871_v32  ;;  %v11609_v15 = vld [vmem:[%s22865_s15 + $0x10] sm:$0xff]  ;;  %v14078_v39 = vld [vmem:[%s22865_s15 + $0x60] sm:$0xff]  ;;  %v14079_v11 = vld [vmem:[%s22865_s15 + $0x68] sm:$0xff] }
 0x73d   :  { %16206 = vmatprep.mubr.f32.mxu1 %v11264_v42  ;;  %11756 = vmatpush1.msra.mxu1 %v11579_v43  ;;  %v15752_v28 = vpop.f32.mrf.mxu1  ;;  %v11599_v29 = vadd.f32 %v11543_v19, %v23869_v34  ;;  %v23873_v43 = vld [vmem:[#allocation32_spill] sm:$0xff]  ;;  %v23875_v42 = vld [vmem:[#allocation35_spill] sm:$0xff]  ;;  %v23876_v30 = vld [vmem:[#allocation210_spill] sm:$0xff] }
 0x73e   :  { %v10262_v1 = vadd.f32 %v15752_v28, %v23863_v17  ;;  %16207 = vmatmul.mubr.f32.gmra.mxu1 %v11265_v61  ;;  %11757 = vmatprep.subr.mxu1 %v11566_v37  ;;  %v11446_v48 = vadd.f32 %v23802_v47, %v10259_v36  ;;  %v11516_v45 = vmax.f32 %v11460_v20, 0.0  ;;  %v11571_v59 = vadd.f32 %v11515_v49, %v23873_v43  ;;  %v14071_v61 = vld [vmem:[%s22865_s15 + $0x48] sm:$0xff]  ;;  %v14080_v37 = vld [vmem:[%s22865_s15 + $0x70] sm:$0xff]  ;;  %v23885_v32 = vld [vmem:[#allocation38_spill] sm:$0xff] }
 0x73f   :  { %11758 = vmatpush1.msra.mxu1 %v11565_v33  ;;  %v10250_v38 = vpop.f32.mrf.mxu1  ;;  %11793 = vmatprep.mubr.f32.mxu1 %v23785_v9  ;;  %v11557_v50 = vadd.f32 %v11501_v44, %v23875_v42  ;;  %v14081_v33 = vld [vmem:[%s22865_s15 + $0x78] sm:$0xff]  ;;  %v23883_v13 = vld [vmem:[#allocation173_spill] sm:$0xff] }
 0x740   :  { %v11488_v7 = vadd.f32 %v21877_v58, %v10262_v1  ;;  %v10261_v51 = vadd.f32 %v10250_v38, %v23867_v26  ;;  %11759 = vmatprep.subr.mxu1 %v11552_v3  ;;  %v11502_v10 = vmax.f32 %v11446_v48, 0.0  ;;  %v11572_v16 = vadd.f32 %v11516_v45, %v23872_v24  ;;  %14075 = vmatmul.mubr.msk.f32.gmra.mxu0 %vm552_vm2, %v14071_v61  ;;  %v23877_v1 = vld [vmem:[#allocation130_spill] sm:$0xff]  ;;  %v23886_v24 = vld [vmem:[#allocation40_spill] sm:$0xff] }
 0x741   :  { %11760 = vmatpush1.msra.mxu1 %v11551_v0  ;;  %11911 = vmatprep.mubr.f32.mxu0 %v23785_v9  ;;  %v23890_v61 = vld [vmem:[#allocation42_spill] sm:$0xff] }
 0x742   :  { %v11544_v63 = vmax.f32 %v11488_v7, 0.0  ;;  %v11474_v53 = vadd.f32 %v23799_v55, %v10261_v51  ;;  %14066 = vmatmul.mubr.msk.f32.vlgmr.msra.gmra.mxu1 %vm552_vm2, %v11607_v18  ;;  %v11558_v52 = vadd.f32 %v11502_v10, %v23874_v27  ;;  %v23880_v18 = vld [vmem:[#allocation175_spill] sm:$0xff]  ;;  %v23882_v51 = vld [vmem:[#allocation201_spill] sm:$0xff] }
 0x743   :  { %11799 = vmatprep.mubr.f32.mxu1 %v23785_v9  ;;  %v23881_v7 = vld [vmem:[#allocation171_spill] sm:$0xff] }
 0x744   :  { %v11530_v4 = vmax.f32 %v11474_v53, 0.0  ;;  %v11600_v31 = vadd.f32 %v11544_v63, %v23868_v54  ;;  %14076 = vmatmul.mubr.msk.f32.gmra.mxu0 %vm552_vm2, %v14072_v8 }
 0x745   :  { %11917 = vmatprep.mubr.f32.mxu0 %v23785_v9 }
 0x746   :  { %11973 = vmatprep.subr.mxu1 %v11600_v31  ;;  %v11586_v46 = vadd.f32 %v11530_v4, %v23870_v22  ;;  %14067 = vmatmul.mubr.msk.f32.gmra.mxu1 %vm552_vm2, %v11608_v23  ;;  %v23884_v22 = vld [vmem:[#allocation39_spill] sm:$0xff] }
 0x747   :  { %11974 = vmatpush1.msra.mxu1 %v11599_v29  ;;  %11805 = vmatprep.mubr.f32.mxu1 %v23785_v9 }
 0x748   :  { %11975 = vmatprep.subr.mxu1 %v11586_v46  ;;  %14077 = vmatmul.mubr.msk.f32.gmra.mxu0 %vm552_vm2, %v14073_v35  ;;  %v14087_v35 = vld [vmem:[%s22865_s15 + $0x88] sm:$0xff] }
 0x749   :  { %11976 = vmatpush1.msra.mxu1 %v11585_v5  ;;  %12127 = vmatprep.mubr.f32.mxu0 %v23785_v9 }
 0x74a   :  { %11977 = vmatprep.subr.mxu1 %v11572_v16  ;;  %14068 = vmatmul.mubr.msk.f32.gmra.mxu1 %vm552_vm2, %v11609_v15 }
 0x74b   :  { %11978 = vmatpush1.msra.mxu1 %v11571_v59  ;;  %11811 = vmatprep.mubr.f32.mxu1 %v23785_v9  ;;  %v23887_v59 = vld [vmem:[#allocation60_spill] sm:$0xff] }
 0x74c   :  { %11979 = vmatprep.subr.mxu1 %v11558_v52  ;;  %v23888_v52 = vld [vmem:[#allocation41_spill] sm:$0xff] }
 0x74d   :  { %11980 = vmatpush1.msra.mxu1 %v11557_v50  ;;  %v23889_v50 = vld [vmem:[#allocation62_spill] sm:$0xff] }
 0x74e   :  { %14069 = vmatmul.mubr.msk.f32.gmra.mxu1 %vm552_vm2, %v11610_v14 }
 0x74f   :  { %12013 = vmatprep.mubr.f32.mxu1 %v23785_v9 }
 0x752   :  { %14082 = vmatmul.mubr.msk.f32.vlgmr.msra.gmra.mxu1 %vm552_vm2, %v14078_v39 }
 0x753   :  { %12019 = vmatprep.mubr.f32.mxu1 %v23785_v9 }
 0x756   :  { %14083 = vmatmul.mubr.msk.f32.gmra.mxu1 %vm552_vm2, %v14079_v11  ;;  %v23891_v11 = vld [vmem:[#allocation64_spill] sm:$0xff] }
 0x757   :  { %12025 = vmatprep.mubr.f32.mxu1 %v23785_v9 }
 0x759   :  { %v15825_v57 = vpop.f32.mrf.mxu1 }
 0x75a   :  { %14084 = vmatmul.mubr.msk.f32.gmra.mxu1 %vm552_vm2, %v14080_v37  ;;  %v10442_v60 = vadd.f32 %v15825_v57, %v23879_v40  ;;  %v14086_v37 = vld [vmem:[%s22865_s15 + $0x80] sm:$0xff]  ;;  %v14089_v57 = vld [vmem:[%s22865_s15 + $0x98] sm:$0xff] }
 0x75b   :  { %12031 = vmatprep.mubr.f32.mxu1 %v23785_v9  ;;  %v10422_v41 = vpop.f32.mrf.mxu1 }
 0x75c   :  { %v10441_v62 = vadd.f32 %v10422_v41, %v23882_v51  ;;  %v11461_v23 = vadd.f32 %v21908_v25, %v10442_v60  ;;  %v23895_v60 = vld [vmem:[#allocation128_spill] sm:$0xff] }
 0x75d   :  { %v15828_v56 = vpop.f32.mrf.mxu1 }
 0x75e   :  { %14085 = vmatmul.mubr.msk.f32.gmra.mxu1 %vm552_vm2, %v14081_v33  ;;  %v10444_v36 = vadd.f32 %v15828_v56, %v23876_v30  ;;  %v11447_v49 = vadd.f32 %v23802_v47, %v10441_v62  ;;  %v11517_v44 = vmax.f32 %v11461_v23, 0.0  ;;  %v14088_v33 = vld [vmem:[%s22865_s15 + $0x90] sm:$0xff]  ;;  %v23898_v62 = vld [vmem:[#allocation98_spill] sm:$0xff] }
 0x75f   :  { %12241 = vmatprep.mubr.f32.mxu1 %v23785_v9  ;;  %v10432_v28 = vpop.f32.mrf.mxu1 }
 0x760   :  { %v10443_v21 = vadd.f32 %v10432_v28, %v23877_v1  ;;  %v11489_v2 = vadd.f32 %v21877_v58, %v10444_v36  ;;  %v11503_v43 = vmax.f32 %v11447_v49, 0.0  ;;  %v11573_v14 = vadd.f32 %v11517_v44, %v23889_v50  ;;  %v23892_v36 = vld [vmem:[#allocation203_spill] sm:$0xff] }
 0x762   :  { %v11475_v19 = vadd.f32 %v23799_v55, %v10443_v21  ;;  %v11545_v45 = vmax.f32 %v11489_v2, 0.0  ;;  %v11559_v8 = vadd.f32 %v11503_v43, %v23891_v11  ;;  %v23893_v21 = vld [vmem:[#allocation121_spill] sm:$0xff] }
 0x764   :  { %v11531_v34 = vmax.f32 %v11475_v19, 0.0  ;;  %v11601_v5 = vadd.f32 %v11545_v45, %v23885_v32 }
 0x766   :  { %v11587_v27 = vadd.f32 %v11531_v34, %v23887_v59 }
 0x779   :  { %v15901_v17 = vpop.f32.mrf.mxu1 }
 0x77a   :  { %v10624_v0 = vadd.f32 %v15901_v17, %v23878_v12 }
 0x77b   :  { %v10604_v3 = vpop.f32.mrf.mxu1 }
 0x77c   :  { %v10623_v20 = vadd.f32 %v10604_v3, %v23880_v18  ;;  %v11462_v63 = vadd.f32 %v21908_v25, %v10624_v0  ;;  %v23894_v0 = vld [vmem:[#allocation207_spill] sm:$0xff] }
 0x77d   :  { %v15904_v38 = vpop.f32.mrf.mxu1 }
 0x77e   :  { %v10626_v26 = vadd.f32 %v15904_v38, %v23881_v7  ;;  %v11448_v4 = vadd.f32 %v23802_v47, %v10623_v20  ;;  %v11518_v29 = vmax.f32 %v11462_v63, 0.0  ;;  %v23896_v20 = vld [vmem:[#allocation159_spill] sm:$0xff] }
 0x77f   :  { %v10614_v48 = vpop.f32.mrf.mxu1 }
 0x780   :  { %v11490_v53 = vadd.f32 %v21877_v58, %v10626_v26  ;;  %v10625_v6 = vadd.f32 %v10614_v48, %v23883_v13  ;;  %v11504_v15 = vmax.f32 %v11448_v4, 0.0  ;;  %v11574_v42 = vadd.f32 %v11518_v29, %v23888_v52  ;;  %v23897_v26 = vld [vmem:[#allocation92_spill] sm:$0xff] }
 0x782   :  { %v11546_v54 = vmax.f32 %v11490_v53, 0.0  ;;  %v11476_v31 = vadd.f32 %v23799_v55, %v10625_v6  ;;  %v11560_v39 = vadd.f32 %v11504_v15, %v23890_v61  ;;  %v23899_v6 = vld [vmem:[#allocation163_spill] sm:$0xff] }
 0x784   :  { %v11532_v10 = vmax.f32 %v11476_v31, 0.0  ;;  %v11602_v46 = vadd.f32 %v11546_v54, %v23884_v22 }
 0x786   :  { %12087 = vmatprep.subr.mxu0 %v11602_v46  ;;  %v11588_v16 = vadd.f32 %v11532_v10, %v23886_v24  ;;  %v23900_v46 = vld [vmem:[#allocation47_spill] sm:$0xff] }
 0x787   :  { %12088 = vmatpush1.msra.mxu0 %v11601_v5  ;;  %v23901_v5 = vld [vmem:[#allocation43_spill] sm:$0xff] }
 0x788   :  { %12089 = vmatprep.subr.mxu0 %v11588_v16  ;;  %v23902_v16 = vld [vmem:[#allocation48_spill] sm:$0xff] }
 0x789   :  { %12090 = vmatpush1.msra.mxu0 %v11587_v27  ;;  %v23903_v27 = vld [vmem:[#allocation44_spill] sm:$0xff] }
 0x78a   :  { %12091 = vmatprep.subr.mxu0 %v11574_v42  ;;  %v23904_v42 = vld [vmem:[#allocation49_spill] sm:$0xff] }
 0x78b   :  { %12092 = vmatpush1.msra.mxu0 %v11573_v14  ;;  %v23905_v14 = vld [vmem:[#allocation45_spill] sm:$0xff] }
 0x78c   :  { %12093 = vmatprep.subr.mxu0 %v11560_v39  ;;  %v23906_v39 = vld [vmem:[#allocation50_spill] sm:$0xff] }
 0x78d   :  { %12094 = vmatpush1.msra.mxu0 %v11559_v8  ;;  %v23907_v8 = vld [vmem:[#allocation46_spill] sm:$0xff] }
 0x78e   :  { %14090 = vmatmul.mubr.msk.f32.vlgmr.msra.gmra.mxu0 %vm552_vm2, %v14086_v37 }
 0x78f   :  { %12133 = vmatprep.mubr.f32.mxu0 %v23785_v9 }
 0x792   :  { %14091 = vmatmul.mubr.msk.f32.gmra.mxu0 %vm552_vm2, %v14087_v35  ;;  %v14094_v35 = vld [vmem:[%s22865_s15 + $0xa0] sm:$0xff] }
 0x793   :  { %12139 = vmatprep.mubr.f32.mxu0 %v23785_v9 }
 0x796   :  { %14092 = vmatmul.mubr.msk.f32.gmra.mxu0 %vm552_vm2, %v14088_v33  ;;  %v14095_v33 = vld [vmem:[%s22865_s15 + $0xa8] sm:$0xff] }
 0x797   :  { %12145 = vmatprep.mubr.f32.mxu0 %v23785_v9 }
 0x799   :  { %v15977_v41 = vpop.f32.mrf.mxu1 }
 0x79a   :  { %14093 = vmatmul.mubr.msk.f32.gmra.mxu0 %vm552_vm2, %v14089_v57  ;;  %v10806_v2 = vadd.f32 %v15977_v41, %v23895_v60  ;;  %v14096_v57 = vld [vmem:[%s22865_s15 + $0xb0] sm:$0xff]  ;;  %v14097_v41 = vld [vmem:[%s22865_s15 + $0xb8] sm:$0xff] }
 0x79b   :  { %12355 = vmatprep.mubr.f32.mxu0 %v23785_v9  ;;  %v10786_v56 = vpop.f32.mrf.mxu1 }
 0x79c   :  { %v10805_v19 = vadd.f32 %v10786_v56, %v23898_v62  ;;  %v11463_v45 = vadd.f32 %v21908_v25, %v10806_v2  ;;  %v23911_v2 = vld [vmem:[#allocation206_spill] sm:$0xff] }
 0x79d   :  { %v15980_v28 = vpop.f32.mrf.mxu1 }
 0x79e   :  { %v10808_v17 = vadd.f32 %v15980_v28, %v23892_v36  ;;  %v11449_v34 = vadd.f32 %v23802_v47, %v10805_v19  ;;  %v11519_v32 = vmax.f32 %v11463_v45, 0.0  ;;  %v23914_v19 = vld [vmem:[#allocation89_spill] sm:$0xff] }
 0x79f   :  { %v10796_v30 = vpop.f32.mrf.mxu1 }
 0x7a0   :  { %v10807_v3 = vadd.f32 %v10796_v30, %v23893_v21  ;;  %v11491_v38 = vadd.f32 %v21877_v58, %v10808_v17  ;;  %v11505_v59 = vmax.f32 %v11449_v34, 0.0  ;;  %v11575_v61 = vadd.f32 %v11519_v32, %v23905_v14  ;;  %v23908_v17 = vld [vmem:[#allocation132_spill] sm:$0xff] }
 0x7a2   :  { %v11477_v48 = vadd.f32 %v23799_v55, %v10807_v3  ;;  %v11547_v4 = vmax.f32 %v11491_v38, 0.0  ;;  %v11561_v37 = vadd.f32 %v11505_v59, %v23907_v8  ;;  %v23909_v3 = vld [vmem:[#allocation162_spill] sm:$0xff]  ;;  %v14103_v8 = vld [vmem:[%s22865_s15 + $0xc8] sm:$0xff] }
 0x7a4   :  { %v11533_v29 = vmax.f32 %v11477_v48, 0.0  ;;  %v11603_v15 = vadd.f32 %v11547_v4, %v23901_v5 }
 0x7a6   :  { %v11589_v52 = vadd.f32 %v11533_v29, %v23903_v27 }
 0x7b9   :  { %v16053_v1 = vpop.f32.mrf.mxu1 }
 0x7ba   :  { %v10988_v40 = vadd.f32 %v16053_v1, %v23894_v0 }
 0x7bb   :  { %v10968_v12 = vpop.f32.mrf.mxu1 }
 0x7bc   :  { %v10987_v7 = vadd.f32 %v10968_v12, %v23896_v20  ;;  %v11464_v53 = vadd.f32 %v21908_v25, %v10988_v40  ;;  %v23910_v40 = vld [vmem:[#allocation124_spill] sm:$0xff] }
 0x7bd   :  { %v16056_v18 = vpop.f32.mrf.mxu1 }
 0x7be   :  { %v10990_v51 = vadd.f32 %v16056_v18, %v23897_v26  ;;  %v11450_v54 = vadd.f32 %v23802_v47, %v10987_v7  ;;  %v11520_v10 = vmax.f32 %v11464_v53, 0.0  ;;  %v23912_v7 = vld [vmem:[#allocation125_spill] sm:$0xff] }
 0x7bf   :  { %v10978_v63 = vpop.f32.mrf.mxu1 }
 0x7c0   :  { %v11492_v13 = vadd.f32 %v21877_v58, %v10990_v51  ;;  %v10989_v23 = vadd.f32 %v10978_v63, %v23899_v6  ;;  %v11506_v24 = vmax.f32 %v11450_v54, 0.0  ;;  %v11576_v50 = vadd.f32 %v11520_v10, %v23904_v42  ;;  %v23913_v51 = vld [vmem:[#allocation185_spill] sm:$0xff] }
 0x7c2   :  { %v11548_v31 = vmax.f32 %v11492_v13, 0.0  ;;  %v11478_v49 = vadd.f32 %v23799_v55, %v10989_v23  ;;  %v11562_v11 = vadd.f32 %v11506_v24, %v23906_v39  ;;  %v23915_v23 = vld [vmem:[#allocation90_spill] sm:$0xff] }
 0x7c4   :  { %v11534_v22 = vmax.f32 %v11478_v49, 0.0  ;;  %v11604_v44 = vadd.f32 %v11548_v31, %v23900_v46 }
 0x7c6   :  { %12201 = vmatprep.subr.mxu1 %v11604_v44  ;;  %v11590_v43 = vadd.f32 %v11534_v22, %v23902_v16  ;;  %v23916_v44 = vld [vmem:[#allocation55_spill] sm:$0xff] }
 0x7c7   :  { %12202 = vmatpush1.msra.mxu1 %v11603_v15 }
 0x7c8   :  { %12203 = vmatprep.subr.mxu1 %v11590_v43 }
 0x7c9   :  { %12204 = vmatpush1.msra.mxu1 %v11589_v52  ;;  %v23926_v52 = vld [vmem:[#allocation53_spill] sm:$0xff] }
 0x7ca   :  { %12205 = vmatprep.subr.mxu1 %v11576_v50  ;;  %v23928_v50 = vld [vmem:[#allocation58_spill] sm:$0xff] }
 0x7cb   :  { %12206 = vmatpush1.msra.mxu1 %v11575_v61  ;;  %v23930_v61 = vld [vmem:[#allocation54_spill] sm:$0xff] }
 0x7cc   :  { %12207 = vmatprep.subr.mxu1 %v11562_v11  ;;  %v14102_v11 = vld [vmem:[%s22865_s15 + $0xc0] sm:$0xff] }
 0x7cd   :  { %12208 = vmatpush1.msra.mxu1 %v11561_v37  ;;  %v14104_v37 = vld [vmem:[%s22865_s15 + $0xd0] sm:$0xff] }
 0x7ce   :  { %14098 = vmatmul.mubr.msk.f32.vlgmr.msra.gmra.mxu1 %vm552_vm2, %v14094_v35  ;;  %v14105_v35 = vld [vmem:[%s22865_s15 + $0xd8] sm:$0xff] }
 0x7cf   :  { %12247 = vmatprep.mubr.f32.mxu1 %v23785_v9 }
 0x7d2   :  { %14099 = vmatmul.mubr.msk.f32.gmra.mxu1 %vm552_vm2, %v14095_v33  ;;  %v12420_v33 = vld [vmem:[%s22866_s17] sm:$0xff] }
 0x7d3   :  { %12253 = vmatprep.mubr.f32.mxu1 %v23785_v9 }
 0x7d6   :  { %14100 = vmatmul.mubr.msk.f32.gmra.mxu1 %vm552_vm2, %v14096_v57  ;;  %v14114_v57 = vld [vmem:[%s22866_s17 + $0x20] sm:$0xff] }
 0x7d7   :  { %12259 = vmatprep.mubr.f32.mxu1 %v23785_v9 }
 0x7d9   :  { %v16129_v56 = vpop.f32.mrf.mxu1 }
 0x7da   :  { %14101 = vmatmul.mubr.msk.f32.gmra.mxu1 %vm552_vm2, %v14097_v41  ;;  %v11170_v38 = vadd.f32 %v16129_v56, %v23911_v2  ;;  %v11694_v41 = vpop.f32.mrf.mxu0 }
 0x7db   :  { %v11150_v28 = vpop.f32.mrf.mxu1  ;;  %16217 = vmatprep.mubr.msk.f32.mxu1 %vm552_vm2, %v12420_v33 }
 0x7dc   :  { %v11169_v48 = vadd.f32 %v11150_v28, %v23914_v19  ;;  %v11465_v4 = vadd.f32 %v21908_v25, %v11170_v38  ;;  %v11696_v56 = vpop.f32.mrf.mxu0 }
 0x7dd   :  { %v16132_v30 = vpop.f32.mrf.mxu1 }
 0x7de   :  { %v11172_v1 = vadd.f32 %v16132_v30, %v23908_v17  ;;  %v11451_v29 = vadd.f32 %v23802_v47, %v11169_v48  ;;  %v11521_v5 = vmax.f32 %v11465_v4, 0.0  ;;  %v11700_v28 = vpop.f32.mrf.mxu0 }
 0x7df   :  { %v11160_v36 = vpop.f32.mrf.mxu1 }
 0x7e0   :  { %v11171_v12 = vadd.f32 %v11160_v36, %v23909_v3  ;;  %v11493_v18 = vadd.f32 %v21877_v58, %v11172_v1  ;;  %v11507_v43 = vmax.f32 %v11451_v29, 0.0  ;;  %v22375_v42 = vadd.f32 %v11521_v5, %v23926_v52  ;;  %v11702_v36 = vpop.f32.mrf.mxu0 }
 0x7e2   :  { %v11479_v63 = vadd.f32 %v23799_v55, %v11171_v12  ;;  %v11549_v54 = vmax.f32 %v11493_v18, 0.0  ;;  %23927 = vst [vmem:[#allocation231_spill] sm:$0xff] %v22375_v42  ;;  %v22383_v39 = vadd.f32 %v11507_v43, %v23930_v61  ;;  %v11706_v1 = vpop.f32.mrf.mxu0 }
 0x7e4   :  { %v11535_v10 = vmax.f32 %v11479_v63, 0.0  ;;  %23931 = vst [vmem:[#allocation119_spill] sm:$0xff] %v22383_v39  ;;  %v11708_v3 = vpop.f32.mrf.mxu0 }
 0x7fa   :  { %v16205_v21 = vpop.f32.mrf.mxu1 }
 0x7fb   :  { %v11352_v60 = vadd.f32 %v16205_v21, %v23910_v40 }
 0x7fc   :  { %v11332_v0 = vpop.f32.mrf.mxu1 }
 0x7fd   :  { %v11351_v26 = vadd.f32 %v11332_v0, %v23912_v7  ;;  %v11466_v13 = vadd.f32 %v21908_v25, %v11352_v60  ;;  %v23920_v25 = vld [vmem:[#allocation56_spill] sm:$0xff]  ;;  %v11712_v0 = vpop.f32.mrf.mxu0 }
 0x7fe   :  { %v16208_v20 = vpop.f32.mrf.mxu1 }
 0x7ff   :  { %v11354_v62 = vadd.f32 %v16208_v20, %v23913_v51  ;;  %v11452_v31 = vadd.f32 %v23802_v47, %v11351_v26  ;;  %v11522_v22 = vmax.f32 %v11466_v13, 0.0  ;;  %v23924_v47 = vld [vmem:[#allocation57_spill] sm:$0xff]  ;;  %v11714_v60 = vpop.f32.mrf.mxu0 }
 0x800   :  { %v11342_v53 = vpop.f32.mrf.mxu1 }
 0x801   :  { %v11494_v6 = vadd.f32 %v21877_v58, %v11354_v62  ;;  %v11353_v45 = vadd.f32 %v11342_v53, %v23915_v23  ;;  %v23918_v58 = vld [vmem:[#allocation51_spill] sm:$0xff]  ;;  %v11508_v24 = vmax.f32 %v11452_v31, 0.0  ;;  %v22372_v27 = vadd.f32 %v11522_v22, %v23924_v47  ;;  %v11901_v38 = vpop.f32.mrf.mxu0 }
 0x802   :  { %v22360_v15 = vadd.f32 %v11549_v54, %v23918_v58  ;;  %v11795_v30 = vpop.f32.mrf.mxu1 }
 0x803   :  { %v11550_v49 = vmax.f32 %v11494_v6, 0.0  ;;  %v11480_v34 = vadd.f32 %v23799_v55, %v11353_v45  ;;  %v23922_v55 = vld [vmem:[#allocation52_spill] sm:$0xff]  ;;  %23925 = vst [vmem:[#allocation184_spill] sm:$0xff] %v22372_v27  ;;  %v22380_v14 = vadd.f32 %v11508_v24, %v23928_v50  ;;  %v11903_v20 = vpop.f32.mrf.mxu0  ;;  %v11796_v61 = vadd.f32 %v11795_v30, %v11694_v41 }
 0x804   :  { %23919 = vst [vmem:[#allocation138_spill] sm:$0xff] %v22360_v15  ;;  %v22367_v59 = vadd.f32 %v11535_v10, %v23922_v55  ;;  %v11797_v17 = vpop.f32.mrf.mxu1 }
 0x805   :  { %v11536_v46 = vmax.f32 %v11480_v34, 0.0  ;;  %v22357_v32 = vadd.f32 %v11550_v49, %v23916_v44  ;;  %23929 = vst [vmem:[#allocation230_spill] sm:$0xff] %v22380_v14  ;;  %v11907_v26 = vpop.f32.mrf.mxu0 }
 0x806   :  { %23923 = vst [vmem:[#allocation151_spill] sm:$0xff] %v22367_v59  ;;  %v11801_v21 = vpop.f32.mrf.mxu1 }
 0x807   :  { %23917 = vst [vmem:[#allocation105_spill] sm:$0xff] %v22357_v32  ;;  %12315 = vmatprep.subr.mxu0 %v22357_v32  ;;  %v22364_v16 = vadd.f32 %v11536_v46, %v23920_v25  ;;  %v11909_v62 = vpop.f32.mrf.mxu0  ;;  %v11802_v47 = vadd.f32 %v11801_v21, %v11700_v28 }
 0x808   :  { %12316 = vmatpush1.msra.mxu0 %v22360_v15  ;;  %v11803_v12 = vpop.f32.mrf.mxu1 }
 0x809   :  { %23921 = vst [vmem:[#allocation217_spill] sm:$0xff] %v22364_v16  ;;  %12317 = vmatprep.subr.mxu0 %v22364_v16  ;;  %v11913_v48 = vpop.f32.mrf.mxu0 }
 0x80a   :  { %12318 = vmatpush1.msra.mxu0 %v22367_v59  ;;  %v11807_v40 = vpop.f32.mrf.mxu1 }
 0x80b   :  { %12319 = vmatprep.subr.mxu0 %v22372_v27  ;;  %v11915_v53 = vpop.f32.mrf.mxu0  ;;  %v11808_v43 = vadd.f32 %v11807_v40, %v11706_v1 }
 0x80c   :  { %12320 = vmatpush1.msra.mxu0 %v22375_v42  ;;  %v11809_v2 = vpop.f32.mrf.mxu1 }
 0x80d   :  { %12321 = vmatprep.subr.mxu0 %v22380_v14  ;;  %v11919_v6 = vpop.f32.mrf.mxu0  ;;  %v11810_v52 = vadd.f32 %v11809_v2, %v11708_v3  ;;  %v11926_v14 = vadd.f32 %v11907_v26, %v11802_v47 }
 0x80e   :  { %12322 = vmatpush1.msra.mxu0 %v22383_v39  ;;  %v11813_v18 = vpop.f32.mrf.mxu1  ;;  %v11924_v39 = vadd.f32 %v11901_v38, %v11796_v61  ;;  %v12423_v61 = vld [vmem:[%s22866_s17 + $0x18] sm:$0xff] }
 0x80f   :  { %14106 = vmatmul.mubr.msk.f32.vlgmr.msra.gmra.mxu0 %vm552_vm2, %v14102_v11  ;;  %v11921_v45 = vpop.f32.mrf.mxu0  ;;  %v11814_v55 = vadd.f32 %v11813_v18, %v11712_v0  ;;  %v11804_v11 = vadd.f32 %v11803_v12, %v11702_v36  ;;  %v11929_v16 = vadd.f32 %v11915_v53, %v11810_v52 }
 0x810   :  { %12361 = vmatprep.mubr.f32.mxu0 %v23785_v9  ;;  %v11815_v7 = vpop.f32.mrf.mxu1 }
 0x811   :  { %v11816_v50 = vadd.f32 %v11815_v7, %v11714_v60  ;;  %v11930_v33 = vadd.f32 %v11919_v6, %v11814_v55  ;;  %v11927_v42 = vadd.f32 %v11909_v62, %v11804_v11  ;;  %v14116_v11 = vld [vmem:[%s22866_s17 + $0x30] sm:$0xff] }
 0x812   :  { %v12015_v51 = vpop.f32.mrf.mxu1 }
 0x813   :  { %14107 = vmatmul.mubr.msk.f32.gmra.mxu0 %vm552_vm2, %v14103_v8  ;;  %v11931_v32 = vadd.f32 %v11921_v45, %v11816_v50  ;;  %v12038_v36 = vadd.f32 %v12015_v51, %v11924_v39  ;;  %v12422_v50 = vld [vmem:[%s22866_s17 + $0x10] sm:$0xff] }
 0x814   :  { %12367 = vmatprep.mubr.f32.mxu0 %v23785_v9  ;;  %v12017_v19 = vpop.f32.mrf.mxu1 }
 0x816   :  { %v12021_v63 = vpop.f32.mrf.mxu1 }
 0x817   :  { %14108 = vmatmul.mubr.msk.f32.gmra.mxu0 %vm552_vm2, %v14104_v37  ;;  %v12040_v21 = vadd.f32 %v12021_v63, %v11926_v14  ;;  %v12410_v63 = vpop.permute.xlu0 %12409 }
 0x818   :  { %12373 = vmatprep.mubr.f32.mxu0 %v23785_v9  ;;  %v12023_v13 = vpop.f32.mrf.mxu1 }
 0x819   :  { %v12041_v12 = vadd.f32 %v12023_v13, %v11927_v42 }
 0x81a   :  { %v12027_v23 = vpop.f32.mrf.mxu1 }
 0x81b   :  { %14109 = vmatmul.mubr.msk.f32.gmra.mxu0 %vm552_vm2, %v14105_v35  ;;  %v11928_v35 = vadd.f32 %v11913_v48, %v11808_v43 }
 0x81c   :  { %16231 = vmatprep.mubr.msk.f32.mxu0 %vm552_vm2, %v14114_v57  ;;  %v12029_v4 = vpop.f32.mrf.mxu1  ;;  %v11798_v57 = vadd.f32 %v11797_v17, %v11696_v56 }
 0x81d   :  { %v12042_v1 = vadd.f32 %v12027_v23, %v11928_v35  ;;  %v12043_v41 = vadd.f32 %v12029_v4, %v11929_v16  ;;  %v12660_v35 = vld [vmem:[%s22867_s19 + $0x8] sm:$0xff] }
 0x81e   :  { %v12033_v31 = vpop.f32.mrf.mxu1  ;;  %v11925_v28 = vadd.f32 %v11903_v20, %v11798_v57  ;;  %v12661_v57 = vld [vmem:[%s22867_s19 + $0x10] sm:$0xff] }
 0x81f   :  { %v12044_v0 = vadd.f32 %v12033_v31, %v11930_v33  ;;  %v12764_v33 = vld [vmem:[%s22868_s20] sm:$0xff] }
 0x820   :  { %v12035_v34 = vpop.f32.mrf.mxu1  ;;  %v12039_v2 = vadd.f32 %v12017_v19, %v11925_v28  ;;  %v22480_v28 = vld [vmem:[%s22864_s2 + $0x70] sm:$0xff] }
 0x821   :  { %v12045_v30 = vadd.f32 %v12035_v34, %v11931_v32 }
 0x84e   :  { %v12129_v54 = vpop.f32.mrf.mxu0 }
 0x84f   :  { %v12152_v62 = vadd.f32 %v12129_v54, %v12038_v36  ;;  %v12870_v36 = vld [vmem:[%s22869_s21 + $0x8] sm:$0xff] }
 0x850   :  { %v12131_v49 = vpop.f32.mrf.mxu0 }
 0x851   :  { %v12153_v16 = vadd.f32 %v12131_v49, %v12039_v2  ;;  %v12872_v2 = vld [vmem:[%s22869_s21 + $0x18] sm:$0xff] }
 0x852   :  { %v12135_v29 = vpop.f32.mrf.mxu0 }
 0x853   :  { %v12154_v18 = vadd.f32 %v12135_v29, %v12040_v21  ;;  %v22488_v21 = vld [vmem:[%s22864_s2 + $0x68] sm:$0xff] }
 0x854   :  { %v12137_v22 = vpop.f32.mrf.mxu0 }
 0x855   :  { %v12155_v48 = vadd.f32 %v12137_v22, %v12041_v12  ;;  %v22520_v12 = vld [vmem:[%s22864_s2 + $0x50] sm:$0xff] }
 0x856   :  { %v12141_v44 = vpop.f32.mrf.mxu0 }
 0x857   :  { %v12156_v56 = vadd.f32 %v12141_v44, %v12042_v1  ;;  %v22467_v1 = vld [vmem:[%s22864_s2 + $0x78] sm:$0xff] }
 0x858   :  { %v12143_v58 = vpop.f32.mrf.mxu0 }
 0x859   :  { %v12157_v38 = vadd.f32 %v12143_v58, %v12043_v41  ;;  %v22501_v41 = vld [vmem:[%s22864_s2 + $0x60] sm:$0xff] }
 0x85a   :  { %v12147_v25 = vpop.f32.mrf.mxu0 }
 0x85b   :  { %v12158_v17 = vadd.f32 %v12147_v25, %v12044_v0  ;;  %v23932_v25 = vld [vmem:[#allocation73_spill] sm:$0xff]  ;;  %v12662_v0 = vld [vmem:[%s22867_s19 + $0x18] sm:$0xff] }
 0x85c   :  { %v12149_v37 = vpop.f32.mrf.mxu0 }
 0x85d   :  { %v12159_v26 = vadd.f32 %v12149_v37, %v12045_v30  ;;  %v12659_v37 = vld [vmem:[%s22867_s19] sm:$0xff]  ;;  %v22508_v30 = vld [vmem:[%s22864_s2 + $0x58] sm:$0xff] }
 0x88e   :  { %v12243_v10 = vpop.f32.mrf.mxu1 }
 0x88f   :  { %v12266_v45 = vadd.f32 %v12243_v10, %v12152_v62  ;;  %v22597_v62 = vld [vmem:[%s22864_s2 + $0x10] sm:$0xff] }
 0x890   :  { %v22415_v46 = vpop.f32.mrf.mxu1 }
 0x891   :  { %v12267_v22 = vadd.f32 %v22415_v46, %v12153_v16  ;;  %v14115_v46 = vld [vmem:[%s22866_s17 + $0x28] sm:$0xff] }
 0x892   :  { %v12249_v5 = vpop.f32.mrf.mxu1 }
 0x893   :  { %v12268_v32 = vadd.f32 %v12249_v5, %v12154_v18  ;;  %v12400_v5 = vpop.permute.xlu0 %12399  ;;  %v22562_v18 = vld [vmem:[%s22864_s2 + $0x30] sm:$0xff] }
 0x894   :  { %v12251_v24 = vpop.f32.mrf.mxu1 }
 0x895   :  { %v12269_v19 = vadd.f32 %v12251_v24, %v12155_v48  ;;  %v23933_v24 = vld [vmem:[#allocation75_spill] sm:$0xff]  ;;  %v22606_v48 = vld [vmem:[%s22864_s2 + $0x8] sm:$0xff] }
 0x896   :  { %v12255_v8 = vpop.f32.mrf.mxu1 }
 0x897   :  { %v12270_v20 = vadd.f32 %v12255_v8, %v12156_v56  ;;  %v14117_v8 = vld [vmem:[%s22866_s17 + $0x38] sm:$0xff]  ;;  %v22541_v56 = vld [vmem:[%s22864_s2 + $0x40] sm:$0xff] }
 0x898   :  { %v12257_v59 = vpop.f32.mrf.mxu1 }
 0x899   :  { %v12271_v42 = vadd.f32 %v12257_v59, %v12157_v38  ;;  %v22579_v38 = vld [vmem:[%s22864_s2 + $0x20] sm:$0xff] }
 0x89a   :  { %v12261_v40 = vpop.f32.mrf.mxu1 }
 0x89b   :  { %v12272_v14 = vadd.f32 %v12261_v40, %v12158_v17  ;;  %v22528_v40 = vld [vmem:[%s22864_s2 + $0x48] sm:$0xff]  ;;  %v22549_v17 = vld [vmem:[%s22864_s2 + $0x38] sm:$0xff] }
 0x89c   :  { %v12263_v53 = vpop.f32.mrf.mxu1 }
 0x89d   :  { %v12273_v51 = vadd.f32 %v12263_v53, %v12159_v26  ;;  %v22588_v26 = vld [vmem:[%s22864_s2 + $0x18] sm:$0xff]  ;;  %v22615_v53 = vld [vmem:[%s22864_s2] sm:$0xff] }
 0x8cf   :  { %v12357_v27 = vpop.f32.mrf.mxu0 }
 0x8d0   :  { %v12380_v44 = vadd.f32 %v12357_v27, %v12266_v45  ;;  %v12421_v27 = vld [vmem:[%s22866_s17 + $0x8] sm:$0xff]  ;;  %v23936_v45 = vld [vmem:[#allocation145_spill] sm:$0xff] }
 0x8d1   :  { %v12359_v15 = vpop.f32.mrf.mxu0 }
 0x8d2   :  { %v12381_v59 = vadd.f32 %v12359_v15, %v12267_v22  ;;  %v12412_v47 = vadd.f32 %v23933_v24, %v12380_v44  ;;  %v23940_v22 = vld [vmem:[#allocation154_spill] sm:$0xff] }
 0x8d3   :  { %v12363_v3 = vpop.f32.mrf.mxu0 }
 0x8d4   :  { %v12382_v31 = vadd.f32 %v12363_v3, %v12268_v32  ;;  %v12413_v15 = vadd.f32 %v23933_v24, %v12381_v59  ;;  %v12869_v3 = vld [vmem:[%s22869_s21] sm:$0xff] }
 0x8d5   :  { %v12365_v60 = vpop.f32.mrf.mxu0  ;;  %v23945_v24 = vld [vmem:[#allocation143_spill] sm:$0xff] }
 0x8d6   :  { %v12383_v58 = vadd.f32 %v12365_v60, %v12269_v19  ;;  %v12414_v55 = vadd.f32 %v12400_v5, %v12382_v31  ;;  %v12871_v60 = vld [vmem:[%s22869_s21 + $0x10] sm:$0xff]  ;;  %v23938_v31 = vld [vmem:[#allocation142_spill] sm:$0xff] }
 0x8d7   :  { %v12369_v7 = vpop.f32.mrf.mxu0 }
 0x8d8   :  { %v12384_v13 = vadd.f32 %v12369_v7, %v12270_v20  ;;  %v12415_v52 = vadd.f32 %v12400_v5, %v12383_v58  ;;  %v22570_v7 = vld [vmem:[%s22864_s2 + $0x28] sm:$0xff]  ;;  %v12766_v20 = vld [vmem:[%s22868_s20 + $0x10] sm:$0xff]  ;;  %v23941_v58 = vld [vmem:[#allocation115_spill] sm:$0xff] }
 0x8d9   :  { %v12371_v6 = vpop.f32.mrf.mxu0  ;;  %v23943_v5 = vld [vmem:[#allocation86_spill] sm:$0xff] }
 0x8da   :  { %v12385_v34 = vadd.f32 %v12371_v6, %v12271_v42  ;;  %v12416_v43 = vadd.f32 %v23932_v25, %v12384_v13  ;;  %v12765_v6 = vld [vmem:[%s22868_s20 + $0x8] sm:$0xff] }
 0x8db   :  { %v12375_v39 = vpop.f32.mrf.mxu0 }
 0x8dc   :  { %v12386_v23 = vadd.f32 %v12375_v39, %v12272_v14  ;;  %v12417_v10 = vadd.f32 %v23932_v25, %v12385_v34  ;;  %v12767_v14 = vld [vmem:[%s22868_s20 + $0x18] sm:$0xff]  ;;  %v23934_v39 = vld [vmem:[#allocation4_spill] sm:$0xff] }
 0x8dd   :  { %v12377_v4 = vpop.f32.mrf.mxu0 }
 0x8de   :  { %v12418_v29 = vadd.f32 %v12410_v63, %v12386_v23  ;;  %v12387_v54 = vadd.f32 %v12377_v4, %v12273_v51  ;;  %v23935_v51 = vld [vmem:[#allocation5_spill] sm:$0xff] }
 0x8df   :  { %v23937_v4 = vld [vmem:[#allocation21_spill] sm:$0xff] }
 0x8e0   :  { %v12419_v49 = vadd.f32 %v12410_v63, %v12387_v54  ;;  %16209 = vmatprep.subr.mxu1 %v12418_v29  ;;  %v22652_v63 = vpop.permute.xlu0 %13367 }
 0x8e1   :  { %16210 = vmatpush3.msra.mxu1 %v12418_v29 }
 0x8e2   :  { %16211 = vmatprep.subr.mxu1 %v12416_v43  ;;  %16223 = vmatprep.subr.mxu0 %v12419_v49 }
 0x8e3   :  { %16212 = vmatpush3.msra.mxu1 %v12416_v43  ;;  %16224 = vmatpush3.msra.mxu0 %v12419_v49 }
 0x8e4   :  { %16213 = vmatprep.subr.mxu1 %v12414_v55  ;;  %16225 = vmatprep.subr.mxu0 %v12417_v10  ;;  %v22654_v16 = vpop.permute.xlu0 %13357 }
 0x8e5   :  { %16214 = vmatpush3.msra.mxu1 %v12414_v55  ;;  %16226 = vmatpush3.msra.mxu0 %v12417_v10 }
 0x8e6   :  { %16215 = vmatprep.subr.mxu1 %v12412_v47  ;;  %16227 = vmatprep.subr.mxu0 %v12415_v52 }
 0x8e7   :  { %16216 = vmatpush3.msra.mxu1 %v12412_v47  ;;  %16228 = vmatpush3.msra.mxu0 %v12415_v52 }
 0x8e8   :  { %16218 = vmatmul.mubr.msk.f32.vlgmr.msra.gmra.mxu1 %vm552_vm2, %v12421_v27  ;;  %16229 = vmatprep.subr.mxu0 %v12413_v15  ;;  %v424_v32 = vpop.permute.xlu0 %423 }
 0x8e9   :  { %12699 = vmatprep.subr.mxu1 %v12419_v49  ;;  %16230 = vmatpush3.msra.mxu0 %v12413_v15  ;;  %v525_v42 = vadd.f32 %v23934_v39, %v424_v32  ;;  %v23956_v32 = vld [vmem:[#allocation195_spill] sm:$0xff] }
 0x8ea   :  { %12700 = vmatpush1.msra.mxu1 %v12418_v29  ;;  %16232 = vmatmul.mubr.msk.f32.vlgmr.msra.gmra.mxu0 %vm552_vm2, %v14115_v46 }
 0x8eb   :  { %12701 = vmatprep.subr.mxu1 %v12417_v10  ;;  %12804 = vmatprep.subr.mxu0 %v12419_v49  ;;  %v5484_v13 = vadd.f32 %v23935_v51, %v525_v42  ;;  %v23957_v42 = vld [vmem:[#allocation199_spill] sm:$0xff] }
 0x8ec   :  { %16220 = vmatprep.mubr.msk.f32.mxu1 %vm552_vm2, %v12422_v50  ;;  %12702 = vmatpush1.msra.mxu1 %v12416_v43  ;;  %v434_v23 = vpop.permute.xlu0 %433  ;;  %v23948_v50 = vld [vmem:[#allocation120_spill] sm:$0xff] }
 0x8ed   :  { %12805 = vmatpush1.msra.mxu0 %v12418_v29  ;;  %16221 = vmatmul.mubr.msk.f32.gmra.mxu1 %vm552_vm2, %v12423_v61  ;;  %v5590_v19 = vadd.f32 %v23936_v45, %v5484_v13  ;;  %v23958_v13 = vld [vmem:[#allocation197_spill] sm:$0xff] }
 0x8ee   :  { %12703 = vmatprep.subr.mxu1 %v12415_v52  ;;  %12806 = vmatprep.subr.mxu0 %v12417_v10  ;;  %v23959_v45 = vld [vmem:[#allocation113_spill] sm:$0xff] }
 0x8ef   :  { %16234 = vmatprep.mubr.msk.f32.mxu0 %vm552_vm2, %v14116_v11  ;;  %12704 = vmatpush1.msra.mxu1 %v12414_v55  ;;  %v23949_v11 = vld [vmem:[#allocation126_spill] sm:$0xff] }
 0x8f0   :  { %12807 = vmatpush1.msra.mxu0 %v12416_v43  ;;  %12705 = vmatprep.subr.mxu1 %v12413_v15 }
 0x8f1   :  { %16235 = vmatmul.mubr.msk.f32.gmra.mxu0 %vm552_vm2, %v14117_v8  ;;  %12808 = vmatprep.subr.mxu0 %v12415_v52 }
 0x8f2   :  { %12706 = vmatpush1.msra.mxu1 %v12412_v47  ;;  %12739 = vmatprep.mubr.f32.mxu1 %v23785_v9 }
 0x8f3   :  { %12809 = vmatpush1.msra.mxu0 %v12414_v55  ;;  %14122 = vmatmul.mubr.msk.f32.vlgmr.msra.gmra.mxu1 %vm552_vm2, %v12659_v37  ;;  %v23950_v37 = vld [vmem:[#allocation84_spill] sm:$0xff] }
 0x8f4   :  { %12810 = vmatprep.subr.mxu0 %v12413_v15  ;;  %12909 = vmatprep.subr.mxu1 %v12419_v49 }
 0x8f5   :  { %12811 = vmatpush1.msra.mxu0 %v12412_v47  ;;  %12910 = vmatpush1.msra.mxu1 %v12418_v29  ;;  %v23939_v29 = vld [vmem:[#allocation144_spill] sm:$0xff] }
 0x8f6   :  { %12911 = vmatprep.subr.mxu1 %v12417_v10  ;;  %12745 = vmatprep.mubr.f32.mxu1 %v23785_v9  ;;  %v5696_v54 = vadd.f32 %v23939_v29, %v5590_v19 }
 0x8f7   :  { %12912 = vmatpush1.msra.mxu1 %v12416_v43  ;;  %12844 = vmatprep.mubr.f32.mxu0 %v23785_v9  ;;  %v23942_v43 = vld [vmem:[#allocation83_spill] sm:$0xff] }
 0x8f8   :  { %14123 = vmatmul.mubr.msk.f32.gmra.mxu1 %vm552_vm2, %v12660_v35  ;;  %12913 = vmatprep.subr.mxu1 %v12415_v52  ;;  %v5802_v25 = vadd.f32 %v23941_v58, %v5696_v54  ;;  %v23946_v52 = vld [vmem:[#allocation141_spill] sm:$0xff]  ;;  %v6873_v54 = vpop.permute.xlu0 %6872  ;;  %v23963_v58 = vld [vmem:[#allocation192_spill] sm:$0xff] }
 0x8f9   :  { %12914 = vmatpush1.msra.mxu1 %v12414_v55  ;;  %12751 = vmatprep.mubr.f32.mxu1 %v23785_v9  ;;  %v23944_v55 = vld [vmem:[#allocation118_spill] sm:$0xff] }
 0x8fa   :  { %12915 = vmatprep.subr.mxu1 %v12413_v15  ;;  %16237 = vmatprep.subr.mxu0 %v22467_v1  ;;  %v5908_v59 = vadd.f32 %v23943_v5, %v5802_v25  ;;  %v23947_v15 = vld [vmem:[#allocation78_spill] sm:$0xff] }
 0x8fb   :  { %12916 = vmatpush1.msra.mxu1 %v12412_v47  ;;  %14126 = vmatmul.mubr.msk.f32.vlgmr.msra.gmra.mxu0 %vm552_vm2, %v12764_v33  ;;  %v23951_v33 = vld [vmem:[#allocation76_spill] sm:$0xff] }
 0x8fc   :  { %14124 = vmatmul.mubr.msk.f32.gmra.mxu1 %vm552_vm2, %v12661_v57  ;;  %16238 = vmatpush3.msra.mxu0 %v22467_v1  ;;  %v6014_v47 = vadd.f32 %v23945_v24, %v5908_v59  ;;  %v23964_v59 = vld [vmem:[#allocation174_spill] sm:$0xff] }
 0x8fd   :  { %12757 = vmatprep.mubr.f32.mxu1 %v23785_v9  ;;  %16239 = vmatprep.subr.mxu0 %v22480_v28 }
 0x8fe   :  { %16240 = vmatpush3.msra.mxu0 %v22480_v28  ;;  %12850 = vmatprep.mubr.f32.mxu0 %v23785_v9  ;;  %v6120_v46 = vadd.f32 %v23947_v15, %v6014_v47  ;;  %v23965_v15 = vld [vmem:[#allocation102_spill] sm:$0xff] }
 0x8ff   :  { %16241 = vmatprep.subr.mxu0 %v22488_v21  ;;  %16275 = vmatprep.subr.mxu1 %v22467_v1 }
 0x900   :  { %14125 = vmatmul.mubr.msk.f32.gmra.mxu1 %vm552_vm2, %v12662_v0  ;;  %16242 = vmatpush3.msra.mxu0 %v22488_v21  ;;  %v6226_v8 = vadd.f32 %v23949_v11, %v6120_v46  ;;  %v23952_v0 = vld [vmem:[#allocation116_spill] sm:$0xff] }
 0x901   :  { %12949 = vmatprep.mubr.f32.mxu1 %v23785_v9  ;;  %16243 = vmatprep.subr.mxu0 %v22501_v41 }
 0x902   :  { %16244 = vmatpush3.msra.mxu0 %v22501_v41  ;;  %v6332_v57 = vadd.f32 %v23951_v33, %v6226_v8 }
 0x903   :  { %16245 = vmatprep.subr.mxu0 %v22508_v30  ;;  %14127 = vmatmul.mubr.msk.f32.gmra.mxu0 %vm552_vm2, %v12765_v6 }
 0x904   :  { %14130 = vmatmul.mubr.msk.f32.vlgmr.msra.gmra.mxu1 %vm552_vm2, %v12869_v3  ;;  %16246 = vmatpush3.msra.mxu0 %v22508_v30 }
 0x905   :  { %12955 = vmatprep.mubr.f32.mxu1 %v23785_v9  ;;  %16247 = vmatprep.subr.mxu0 %v22520_v12 }
 0x906   :  { %16248 = vmatpush3.msra.mxu0 %v22520_v12  ;;  %16276 = vmatpush3.msra.mxu1 %v22467_v1 }
 0x907   :  { %16249 = vmatprep.subr.mxu0 %v22528_v40  ;;  %16277 = vmatprep.subr.mxu1 %v22480_v28 }
 0x908   :  { %14131 = vmatmul.mubr.msk.f32.gmra.mxu1 %vm552_vm2, %v12870_v36  ;;  %16250 = vmatpush3.msra.mxu0 %v22528_v40  ;;  %v23953_v36 = vld [vmem:[#allocation168_spill] sm:$0xff] }
 0x909   :  { %12961 = vmatprep.mubr.f32.mxu1 %v23785_v9  ;;  %16251 = vmatprep.subr.mxu0 %v22541_v56 }
 0x90a   :  { %16252 = vmatpush3.msra.mxu0 %v22541_v56  ;;  %16278 = vmatpush3.msra.mxu1 %v22480_v28 }
 0x90b   :  { %16253 = vmatprep.subr.mxu0 %v22549_v17  ;;  %16279 = vmatprep.subr.mxu1 %v22488_v21 }
 0x90c   :  { %14132 = vmatmul.mubr.msk.f32.gmra.mxu1 %vm552_vm2, %v12871_v60  ;;  %16254 = vmatpush3.msra.mxu0 %v22549_v17  ;;  %v6438_v60 = vadd.f32 %v23953_v36, %v6332_v57 }
 0x90d   :  { %12967 = vmatprep.mubr.f32.mxu1 %v23785_v9  ;;  %16255 = vmatprep.subr.mxu0 %v22562_v18 }
 0x90e   :  { %16256 = vmatpush3.msra.mxu0 %v22562_v18  ;;  %16280 = vmatpush3.msra.mxu1 %v22488_v21 }
 0x90f   :  { %16257 = vmatprep.subr.mxu0 %v22570_v7  ;;  %16281 = vmatprep.subr.mxu1 %v22501_v41 }
 0x910   :  { %14133 = vmatmul.mubr.msk.f32.gmra.mxu1 %vm552_vm2, %v12872_v2  ;;  %16258 = vmatpush3.msra.mxu0 %v22570_v7  ;;  %v23954_v2 = vld [vmem:[#allocation169_spill] sm:$0xff] }
 0x911   :  { %16259 = vmatprep.subr.mxu0 %v22579_v38  ;;  %16282 = vmatpush3.msra.mxu1 %v22501_v41 }
 0x912   :  { %16260 = vmatpush3.msra.mxu0 %v22579_v38  ;;  %16283 = vmatprep.subr.mxu1 %v22508_v30 }
 0x913   :  { %16261 = vmatprep.subr.mxu0 %v22588_v26  ;;  %16284 = vmatpush3.msra.mxu1 %v22508_v30 }
 0x914   :  { %16262 = vmatpush3.msra.mxu0 %v22588_v26  ;;  %16285 = vmatprep.subr.mxu1 %v22520_v12 }
 0x915   :  { %16263 = vmatprep.subr.mxu0 %v22597_v62  ;;  %16286 = vmatpush3.msra.mxu1 %v22520_v12 }
 0x916   :  { %16264 = vmatpush3.msra.mxu0 %v22597_v62  ;;  %16287 = vmatprep.subr.mxu1 %v22528_v40 }
 0x917   :  { %16265 = vmatprep.subr.mxu0 %v22606_v48  ;;  %16288 = vmatpush3.msra.mxu1 %v22528_v40 }
 0x918   :  { %16266 = vmatpush3.msra.mxu0 %v22606_v48  ;;  %16289 = vmatprep.subr.mxu1 %v22541_v56 }
 0x919   :  { %16267 = vmatprep.subr.mxu0 %v22615_v53  ;;  %16290 = vmatpush3.msra.mxu1 %v22541_v56 }
 0x91a   :  { %16268 = vmatpush3.msra.mxu0 %v22615_v53  ;;  %16291 = vmatprep.subr.mxu1 %v22549_v17 }
 0x91b   :  { %16313 = vmatprep.subr.mxu0 %v22467_v1  ;;  %16292 = vmatpush3.msra.mxu1 %v22549_v17 }
 0x91c   :  { %16293 = vmatprep.subr.mxu1 %v22562_v18  ;;  %12856 = vmatprep.mubr.f32.mxu0 %v23785_v9 }
 0x91d   :  { %16294 = vmatpush3.msra.mxu1 %v22562_v18  ;;  %14128 = vmatmul.mubr.msk.f32.gmra.mxu0 %vm552_vm2, %v12766_v20  ;;  %v23955_v20 = vld [vmem:[#allocation6_spill] sm:$0xff] }
 0x91e   :  { %16295 = vmatprep.subr.mxu1 %v22570_v7  ;;  %12862 = vmatprep.mubr.f32.mxu0 %v23785_v9  ;;  %v535_v9 = vadd.f32 %v23937_v4, %v434_v23  ;;  %v23960_v4 = vld [vmem:[#allocation158_spill] sm:$0xff] }
 0x91f   :  { %16296 = vmatpush3.msra.mxu1 %v22570_v7 }
 0x920   :  { %16297 = vmatprep.subr.mxu1 %v22579_v38  ;;  %v5486_v34 = vadd.f32 %v23938_v31, %v535_v9  ;;  %v6878_v31 = vpop.permute.xlu1 %6877 }
 0x921   :  { %16298 = vmatpush3.msra.mxu1 %v22579_v38  ;;  %14129 = vmatmul.mubr.msk.f32.gmra.mxu0 %vm552_vm2, %v12767_v14  ;;  %v6544_v14 = vadd.f32 %v23955_v20, %v6438_v60 }
 0x922   :  { %16299 = vmatprep.subr.mxu1 %v22588_v26  ;;  %v5592_v44 = vadd.f32 %v23940_v22, %v5486_v34  ;;  %v23961_v34 = vld [vmem:[#allocation194_spill] sm:$0xff]  ;;  %v23962_v22 = vld [vmem:[#allocation157_spill] sm:$0xff] }
 0x923   :  { %16300 = vmatpush3.msra.mxu1 %v22588_v26  ;;  %v6650_v51 = vadd.f32 %v23957_v42, %v6544_v14 }
 0x924   :  { %16301 = vmatprep.subr.mxu1 %v22597_v62  ;;  %v5698_v49 = vadd.f32 %v23942_v43, %v5592_v44  ;;  %v6891_v44 = vadd.f32 %v6878_v31, %v23962_v22  ;;  %v6888_v47 = vpop.permute.xlu1 %6887 }
 0x925   :  { %16302 = vmatpush3.msra.mxu1 %v22597_v62  ;;  %v6756_v19 = vadd.f32 %v23959_v45, %v6650_v51  ;;  %v6893_v46 = vadd.f32 %v6888_v47, %v23965_v15 }
 0x926   :  { %16303 = vmatprep.subr.mxu1 %v22606_v48  ;;  %v5804_v10 = vadd.f32 %v23944_v55, %v5698_v49 }
 0x927   :  { %16304 = vmatpush3.msra.mxu1 %v22606_v48  ;;  %v6862_v29 = vadd.f32 %v23961_v34, %v6756_v19 }
 0x928   :  { %16305 = vmatprep.subr.mxu1 %v22615_v53  ;;  %v5910_v27 = vadd.f32 %v23946_v52, %v5804_v10 }
 0x929   :  { %16306 = vmatpush3.msra.mxu1 %v22615_v53  ;;  %v6890_v5 = vadd.f32 %v6873_v54, %v6862_v29 }
 0x92a   :  { %16351 = vmatprep.subr.mxu1 %v22467_v1  ;;  %v6016_v61 = vadd.f32 %v23948_v50, %v5910_v27 }
 0x92c   :  { %v6122_v35 = vadd.f32 %v23950_v37, %v6016_v61  ;;  %v6883_v61 = vpop.permute.xlu0 %6882 }
 0x92e   :  { %v6228_v3 = vadd.f32 %v23952_v0, %v6122_v35 }
 0x930   :  { %v6334_v6 = vadd.f32 %v23954_v2, %v6228_v3 }
 0x932   :  { %v6440_v39 = vadd.f32 %v23956_v32, %v6334_v6 }
 0x934   :  { %v6546_v23 = vadd.f32 %v23958_v13, %v6440_v39 }
 0x936   :  { %v6652_v9 = vadd.f32 %v23960_v4, %v6546_v23 }
 0x938   :  { %v6758_v25 = vadd.f32 %v23963_v58, %v6652_v9 }
 0x93a   :  { %v6864_v55 = vadd.f32 %v23964_v59, %v6758_v25 }
 0x93c   :  { %v6892_v35 = vadd.f32 %v6883_v61, %v6864_v55 }
 0x9a8   :  { %v16219_v43 = vpop.f32.mrf.mxu1 }
 0x9a9   :  { %v12522_v49 = vadd.f32 %v16219_v43, %v6891_v44 }
 0x9aa   :  { %v12502_v10 = vpop.f32.mrf.mxu1  ;;  %v16233_v24 = vpop.f32.mrf.mxu0 }
 0x9ab   :  { %v12521_v52 = vadd.f32 %v12502_v10, %v6890_v5  ;;  %v22687_v27 = vadd.f32 %v16233_v24, %v12522_v49 }
 0x9ac   :  { %v12608_v50 = vpop.f32.mrf.mxu0 }
 0x9ad   :  { %v16222_v11 = vpop.f32.mrf.mxu1  ;;  %v22690_v8 = vadd.f32 %v12608_v50, %v12521_v52 }
 0x9ae   :  { %v12524_v37 = vadd.f32 %v16222_v11, %v6893_v46 }
 0x9af   :  { %v12512_v33 = vpop.f32.mrf.mxu1 }
 0x9b0   :  { %v12523_v57 = vadd.f32 %v12512_v33, %v6892_v35 }
 0x9b1   :  { %v16236_v0 = vpop.f32.mrf.mxu0 }
 0x9b2   :  { %v22692_v3 = vadd.f32 %v16236_v0, %v12524_v37  ;;  %v23966_v37 = vld [vmem:[#allocation70_spill] sm:$0xff] }
 0x9b3   :  { %v12618_v36 = vpop.f32.mrf.mxu0  ;;  %v22694_v60 = vpop.f32.mrf.mxu1 }
 0x9b4   :  { %v22696_v2 = vadd.f32 %v12618_v36, %v12523_v57  ;;  %v23967_v57 = vld [vmem:[#allocation117_spill] sm:$0xff] }
 0x9b5   :  { %v22698_v6 = vpop.f32.mrf.mxu1 }
 0x9b8   :  { %v22700_v20 = vpop.f32.mrf.mxu1 }
 0x9ba   :  { %v22702_v14 = vpop.f32.mrf.mxu1 }
 0x9bb   :  { %v12846_v29 = vpop.f32.mrf.mxu0 }
 0x9bc   :  { %v22704_v32 = vpop.f32.mrf.mxu1 }
 0x9bd   :  { %v12848_v54 = vpop.f32.mrf.mxu0 }
 0x9be   :  { %v22706_v39 = vpop.f32.mrf.mxu1 }
 0x9c0   :  { %v22708_v42 = vpop.f32.mrf.mxu1 }
 0x9c2   :  { %v22710_v51 = vpop.f32.mrf.mxu1 }
 0x9c3   :  { %v12852_v22 = vpop.f32.mrf.mxu0 }
 0x9c4   :  { %v12951_v13 = vpop.f32.mrf.mxu1 }
 0x9c5   :  { %16269 = vmatprep.mubr.f32.mxu0 %v12951_v13  ;;  %v12854_v44 = vpop.f32.mrf.mxu0 }
 0x9c6   :  { %v12953_v23 = vpop.f32.mrf.mxu1 }
 0x9c8   :  { %v12957_v45 = vpop.f32.mrf.mxu1 }
 0x9c9   :  { %16270 = vmatmul.mubr.f32.vlgmr.msra.gmra.mxu0 %v12957_v45 }
 0x9ca   :  { %16314 = vmatpush3.msra.mxu0 %v22467_v1  ;;  %v12959_v19 = vpop.f32.mrf.mxu1 }
 0x9cb   :  { %16315 = vmatprep.subr.mxu0 %v22480_v28 }
 0x9cc   :  { %16316 = vmatpush3.msra.mxu0 %v22480_v28  ;;  %v12963_v4 = vpop.f32.mrf.mxu1 }
 0x9cd   :  { %16317 = vmatprep.subr.mxu0 %v22488_v21  ;;  %16272 = vmatprep.mubr.f32.mxu0 %v12963_v4 }
 0x9ce   :  { %16318 = vmatpush3.msra.mxu0 %v22488_v21  ;;  %v12965_v9 = vpop.f32.mrf.mxu1 }
 0x9cf   :  { %16319 = vmatprep.subr.mxu0 %v22501_v41 }
 0x9d0   :  { %16320 = vmatpush3.msra.mxu0 %v22501_v41  ;;  %v12969_v31 = vpop.f32.mrf.mxu1 }
 0x9d1   :  { %16321 = vmatprep.subr.mxu0 %v22508_v30  ;;  %16273 = vmatmul.mubr.f32.gmra.mxu0 %v12969_v31  ;;  %v13395_v31 = vld [vmem:[%s22870_s23 + $0x8] sm:$0xff] }
 0x9d2   :  { %16322 = vmatpush3.msra.mxu0 %v22508_v30  ;;  %16345 = vmatprep.mubr.f32.mxu0 %v12953_v23  ;;  %v12971_v34 = vpop.f32.mrf.mxu1 }
 0x9d3   :  { %16323 = vmatprep.subr.mxu0 %v22520_v12 }
 0x9d4   :  { %16324 = vmatpush3.msra.mxu0 %v22520_v12 }
 0x9d5   :  { %16325 = vmatprep.subr.mxu0 %v22528_v40 }
 0x9d6   :  { %16326 = vmatpush3.msra.mxu0 %v22528_v40 }
 0x9d7   :  { %16327 = vmatprep.subr.mxu0 %v22541_v56 }
 0x9d8   :  { %16328 = vmatpush3.msra.mxu0 %v22541_v56 }
 0x9d9   :  { %16329 = vmatprep.subr.mxu0 %v22549_v17 }
 0x9da   :  { %16330 = vmatpush3.msra.mxu0 %v22549_v17 }
 0x9db   :  { %16331 = vmatprep.subr.mxu0 %v22562_v18 }
 0x9dc   :  { %16332 = vmatpush3.msra.mxu0 %v22562_v18 }
 0x9dd   :  { %16333 = vmatprep.subr.mxu0 %v22570_v7  ;;  %v12858_v58 = vpop.f32.mrf.mxu0 }
 0x9de   :  { %16334 = vmatpush3.msra.mxu0 %v22570_v7 }
 0x9df   :  { %16335 = vmatprep.subr.mxu0 %v22579_v38  ;;  %v12860_v25 = vpop.f32.mrf.mxu0 }
 0x9e0   :  { %16336 = vmatpush3.msra.mxu0 %v22579_v38 }
 0x9e1   :  { %16337 = vmatprep.subr.mxu0 %v22588_v26  ;;  %v12864_v43 = vpop.f32.mrf.mxu0 }
 0x9e2   :  { %16338 = vmatpush3.msra.mxu0 %v22588_v26 }
 0x9e3   :  { %16339 = vmatprep.subr.mxu0 %v22597_v62  ;;  %v12866_v49 = vpop.f32.mrf.mxu0 }
 0x9e4   :  { %16340 = vmatpush3.msra.mxu0 %v22597_v62 }
 0x9e5   :  { %16341 = vmatprep.subr.mxu0 %v22606_v48 }
 0x9e6   :  { %16342 = vmatpush3.msra.mxu0 %v22606_v48 }
 0x9e7   :  { %16343 = vmatprep.subr.mxu0 %v22615_v53 }
 0x9e8   :  { %16344 = vmatpush3.msra.mxu0 %v22615_v53 }
 0x9e9   :  { %16346 = vmatmul.mubr.f32.vlgmr.msra.gmra.mxu0 %v12959_v19  ;;  %v23970_v19 = vld [vmem:[#allocation231_spill] sm:$0xff] }
 0x9ea   :  { %16348 = vmatprep.mubr.f32.mxu0 %v12965_v9 }
 0x9ed   :  { %16349 = vmatmul.mubr.f32.gmra.mxu0 %v12971_v34  ;;  %v13396_v34 = vld [vmem:[%s22870_s23 + $0x10] sm:$0xff] }
 0xa89   :  { %v16271_v5 = vpop.f32.mrf.mxu0 }
 0xa8a   :  { %v13060_v10 = vadd.f32 %v16271_v5, %v12852_v22 }
 0xa8b   :  { %v13040_v59 = vpop.f32.mrf.mxu0 }
 0xa8c   :  { %v13059_v55 = vadd.f32 %v13040_v59, %v12846_v29  ;;  %v13397_v29 = vld [vmem:[%s22870_s23 + $0x18] sm:$0xff] }
 0xa8e   :  { %16307 = vmatprep.mubr.f32.mxu1 %v13059_v55 }
 0xa8f   :  { %16308 = vmatmul.mubr.f32.vlgmr.msra.gmra.mxu1 %v13060_v10 }
 0xa90   :  { %16352 = vmatpush3.msra.mxu1 %v22467_v1 }
 0xa91   :  { %16353 = vmatprep.subr.mxu1 %v22480_v28  ;;  %v16274_v24 = vpop.f32.mrf.mxu0 }
 0xa92   :  { %16354 = vmatpush3.msra.mxu1 %v22480_v28  ;;  %v13062_v15 = vadd.f32 %v16274_v24, %v12864_v43 }
 0xa93   :  { %16355 = vmatprep.subr.mxu1 %v22488_v21  ;;  %v13050_v47 = vpop.f32.mrf.mxu0 }
 0xa94   :  { %v13061_v52 = vadd.f32 %v13050_v47, %v12858_v58  ;;  %16356 = vmatpush3.msra.mxu1 %v22488_v21 }
 0xa95   :  { %16357 = vmatprep.subr.mxu1 %v22501_v41 }
 0xa96   :  { %16358 = vmatpush3.msra.mxu1 %v22501_v41  ;;  %16310 = vmatprep.mubr.f32.mxu1 %v13061_v52 }
 0xa97   :  { %16359 = vmatprep.subr.mxu1 %v22508_v30  ;;  %16311 = vmatmul.mubr.f32.gmra.mxu1 %v13062_v15 }
 0xa98   :  { %16360 = vmatpush3.msra.mxu1 %v22508_v30 }
 0xa99   :  { %16361 = vmatprep.subr.mxu1 %v22520_v12 }
 0xa9a   :  { %16362 = vmatpush3.msra.mxu1 %v22520_v12 }
 0xa9b   :  { %16363 = vmatprep.subr.mxu1 %v22528_v40 }
 0xa9c   :  { %16364 = vmatpush3.msra.mxu1 %v22528_v40 }
 0xa9d   :  { %16365 = vmatprep.subr.mxu1 %v22541_v56 }
 0xa9e   :  { %16366 = vmatpush3.msra.mxu1 %v22541_v56 }
 0xa9f   :  { %16367 = vmatprep.subr.mxu1 %v22549_v17 }
 0xaa0   :  { %16368 = vmatpush3.msra.mxu1 %v22549_v17  ;;  %v13394_v17 = vld [vmem:[%s22870_s23] sm:$0xff] }
 0xaa1   :  { %16369 = vmatprep.subr.mxu1 %v22562_v18  ;;  %16397 = vmatprep.mubr.msk.f32.mxu0 %vm552_vm2, %v13394_v17 }
 0xaa2   :  { %16370 = vmatpush3.msra.mxu1 %v22562_v18  ;;  %v14140_v18 = vld [vmem:[%s22870_s23 + $0x30] sm:$0xff] }
 0xaa3   :  { %16371 = vmatprep.subr.mxu1 %v22570_v7 }
 0xaa4   :  { %16372 = vmatpush3.msra.mxu1 %v22570_v7 }
 0xaa5   :  { %16373 = vmatprep.subr.mxu1 %v22579_v38 }
 0xaa6   :  { %16374 = vmatpush3.msra.mxu1 %v22579_v38 }
 0xaa7   :  { %16375 = vmatprep.subr.mxu1 %v22588_v26 }
 0xaa8   :  { %16376 = vmatpush3.msra.mxu1 %v22588_v26 }
 0xaa9   :  { %v16347_v1 = vpop.f32.mrf.mxu0  ;;  %16377 = vmatprep.subr.mxu1 %v22597_v62 }
 0xaaa   :  { %16378 = vmatpush3.msra.mxu1 %v22597_v62  ;;  %v13242_v41 = vadd.f32 %v16347_v1, %v12854_v44  ;;  %v23972_v1 = vld [vmem:[#allocation105_spill] sm:$0xff] }
 0xaab   :  { %v13222_v28 = vpop.f32.mrf.mxu0  ;;  %16379 = vmatprep.subr.mxu1 %v22606_v48 }
 0xaac   :  { %v13241_v21 = vadd.f32 %v13222_v28, %v12848_v54  ;;  %16380 = vmatpush3.msra.mxu1 %v22606_v48  ;;  %v14138_v54 = vld [vmem:[%s22870_s23 + $0x20] sm:$0xff] }
 0xaad   :  { %v16350_v30 = vpop.f32.mrf.mxu0  ;;  %16381 = vmatprep.subr.mxu1 %v22615_v53 }
 0xaae   :  { %16382 = vmatpush3.msra.mxu1 %v22615_v53  ;;  %16383 = vmatprep.mubr.f32.mxu1 %v13241_v21  ;;  %v13244_v56 = vadd.f32 %v16350_v30, %v12866_v49  ;;  %v14139_v30 = vld [vmem:[%s22870_s23 + $0x28] sm:$0xff] }
 0xaaf   :  { %v13232_v12 = vpop.f32.mrf.mxu0  ;;  %16384 = vmatmul.mubr.f32.vlgmr.msra.gmra.mxu1 %v13242_v41 }
 0xab0   :  { %v13243_v40 = vadd.f32 %v13232_v12, %v12860_v25  ;;  %v14141_v12 = vld [vmem:[%s22870_s23 + $0x38] sm:$0xff] }
 0xab2   :  { %16386 = vmatprep.mubr.f32.mxu1 %v13243_v40  ;;  %v12643_v40 = vpop.permute.xlu1 %12642 }
 0xab3   :  { %16387 = vmatmul.mubr.f32.gmra.mxu1 %v13244_v56  ;;  %v12638_v56 = vpop.permute.xlu0 %12637 }
 0xab4   :  { %16414 = vmatprep.mubr.msk.f32.mxu1 %vm552_vm2, %v14140_v18 }
 0xab6   :  { %v12653_v18 = vpop.permute.xlu1 %12652 }
 0xb4f   :  { %v16309_v7 = vpop.f32.mrf.mxu1 }
 0xb50   :  { %v13149_v26 = vadd.f32 %v16309_v7, %v22700_v20  ;;  %v23968_v20 = vld [vmem:[#allocation138_spill] sm:$0xff] }
 0xb51   :  { %v13129_v38 = vpop.f32.mrf.mxu1 }
 0xb52   :  { %v13148_v48 = vadd.f32 %v13129_v38, %v22694_v60  ;;  %v13372_v50 = vadd.f32 %v22654_v16, %v13149_v26  ;;  %v23969_v60 = vld [vmem:[#allocation151_spill] sm:$0xff]  ;;  %v12648_v38 = vpop.permute.xlu0 %12647 }
 0xb54   :  { %v13370_v35 = vadd.f32 %v23966_v37, %v13148_v48  ;;  %v13380_v36 = vmax.f32 %v13372_v50, 0.0  ;;  %v12656_v48 = vadd.f32 %v12643_v40, %v22687_v27 }
 0xb56   :  { %v13378_v45 = vmax.f32 %v13370_v35, 0.0  ;;  %v13388_v4 = vadd.f32 %v13380_v36, %v23970_v19  ;;  %v12657_v35 = vadd.f32 %v12648_v38, %v22696_v2 }
 0xb57   :  { %v16312_v62 = vpop.f32.mrf.mxu1 }
 0xb58   :  { %v13151_v53 = vadd.f32 %v16312_v62, %v22708_v42  ;;  %v13617_v62 = vpop.permute.xlu1 %13616 }
 0xb59   :  { %v13139_v46 = vpop.f32.mrf.mxu1 }
 0xb5a   :  { %v13376_v61 = vadd.f32 %v22652_v63, %v13151_v53  ;;  %v13150_v11 = vadd.f32 %v13139_v46, %v22704_v32  ;;  %v23971_v32 = vld [vmem:[#allocation119_spill] sm:$0xff]  ;;  %v12658_v53 = vadd.f32 %v12653_v18, %v22692_v3  ;;  %v13612_v46 = vpop.permute.xlu0 %13611 }
 0xb5b   :  { %v13386_v9 = vadd.f32 %v13378_v45, %v23971_v32 }
 0xb5c   :  { %v13384_v33 = vmax.f32 %v13376_v61, 0.0  ;;  %v13374_v0 = vadd.f32 %v23967_v57, %v13150_v11  ;;  %v12655_v11 = vadd.f32 %v12638_v56, %v22690_v8 }
 0xb5e   :  { %v13382_v13 = vmax.f32 %v13374_v0, 0.0  ;;  %v13392_v23 = vadd.f32 %v13384_v33, %v23968_v20  ;;  %v13627_v0 = vpop.permute.xlu1 %13626 }
 0xb60   :  { %16389 = vmatprep.subr.mxu0 %v13392_v23  ;;  %v13390_v42 = vadd.f32 %v13382_v13, %v23969_v60 }
 0xb61   :  { %16390 = vmatpush3.msra.mxu0 %v13392_v23 }
 0xb62   :  { %16391 = vmatprep.subr.mxu0 %v13390_v42 }
 0xb63   :  { %16392 = vmatpush3.msra.mxu0 %v13390_v42 }
 0xb64   :  { %16393 = vmatprep.subr.mxu0 %v13388_v4 }
 0xb65   :  { %16394 = vmatpush3.msra.mxu0 %v13388_v4  ;;  %v13622_v4 = vpop.permute.xlu0 %13621 }
 0xb66   :  { %16395 = vmatprep.subr.mxu0 %v13386_v9 }
 0xb67   :  { %16396 = vmatpush3.msra.mxu0 %v13386_v9 }
 0xb68   :  { %16398 = vmatmul.mubr.msk.f32.vlgmr.msra.gmra.mxu0 %vm552_vm2, %v13395_v31 }
 0xb69   :  { %16400 = vmatprep.mubr.msk.f32.mxu0 %vm552_vm2, %v13396_v34 }
 0xb6c   :  { %16401 = vmatmul.mubr.msk.f32.gmra.mxu0 %vm552_vm2, %v13397_v29 }
 0xb6d   :  { %16411 = vmatprep.mubr.msk.f32.mxu0 %vm552_vm2, %v14138_v54 }
 0xb6f   :  { %v16385_v22 = vpop.f32.mrf.mxu1 }
 0xb70   :  { %v13331_v58 = vadd.f32 %v16385_v22, %v22702_v14 }
 0xb71   :  { %v13311_v44 = vpop.f32.mrf.mxu1 }
 0xb72   :  { %v13330_v43 = vadd.f32 %v13311_v44, %v22698_v6  ;;  %v13373_v59 = vadd.f32 %v22654_v16, %v13331_v58  ;;  %v23973_v6 = vld [vmem:[#allocation217_spill] sm:$0xff]  ;;  %v23974_v16 = vld [vmem:[#allocation184_spill] sm:$0xff] }
 0xb73   :  { %v16388_v25 = vpop.f32.mrf.mxu1 }
 0xb74   :  { %v13333_v49 = vadd.f32 %v16388_v25, %v22710_v51  ;;  %v13371_v24 = vadd.f32 %v23966_v37, %v13330_v43  ;;  %v13381_v15 = vmax.f32 %v13373_v59, 0.0 }
 0xb75   :  { %v13321_v5 = vpop.f32.mrf.mxu1 }
 0xb76   :  { %v13377_v55 = vadd.f32 %v22652_v63, %v13333_v49  ;;  %v13332_v10 = vadd.f32 %v13321_v5, %v22706_v39  ;;  %v13379_v21 = vmax.f32 %v13371_v24, 0.0  ;;  %v13389_v63 = vadd.f32 %v13381_v15, %v23974_v16  ;;  %v23975_v39 = vld [vmem:[#allocation230_spill] sm:$0xff] }
 0xb78   :  { %v13385_v47 = vmax.f32 %v13377_v55, 0.0  ;;  %v13375_v52 = vadd.f32 %v23967_v57, %v13332_v10  ;;  %v13387_v51 = vadd.f32 %v13379_v21, %v23975_v39 }
 0xb7a   :  { %v13393_v14 = vadd.f32 %v13385_v47, %v23972_v1  ;;  %v13383_v28 = vmax.f32 %v13375_v52, 0.0 }
 0xb7c   :  { %v13391_v41 = vadd.f32 %v13383_v28, %v23973_v6  ;;  %16403 = vmatprep.subr.mxu0 %v13393_v14  ;;  %16417 = vmatprep.subr.mxu1 %v13393_v14 }
 0xb7d   :  { %16404 = vmatpush3.msra.mxu0 %v13393_v14  ;;  %16421 = vmatpush3.msra.mxu1 %v13393_v14 }
 0xb7e   :  { %16405 = vmatprep.subr.mxu0 %v13391_v41  ;;  %16418 = vmatprep.subr.mxu1 %v13391_v41 }
 0xb7f   :  { %16406 = vmatpush3.msra.mxu0 %v13391_v41  ;;  %16422 = vmatpush3.msra.mxu1 %v13391_v41 }
 0xb80   :  { %16407 = vmatprep.subr.mxu0 %v13389_v63  ;;  %16419 = vmatprep.subr.mxu1 %v13389_v63 }
 0xb81   :  { %16408 = vmatpush3.msra.mxu0 %v13389_v63  ;;  %16423 = vmatpush3.msra.mxu1 %v13389_v63 }
 0xb82   :  { %16409 = vmatprep.subr.mxu0 %v13387_v51  ;;  %16420 = vmatprep.subr.mxu1 %v13387_v51 }
 0xb83   :  { %16410 = vmatpush3.msra.mxu0 %v13387_v51  ;;  %16424 = vmatpush3.msra.mxu1 %v13387_v51 }
 0xb84   :  { %16412 = vmatmul.mubr.msk.f32.vlgmr.msra.gmra.mxu0 %vm552_vm2, %v14139_v30  ;;  %16415 = vmatmul.mubr.msk.f32.vlgmr.msra.gmra.mxu1 %vm552_vm2, %v14141_v12 }
 0xc28   :  { %v16399_v17 = vpop.f32.mrf.mxu0 }
 0xc29   :  { %v13496_v61 = vadd.f32 %v16399_v17, %v12656_v48 }
 0xc2a   :  { %v13476_v7 = vpop.f32.mrf.mxu0 }
 0xc2b   :  { %v13495_v36 = vadd.f32 %v13476_v7, %v12655_v11 }
 0xc2c   :  { %v16402_v26 = vpop.f32.mrf.mxu0 }
 0xc2d   :  { %v13498_v37 = vadd.f32 %v16402_v26, %v12658_v53 }
 0xc2e   :  { %v13486_v50 = vpop.f32.mrf.mxu0 }
 0xc2f   :  { %v13497_v13 = vadd.f32 %v13486_v50, %v12657_v35 }
 0xc44   :  { %v16413_v33 = vpop.f32.mrf.mxu0  ;;  %v16416_v57 = vpop.f32.mrf.mxu1 }
 0xc45   :  { %v13602_v20 = vadd.f32 %v16413_v33, %v13496_v61  ;;  %v13604_v23 = vadd.f32 %v16416_v57, %v13498_v37 }
 0xc46   :  { %v13582_v45 = vpop.f32.mrf.mxu0  ;;  %v13592_v60 = vpop.f32.mrf.mxu1 }
 0xc47   :  { %v13630_v27 = vadd.f32 %v13617_v62, %v13602_v20  ;;  %v13632_v42 = vadd.f32 %v13627_v0, %v13604_v23  ;;  %v13601_v3 = vadd.f32 %v13582_v45, %v13495_v36  ;;  %v13603_v19 = vadd.f32 %v13592_v60, %v13497_v13 }
 0xc49   :  { %13634 = vst [vmem:[%s22871_s25 + $0x8] sm:$0xff] %v13630_v27  ;;  %13636 = vst [vmem:[%s22871_s25 + $0x18] sm:$0xff] %v13632_v42  ;;  %v13629_v8 = vadd.f32 %v13612_v46, %v13601_v3  ;;  %v13631_v2 = vadd.f32 %v13622_v4, %v13603_v19 }
 0xc4b   :  { %13633 = vst [vmem:[%s22871_s25] sm:$0xff] %v13629_v8  ;;  %13635 = vst [vmem:[%s22871_s25 + $0x10] sm:$0xff] %v13631_v2 }

</bundles_post_ra>
